<compile_context>
chip_gen: v5e
topology: v5e:2x2
jax: 0.10.0
libtpu: 0.0.40
codegen_flags: <defaults>
</compile_context>

<pallas_src>
import collections
import functools
import math

import jax
import jax.numpy as jnp
import numpy as np
from jax.experimental import pallas as pl
from jax.experimental.pallas import tpu as pltpu


# --------------------------- static geometry plan ----------------------------

_Geom = collections.namedtuple("_Geom", [
    "wp1", "m1", "mv1", "r1",
    "wp2", "m2", "mv2", "r2",
    "wp3", "m3", "r3",
    "wp4", "m4", "r4",
    "wp5", "m5", "r5",
    "wp6", "m6", "r6",
    "out_rows"])


def _nearest_indices(n_in, scale):
    # torch.nn.Upsample(scale_factor=scale, mode='nearest'): src = floor(dst/scale).
    # NOTE: some torch builds recompute the scale from the rounded output size;
    # kernel and reference below use the same convention, so they agree.
    n_out = int(math.floor(n_in * scale))
    idx = np.minimum(np.floor(np.arange(n_out) * (1.0 / scale)).astype(np.int64),
                     n_in - 1)
    return n_out, idx


def _selection_to_padded(h_t, w_t, m_src, src_row):
    """0/1 matrix S: S[p, r]=1 copies source flat row r=src_row(ht,wt) into the
    interior position (ht+1, wt+1) of the next layer's zero-padded flat layout.
    Pad rows/cols (and the bottom halo rows) stay all-zero -> padding is free."""
    wp = w_t + 2
    s = np.zeros(((h_t + 3) * wp, m_src), np.float32)
    for ht in range(h_t):
        for wt in range(w_t):
            s[(ht + 1) * wp + (wt + 1), int(src_row(ht, wt))] = 1.0
    return s


def _make_plan(h, w):
    assert h >= 4 and w >= 4, "input must be at least 4x4"
    up1 = 2.15
    up2 = (150 + 151) / (2 * 79)

    h1, w1 = h, w
    h2, w2 = h1 // 2, w1 // 2                      # after MaxPool2d(2,2)
    h3, w3 = h2 // 2, w2 // 2                      # after second MaxPool2d(2,2)
    h5, iy1 = _nearest_indices(h3, up1)            # after Upsample(2.15)
    w5, ix1 = _nearest_indices(w3, up1)
    h6, iy2 = _nearest_indices(h5, up2)            # after Upsample(301/158)
    w6, ix2 = _nearest_indices(w5, up2)

    wp1, wp2, wp3, wp4, wp5, wp6 = w1 + 2, w2 + 2, w3 + 2, w3 + 2, w5 + 2, w6 + 2
    m1, m2, m3 = h1 * wp1, h2 * wp2, h3 * wp3
    m4, m5, m6 = h3 * wp4, h5 * wp5, h6 * wp6
    r1, r2, r3 = (h1 + 3) * wp1, (h2 + 3) * wp2, (h3 + 3) * wp3
    r4, r5, r6 = (h3 + 3) * wp4, (h5 + 3) * wp5, (h6 + 3) * wp6
    mv1 = m1 - wp1 - 1                             # pooled rows (layer 1)
    mv2 = m2 - wp2 - 1                             # pooled rows (layer 2)

    # Restructuring matrices: pool-decimate / crop / upsample / re-pad.
    s12 = _selection_to_padded(h2, w2, mv1, lambda ht, wt: 2 * ht * wp1 + 2 * wt)
    s23 = _selection_to_padded(h3, w3, mv2, lambda ht, wt: 2 * ht * wp2 + 2 * wt)
    s34 = _selection_to_padded(h3, w3, m3, lambda ht, wt: ht * wp3 + wt)
    s45 = _selection_to_padded(h5, w5, m4, lambda ht, wt: iy1[ht] * wp4 + ix1[wt])
    s56 = _selection_to_padded(h6, w6, m5, lambda ht, wt: iy2[ht] * wp5 + ix2[wt])
    sout = np.zeros((h6 * w6, m6), np.float32)     # crop junk columns of d4
    for ht in range(h6):
        for wt in range(w6):
            sout[ht * w6 + wt, ht * wp6 + wt] = 1.0

    geom = _Geom(wp1=wp1, m1=m1, mv1=mv1, r1=r1,
                 wp2=wp2, m2=m2, mv2=mv2, r2=r2,
                 wp3=wp3, m3=m3, r3=r3,
                 wp4=wp4, m4=m4, r4=r4,
                 wp5=wp5, m5=m5, r5=r5,
                 wp6=wp6, m6=m6, r6=r6,
                 out_rows=h6 * w6)
    return geom, (s12, s23, s34, s45, s56, sout), (h6, w6)


# ------------------------------ fused Pallas kernel ---------------------------

def _fused_fwd_kernel(x_ref,
                      w1_ref, b1_ref, w2_ref, b2_ref, w3_ref, b3_ref,
                      w4_ref, b4_ref, w5_ref, b5_ref, w6_ref, b6_ref,
                      s12_ref, s23_ref, s34_ref, s45_ref, s56_ref, sout_ref,
                      o_ref,
                      a1_ref, a2_ref, p2_ref, p3_ref, p4_ref, p5_ref, p6_ref,
                      *, g):
    f32 = jnp.float32
    bf16 = jnp.bfloat16

    def conv_taps(src_ref, w_ref, wp, m):
        # 3x3 conv on a zero-padded flat-row VMEM ref: 9 contiguous row-slice
        # loads, each one bf16 MXU matmul with f32 accumulation.
        acc = None
        for tap in range(9):
            off = (tap // 3) * wp + (tap % 3)
            part = jnp.dot(src_ref[off:off + m, :], w_ref[tap],
                           preferred_element_type=f32)
            acc = part if acc is None else acc + part
        return acc

    def restructure(sel_ref, act, dst_ref):
        # Crop / pool-decimation / nearest-upsample / re-zero-pad folded into a
        # single 0/1 selection matmul writing the next layer's padded input.
        dst_ref[...] = jnp.dot(sel_ref[...], act.astype(bf16),
                               preferred_element_type=f32).astype(bf16)

    def pool2x2(a_ref, wp, mv):
        # Fused MaxPool2d(2,2): 2x2-window max anchored at every flat row, read
        # back from scratch as cheap offset loads (vld slot has slack).
        return jnp.maximum(
            jnp.maximum(a_ref[0:mv, :], a_ref[1:mv + 1, :]),
            jnp.maximum(a_ref[wp:wp + mv, :], a_ref[wp + 1:wp + 1 + mv, :]))

    # ---------------- encoder: Conv2d(1, 64) + ReLU + MaxPool2d(2, 2) --------
    # Cin == 1: K=1 MXU matmul is wasted -> VPU broadcast-multiply; weight cast
    # hoisted out of the unrolled tap loop.
    w1 = w1_ref[...].astype(f32)                               # (9, 1, 64)
    acc = None
    for tap in range(9):
        off = (tap // 3) * g.wp1 + (tap % 3)
        xs = x_ref[0, off:off + g.m1, :].astype(f32)           # (m1, 1)
        part = xs * w1[tap]                                    # -> (m1, 64)
        acc = part if acc is None else acc + part
    a1_ref[...] = jnp.maximum(acc + b1_ref[...], 0.0)
    restructure(s12_ref, pool2x2(a1_ref, g.wp1, g.mv1), p2_ref)

    # ---------------- encoder: Conv2d(64, 16) + ReLU + MaxPool2d(2, 2) -------
    acc = conv_taps(p2_ref, w2_ref, g.wp2, g.m2)
    a2_ref[...] = jnp.maximum(acc + b2_ref[...], 0.0)
    restructure(s23_ref, pool2x2(a2_ref, g.wp2, g.mv2), p3_ref)

    # ---------------- decoder: Conv2d(16, 16) + ReLU --------------------------
    acc = conv_taps(p3_ref, w3_ref, g.wp3, g.m3)
    restructure(s34_ref, jnp.maximum(acc + b3_ref[...], 0.0), p4_ref)

    # ---------------- decoder: ConvTranspose2d(16, 16) ------------------------
    # The module's ReLU sits after the nearest Upsample(2.15) but commutes
    # exactly with the 0/1 selection, so it is fused here.
    acc = conv_taps(p4_ref, w4_ref, g.wp4, g.m4)
    restructure(s45_ref, jnp.maximum(acc + b4_ref[...], 0.0), p5_ref)

    # ---------------- decoder: ConvTranspose2d(16, 16); Upsample in s56 -------
    acc = conv_taps(p5_ref, w5_ref, g.wp5, g.m5)
    restructure(s56_ref, acc + b5_ref[...], p6_ref)

    # ---------------- decoder: ConvTranspose2d(16, 1) + crop + Tanh -----------
    acc = conv_taps(p6_ref, w6_ref, g.wp6, g.m6)               # (m6, 1) f32
    y = jnp.dot(sout_ref[...], acc + b6_ref[...],              # crop junk cols
                preferred_element_type=f32)                    # (out_rows, 1)
    o_ref[0, :, :] = jnp.tanh(y)


# --------------------------------- wrapper ------------------------------------

def _prep_conv_weight(w_torch, transpose):
    # PyTorch Conv2d weight (Cout,Cin,3,3); ConvTranspose2d(k=3,s=1,p=1) equals
    # a same-padded conv with in/out channels swapped and taps flipped.
    if transpose:
        w_torch = jnp.flip(jnp.transpose(w_torch, (1, 0, 2, 3)), axis=(2, 3))
    cout, cin = w_torch.shape[0], w_torch.shape[1]
    return jnp.transpose(w_torch, (2, 3, 1, 0)).reshape(9, cin, cout).astype(
        jnp.bfloat16)


def convautoencoder2_forward(x_nchw, p):
    n, cin, h, w = x_nchw.shape
    assert cin == 1, "ConvAutoencoder2 expects a single input channel"
    g, sels, (h_out, w_out) = _make_plan(h, w)

    # Input: NCHW -> NHWC -> zero-pad halo (top1/bottom2, left1/right1) -> flat.
    xh = jnp.transpose(x_nchw, (0, 2, 3, 1))
    xp = jnp.pad(xh, ((0, 0), (1, 2), (1, 1), (0, 0)))
    xf = xp.reshape(n, g.r1, 1).astype(jnp.bfloat16)

    def b(v):
        return v.reshape(1, -1).astype(jnp.float32)

    ws = [
        _prep_conv_weight(p["w_e1"], False), b(p["b_e1"]),
        _prep_conv_weight(p["w_e2"], False), b(p["b_e2"]),
        _prep_conv_weight(p["w_d1"], False), b(p["b_d1"]),
        _prep_conv_weight(p["w_d2"], True), b(p["b_d2"]),
        _prep_conv_weight(p["w_d3"], True), b(p["b_d3"]),
        _prep_conv_weight(p["w_d4"], True), b(p["b_d4"]),
    ]
    s12, s23, s34, s45, s56, sout = sels
    sel_args = [jnp.asarray(s12, jnp.bfloat16), jnp.asarray(s23, jnp.bfloat16),
                jnp.asarray(s34, jnp.bfloat16), jnp.asarray(s45, jnp.bfloat16),
                jnp.asarray(s56, jnp.bfloat16), jnp.asarray(sout, jnp.float32)]

    res3 = lambda i: (0, 0, 0)        # resident 3-D blocks (weights)
    res2 = lambda i: (0, 0)           # resident 2-D blocks (biases, selections)
    in_specs = [pl.BlockSpec((1, g.r1, 1), lambda i: (i, 0, 0))]
    for wk, bk in zip(ws[0::2], ws[1::2]):
        in_specs.append(pl.BlockSpec(wk.shape, res3))
        in_specs.append(pl.BlockSpec(bk.shape, res2))
    for sk in sel_args:
        in_specs.append(pl.BlockSpec(sk.shape, res2))

    kern = functools.partial(_fused_fwd_kernel, g=g)
    out_flat = pl.pallas_call(
        kern,
        out_shape=jax.ShapeDtypeStruct((n, g.out_rows, 1), jnp.float32),
        grid=(n,),
        in_specs=in_specs,
        out_specs=pl.BlockSpec((1, g.out_rows, 1), lambda i: (i, 0, 0)),
        scratch_shapes=[
            pltpu.VMEM((g.m1, 64), jnp.float32),   # conv1 activation (pool src)
            pltpu.VMEM((g.m2, 16), jnp.float32),   # conv2 activation (pool src)
            pltpu.VMEM((g.r2, 64), jnp.bfloat16),  # padded flat input of enc2
            pltpu.VMEM((g.r3, 16), jnp.bfloat16),  # padded flat input of dec1
            pltpu.VMEM((g.r4, 16), jnp.bfloat16),  # padded flat input of dec2
            pltpu.VMEM((g.r5, 16), jnp.bfloat16),  # padded flat input of dec3
            pltpu.VMEM((g.r6, 16), jnp.bfloat16),  # padded flat input of dec4
        ],
        compiler_params=pltpu.CompilerParams(
            dimension_semantics=("parallel",)),    # megacore over batch (v7x)
    )(xf, *ws, *sel_args)

    out = out_flat.reshape(n, h_out, w_out)
    return out[:, None, :, :]                      # NHW -> NCHW (C=1)


# ----------------------- deterministic parameter init ------------------------

def init_params(key):
    def uinit(k, shape, fan_in):
        bound = 1.0 / math.sqrt(fan_in)
        return jax.random.uniform(k, shape, jnp.float32, -bound, bound)

    ks = jax.random.split(key, 12)
    p = {}
    # encoder (torch Conv2d weight layout: (Cout, Cin, 3, 3))
    p["w_e1"], p["b_e1"] = uinit(ks[0], (64, 1, 3, 3), 9), uinit(ks[1], (64,), 9)
    p["w_e2"], p["b_e2"] = uinit(ks[2], (16, 64, 3, 3), 576), uinit(ks[3], (16,), 576)
    # decoder: Conv2d (Cout,Cin,3,3); ConvTranspose2d (Cin,Cout,3,3)
    p["w_d1"], p["b_d1"] = uinit(ks[4], (16, 16, 3, 3), 144), uinit(ks[5], (16,), 144)
    p["w_d2"], p["b_d2"] = uinit(ks[6], (16, 16, 3, 3), 144), uinit(ks[7], (16,), 144)
    p["w_d3"], p["b_d3"] = uinit(ks[8], (16, 16, 3, 3), 144), uinit(ks[9], (16,), 144)
    p["w_d4"], p["b_d4"] = uinit(ks[10], (16, 1, 3, 3), 144), uinit(ks[11], (1,), 144)
    return p


# ----------------------------- pure-JAX reference ----------------------------

def _upsample_nearest(x, scale):
    n, h, w, c = x.shape
    _, ih = _nearest_indices(h, scale)
    _, iw = _nearest_indices(w, scale)
    return x[:, ih][:, :, iw]


def _forward_reference(x_nchw, p):
    bf16, f32 = jnp.bfloat16, jnp.float32

    def conv(x, w_torch, bias, transpose=False):
        if transpose:
            w_torch = jnp.flip(jnp.transpose(w_torch, (1, 0, 2, 3)), axis=(2, 3))
        w_hwio = jnp.transpose(w_torch, (2, 3, 1, 0)).astype(bf16)
        y = jax.lax.conv_general_dilated(
            x.astype(bf16), w_hwio, window_strides=(1, 1),
            padding=((1, 1), (1, 1)),
            dimension_numbers=("NHWC", "HWIO", "NHWC"),
            preferred_element_type=f32)
        return y + bias.astype(f32)

    def pool(x):
        return jax.lax.reduce_window(x, -jnp.inf, jax.lax.max,
                                     (1, 2, 2, 1), (1, 2, 2, 1), "VALID")

    x = jnp.transpose(x_nchw, (0, 2, 3, 1))
    y = pool(jax.nn.relu(conv(x, p["w_e1"], p["b_e1"]))).astype(bf16)
    y = pool(jax.nn.relu(conv(y, p["w_e2"], p["b_e2"]))).astype(bf16)
    y = jax.nn.relu(conv(y, p["w_d1"], p["b_d1"])).astype(bf16)
    y = conv(y, p["w_d2"], p["b_d2"], transpose=True).astype(bf16)
    y = _upsample_nearest(y, 2.15)
    y = jax.nn.relu(y)
    y = conv(y, p["w_d3"], p["b_d3"], transpose=True).astype(bf16)
    y = _upsample_nearest(y, (150 + 151) / (2 * 79))
    y = jnp.tanh(conv(y, p["w_d4"], p["b_d4"], transpose=True))
    return jnp.transpose(y, (0, 3, 1, 2))


# ----------------------------------- main -------------------------------------

if __name__ == "__main__":
    key = jax.random.PRNGKey(0)
    kp, kx = jax.random.split(key)
    params = init_params(kp)

    # Module requires a single input channel; small spatial size for the demo.
    x = jax.random.normal(kx, (2, 1, 16, 16), jnp.float32)

    out = jax.jit(convautoencoder2_forward)(x, params)
    out = jax.block_until_ready(out)
    # 16 -> pool 8 -> pool 4 -> upsample(2.15) 8 -> upsample(301/158) 15
    assert out.shape == (2, 1, 15, 15), out.shape

    ref = _forward_reference(x, params)
    # Both paths use identical bf16 matmul inputs, identical intermediate bf16
    # quantization points and f32 accumulation; remaining differences are f32
    # summation order, hence the 5e-3 tolerance.
    np.testing.assert_allclose(np.asarray(out), np.asarray(ref),
                               rtol=5e-3, atol=5e-3)
    print("KERNEL_OK")
</pallas_src>

<mosaic_0001>
module attributes {stable_mosaic.version = 11 : i64} {
  func.func @_fused_fwd_kernel(%arg0: i32, %arg1: memref<1x342x1xbf16, #tpu.memory_space<vmem>>, %arg2: memref<9x1x64xbf16, #tpu.memory_space<vmem>>, %arg3: memref<1x64xf32, #tpu.memory_space<vmem>>, %arg4: memref<9x64x16xbf16, #tpu.memory_space<vmem>>, %arg5: memref<1x16xf32, #tpu.memory_space<vmem>>, %arg6: memref<9x16x16xbf16, #tpu.memory_space<vmem>>, %arg7: memref<1x16xf32, #tpu.memory_space<vmem>>, %arg8: memref<9x16x16xbf16, #tpu.memory_space<vmem>>, %arg9: memref<1x16xf32, #tpu.memory_space<vmem>>, %arg10: memref<9x16x16xbf16, #tpu.memory_space<vmem>>, %arg11: memref<1x16xf32, #tpu.memory_space<vmem>>, %arg12: memref<9x16x1xbf16, #tpu.memory_space<vmem>>, %arg13: memref<1x1xf32, #tpu.memory_space<vmem>>, %arg14: memref<110x269xbf16, #tpu.memory_space<vmem>>, %arg15: memref<42x69xbf16, #tpu.memory_space<vmem>>, %arg16: memref<42x24xbf16, #tpu.memory_space<vmem>>, %arg17: memref<110x24xbf16, #tpu.memory_space<vmem>>, %arg18: memref<306x80xbf16, #tpu.memory_space<vmem>>, %arg19: memref<225x255xf32, #tpu.memory_space<vmem>>, %arg20: memref<1x225x1xf32, #tpu.memory_space<vmem>>, %arg21: memref<288x64xf32, #tpu.memory_space<vmem>>, %arg22: memref<80x16xf32, #tpu.memory_space<vmem>>, %arg23: memref<110x64xbf16, #tpu.memory_space<vmem>>, %arg24: memref<42x16xbf16, #tpu.memory_space<vmem>>, %arg25: memref<42x16xbf16, #tpu.memory_space<vmem>>, %arg26: memref<110x16xbf16, #tpu.memory_space<vmem>>, %arg27: memref<306x16xbf16, #tpu.memory_space<vmem>>) attributes {dimension_semantics = [#tpu.dimension_semantics<parallel>], iteration_bounds = array<i64: 2>, scalar_prefetch = 0 : i64, scratch_operands = 7 : i64, tpu.core_type = #tpu.core_type<tc>, window_params = [{transform_indices = @transform_0, window_bounds = array<i64: 1, 342, 1>}, {pipeline_mode = #tpu.pipeline_mode<synchronous>, transform_indices = @transform_1, window_bounds = array<i64: 9, 1, 64>}, {pipeline_mode = #tpu.pipeline_mode<synchronous>, transform_indices = @transform_2, window_bounds = array<i64: 1, 64>}, {pipeline_mode = #tpu.pipeline_mode<synchronous>, transform_indices = @transform_3, window_bounds = array<i64: 9, 64, 16>}, {pipeline_mode = #tpu.pipeline_mode<synchronous>, transform_indices = @transform_4, window_bounds = array<i64: 1, 16>}, {pipeline_mode = #tpu.pipeline_mode<synchronous>, transform_indices = @transform_5, window_bounds = array<i64: 9, 16, 16>}, {pipeline_mode = #tpu.pipeline_mode<synchronous>, transform_indices = @transform_6, window_bounds = array<i64: 1, 16>}, {pipeline_mode = #tpu.pipeline_mode<synchronous>, transform_indices = @transform_7, window_bounds = array<i64: 9, 16, 16>}, {pipeline_mode = #tpu.pipeline_mode<synchronous>, transform_indices = @transform_8, window_bounds = array<i64: 1, 16>}, {pipeline_mode = #tpu.pipeline_mode<synchronous>, transform_indices = @transform_9, window_bounds = array<i64: 9, 16, 16>}, {pipeline_mode = #tpu.pipeline_mode<synchronous>, transform_indices = @transform_10, window_bounds = array<i64: 1, 16>}, {pipeline_mode = #tpu.pipeline_mode<synchronous>, transform_indices = @transform_11, window_bounds = array<i64: 9, 16, 1>}, {pipeline_mode = #tpu.pipeline_mode<synchronous>, transform_indices = @transform_12, window_bounds = array<i64: 1, 1>}, {pipeline_mode = #tpu.pipeline_mode<synchronous>, transform_indices = @transform_13, window_bounds = array<i64: 110, 269>}, {pipeline_mode = #tpu.pipeline_mode<synchronous>, transform_indices = @transform_14, window_bounds = array<i64: 42, 69>}, {pipeline_mode = #tpu.pipeline_mode<synchronous>, transform_indices = @transform_15, window_bounds = array<i64: 42, 24>}, {pipeline_mode = #tpu.pipeline_mode<synchronous>, transform_indices = @transform_16, window_bounds = array<i64: 110, 24>}, {pipeline_mode = #tpu.pipeline_mode<synchronous>, transform_indices = @transform_17, window_bounds = array<i64: 306, 80>}, {pipeline_mode = #tpu.pipeline_mode<synchronous>, transform_indices = @transform_18, window_bounds = array<i64: 225, 255>}, {transform_indices = @transform_19, window_bounds = array<i64: 1, 225, 1>}]} {
    %c0 = arith.constant 0 : index
    %c0_0 = arith.constant 0 : index
    %c0_1 = arith.constant 0 : index
    %0 = vector.load %arg2[%c0, %c0_0, %c0_1] : memref<9x1x64xbf16, #tpu.memory_space<vmem>>, vector<9x1x64xbf16>
    %1 = arith.extf %0 : vector<9x1x64xbf16> to vector<9x1x64xf32>
    %c0_2 = arith.constant 0 : index
    %c0_3 = arith.constant 0 : index
    %c0_4 = arith.constant 0 : index
    %2 = vector.load %arg1[%c0_2, %c0_3, %c0_4] : memref<1x342x1xbf16, #tpu.memory_space<vmem>>, vector<1x288x1xbf16>
    %3 = vector.shape_cast %2 : vector<1x288x1xbf16> to vector<288x1xbf16>
    %4 = arith.extf %3 : vector<288x1xbf16> to vector<288x1xf32>
    %5 = vector.extract_strided_slice %1 {offsets = [0, 0, 0], sizes = [1, 1, 64], strides = [1, 1, 1]} : vector<9x1x64xf32> to vector<1x1x64xf32>
    %6 = vector.shape_cast %5 : vector<1x1x64xf32> to vector<1x64xf32>
    %7 = vector.broadcast %4 : vector<288x1xf32> to vector<288x64xf32>
    %8 = vector.broadcast %6 : vector<1x64xf32> to vector<288x64xf32>
    %9 = arith.mulf %7, %8 : vector<288x64xf32>
    %c0_5 = arith.constant 0 : index
    %c1 = arith.constant 1 : index
    %c0_6 = arith.constant 0 : index
    %10 = vector.load %arg1[%c0_5, %c1, %c0_6] : memref<1x342x1xbf16, #tpu.memory_space<vmem>>, vector<1x288x1xbf16>
    %11 = vector.shape_cast %10 : vector<1x288x1xbf16> to vector<288x1xbf16>
    %12 = arith.extf %11 : vector<288x1xbf16> to vector<288x1xf32>
    %13 = vector.extract_strided_slice %1 {offsets = [1, 0, 0], sizes = [1, 1, 64], strides = [1, 1, 1]} : vector<9x1x64xf32> to vector<1x1x64xf32>
    %14 = vector.shape_cast %13 : vector<1x1x64xf32> to vector<1x64xf32>
    %15 = vector.broadcast %12 : vector<288x1xf32> to vector<288x64xf32>
    %16 = vector.broadcast %14 : vector<1x64xf32> to vector<288x64xf32>
    %17 = arith.mulf %15, %16 : vector<288x64xf32>
    %18 = arith.addf %9, %17 : vector<288x64xf32>
    %c0_7 = arith.constant 0 : index
    %c2 = arith.constant 2 : index
    %c0_8 = arith.constant 0 : index
    %19 = vector.load %arg1[%c0_7, %c2, %c0_8] : memref<1x342x1xbf16, #tpu.memory_space<vmem>>, vector<1x288x1xbf16>
    %20 = vector.shape_cast %19 : vector<1x288x1xbf16> to vector<288x1xbf16>
    %21 = arith.extf %20 : vector<288x1xbf16> to vector<288x1xf32>
    %22 = vector.extract_strided_slice %1 {offsets = [2, 0, 0], sizes = [1, 1, 64], strides = [1, 1, 1]} : vector<9x1x64xf32> to vector<1x1x64xf32>
    %23 = vector.shape_cast %22 : vector<1x1x64xf32> to vector<1x64xf32>
    %24 = vector.broadcast %21 : vector<288x1xf32> to vector<288x64xf32>
    %25 = vector.broadcast %23 : vector<1x64xf32> to vector<288x64xf32>
    %26 = arith.mulf %24, %25 : vector<288x64xf32>
    %27 = arith.addf %18, %26 : vector<288x64xf32>
    %c0_9 = arith.constant 0 : index
    %c18 = arith.constant 18 : index
    %c0_10 = arith.constant 0 : index
    %28 = vector.load %arg1[%c0_9, %c18, %c0_10] : memref<1x342x1xbf16, #tpu.memory_space<vmem>>, vector<1x288x1xbf16>
    %29 = vector.shape_cast %28 : vector<1x288x1xbf16> to vector<288x1xbf16>
    %30 = arith.extf %29 : vector<288x1xbf16> to vector<288x1xf32>
    %31 = vector.extract_strided_slice %1 {offsets = [3, 0, 0], sizes = [1, 1, 64], strides = [1, 1, 1]} : vector<9x1x64xf32> to vector<1x1x64xf32>
    %32 = vector.shape_cast %31 : vector<1x1x64xf32> to vector<1x64xf32>
    %33 = vector.broadcast %30 : vector<288x1xf32> to vector<288x64xf32>
    %34 = vector.broadcast %32 : vector<1x64xf32> to vector<288x64xf32>
    %35 = arith.mulf %33, %34 : vector<288x64xf32>
    %36 = arith.addf %27, %35 : vector<288x64xf32>
    %c0_11 = arith.constant 0 : index
    %c19 = arith.constant 19 : index
    %c0_12 = arith.constant 0 : index
    %37 = vector.load %arg1[%c0_11, %c19, %c0_12] : memref<1x342x1xbf16, #tpu.memory_space<vmem>>, vector<1x288x1xbf16>
    %38 = vector.shape_cast %37 : vector<1x288x1xbf16> to vector<288x1xbf16>
    %39 = arith.extf %38 : vector<288x1xbf16> to vector<288x1xf32>
    %40 = vector.extract_strided_slice %1 {offsets = [4, 0, 0], sizes = [1, 1, 64], strides = [1, 1, 1]} : vector<9x1x64xf32> to vector<1x1x64xf32>
    %41 = vector.shape_cast %40 : vector<1x1x64xf32> to vector<1x64xf32>
    %42 = vector.broadcast %39 : vector<288x1xf32> to vector<288x64xf32>
    %43 = vector.broadcast %41 : vector<1x64xf32> to vector<288x64xf32>
    %44 = arith.mulf %42, %43 : vector<288x64xf32>
    %45 = arith.addf %36, %44 : vector<288x64xf32>
    %c0_13 = arith.constant 0 : index
    %c20 = arith.constant 20 : index
    %c0_14 = arith.constant 0 : index
    %46 = vector.load %arg1[%c0_13, %c20, %c0_14] : memref<1x342x1xbf16, #tpu.memory_space<vmem>>, vector<1x288x1xbf16>
    %47 = vector.shape_cast %46 : vector<1x288x1xbf16> to vector<288x1xbf16>
    %48 = arith.extf %47 : vector<288x1xbf16> to vector<288x1xf32>
    %49 = vector.extract_strided_slice %1 {offsets = [5, 0, 0], sizes = [1, 1, 64], strides = [1, 1, 1]} : vector<9x1x64xf32> to vector<1x1x64xf32>
    %50 = vector.shape_cast %49 : vector<1x1x64xf32> to vector<1x64xf32>
    %51 = vector.broadcast %48 : vector<288x1xf32> to vector<288x64xf32>
    %52 = vector.broadcast %50 : vector<1x64xf32> to vector<288x64xf32>
    %53 = arith.mulf %51, %52 : vector<288x64xf32>
    %54 = arith.addf %45, %53 : vector<288x64xf32>
    %c0_15 = arith.constant 0 : index
    %c36 = arith.constant 36 : index
    %c0_16 = arith.constant 0 : index
    %55 = vector.load %arg1[%c0_15, %c36, %c0_16] : memref<1x342x1xbf16, #tpu.memory_space<vmem>>, vector<1x288x1xbf16>
    %56 = vector.shape_cast %55 : vector<1x288x1xbf16> to vector<288x1xbf16>
    %57 = arith.extf %56 : vector<288x1xbf16> to vector<288x1xf32>
    %58 = vector.extract_strided_slice %1 {offsets = [6, 0, 0], sizes = [1, 1, 64], strides = [1, 1, 1]} : vector<9x1x64xf32> to vector<1x1x64xf32>
    %59 = vector.shape_cast %58 : vector<1x1x64xf32> to vector<1x64xf32>
    %60 = vector.broadcast %57 : vector<288x1xf32> to vector<288x64xf32>
    %61 = vector.broadcast %59 : vector<1x64xf32> to vector<288x64xf32>
    %62 = arith.mulf %60, %61 : vector<288x64xf32>
    %63 = arith.addf %54, %62 : vector<288x64xf32>
    %c0_17 = arith.constant 0 : index
    %c37 = arith.constant 37 : index
    %c0_18 = arith.constant 0 : index
    %64 = vector.load %arg1[%c0_17, %c37, %c0_18] : memref<1x342x1xbf16, #tpu.memory_space<vmem>>, vector<1x288x1xbf16>
    %65 = vector.shape_cast %64 : vector<1x288x1xbf16> to vector<288x1xbf16>
    %66 = arith.extf %65 : vector<288x1xbf16> to vector<288x1xf32>
    %67 = vector.extract_strided_slice %1 {offsets = [7, 0, 0], sizes = [1, 1, 64], strides = [1, 1, 1]} : vector<9x1x64xf32> to vector<1x1x64xf32>
    %68 = vector.shape_cast %67 : vector<1x1x64xf32> to vector<1x64xf32>
    %69 = vector.broadcast %66 : vector<288x1xf32> to vector<288x64xf32>
    %70 = vector.broadcast %68 : vector<1x64xf32> to vector<288x64xf32>
    %71 = arith.mulf %69, %70 : vector<288x64xf32>
    %72 = arith.addf %63, %71 : vector<288x64xf32>
    %c0_19 = arith.constant 0 : index
    %c38 = arith.constant 38 : index
    %c0_20 = arith.constant 0 : index
    %73 = vector.load %arg1[%c0_19, %c38, %c0_20] : memref<1x342x1xbf16, #tpu.memory_space<vmem>>, vector<1x288x1xbf16>
    %74 = vector.shape_cast %73 : vector<1x288x1xbf16> to vector<288x1xbf16>
    %75 = arith.extf %74 : vector<288x1xbf16> to vector<288x1xf32>
    %76 = vector.extract_strided_slice %1 {offsets = [8, 0, 0], sizes = [1, 1, 64], strides = [1, 1, 1]} : vector<9x1x64xf32> to vector<1x1x64xf32>
    %77 = vector.shape_cast %76 : vector<1x1x64xf32> to vector<1x64xf32>
    %78 = vector.broadcast %75 : vector<288x1xf32> to vector<288x64xf32>
    %79 = vector.broadcast %77 : vector<1x64xf32> to vector<288x64xf32>
    %80 = arith.mulf %78, %79 : vector<288x64xf32>
    %81 = arith.addf %72, %80 : vector<288x64xf32>
    %c0_21 = arith.constant 0 : index
    %c0_22 = arith.constant 0 : index
    %82 = vector.load %arg3[%c0_21, %c0_22] : memref<1x64xf32, #tpu.memory_space<vmem>>, vector<1x64xf32>
    %83 = vector.broadcast %82 : vector<1x64xf32> to vector<288x64xf32>
    %84 = arith.addf %81, %83 : vector<288x64xf32>
    %cst = arith.constant 0.000000e+00 : f32
    %85 = vector.broadcast %cst : f32 to vector<288x64xf32>
    %86 = arith.maximumf %84, %85 : vector<288x64xf32>
    %c0_23 = arith.constant 0 : index
    %c0_24 = arith.constant 0 : index
    %87 = vector.load %arg21[%c0_23, %c0_24] : memref<288x64xf32, #tpu.memory_space<vmem>>, vector<288x64xf32>
    tpu.vector_store %arg21[%c0_23, %c0_24], %86 {strides = array<i32>} : memref<288x64xf32, #tpu.memory_space<vmem>>, vector<288x64xf32>,
    %c0_25 = arith.constant 0 : index
    %c0_26 = arith.constant 0 : index
    %88 = vector.load %arg21[%c0_25, %c0_26] : memref<288x64xf32, #tpu.memory_space<vmem>>, vector<269x64xf32>
    %c1_27 = arith.constant 1 : index
    %c0_28 = arith.constant 0 : index
    %89 = vector.load %arg21[%c1_27, %c0_28] : memref<288x64xf32, #tpu.memory_space<vmem>>, vector<269x64xf32>
    %90 = arith.maximumf %88, %89 : vector<269x64xf32>
    %c18_29 = arith.constant 18 : index
    %c0_30 = arith.constant 0 : index
    %91 = vector.load %arg21[%c18_29, %c0_30] : memref<288x64xf32, #tpu.memory_space<vmem>>, vector<269x64xf32>
    %c19_31 = arith.constant 19 : index
    %c0_32 = arith.constant 0 : index
    %92 = vector.load %arg21[%c19_31, %c0_32] : memref<288x64xf32, #tpu.memory_space<vmem>>, vector<269x64xf32>
    %93 = arith.maximumf %91, %92 : vector<269x64xf32>
    %94 = arith.maximumf %90, %93 : vector<269x64xf32>
    %c0_33 = arith.constant 0 : index
    %c0_34 = arith.constant 0 : index
    %95 = vector.load %arg14[%c0_33, %c0_34] : memref<110x269xbf16, #tpu.memory_space<vmem>>, vector<110x269xbf16>
    %96 = arith.truncf %94 : vector<269x64xf32> to vector<269x64xbf16>
    %cst_35 = arith.constant dense<0.000000e+00> : vector<110x64xf32>
    %97 = tpu.matmul %95, %96, %cst_35 {dimension_numbers = #tpu.dot_dimension_numbers<[1], [0], [0], [1], [0, 0, 1, 1], [], []>} : vector<110x269xbf16>, vector<269x64xbf16>, vector<110x64xf32> -> vector<110x64xf32>
    %98 = arith.truncf %97 : vector<110x64xf32> to vector<110x64xbf16>
    %c0_36 = arith.constant 0 : index
    %c0_37 = arith.constant 0 : index
    %99 = vector.load %arg23[%c0_36, %c0_37] : memref<110x64xbf16, #tpu.memory_space<vmem>>, vector<110x64xbf16>
    tpu.vector_store %arg23[%c0_36, %c0_37], %98 {strides = array<i32>} : memref<110x64xbf16, #tpu.memory_space<vmem>>, vector<110x64xbf16>,
    %c0_38 = arith.constant 0 : index
    %c0_39 = arith.constant 0 : index
    %100 = vector.load %arg23[%c0_38, %c0_39] : memref<110x64xbf16, #tpu.memory_space<vmem>>, vector<80x64xbf16>
    %c0_40 = arith.constant 0 : index
    %c0_41 = arith.constant 0 : index
    %c0_42 = arith.constant 0 : index
    %101 = vector.load %arg4[%c0_40, %c0_41, %c0_42] : memref<9x64x16xbf16, #tpu.memory_space<vmem>>, vector<1x64x16xbf16>
    %102 = vector.shape_cast %101 : vector<1x64x16xbf16> to vector<64x16xbf16>
    %cst_43 = arith.constant dense<0.000000e+00> : vector<80x16xf32>
    %103 = tpu.matmul %100, %102, %cst_43 {dimension_numbers = #tpu.dot_dimension_numbers<[1], [0], [0], [1], [0, 0, 1, 1], [], []>} : vector<80x64xbf16>, vector<64x16xbf16>, vector<80x16xf32> -> vector<80x16xf32>
    %c1_44 = arith.constant 1 : index
    %c0_45 = arith.constant 0 : index
    %104 = vector.load %arg23[%c1_44, %c0_45] : memref<110x64xbf16, #tpu.memory_space<vmem>>, vector<80x64xbf16>
    %c1_46 = arith.constant 1 : index
    %c0_47 = arith.constant 0 : index
    %c0_48 = arith.constant 0 : index
    %105 = vector.load %arg4[%c1_46, %c0_47, %c0_48] : memref<9x64x16xbf16, #tpu.memory_space<vmem>>, vector<1x64x16xbf16>
    %106 = vector.shape_cast %105 : vector<1x64x16xbf16> to vector<64x16xbf16>
    %cst_49 = arith.constant dense<0.000000e+00> : vector<80x16xf32>
    %107 = tpu.matmul %104, %106, %cst_49 {dimension_numbers = #tpu.dot_dimension_numbers<[1], [0], [0], [1], [0, 0, 1, 1], [], []>} : vector<80x64xbf16>, vector<64x16xbf16>, vector<80x16xf32> -> vector<80x16xf32>
    %108 = arith.addf %103, %107 : vector<80x16xf32>
    %c2_50 = arith.constant 2 : index
    %c0_51 = arith.constant 0 : index
    %109 = vector.load %arg23[%c2_50, %c0_51] : memref<110x64xbf16, #tpu.memory_space<vmem>>, vector<80x64xbf16>
    %c2_52 = arith.constant 2 : index
    %c0_53 = arith.constant 0 : index
    %c0_54 = arith.constant 0 : index
    %110 = vector.load %arg4[%c2_52, %c0_53, %c0_54] : memref<9x64x16xbf16, #tpu.memory_space<vmem>>, vector<1x64x16xbf16>
    %111 = vector.shape_cast %110 : vector<1x64x16xbf16> to vector<64x16xbf16>
    %cst_55 = arith.constant dense<0.000000e+00> : vector<80x16xf32>
    %112 = tpu.matmul %109, %111, %cst_55 {dimension_numbers = #tpu.dot_dimension_numbers<[1], [0], [0], [1], [0, 0, 1, 1], [], []>} : vector<80x64xbf16>, vector<64x16xbf16>, vector<80x16xf32> -> vector<80x16xf32>
    %113 = arith.addf %108, %112 : vector<80x16xf32>
    %c10 = arith.constant 10 : index
    %c0_56 = arith.constant 0 : index
    %114 = vector.load %arg23[%c10, %c0_56] : memref<110x64xbf16, #tpu.memory_space<vmem>>, vector<80x64xbf16>
    %c3 = arith.constant 3 : index
    %c0_57 = arith.constant 0 : index
    %c0_58 = arith.constant 0 : index
    %115 = vector.load %arg4[%c3, %c0_57, %c0_58] : memref<9x64x16xbf16, #tpu.memory_space<vmem>>, vector<1x64x16xbf16>
    %116 = vector.shape_cast %115 : vector<1x64x16xbf16> to vector<64x16xbf16>
    %cst_59 = arith.constant dense<0.000000e+00> : vector<80x16xf32>
    %117 = tpu.matmul %114, %116, %cst_59 {dimension_numbers = #tpu.dot_dimension_numbers<[1], [0], [0], [1], [0, 0, 1, 1], [], []>} : vector<80x64xbf16>, vector<64x16xbf16>, vector<80x16xf32> -> vector<80x16xf32>
    %118 = arith.addf %113, %117 : vector<80x16xf32>
    %c11 = arith.constant 11 : index
    %c0_60 = arith.constant 0 : index
    %119 = vector.load %arg23[%c11, %c0_60] : memref<110x64xbf16, #tpu.memory_space<vmem>>, vector<80x64xbf16>
    %c4 = arith.constant 4 : index
    %c0_61 = arith.constant 0 : index
    %c0_62 = arith.constant 0 : index
    %120 = vector.load %arg4[%c4, %c0_61, %c0_62] : memref<9x64x16xbf16, #tpu.memory_space<vmem>>, vector<1x64x16xbf16>
    %121 = vector.shape_cast %120 : vector<1x64x16xbf16> to vector<64x16xbf16>
    %cst_63 = arith.constant dense<0.000000e+00> : vector<80x16xf32>
    %122 = tpu.matmul %119, %121, %cst_63 {dimension_numbers = #tpu.dot_dimension_numbers<[1], [0], [0], [1], [0, 0, 1, 1], [], []>} : vector<80x64xbf16>, vector<64x16xbf16>, vector<80x16xf32> -> vector<80x16xf32>
    %123 = arith.addf %118, %122 : vector<80x16xf32>
    %c12 = arith.constant 12 : index
    %c0_64 = arith.constant 0 : index
    %124 = vector.load %arg23[%c12, %c0_64] : memref<110x64xbf16, #tpu.memory_space<vmem>>, vector<80x64xbf16>
    %c5 = arith.constant 5 : index
    %c0_65 = arith.constant 0 : index
    %c0_66 = arith.constant 0 : index
    %125 = vector.load %arg4[%c5, %c0_65, %c0_66] : memref<9x64x16xbf16, #tpu.memory_space<vmem>>, vector<1x64x16xbf16>
    %126 = vector.shape_cast %125 : vector<1x64x16xbf16> to vector<64x16xbf16>
    %cst_67 = arith.constant dense<0.000000e+00> : vector<80x16xf32>
    %127 = tpu.matmul %124, %126, %cst_67 {dimension_numbers = #tpu.dot_dimension_numbers<[1], [0], [0], [1], [0, 0, 1, 1], [], []>} : vector<80x64xbf16>, vector<64x16xbf16>, vector<80x16xf32> -> vector<80x16xf32>
    %128 = arith.addf %123, %127 : vector<80x16xf32>
    %c20_68 = arith.constant 20 : index
    %c0_69 = arith.constant 0 : index
    %129 = vector.load %arg23[%c20_68, %c0_69] : memref<110x64xbf16, #tpu.memory_space<vmem>>, vector<80x64xbf16>
    %c6 = arith.constant 6 : index
    %c0_70 = arith.constant 0 : index
    %c0_71 = arith.constant 0 : index
    %130 = vector.load %arg4[%c6, %c0_70, %c0_71] : memref<9x64x16xbf16, #tpu.memory_space<vmem>>, vector<1x64x16xbf16>
    %131 = vector.shape_cast %130 : vector<1x64x16xbf16> to vector<64x16xbf16>
    %cst_72 = arith.constant dense<0.000000e+00> : vector<80x16xf32>
    %132 = tpu.matmul %129, %131, %cst_72 {dimension_numbers = #tpu.dot_dimension_numbers<[1], [0], [0], [1], [0, 0, 1, 1], [], []>} : vector<80x64xbf16>, vector<64x16xbf16>, vector<80x16xf32> -> vector<80x16xf32>
    %133 = arith.addf %128, %132 : vector<80x16xf32>
    %c21 = arith.constant 21 : index
    %c0_73 = arith.constant 0 : index
    %134 = vector.load %arg23[%c21, %c0_73] : memref<110x64xbf16, #tpu.memory_space<vmem>>, vector<80x64xbf16>
    %c7 = arith.constant 7 : index
    %c0_74 = arith.constant 0 : index
    %c0_75 = arith.constant 0 : index
    %135 = vector.load %arg4[%c7, %c0_74, %c0_75] : memref<9x64x16xbf16, #tpu.memory_space<vmem>>, vector<1x64x16xbf16>
    %136 = vector.shape_cast %135 : vector<1x64x16xbf16> to vector<64x16xbf16>
    %cst_76 = arith.constant dense<0.000000e+00> : vector<80x16xf32>
    %137 = tpu.matmul %134, %136, %cst_76 {dimension_numbers = #tpu.dot_dimension_numbers<[1], [0], [0], [1], [0, 0, 1, 1], [], []>} : vector<80x64xbf16>, vector<64x16xbf16>, vector<80x16xf32> -> vector<80x16xf32>
    %138 = arith.addf %133, %137 : vector<80x16xf32>
    %c22 = arith.constant 22 : index
    %c0_77 = arith.constant 0 : index
    %139 = vector.load %arg23[%c22, %c0_77] : memref<110x64xbf16, #tpu.memory_space<vmem>>, vector<80x64xbf16>
    %c8 = arith.constant 8 : index
    %c0_78 = arith.constant 0 : index
    %c0_79 = arith.constant 0 : index
    %140 = vector.load %arg4[%c8, %c0_78, %c0_79] : memref<9x64x16xbf16, #tpu.memory_space<vmem>>, vector<1x64x16xbf16>
    %141 = vector.shape_cast %140 : vector<1x64x16xbf16> to vector<64x16xbf16>
    %cst_80 = arith.constant dense<0.000000e+00> : vector<80x16xf32>
    %142 = tpu.matmul %139, %141, %cst_80 {dimension_numbers = #tpu.dot_dimension_numbers<[1], [0], [0], [1], [0, 0, 1, 1], [], []>} : vector<80x64xbf16>, vector<64x16xbf16>, vector<80x16xf32> -> vector<80x16xf32>
    %143 = arith.addf %138, %142 : vector<80x16xf32>
    %c0_81 = arith.constant 0 : index
    %c0_82 = arith.constant 0 : index
    %144 = vector.load %arg5[%c0_81, %c0_82] : memref<1x16xf32, #tpu.memory_space<vmem>>, vector<1x16xf32>
    %145 = vector.broadcast %144 : vector<1x16xf32> to vector<80x16xf32>
    %146 = arith.addf %143, %145 : vector<80x16xf32>
    %cst_83 = arith.constant 0.000000e+00 : f32
    %147 = vector.broadcast %cst_83 : f32 to vector<80x16xf32>
    %148 = arith.maximumf %146, %147 : vector<80x16xf32>
    %c0_84 = arith.constant 0 : index
    %c0_85 = arith.constant 0 : index
    %149 = vector.load %arg22[%c0_84, %c0_85] : memref<80x16xf32, #tpu.memory_space<vmem>>, vector<80x16xf32>
    tpu.vector_store %arg22[%c0_84, %c0_85], %148 {strides = array<i32>} : memref<80x16xf32, #tpu.memory_space<vmem>>, vector<80x16xf32>,
    %c0_86 = arith.constant 0 : index
    %c0_87 = arith.constant 0 : index
    %150 = vector.load %arg22[%c0_86, %c0_87] : memref<80x16xf32, #tpu.memory_space<vmem>>, vector<69x16xf32>
    %c1_88 = arith.constant 1 : index
    %c0_89 = arith.constant 0 : index
    %151 = vector.load %arg22[%c1_88, %c0_89] : memref<80x16xf32, #tpu.memory_space<vmem>>, vector<69x16xf32>
    %152 = arith.maximumf %150, %151 : vector<69x16xf32>
    %c10_90 = arith.constant 10 : index
    %c0_91 = arith.constant 0 : index
    %153 = vector.load %arg22[%c10_90, %c0_91] : memref<80x16xf32, #tpu.memory_space<vmem>>, vector<69x16xf32>
    %c11_92 = arith.constant 11 : index
    %c0_93 = arith.constant 0 : index
    %154 = vector.load %arg22[%c11_92, %c0_93] : memref<80x16xf32, #tpu.memory_space<vmem>>, vector<69x16xf32>
    %155 = arith.maximumf %153, %154 : vector<69x16xf32>
    %156 = arith.maximumf %152, %155 : vector<69x16xf32>
    %c0_94 = arith.constant 0 : index
    %c0_95 = arith.constant 0 : index
    %157 = vector.load %arg15[%c0_94, %c0_95] : memref<42x69xbf16, #tpu.memory_space<vmem>>, vector<42x69xbf16>
    %158 = arith.truncf %156 : vector<69x16xf32> to vector<69x16xbf16>
    %cst_96 = arith.constant dense<0.000000e+00> : vector<42x16xf32>
    %159 = tpu.matmul %157, %158, %cst_96 {dimension_numbers = #tpu.dot_dimension_numbers<[1], [0], [0], [1], [0, 0, 1, 1], [], []>} : vector<42x69xbf16>, vector<69x16xbf16>, vector<42x16xf32> -> vector<42x16xf32>
    %160 = arith.truncf %159 : vector<42x16xf32> to vector<42x16xbf16>
    %c0_97 = arith.constant 0 : index
    %c0_98 = arith.constant 0 : index
    %161 = vector.load %arg24[%c0_97, %c0_98] : memref<42x16xbf16, #tpu.memory_space<vmem>>, vector<42x16xbf16>
    tpu.vector_store %arg24[%c0_97, %c0_98], %160 {strides = array<i32>} : memref<42x16xbf16, #tpu.memory_space<vmem>>, vector<42x16xbf16>,
    %c0_99 = arith.constant 0 : index
    %c0_100 = arith.constant 0 : index
    %162 = vector.load %arg24[%c0_99, %c0_100] : memref<42x16xbf16, #tpu.memory_space<vmem>>, vector<24x16xbf16>
    %c0_101 = arith.constant 0 : index
    %c0_102 = arith.constant 0 : index
    %c0_103 = arith.constant 0 : index
    %163 = vector.load %arg6[%c0_101, %c0_102, %c0_103] : memref<9x16x16xbf16, #tpu.memory_space<vmem>>, vector<1x16x16xbf16>
    %164 = vector.shape_cast %163 : vector<1x16x16xbf16> to vector<16x16xbf16>
    %cst_104 = arith.constant dense<0.000000e+00> : vector<24x16xf32>
    %165 = tpu.matmul %162, %164, %cst_104 {dimension_numbers = #tpu.dot_dimension_numbers<[1], [0], [0], [1], [0, 0, 1, 1], [], []>} : vector<24x16xbf16>, vector<16x16xbf16>, vector<24x16xf32> -> vector<24x16xf32>
    %c1_105 = arith.constant 1 : index
    %c0_106 = arith.constant 0 : index
    %166 = vector.load %arg24[%c1_105, %c0_106] : memref<42x16xbf16, #tpu.memory_space<vmem>>, vector<24x16xbf16>
    %c1_107 = arith.constant 1 : index
    %c0_108 = arith.constant 0 : index
    %c0_109 = arith.constant 0 : index
    %167 = vector.load %arg6[%c1_107, %c0_108, %c0_109] : memref<9x16x16xbf16, #tpu.memory_space<vmem>>, vector<1x16x16xbf16>
    %168 = vector.shape_cast %167 : vector<1x16x16xbf16> to vector<16x16xbf16>
    %cst_110 = arith.constant dense<0.000000e+00> : vector<24x16xf32>
    %169 = tpu.matmul %166, %168, %cst_110 {dimension_numbers = #tpu.dot_dimension_numbers<[1], [0], [0], [1], [0, 0, 1, 1], [], []>} : vector<24x16xbf16>, vector<16x16xbf16>, vector<24x16xf32> -> vector<24x16xf32>
    %170 = arith.addf %165, %169 : vector<24x16xf32>
    %c2_111 = arith.constant 2 : index
    %c0_112 = arith.constant 0 : index
    %171 = vector.load %arg24[%c2_111, %c0_112] : memref<42x16xbf16, #tpu.memory_space<vmem>>, vector<24x16xbf16>
    %c2_113 = arith.constant 2 : index
    %c0_114 = arith.constant 0 : index
    %c0_115 = arith.constant 0 : index
    %172 = vector.load %arg6[%c2_113, %c0_114, %c0_115] : memref<9x16x16xbf16, #tpu.memory_space<vmem>>, vector<1x16x16xbf16>
    %173 = vector.shape_cast %172 : vector<1x16x16xbf16> to vector<16x16xbf16>
    %cst_116 = arith.constant dense<0.000000e+00> : vector<24x16xf32>
    %174 = tpu.matmul %171, %173, %cst_116 {dimension_numbers = #tpu.dot_dimension_numbers<[1], [0], [0], [1], [0, 0, 1, 1], [], []>} : vector<24x16xbf16>, vector<16x16xbf16>, vector<24x16xf32> -> vector<24x16xf32>
    %175 = arith.addf %170, %174 : vector<24x16xf32>
    %c6_117 = arith.constant 6 : index
    %c0_118 = arith.constant 0 : index
    %176 = vector.load %arg24[%c6_117, %c0_118] : memref<42x16xbf16, #tpu.memory_space<vmem>>, vector<24x16xbf16>
    %c3_119 = arith.constant 3 : index
    %c0_120 = arith.constant 0 : index
    %c0_121 = arith.constant 0 : index
    %177 = vector.load %arg6[%c3_119, %c0_120, %c0_121] : memref<9x16x16xbf16, #tpu.memory_space<vmem>>, vector<1x16x16xbf16>
    %178 = vector.shape_cast %177 : vector<1x16x16xbf16> to vector<16x16xbf16>
    %cst_122 = arith.constant dense<0.000000e+00> : vector<24x16xf32>
    %179 = tpu.matmul %176, %178, %cst_122 {dimension_numbers = #tpu.dot_dimension_numbers<[1], [0], [0], [1], [0, 0, 1, 1], [], []>} : vector<24x16xbf16>, vector<16x16xbf16>, vector<24x16xf32> -> vector<24x16xf32>
    %180 = arith.addf %175, %179 : vector<24x16xf32>
    %c7_123 = arith.constant 7 : index
    %c0_124 = arith.constant 0 : index
    %181 = vector.load %arg24[%c7_123, %c0_124] : memref<42x16xbf16, #tpu.memory_space<vmem>>, vector<24x16xbf16>
    %c4_125 = arith.constant 4 : index
    %c0_126 = arith.constant 0 : index
    %c0_127 = arith.constant 0 : index
    %182 = vector.load %arg6[%c4_125, %c0_126, %c0_127] : memref<9x16x16xbf16, #tpu.memory_space<vmem>>, vector<1x16x16xbf16>
    %183 = vector.shape_cast %182 : vector<1x16x16xbf16> to vector<16x16xbf16>
    %cst_128 = arith.constant dense<0.000000e+00> : vector<24x16xf32>
    %184 = tpu.matmul %181, %183, %cst_128 {dimension_numbers = #tpu.dot_dimension_numbers<[1], [0], [0], [1], [0, 0, 1, 1], [], []>} : vector<24x16xbf16>, vector<16x16xbf16>, vector<24x16xf32> -> vector<24x16xf32>
    %185 = arith.addf %180, %184 : vector<24x16xf32>
    %c8_129 = arith.constant 8 : index
    %c0_130 = arith.constant 0 : index
    %186 = vector.load %arg24[%c8_129, %c0_130] : memref<42x16xbf16, #tpu.memory_space<vmem>>, vector<24x16xbf16>
    %c5_131 = arith.constant 5 : index
    %c0_132 = arith.constant 0 : index
    %c0_133 = arith.constant 0 : index
    %187 = vector.load %arg6[%c5_131, %c0_132, %c0_133] : memref<9x16x16xbf16, #tpu.memory_space<vmem>>, vector<1x16x16xbf16>
    %188 = vector.shape_cast %187 : vector<1x16x16xbf16> to vector<16x16xbf16>
    %cst_134 = arith.constant dense<0.000000e+00> : vector<24x16xf32>
    %189 = tpu.matmul %186, %188, %cst_134 {dimension_numbers = #tpu.dot_dimension_numbers<[1], [0], [0], [1], [0, 0, 1, 1], [], []>} : vector<24x16xbf16>, vector<16x16xbf16>, vector<24x16xf32> -> vector<24x16xf32>
    %190 = arith.addf %185, %189 : vector<24x16xf32>
    %c12_135 = arith.constant 12 : index
    %c0_136 = arith.constant 0 : index
    %191 = vector.load %arg24[%c12_135, %c0_136] : memref<42x16xbf16, #tpu.memory_space<vmem>>, vector<24x16xbf16>
    %c6_137 = arith.constant 6 : index
    %c0_138 = arith.constant 0 : index
    %c0_139 = arith.constant 0 : index
    %192 = vector.load %arg6[%c6_137, %c0_138, %c0_139] : memref<9x16x16xbf16, #tpu.memory_space<vmem>>, vector<1x16x16xbf16>
    %193 = vector.shape_cast %192 : vector<1x16x16xbf16> to vector<16x16xbf16>
    %cst_140 = arith.constant dense<0.000000e+00> : vector<24x16xf32>
    %194 = tpu.matmul %191, %193, %cst_140 {dimension_numbers = #tpu.dot_dimension_numbers<[1], [0], [0], [1], [0, 0, 1, 1], [], []>} : vector<24x16xbf16>, vector<16x16xbf16>, vector<24x16xf32> -> vector<24x16xf32>
    %195 = arith.addf %190, %194 : vector<24x16xf32>
    %c13 = arith.constant 13 : index
    %c0_141 = arith.constant 0 : index
    %196 = vector.load %arg24[%c13, %c0_141] : memref<42x16xbf16, #tpu.memory_space<vmem>>, vector<24x16xbf16>
    %c7_142 = arith.constant 7 : index
    %c0_143 = arith.constant 0 : index
    %c0_144 = arith.constant 0 : index
    %197 = vector.load %arg6[%c7_142, %c0_143, %c0_144] : memref<9x16x16xbf16, #tpu.memory_space<vmem>>, vector<1x16x16xbf16>
    %198 = vector.shape_cast %197 : vector<1x16x16xbf16> to vector<16x16xbf16>
    %cst_145 = arith.constant dense<0.000000e+00> : vector<24x16xf32>
    %199 = tpu.matmul %196, %198, %cst_145 {dimension_numbers = #tpu.dot_dimension_numbers<[1], [0], [0], [1], [0, 0, 1, 1], [], []>} : vector<24x16xbf16>, vector<16x16xbf16>, vector<24x16xf32> -> vector<24x16xf32>
    %200 = arith.addf %195, %199 : vector<24x16xf32>
    %c14 = arith.constant 14 : index
    %c0_146 = arith.constant 0 : index
    %201 = vector.load %arg24[%c14, %c0_146] : memref<42x16xbf16, #tpu.memory_space<vmem>>, vector<24x16xbf16>
    %c8_147 = arith.constant 8 : index
    %c0_148 = arith.constant 0 : index
    %c0_149 = arith.constant 0 : index
    %202 = vector.load %arg6[%c8_147, %c0_148, %c0_149] : memref<9x16x16xbf16, #tpu.memory_space<vmem>>, vector<1x16x16xbf16>
    %203 = vector.shape_cast %202 : vector<1x16x16xbf16> to vector<16x16xbf16>
    %cst_150 = arith.constant dense<0.000000e+00> : vector<24x16xf32>
    %204 = tpu.matmul %201, %203, %cst_150 {dimension_numbers = #tpu.dot_dimension_numbers<[1], [0], [0], [1], [0, 0, 1, 1], [], []>} : vector<24x16xbf16>, vector<16x16xbf16>, vector<24x16xf32> -> vector<24x16xf32>
    %205 = arith.addf %200, %204 : vector<24x16xf32>
    %c0_151 = arith.constant 0 : index
    %c0_152 = arith.constant 0 : index
    %206 = vector.load %arg7[%c0_151, %c0_152] : memref<1x16xf32, #tpu.memory_space<vmem>>, vector<1x16xf32>
    %207 = vector.broadcast %206 : vector<1x16xf32> to vector<24x16xf32>
    %208 = arith.addf %205, %207 : vector<24x16xf32>
    %cst_153 = arith.constant 0.000000e+00 : f32
    %209 = vector.broadcast %cst_153 : f32 to vector<24x16xf32>
    %210 = arith.maximumf %208, %209 : vector<24x16xf32>
    %c0_154 = arith.constant 0 : index
    %c0_155 = arith.constant 0 : index
    %211 = vector.load %arg16[%c0_154, %c0_155] : memref<42x24xbf16, #tpu.memory_space<vmem>>, vector<42x24xbf16>
    %212 = arith.truncf %210 : vector<24x16xf32> to vector<24x16xbf16>
    %cst_156 = arith.constant dense<0.000000e+00> : vector<42x16xf32>
    %213 = tpu.matmul %211, %212, %cst_156 {dimension_numbers = #tpu.dot_dimension_numbers<[1], [0], [0], [1], [0, 0, 1, 1], [], []>} : vector<42x24xbf16>, vector<24x16xbf16>, vector<42x16xf32> -> vector<42x16xf32>
    %214 = arith.truncf %213 : vector<42x16xf32> to vector<42x16xbf16>
    %c0_157 = arith.constant 0 : index
    %c0_158 = arith.constant 0 : index
    %215 = vector.load %arg25[%c0_157, %c0_158] : memref<42x16xbf16, #tpu.memory_space<vmem>>, vector<42x16xbf16>
    tpu.vector_store %arg25[%c0_157, %c0_158], %214 {strides = array<i32>} : memref<42x16xbf16, #tpu.memory_space<vmem>>, vector<42x16xbf16>,
    %c0_159 = arith.constant 0 : index
    %c0_160 = arith.constant 0 : index
    %216 = vector.load %arg25[%c0_159, %c0_160] : memref<42x16xbf16, #tpu.memory_space<vmem>>, vector<24x16xbf16>
    %c0_161 = arith.constant 0 : index
    %c0_162 = arith.constant 0 : index
    %c0_163 = arith.constant 0 : index
    %217 = vector.load %arg8[%c0_161, %c0_162, %c0_163] : memref<9x16x16xbf16, #tpu.memory_space<vmem>>, vector<1x16x16xbf16>
    %218 = vector.shape_cast %217 : vector<1x16x16xbf16> to vector<16x16xbf16>
    %cst_164 = arith.constant dense<0.000000e+00> : vector<24x16xf32>
    %219 = tpu.matmul %216, %218, %cst_164 {dimension_numbers = #tpu.dot_dimension_numbers<[1], [0], [0], [1], [0, 0, 1, 1], [], []>} : vector<24x16xbf16>, vector<16x16xbf16>, vector<24x16xf32> -> vector<24x16xf32>
    %c1_165 = arith.constant 1 : index
    %c0_166 = arith.constant 0 : index
    %220 = vector.load %arg25[%c1_165, %c0_166] : memref<42x16xbf16, #tpu.memory_space<vmem>>, vector<24x16xbf16>
    %c1_167 = arith.constant 1 : index
    %c0_168 = arith.constant 0 : index
    %c0_169 = arith.constant 0 : index
    %221 = vector.load %arg8[%c1_167, %c0_168, %c0_169] : memref<9x16x16xbf16, #tpu.memory_space<vmem>>, vector<1x16x16xbf16>
    %222 = vector.shape_cast %221 : vector<1x16x16xbf16> to vector<16x16xbf16>
    %cst_170 = arith.constant dense<0.000000e+00> : vector<24x16xf32>
    %223 = tpu.matmul %220, %222, %cst_170 {dimension_numbers = #tpu.dot_dimension_numbers<[1], [0], [0], [1], [0, 0, 1, 1], [], []>} : vector<24x16xbf16>, vector<16x16xbf16>, vector<24x16xf32> -> vector<24x16xf32>
    %224 = arith.addf %219, %223 : vector<24x16xf32>
    %c2_171 = arith.constant 2 : index
    %c0_172 = arith.constant 0 : index
    %225 = vector.load %arg25[%c2_171, %c0_172] : memref<42x16xbf16, #tpu.memory_space<vmem>>, vector<24x16xbf16>
    %c2_173 = arith.constant 2 : index
    %c0_174 = arith.constant 0 : index
    %c0_175 = arith.constant 0 : index
    %226 = vector.load %arg8[%c2_173, %c0_174, %c0_175] : memref<9x16x16xbf16, #tpu.memory_space<vmem>>, vector<1x16x16xbf16>
    %227 = vector.shape_cast %226 : vector<1x16x16xbf16> to vector<16x16xbf16>
    %cst_176 = arith.constant dense<0.000000e+00> : vector<24x16xf32>
    %228 = tpu.matmul %225, %227, %cst_176 {dimension_numbers = #tpu.dot_dimension_numbers<[1], [0], [0], [1], [0, 0, 1, 1], [], []>} : vector<24x16xbf16>, vector<16x16xbf16>, vector<24x16xf32> -> vector<24x16xf32>
    %229 = arith.addf %224, %228 : vector<24x16xf32>
    %c6_177 = arith.constant 6 : index
    %c0_178 = arith.constant 0 : index
    %230 = vector.load %arg25[%c6_177, %c0_178] : memref<42x16xbf16, #tpu.memory_space<vmem>>, vector<24x16xbf16>
    %c3_179 = arith.constant 3 : index
    %c0_180 = arith.constant 0 : index
    %c0_181 = arith.constant 0 : index
    %231 = vector.load %arg8[%c3_179, %c0_180, %c0_181] : memref<9x16x16xbf16, #tpu.memory_space<vmem>>, vector<1x16x16xbf16>
    %232 = vector.shape_cast %231 : vector<1x16x16xbf16> to vector<16x16xbf16>
    %cst_182 = arith.constant dense<0.000000e+00> : vector<24x16xf32>
    %233 = tpu.matmul %230, %232, %cst_182 {dimension_numbers = #tpu.dot_dimension_numbers<[1], [0], [0], [1], [0, 0, 1, 1], [], []>} : vector<24x16xbf16>, vector<16x16xbf16>, vector<24x16xf32> -> vector<24x16xf32>
    %234 = arith.addf %229, %233 : vector<24x16xf32>
    %c7_183 = arith.constant 7 : index
    %c0_184 = arith.constant 0 : index
    %235 = vector.load %arg25[%c7_183, %c0_184] : memref<42x16xbf16, #tpu.memory_space<vmem>>, vector<24x16xbf16>
    %c4_185 = arith.constant 4 : index
    %c0_186 = arith.constant 0 : index
    %c0_187 = arith.constant 0 : index
    %236 = vector.load %arg8[%c4_185, %c0_186, %c0_187] : memref<9x16x16xbf16, #tpu.memory_space<vmem>>, vector<1x16x16xbf16>
    %237 = vector.shape_cast %236 : vector<1x16x16xbf16> to vector<16x16xbf16>
    %cst_188 = arith.constant dense<0.000000e+00> : vector<24x16xf32>
    %238 = tpu.matmul %235, %237, %cst_188 {dimension_numbers = #tpu.dot_dimension_numbers<[1], [0], [0], [1], [0, 0, 1, 1], [], []>} : vector<24x16xbf16>, vector<16x16xbf16>, vector<24x16xf32> -> vector<24x16xf32>
    %239 = arith.addf %234, %238 : vector<24x16xf32>
    %c8_189 = arith.constant 8 : index
    %c0_190 = arith.constant 0 : index
    %240 = vector.load %arg25[%c8_189, %c0_190] : memref<42x16xbf16, #tpu.memory_space<vmem>>, vector<24x16xbf16>
    %c5_191 = arith.constant 5 : index
    %c0_192 = arith.constant 0 : index
    %c0_193 = arith.constant 0 : index
    %241 = vector.load %arg8[%c5_191, %c0_192, %c0_193] : memref<9x16x16xbf16, #tpu.memory_space<vmem>>, vector<1x16x16xbf16>
    %242 = vector.shape_cast %241 : vector<1x16x16xbf16> to vector<16x16xbf16>
    %cst_194 = arith.constant dense<0.000000e+00> : vector<24x16xf32>
    %243 = tpu.matmul %240, %242, %cst_194 {dimension_numbers = #tpu.dot_dimension_numbers<[1], [0], [0], [1], [0, 0, 1, 1], [], []>} : vector<24x16xbf16>, vector<16x16xbf16>, vector<24x16xf32> -> vector<24x16xf32>
    %244 = arith.addf %239, %243 : vector<24x16xf32>
    %c12_195 = arith.constant 12 : index
    %c0_196 = arith.constant 0 : index
    %245 = vector.load %arg25[%c12_195, %c0_196] : memref<42x16xbf16, #tpu.memory_space<vmem>>, vector<24x16xbf16>
    %c6_197 = arith.constant 6 : index
    %c0_198 = arith.constant 0 : index
    %c0_199 = arith.constant 0 : index
    %246 = vector.load %arg8[%c6_197, %c0_198, %c0_199] : memref<9x16x16xbf16, #tpu.memory_space<vmem>>, vector<1x16x16xbf16>
    %247 = vector.shape_cast %246 : vector<1x16x16xbf16> to vector<16x16xbf16>
    %cst_200 = arith.constant dense<0.000000e+00> : vector<24x16xf32>
    %248 = tpu.matmul %245, %247, %cst_200 {dimension_numbers = #tpu.dot_dimension_numbers<[1], [0], [0], [1], [0, 0, 1, 1], [], []>} : vector<24x16xbf16>, vector<16x16xbf16>, vector<24x16xf32> -> vector<24x16xf32>
    %249 = arith.addf %244, %248 : vector<24x16xf32>
    %c13_201 = arith.constant 13 : index
    %c0_202 = arith.constant 0 : index
    %250 = vector.load %arg25[%c13_201, %c0_202] : memref<42x16xbf16, #tpu.memory_space<vmem>>, vector<24x16xbf16>
    %c7_203 = arith.constant 7 : index
    %c0_204 = arith.constant 0 : index
    %c0_205 = arith.constant 0 : index
    %251 = vector.load %arg8[%c7_203, %c0_204, %c0_205] : memref<9x16x16xbf16, #tpu.memory_space<vmem>>, vector<1x16x16xbf16>
    %252 = vector.shape_cast %251 : vector<1x16x16xbf16> to vector<16x16xbf16>
    %cst_206 = arith.constant dense<0.000000e+00> : vector<24x16xf32>
    %253 = tpu.matmul %250, %252, %cst_206 {dimension_numbers = #tpu.dot_dimension_numbers<[1], [0], [0], [1], [0, 0, 1, 1], [], []>} : vector<24x16xbf16>, vector<16x16xbf16>, vector<24x16xf32> -> vector<24x16xf32>
    %254 = arith.addf %249, %253 : vector<24x16xf32>
    %c14_207 = arith.constant 14 : index
    %c0_208 = arith.constant 0 : index
    %255 = vector.load %arg25[%c14_207, %c0_208] : memref<42x16xbf16, #tpu.memory_space<vmem>>, vector<24x16xbf16>
    %c8_209 = arith.constant 8 : index
    %c0_210 = arith.constant 0 : index
    %c0_211 = arith.constant 0 : index
    %256 = vector.load %arg8[%c8_209, %c0_210, %c0_211] : memref<9x16x16xbf16, #tpu.memory_space<vmem>>, vector<1x16x16xbf16>
    %257 = vector.shape_cast %256 : vector<1x16x16xbf16> to vector<16x16xbf16>
    %cst_212 = arith.constant dense<0.000000e+00> : vector<24x16xf32>
    %258 = tpu.matmul %255, %257, %cst_212 {dimension_numbers = #tpu.dot_dimension_numbers<[1], [0], [0], [1], [0, 0, 1, 1], [], []>} : vector<24x16xbf16>, vector<16x16xbf16>, vector<24x16xf32> -> vector<24x16xf32>
    %259 = arith.addf %254, %258 : vector<24x16xf32>
    %c0_213 = arith.constant 0 : index
    %c0_214 = arith.constant 0 : index
    %260 = vector.load %arg9[%c0_213, %c0_214] : memref<1x16xf32, #tpu.memory_space<vmem>>, vector<1x16xf32>
    %261 = vector.broadcast %260 : vector<1x16xf32> to vector<24x16xf32>
    %262 = arith.addf %259, %261 : vector<24x16xf32>
    %cst_215 = arith.constant 0.000000e+00 : f32
    %263 = vector.broadcast %cst_215 : f32 to vector<24x16xf32>
    %264 = arith.maximumf %262, %263 : vector<24x16xf32>
    %c0_216 = arith.constant 0 : index
    %c0_217 = arith.constant 0 : index
    %265 = vector.load %arg17[%c0_216, %c0_217] : memref<110x24xbf16, #tpu.memory_space<vmem>>, vector<110x24xbf16>
    %266 = arith.truncf %264 : vector<24x16xf32> to vector<24x16xbf16>
    %cst_218 = arith.constant dense<0.000000e+00> : vector<110x16xf32>
    %267 = tpu.matmul %265, %266, %cst_218 {dimension_numbers = #tpu.dot_dimension_numbers<[1], [0], [0], [1], [0, 0, 1, 1], [], []>} : vector<110x24xbf16>, vector<24x16xbf16>, vector<110x16xf32> -> vector<110x16xf32>
    %268 = arith.truncf %267 : vector<110x16xf32> to vector<110x16xbf16>
    %c0_219 = arith.constant 0 : index
    %c0_220 = arith.constant 0 : index
    %269 = vector.load %arg26[%c0_219, %c0_220] : memref<110x16xbf16, #tpu.memory_space<vmem>>, vector<110x16xbf16>
    tpu.vector_store %arg26[%c0_219, %c0_220], %268 {strides = array<i32>} : memref<110x16xbf16, #tpu.memory_space<vmem>>, vector<110x16xbf16>,
    %c0_221 = arith.constant 0 : index
    %c0_222 = arith.constant 0 : index
    %270 = vector.load %arg26[%c0_221, %c0_222] : memref<110x16xbf16, #tpu.memory_space<vmem>>, vector<80x16xbf16>
    %c0_223 = arith.constant 0 : index
    %c0_224 = arith.constant 0 : index
    %c0_225 = arith.constant 0 : index
    %271 = vector.load %arg10[%c0_223, %c0_224, %c0_225] : memref<9x16x16xbf16, #tpu.memory_space<vmem>>, vector<1x16x16xbf16>
    %272 = vector.shape_cast %271 : vector<1x16x16xbf16> to vector<16x16xbf16>
    %cst_226 = arith.constant dense<0.000000e+00> : vector<80x16xf32>
    %273 = tpu.matmul %270, %272, %cst_226 {dimension_numbers = #tpu.dot_dimension_numbers<[1], [0], [0], [1], [0, 0, 1, 1], [], []>} : vector<80x16xbf16>, vector<16x16xbf16>, vector<80x16xf32> -> vector<80x16xf32>
    %c1_227 = arith.constant 1 : index
    %c0_228 = arith.constant 0 : index
    %274 = vector.load %arg26[%c1_227, %c0_228] : memref<110x16xbf16, #tpu.memory_space<vmem>>, vector<80x16xbf16>
    %c1_229 = arith.constant 1 : index
    %c0_230 = arith.constant 0 : index
    %c0_231 = arith.constant 0 : index
    %275 = vector.load %arg10[%c1_229, %c0_230, %c0_231] : memref<9x16x16xbf16, #tpu.memory_space<vmem>>, vector<1x16x16xbf16>
    %276 = vector.shape_cast %275 : vector<1x16x16xbf16> to vector<16x16xbf16>
    %cst_232 = arith.constant dense<0.000000e+00> : vector<80x16xf32>
    %277 = tpu.matmul %274, %276, %cst_232 {dimension_numbers = #tpu.dot_dimension_numbers<[1], [0], [0], [1], [0, 0, 1, 1], [], []>} : vector<80x16xbf16>, vector<16x16xbf16>, vector<80x16xf32> -> vector<80x16xf32>
    %278 = arith.addf %273, %277 : vector<80x16xf32>
    %c2_233 = arith.constant 2 : index
    %c0_234 = arith.constant 0 : index
    %279 = vector.load %arg26[%c2_233, %c0_234] : memref<110x16xbf16, #tpu.memory_space<vmem>>, vector<80x16xbf16>
    %c2_235 = arith.constant 2 : index
    %c0_236 = arith.constant 0 : index
    %c0_237 = arith.constant 0 : index
    %280 = vector.load %arg10[%c2_235, %c0_236, %c0_237] : memref<9x16x16xbf16, #tpu.memory_space<vmem>>, vector<1x16x16xbf16>
    %281 = vector.shape_cast %280 : vector<1x16x16xbf16> to vector<16x16xbf16>
    %cst_238 = arith.constant dense<0.000000e+00> : vector<80x16xf32>
    %282 = tpu.matmul %279, %281, %cst_238 {dimension_numbers = #tpu.dot_dimension_numbers<[1], [0], [0], [1], [0, 0, 1, 1], [], []>} : vector<80x16xbf16>, vector<16x16xbf16>, vector<80x16xf32> -> vector<80x16xf32>
    %283 = arith.addf %278, %282 : vector<80x16xf32>
    %c10_239 = arith.constant 10 : index
    %c0_240 = arith.constant 0 : index
    %284 = vector.load %arg26[%c10_239, %c0_240] : memref<110x16xbf16, #tpu.memory_space<vmem>>, vector<80x16xbf16>
    %c3_241 = arith.constant 3 : index
    %c0_242 = arith.constant 0 : index
    %c0_243 = arith.constant 0 : index
    %285 = vector.load %arg10[%c3_241, %c0_242, %c0_243] : memref<9x16x16xbf16, #tpu.memory_space<vmem>>, vector<1x16x16xbf16>
    %286 = vector.shape_cast %285 : vector<1x16x16xbf16> to vector<16x16xbf16>
    %cst_244 = arith.constant dense<0.000000e+00> : vector<80x16xf32>
    %287 = tpu.matmul %284, %286, %cst_244 {dimension_numbers = #tpu.dot_dimension_numbers<[1], [0], [0], [1], [0, 0, 1, 1], [], []>} : vector<80x16xbf16>, vector<16x16xbf16>, vector<80x16xf32> -> vector<80x16xf32>
    %288 = arith.addf %283, %287 : vector<80x16xf32>
    %c11_245 = arith.constant 11 : index
    %c0_246 = arith.constant 0 : index
    %289 = vector.load %arg26[%c11_245, %c0_246] : memref<110x16xbf16, #tpu.memory_space<vmem>>, vector<80x16xbf16>
    %c4_247 = arith.constant 4 : index
    %c0_248 = arith.constant 0 : index
    %c0_249 = arith.constant 0 : index
    %290 = vector.load %arg10[%c4_247, %c0_248, %c0_249] : memref<9x16x16xbf16, #tpu.memory_space<vmem>>, vector<1x16x16xbf16>
    %291 = vector.shape_cast %290 : vector<1x16x16xbf16> to vector<16x16xbf16>
    %cst_250 = arith.constant dense<0.000000e+00> : vector<80x16xf32>
    %292 = tpu.matmul %289, %291, %cst_250 {dimension_numbers = #tpu.dot_dimension_numbers<[1], [0], [0], [1], [0, 0, 1, 1], [], []>} : vector<80x16xbf16>, vector<16x16xbf16>, vector<80x16xf32> -> vector<80x16xf32>
    %293 = arith.addf %288, %292 : vector<80x16xf32>
    %c12_251 = arith.constant 12 : index
    %c0_252 = arith.constant 0 : index
    %294 = vector.load %arg26[%c12_251, %c0_252] : memref<110x16xbf16, #tpu.memory_space<vmem>>, vector<80x16xbf16>
    %c5_253 = arith.constant 5 : index
    %c0_254 = arith.constant 0 : index
    %c0_255 = arith.constant 0 : index
    %295 = vector.load %arg10[%c5_253, %c0_254, %c0_255] : memref<9x16x16xbf16, #tpu.memory_space<vmem>>, vector<1x16x16xbf16>
    %296 = vector.shape_cast %295 : vector<1x16x16xbf16> to vector<16x16xbf16>
    %cst_256 = arith.constant dense<0.000000e+00> : vector<80x16xf32>
    %297 = tpu.matmul %294, %296, %cst_256 {dimension_numbers = #tpu.dot_dimension_numbers<[1], [0], [0], [1], [0, 0, 1, 1], [], []>} : vector<80x16xbf16>, vector<16x16xbf16>, vector<80x16xf32> -> vector<80x16xf32>
    %298 = arith.addf %293, %297 : vector<80x16xf32>
    %c20_257 = arith.constant 20 : index
    %c0_258 = arith.constant 0 : index
    %299 = vector.load %arg26[%c20_257, %c0_258] : memref<110x16xbf16, #tpu.memory_space<vmem>>, vector<80x16xbf16>
    %c6_259 = arith.constant 6 : index
    %c0_260 = arith.constant 0 : index
    %c0_261 = arith.constant 0 : index
    %300 = vector.load %arg10[%c6_259, %c0_260, %c0_261] : memref<9x16x16xbf16, #tpu.memory_space<vmem>>, vector<1x16x16xbf16>
    %301 = vector.shape_cast %300 : vector<1x16x16xbf16> to vector<16x16xbf16>
    %cst_262 = arith.constant dense<0.000000e+00> : vector<80x16xf32>
    %302 = tpu.matmul %299, %301, %cst_262 {dimension_numbers = #tpu.dot_dimension_numbers<[1], [0], [0], [1], [0, 0, 1, 1], [], []>} : vector<80x16xbf16>, vector<16x16xbf16>, vector<80x16xf32> -> vector<80x16xf32>
    %303 = arith.addf %298, %302 : vector<80x16xf32>
    %c21_263 = arith.constant 21 : index
    %c0_264 = arith.constant 0 : index
    %304 = vector.load %arg26[%c21_263, %c0_264] : memref<110x16xbf16, #tpu.memory_space<vmem>>, vector<80x16xbf16>
    %c7_265 = arith.constant 7 : index
    %c0_266 = arith.constant 0 : index
    %c0_267 = arith.constant 0 : index
    %305 = vector.load %arg10[%c7_265, %c0_266, %c0_267] : memref<9x16x16xbf16, #tpu.memory_space<vmem>>, vector<1x16x16xbf16>
    %306 = vector.shape_cast %305 : vector<1x16x16xbf16> to vector<16x16xbf16>
    %cst_268 = arith.constant dense<0.000000e+00> : vector<80x16xf32>
    %307 = tpu.matmul %304, %306, %cst_268 {dimension_numbers = #tpu.dot_dimension_numbers<[1], [0], [0], [1], [0, 0, 1, 1], [], []>} : vector<80x16xbf16>, vector<16x16xbf16>, vector<80x16xf32> -> vector<80x16xf32>
    %308 = arith.addf %303, %307 : vector<80x16xf32>
    %c22_269 = arith.constant 22 : index
    %c0_270 = arith.constant 0 : index
    %309 = vector.load %arg26[%c22_269, %c0_270] : memref<110x16xbf16, #tpu.memory_space<vmem>>, vector<80x16xbf16>
    %c8_271 = arith.constant 8 : index
    %c0_272 = arith.constant 0 : index
    %c0_273 = arith.constant 0 : index
    %310 = vector.load %arg10[%c8_271, %c0_272, %c0_273] : memref<9x16x16xbf16, #tpu.memory_space<vmem>>, vector<1x16x16xbf16>
    %311 = vector.shape_cast %310 : vector<1x16x16xbf16> to vector<16x16xbf16>
    %cst_274 = arith.constant dense<0.000000e+00> : vector<80x16xf32>
    %312 = tpu.matmul %309, %311, %cst_274 {dimension_numbers = #tpu.dot_dimension_numbers<[1], [0], [0], [1], [0, 0, 1, 1], [], []>} : vector<80x16xbf16>, vector<16x16xbf16>, vector<80x16xf32> -> vector<80x16xf32>
    %313 = arith.addf %308, %312 : vector<80x16xf32>
    %c0_275 = arith.constant 0 : index
    %c0_276 = arith.constant 0 : index
    %314 = vector.load %arg11[%c0_275, %c0_276] : memref<1x16xf32, #tpu.memory_space<vmem>>, vector<1x16xf32>
    %315 = vector.broadcast %314 : vector<1x16xf32> to vector<80x16xf32>
    %316 = arith.addf %313, %315 : vector<80x16xf32>
    %c0_277 = arith.constant 0 : index
    %c0_278 = arith.constant 0 : index
    %317 = vector.load %arg18[%c0_277, %c0_278] : memref<306x80xbf16, #tpu.memory_space<vmem>>, vector<306x80xbf16>
    %318 = arith.truncf %316 : vector<80x16xf32> to vector<80x16xbf16>
    %cst_279 = arith.constant dense<0.000000e+00> : vector<306x16xf32>
    %319 = tpu.matmul %317, %318, %cst_279 {dimension_numbers = #tpu.dot_dimension_numbers<[1], [0], [0], [1], [0, 0, 1, 1], [], []>} : vector<306x80xbf16>, vector<80x16xbf16>, vector<306x16xf32> -> vector<306x16xf32>
    %320 = arith.truncf %319 : vector<306x16xf32> to vector<306x16xbf16>
    %c0_280 = arith.constant 0 : index
    %c0_281 = arith.constant 0 : index
    %321 = vector.load %arg27[%c0_280, %c0_281] : memref<306x16xbf16, #tpu.memory_space<vmem>>, vector<306x16xbf16>
    tpu.vector_store %arg27[%c0_280, %c0_281], %320 {strides = array<i32>} : memref<306x16xbf16, #tpu.memory_space<vmem>>, vector<306x16xbf16>,
    %c0_282 = arith.constant 0 : index
    %c0_283 = arith.constant 0 : index
    %322 = vector.load %arg27[%c0_282, %c0_283] : memref<306x16xbf16, #tpu.memory_space<vmem>>, vector<255x16xbf16>
    %c0_284 = arith.constant 0 : index
    %c0_285 = arith.constant 0 : index
    %c0_286 = arith.constant 0 : index
    %323 = vector.load %arg12[%c0_284, %c0_285, %c0_286] : memref<9x16x1xbf16, #tpu.memory_space<vmem>>, vector<1x16x1xbf16>
    %324 = vector.shape_cast %323 : vector<1x16x1xbf16> to vector<16x1xbf16>
    %cst_287 = arith.constant dense<0.000000e+00> : vector<255x1xf32>
    %325 = tpu.matmul %322, %324, %cst_287 {dimension_numbers = #tpu.dot_dimension_numbers<[1], [0], [0], [1], [0, 0, 1, 1], [], []>} : vector<255x16xbf16>, vector<16x1xbf16>, vector<255x1xf32> -> vector<255x1xf32>
    %c1_288 = arith.constant 1 : index
    %c0_289 = arith.constant 0 : index
    %326 = vector.load %arg27[%c1_288, %c0_289] : memref<306x16xbf16, #tpu.memory_space<vmem>>, vector<255x16xbf16>
    %c1_290 = arith.constant 1 : index
    %c0_291 = arith.constant 0 : index
    %c0_292 = arith.constant 0 : index
    %327 = vector.load %arg12[%c1_290, %c0_291, %c0_292] : memref<9x16x1xbf16, #tpu.memory_space<vmem>>, vector<1x16x1xbf16>
    %328 = vector.shape_cast %327 : vector<1x16x1xbf16> to vector<16x1xbf16>
    %cst_293 = arith.constant dense<0.000000e+00> : vector<255x1xf32>
    %329 = tpu.matmul %326, %328, %cst_293 {dimension_numbers = #tpu.dot_dimension_numbers<[1], [0], [0], [1], [0, 0, 1, 1], [], []>} : vector<255x16xbf16>, vector<16x1xbf16>, vector<255x1xf32> -> vector<255x1xf32>
    %330 = arith.addf %325, %329 : vector<255x1xf32>
    %c2_294 = arith.constant 2 : index
    %c0_295 = arith.constant 0 : index
    %331 = vector.load %arg27[%c2_294, %c0_295] : memref<306x16xbf16, #tpu.memory_space<vmem>>, vector<255x16xbf16>
    %c2_296 = arith.constant 2 : index
    %c0_297 = arith.constant 0 : index
    %c0_298 = arith.constant 0 : index
    %332 = vector.load %arg12[%c2_296, %c0_297, %c0_298] : memref<9x16x1xbf16, #tpu.memory_space<vmem>>, vector<1x16x1xbf16>
    %333 = vector.shape_cast %332 : vector<1x16x1xbf16> to vector<16x1xbf16>
    %cst_299 = arith.constant dense<0.000000e+00> : vector<255x1xf32>
    %334 = tpu.matmul %331, %333, %cst_299 {dimension_numbers = #tpu.dot_dimension_numbers<[1], [0], [0], [1], [0, 0, 1, 1], [], []>} : vector<255x16xbf16>, vector<16x1xbf16>, vector<255x1xf32> -> vector<255x1xf32>
    %335 = arith.addf %330, %334 : vector<255x1xf32>
    %c17 = arith.constant 17 : index
    %c0_300 = arith.constant 0 : index
    %336 = vector.load %arg27[%c17, %c0_300] : memref<306x16xbf16, #tpu.memory_space<vmem>>, vector<255x16xbf16>
    %c3_301 = arith.constant 3 : index
    %c0_302 = arith.constant 0 : index
    %c0_303 = arith.constant 0 : index
    %337 = vector.load %arg12[%c3_301, %c0_302, %c0_303] : memref<9x16x1xbf16, #tpu.memory_space<vmem>>, vector<1x16x1xbf16>
    %338 = vector.shape_cast %337 : vector<1x16x1xbf16> to vector<16x1xbf16>
    %cst_304 = arith.constant dense<0.000000e+00> : vector<255x1xf32>
    %339 = tpu.matmul %336, %338, %cst_304 {dimension_numbers = #tpu.dot_dimension_numbers<[1], [0], [0], [1], [0, 0, 1, 1], [], []>} : vector<255x16xbf16>, vector<16x1xbf16>, vector<255x1xf32> -> vector<255x1xf32>
    %340 = arith.addf %335, %339 : vector<255x1xf32>
    %c18_305 = arith.constant 18 : index
    %c0_306 = arith.constant 0 : index
    %341 = vector.load %arg27[%c18_305, %c0_306] : memref<306x16xbf16, #tpu.memory_space<vmem>>, vector<255x16xbf16>
    %c4_307 = arith.constant 4 : index
    %c0_308 = arith.constant 0 : index
    %c0_309 = arith.constant 0 : index
    %342 = vector.load %arg12[%c4_307, %c0_308, %c0_309] : memref<9x16x1xbf16, #tpu.memory_space<vmem>>, vector<1x16x1xbf16>
    %343 = vector.shape_cast %342 : vector<1x16x1xbf16> to vector<16x1xbf16>
    %cst_310 = arith.constant dense<0.000000e+00> : vector<255x1xf32>
    %344 = tpu.matmul %341, %343, %cst_310 {dimension_numbers = #tpu.dot_dimension_numbers<[1], [0], [0], [1], [0, 0, 1, 1], [], []>} : vector<255x16xbf16>, vector<16x1xbf16>, vector<255x1xf32> -> vector<255x1xf32>
    %345 = arith.addf %340, %344 : vector<255x1xf32>
    %c19_311 = arith.constant 19 : index
    %c0_312 = arith.constant 0 : index
    %346 = vector.load %arg27[%c19_311, %c0_312] : memref<306x16xbf16, #tpu.memory_space<vmem>>, vector<255x16xbf16>
    %c5_313 = arith.constant 5 : index
    %c0_314 = arith.constant 0 : index
    %c0_315 = arith.constant 0 : index
    %347 = vector.load %arg12[%c5_313, %c0_314, %c0_315] : memref<9x16x1xbf16, #tpu.memory_space<vmem>>, vector<1x16x1xbf16>
    %348 = vector.shape_cast %347 : vector<1x16x1xbf16> to vector<16x1xbf16>
    %cst_316 = arith.constant dense<0.000000e+00> : vector<255x1xf32>
    %349 = tpu.matmul %346, %348, %cst_316 {dimension_numbers = #tpu.dot_dimension_numbers<[1], [0], [0], [1], [0, 0, 1, 1], [], []>} : vector<255x16xbf16>, vector<16x1xbf16>, vector<255x1xf32> -> vector<255x1xf32>
    %350 = arith.addf %345, %349 : vector<255x1xf32>
    %c34 = arith.constant 34 : index
    %c0_317 = arith.constant 0 : index
    %351 = vector.load %arg27[%c34, %c0_317] : memref<306x16xbf16, #tpu.memory_space<vmem>>, vector<255x16xbf16>
    %c6_318 = arith.constant 6 : index
    %c0_319 = arith.constant 0 : index
    %c0_320 = arith.constant 0 : index
    %352 = vector.load %arg12[%c6_318, %c0_319, %c0_320] : memref<9x16x1xbf16, #tpu.memory_space<vmem>>, vector<1x16x1xbf16>
    %353 = vector.shape_cast %352 : vector<1x16x1xbf16> to vector<16x1xbf16>
    %cst_321 = arith.constant dense<0.000000e+00> : vector<255x1xf32>
    %354 = tpu.matmul %351, %353, %cst_321 {dimension_numbers = #tpu.dot_dimension_numbers<[1], [0], [0], [1], [0, 0, 1, 1], [], []>} : vector<255x16xbf16>, vector<16x1xbf16>, vector<255x1xf32> -> vector<255x1xf32>
    %355 = arith.addf %350, %354 : vector<255x1xf32>
    %c35 = arith.constant 35 : index
    %c0_322 = arith.constant 0 : index
    %356 = vector.load %arg27[%c35, %c0_322] : memref<306x16xbf16, #tpu.memory_space<vmem>>, vector<255x16xbf16>
    %c7_323 = arith.constant 7 : index
    %c0_324 = arith.constant 0 : index
    %c0_325 = arith.constant 0 : index
    %357 = vector.load %arg12[%c7_323, %c0_324, %c0_325] : memref<9x16x1xbf16, #tpu.memory_space<vmem>>, vector<1x16x1xbf16>
    %358 = vector.shape_cast %357 : vector<1x16x1xbf16> to vector<16x1xbf16>
    %cst_326 = arith.constant dense<0.000000e+00> : vector<255x1xf32>
    %359 = tpu.matmul %356, %358, %cst_326 {dimension_numbers = #tpu.dot_dimension_numbers<[1], [0], [0], [1], [0, 0, 1, 1], [], []>} : vector<255x16xbf16>, vector<16x1xbf16>, vector<255x1xf32> -> vector<255x1xf32>
    %360 = arith.addf %355, %359 : vector<255x1xf32>
    %c36_327 = arith.constant 36 : index
    %c0_328 = arith.constant 0 : index
    %361 = vector.load %arg27[%c36_327, %c0_328] : memref<306x16xbf16, #tpu.memory_space<vmem>>, vector<255x16xbf16>
    %c8_329 = arith.constant 8 : index
    %c0_330 = arith.constant 0 : index
    %c0_331 = arith.constant 0 : index
    %362 = vector.load %arg12[%c8_329, %c0_330, %c0_331] : memref<9x16x1xbf16, #tpu.memory_space<vmem>>, vector<1x16x1xbf16>
    %363 = vector.shape_cast %362 : vector<1x16x1xbf16> to vector<16x1xbf16>
    %cst_332 = arith.constant dense<0.000000e+00> : vector<255x1xf32>
    %364 = tpu.matmul %361, %363, %cst_332 {dimension_numbers = #tpu.dot_dimension_numbers<[1], [0], [0], [1], [0, 0, 1, 1], [], []>} : vector<255x16xbf16>, vector<16x1xbf16>, vector<255x1xf32> -> vector<255x1xf32>
    %365 = arith.addf %360, %364 : vector<255x1xf32>
    %c0_333 = arith.constant 0 : index
    %c0_334 = arith.constant 0 : index
    %366 = vector.load %arg19[%c0_333, %c0_334] : memref<225x255xf32, #tpu.memory_space<vmem>>, vector<225x255xf32>
    %c0_335 = arith.constant 0 : index
    %c0_336 = arith.constant 0 : index
    %367 = vector.load %arg13[%c0_335, %c0_336] : memref<1x1xf32, #tpu.memory_space<vmem>>, vector<1x1xf32>
    %368 = vector.broadcast %367 : vector<1x1xf32> to vector<255x1xf32>
    %369 = arith.addf %365, %368 : vector<255x1xf32>
    %cst_337 = arith.constant dense<0.000000e+00> : vector<225x1xf32>
    %370 = tpu.matmul %366, %369, %cst_337 {dimension_numbers = #tpu.dot_dimension_numbers<[1], [0], [0], [1], [0, 0, 1, 1], [], []>} : vector<225x255xf32>, vector<255x1xf32>, vector<225x1xf32> -> vector<225x1xf32>
    %371 = math.tanh %370 : vector<225x1xf32>
    %c0_338 = arith.constant 0 : index
    %c0_339 = arith.constant 0 : index
    %c0_340 = arith.constant 0 : index
    %372 = vector.load %arg20[%c0_338, %c0_339, %c0_340] : memref<1x225x1xf32, #tpu.memory_space<vmem>>, vector<1x225x1xf32>
    %373 = vector.shape_cast %372 : vector<1x225x1xf32> to vector<225x1xf32>
    %374 = vector.shape_cast %371 : vector<225x1xf32> to vector<1x225x1xf32>
    tpu.vector_store %arg20[%c0_338, %c0_339, %c0_340], %374 {strides = array<i32>} : memref<1x225x1xf32, #tpu.memory_space<vmem>>, vector<1x225x1xf32>,
    return
  }
  func.func @transform_0(%arg0: i32) -> (i32, i32, i32) {
    %c0_i32 = arith.constant 0 : i32
    %c0_i32_0 = arith.constant 0 : i32
    %c0_i32_1 = arith.constant 0 : i32
    return %arg0, %c0_i32, %c0_i32_0 : i32, i32, i32
  }
  func.func @transform_1(%arg0: i32) -> (i32, i32, i32) {
    %c0_i32 = arith.constant 0 : i32
    %c0_i32_0 = arith.constant 0 : i32
    %c0_i32_1 = arith.constant 0 : i32
    %c0_i32_2 = arith.constant 0 : i32
    return %c0_i32, %c0_i32_0, %c0_i32_1 : i32, i32, i32
  }
  func.func @transform_2(%arg0: i32) -> (i32, i32) {
    %c0_i32 = arith.constant 0 : i32
    %c0_i32_0 = arith.constant 0 : i32
    %c0_i32_1 = arith.constant 0 : i32
    return %c0_i32, %c0_i32_0 : i32, i32
  }
  func.func @transform_3(%arg0: i32) -> (i32, i32, i32) {
    %c0_i32 = arith.constant 0 : i32
    %c0_i32_0 = arith.constant 0 : i32
    %c0_i32_1 = arith.constant 0 : i32
    %c0_i32_2 = arith.constant 0 : i32
    return %c0_i32, %c0_i32_0, %c0_i32_1 : i32, i32, i32
  }
  func.func @transform_4(%arg0: i32) -> (i32, i32) {
    %c0_i32 = arith.constant 0 : i32
    %c0_i32_0 = arith.constant 0 : i32
    %c0_i32_1 = arith.constant 0 : i32
    return %c0_i32, %c0_i32_0 : i32, i32
  }
  func.func @transform_5(%arg0: i32) -> (i32, i32, i32) {
    %c0_i32 = arith.constant 0 : i32
    %c0_i32_0 = arith.constant 0 : i32
    %c0_i32_1 = arith.constant 0 : i32
    %c0_i32_2 = arith.constant 0 : i32
    return %c0_i32, %c0_i32_0, %c0_i32_1 : i32, i32, i32
  }
  func.func @transform_6(%arg0: i32) -> (i32, i32) {
    %c0_i32 = arith.constant 0 : i32
    %c0_i32_0 = arith.constant 0 : i32
    %c0_i32_1 = arith.constant 0 : i32
    return %c0_i32, %c0_i32_0 : i32, i32
  }
  func.func @transform_7(%arg0: i32) -> (i32, i32, i32) {
    %c0_i32 = arith.constant 0 : i32
    %c0_i32_0 = arith.constant 0 : i32
    %c0_i32_1 = arith.constant 0 : i32
    %c0_i32_2 = arith.constant 0 : i32
    return %c0_i32, %c0_i32_0, %c0_i32_1 : i32, i32, i32
  }
  func.func @transform_8(%arg0: i32) -> (i32, i32) {
    %c0_i32 = arith.constant 0 : i32
    %c0_i32_0 = arith.constant 0 : i32
    %c0_i32_1 = arith.constant 0 : i32
    return %c0_i32, %c0_i32_0 : i32, i32
  }
  func.func @transform_9(%arg0: i32) -> (i32, i32, i32) {
    %c0_i32 = arith.constant 0 : i32
    %c0_i32_0 = arith.constant 0 : i32
    %c0_i32_1 = arith.constant 0 : i32
    %c0_i32_2 = arith.constant 0 : i32
    return %c0_i32, %c0_i32_0, %c0_i32_1 : i32, i32, i32
  }
  func.func @transform_10(%arg0: i32) -> (i32, i32) {
    %c0_i32 = arith.constant 0 : i32
    %c0_i32_0 = arith.constant 0 : i32
    %c0_i32_1 = arith.constant 0 : i32
    return %c0_i32, %c0_i32_0 : i32, i32
  }
  func.func @transform_11(%arg0: i32) -> (i32, i32, i32) {
    %c0_i32 = arith.constant 0 : i32
    %c0_i32_0 = arith.constant 0 : i32
    %c0_i32_1 = arith.constant 0 : i32
    %c0_i32_2 = arith.constant 0 : i32
    return %c0_i32, %c0_i32_0, %c0_i32_1 : i32, i32, i32
  }
  func.func @transform_12(%arg0: i32) -> (i32, i32) {
    %c0_i32 = arith.constant 0 : i32
    %c0_i32_0 = arith.constant 0 : i32
    %c0_i32_1 = arith.constant 0 : i32
    return %c0_i32, %c0_i32_0 : i32, i32
  }
  func.func @transform_13(%arg0: i32) -> (i32, i32) {
    %c0_i32 = arith.constant 0 : i32
    %c0_i32_0 = arith.constant 0 : i32
    %c0_i32_1 = arith.constant 0 : i32
    return %c0_i32, %c0_i32_0 : i32, i32
  }
  func.func @transform_14(%arg0: i32) -> (i32, i32) {
    %c0_i32 = arith.constant 0 : i32
    %c0_i32_0 = arith.constant 0 : i32
    %c0_i32_1 = arith.constant 0 : i32
    return %c0_i32, %c0_i32_0 : i32, i32
  }
  func.func @transform_15(%arg0: i32) -> (i32, i32) {
    %c0_i32 = arith.constant 0 : i32
    %c0_i32_0 = arith.constant 0 : i32
    %c0_i32_1 = arith.constant 0 : i32
    return %c0_i32, %c0_i32_0 : i32, i32
  }
  func.func @transform_16(%arg0: i32) -> (i32, i32) {
    %c0_i32 = arith.constant 0 : i32
    %c0_i32_0 = arith.constant 0 : i32
    %c0_i32_1 = arith.constant 0 : i32
    return %c0_i32, %c0_i32_0 : i32, i32
  }
  func.func @transform_17(%arg0: i32) -> (i32, i32) {
    %c0_i32 = arith.constant 0 : i32
    %c0_i32_0 = arith.constant 0 : i32
    %c0_i32_1 = arith.constant 0 : i32
    return %c0_i32, %c0_i32_0 : i32, i32
  }
  func.func @transform_18(%arg0: i32) -> (i32, i32) {
    %c0_i32 = arith.constant 0 : i32
    %c0_i32_0 = arith.constant 0 : i32
    %c0_i32_1 = arith.constant 0 : i32
    return %c0_i32, %c0_i32_0 : i32, i32
  }
  func.func @transform_19(%arg0: i32) -> (i32, i32, i32) {
    %c0_i32 = arith.constant 0 : i32
    %c0_i32_0 = arith.constant 0 : i32
    %c0_i32_1 = arith.constant 0 : i32
    return %arg0, %c0_i32, %c0_i32_0 : i32, i32, i32
  }
}

</mosaic_0001>

<bundles_post_ra>
// kernel: convautoencoder2_forward.1
= control target key start
LH: loop header
LB: loop body
LE: loop exit
PB: predicated region body
PF: predicated region fallthrough
CT: control target
= control target key end

     0   :  { %s13811_s20 = smov 0   ;;  %s18988_s0 = inlined_call_operand.vmem [shape: bf16[2,342,1], index: 0, kind: input, shape index: {}]   ;;  %s18989_s1 = inlined_call_operand.vmem [shape: bf16[9,1,64], index: 1, kind: input, shape index: {}]   ;;  %s18990_s2 = inlined_call_operand.vmem [shape: f32[1,64], index: 2, kind: input, shape index: {}]   ;;  %s18991_s3 = inlined_call_operand.vmem [shape: bf16[9,64,16], index: 3, kind: input, shape index: {}]   ;;  %s18992_s4 = inlined_call_operand.vmem [shape: f32[1,16], index: 4, kind: input, shape index: {}]   ;;  %s18993_s5 = inlined_call_operand.vmem [shape: bf16[9,16,16], index: 5, kind: input, shape index: {}]   ;;  %s18994_s6 = inlined_call_operand.vmem [shape: f32[1,16], index: 6, kind: input, shape index: {}]   ;;  %s18995_s7 = inlined_call_operand.vmem [shape: bf16[9,16,16], index: 7, kind: input, shape index: {}]   ;;  %s18996_s8 = inlined_call_operand.vmem [shape: f32[1,16], index: 8, kind: input, shape index: {}]   ;;  %s18997_s9 = inlined_call_operand.vmem [shape: bf16[9,16,16], index: 9, kind: input, shape index: {}]   ;;  %s18998_s10 = inlined_call_operand.vmem [shape: f32[1,16], index: 10, kind: input, shape index: {}]   ;;  %s18999_s11 = inlined_call_operand.vmem [shape: bf16[9,16,1], index: 11, kind: input, shape index: {}]   ;;  %s19000_s12 = inlined_call_operand.<no memory space> [shape: f32[1,1], index: 12, kind: input, shape index: {}]   ;;  %s19001_s13 = inlined_call_operand.vmem [shape: bf16[110,269], index: 13, kind: input, shape index: {}]   ;;  %s19002_s14 = inlined_call_operand.vmem [shape: bf16[42,69], index: 14, kind: input, shape index: {}]   ;;  %s19003_s15 = inlined_call_operand.vmem [shape: bf16[42,24], index: 15, kind: input, shape index: {}]   ;;  %s19004_s16 = inlined_call_operand.vmem [shape: bf16[110,24], index: 16, kind: input, shape index: {}]   ;;  %s19005_s17 = inlined_call_operand.vmem [shape: bf16[306,80], index: 17, kind: input, shape index: {}]   ;;  %s19006_s18 = inlined_call_operand.vmem [shape: f32[225,255], index: 18, kind: input, shape index: {}]   ;;  %s19007_s19 = inlined_call_operand.vmem [shape: f32[2,225,1], index: 19, kind: output, shape index: {}]  }
   0x1   :  { %19199 = sst [smem:[#allocation74_spill]] %s18988_s0  ;;  %v24_v0 = vstv %s19000_s12 }
   0x2   :  { %19200 = sst [smem:[#allocation75_spill]] %s18989_s1  ;;  %25 = vst [vmem:[#allocation9] sm:$0x1] %v24_v0 }
   0x3   :  { %19201 = sst [smem:[#allocation76_spill]] %s18990_s2 }
   0x4   :  { %19202 = sst [smem:[#allocation77_spill]] %s18991_s3 }
   0x5 LB: > { %s11243_s21 = sadd.s32 4294967295, %s13704_s20   ;;  %p11247_p0 = scmp.ge.s32.totalorder %s13704_s20, 1  ;;  %s13704_s20 = sphi %s13811_s20, %s31_s20  }
   0x6   : > { %p539_p1 = scmp.lt.s32.totalorder %s13704_s20, 3 }
   0x8   : > { %p540_p2 = pnand %p11247_p0, %p539_p1 }
   0xa   : > { %543 = sbr.rel (%p540_p2) target bundleno = 4023 (0xfb7), region = 96 }
   0xf   : > { %p595_p3 = scmp.lt.s32.totalorder %s11243_s21, 1  ;;  %v13706_v1 = vmov 0   ;;  %s19203_s2 = sld [smem:[#allocation74_spill]]  ;;  %vm1247_vm0 = vcmask 1046528   ;;  %vm1475_vm1 = vcmask 1045504   ;;  %vm2182_vm2 = vcmask 1044480  }
  0x10   : > { %13275 = vset.pattern.permute.xlu2 %v13706_v1  ;;  %13264 = vset.pattern.permute.xlu1 %v13706_v1  ;;  %s19205_s3 = sld [smem:[#allocation75_spill]]  ;;  %vm2410_vm3 = vcmask 1043456   ;;  %vm3117_vm4 = vcmask 1042432   ;;  %vm3345_vm5 = vcmask 1041408   ;;  %vm3567_vm6 = vcmask 523264  }
  0x11   : > { %13253 = vset.pattern.permute.xlu0 %v13706_v1  ;;  %s19829_s21 = smov (!%p595_p3, %s11243_s21), 1  ;;  %vm3992_vm7 = vcmask 105472   ;;  %s19654_s26 = sld [smem:[#allocation77_spill]]  ;;  %vm4165_vm8 = vcmask 519168   ;;  %vm4237_vm9 = vsmask.f32 7424 }
  0x12   : > { %s13241_s12 = smul.u32 172, %s19829_s21  ;;  %vm4686_vm10 = vsmask.f32 6400  ;;  %vm5086_vm11 = vsmask.f32 5376  ;;  %vm5355_vm12 = vcmask 130048  }
  0x13   : > { %vm5455_vm13 = vcmask 564224   ;;  %vm5500_vm14 = vcmask 125952   ;;  %vm5699_vm15 = vsmask.f32 4352  ;;  %s13242_s28 = smul.u32 232, %s19829_s21 }
  0x15   : > { %s13825_s23 = scalar_lea.vmem %s19203_s2, %s13241_s12  ;;  %s19273_s12 = sld [smem:[#allocation76_spill]] }
  0x16   : > { %v13196_v2 = vld [vmem:[%s13825_s23 + $0x80] sm:$0xff]   ;;  %v13189_v3 = vld [vmem:[%s13825_s23 + $0x48] sm:$0xff]   ;;  %v13187_v4 = vld [vmem:[%s13825_s23 + $0x38] sm:$0xff]   ;;  %s18854_s30 = scalar_lea.vmem %s19007_s19, %s13242_s28 }
  0x17   : > { %v12998_v5 = vunpack.c.l.bf16 %v13196_v2  ;;  %v12999_v6 = vunpack.c.h.bf16 %v13196_v2  ;;  %v12970_v7 = vunpack.c.l.bf16 %v13189_v3  ;;  %v12971_v8 = vunpack.c.h.bf16 %v13189_v3  ;;  %v13831_v11 = vld [vmem:[%s13825_s23 + $0x88] sm:$0xff]   ;;  %v13195_v12 = vld [vmem:[%s13825_s23 + $0x78] sm:$0xff]   ;;  %v13188_v15 = vld [vmem:[%s13825_s23 + $0x40] sm:$0xff]  }
  0x18   : > { %v12962_v9 = vunpack.c.l.bf16 %v13187_v4  ;;  %v12963_v10 = vunpack.c.h.bf16 %v13187_v4  ;;  %19204 = vst [vmem:[#allocation10_spill] sm:$0xff] %v13831_v11  ;;  %v13002_v17 = vunpack.c.l.bf16 %v13831_v11  ;;  %v19013_v18 = vunpack.c.h.bf16 %v13831_v11  ;;  %v13855_v27 = vld [vmem:[%s13825_s23 + $0x30] sm:$0xff]   ;;  %v13193_v45 = vld [vmem:[%s13825_s23 + $0x68] sm:$0xff]   ;;  %v13908_v53 = vld [vmem:[%s13825_s23 + $0x58] sm:$0xff]  }
  0x19   : > { %v13834_v13 = vpack.i.bf16 %v12999_v6, %v12998_v5  ;;  %v13836_v14 = vpack.i.bf16 %v12971_v8, %v12970_v7  ;;  %v12994_v19 = vunpack.c.l.bf16 %v13195_v12  ;;  %v12995_v20 = vunpack.c.h.bf16 %v13195_v12  ;;  %v13868_v33 = vld [vmem:[%s13825_s23 + $0x70] sm:$0xff]   ;;  %v13185_v46 = vld [vmem:[%s13825_s23 + $0x28] sm:$0xff]   ;;  %v13231_v57 = vld [vmem:[%s13825_s23 + $0x98] sm:$0xff]  }
  0x1a   : > { %v13839_v16 = vpack.i.bf16 %v12963_v10, %v12962_v9  ;;  %v12966_v21 = vunpack.c.l.bf16 %v13188_v15  ;;  %v12967_v22 = vunpack.c.h.bf16 %v13188_v15  ;;  %v13281_v23 = vpack.i.bf16 %v19013_v18, %v13002_v17  ;;  %v13880_v37 = vld [vmem:[%s13825_s23 + $0x50] sm:$0xff]   ;;  %v13192_v61 = vld [vmem:[%s13825_s23 + $0x60] sm:$0xff]  }
  0x1b   : > { %13277 = vperm.xlu2 %13275, %v13834_v13   ;;  %13266 = vperm.xlu1 %13264, %v13836_v14   ;;  %v13848_v24 = vpack.i.bf16 %v12995_v20, %v12994_v19  ;;  %v13296_v26 = vpack.i.bf16 %v12994_v19, %v12970_v7  ;;  %v19030_v28 = vunpack.c.l.bf16 %v13855_v27  ;;  %v19026_v29 = vunpack.c.h.bf16 %v13855_v27  ;;  %v13214_v41 = vld [vmem:[%s13825_s23 + $0x90] sm:$0xff]   ;;  %v13184_v62 = vld [vmem:[%s13825_s23 + $0x20] sm:$0xff]  }
  0x1c   : > { %13255 = vperm.xlu0 %13253, %v13839_v16   ;;  %v13850_v25 = vpack.i.bf16 %v12967_v22, %v12966_v21  ;;  %v13306_v31 = vpack.i.bf16 %v13002_v17, %v12999_v6  ;;  %v13301_v32 = vpack.i.bf16 %v12998_v5, %v12995_v20  ;;  %v19025_v34 = vunpack.c.l.bf16 %v13868_v33  ;;  %v13935_v6 = vld [vmem:[%s13825_s23 + $0x18] sm:$0xff]   ;;  %v607_v7 = vld [vmem:[%s19205_s3 + $0x1] sm:$0x1]  ;;  %v608_v8 = vld [vmem:[%s19205_s3 + $0x2] sm:$0x1] }
  0x1d   : > { %v13865_v30 = vpack.i.bf16 %v19026_v29, %v19030_v28  ;;  %v19021_v35 = vunpack.c.h.bf16 %v13868_v33  ;;  %v19023_v38 = vunpack.c.l.bf16 %v13880_v37  ;;  %v19016_v39 = vunpack.c.h.bf16 %v13880_v37 }
  0x1e   : > { %v13070_v42 = vunpack.c.l.bf16 %v13214_v41  ;;  %v13071_v43 = vunpack.c.h.bf16 %v13214_v41  ;;  %v12986_v47 = vunpack.c.l.bf16 %v13193_v45  ;;  %v12987_v48 = vunpack.c.h.bf16 %v13193_v45  ;;  %v609_v41 = vld [vmem:[%s19205_s3 + $0x3] sm:$0x1]  ;;  %v611_v45 = vld [vmem:[%s19205_s3 + $0x5] sm:$0x1] }
  0x1f   : > { %v13877_v36 = vpack.i.bf16 %v19021_v35, %v19025_v34  ;;  %v13891_v40 = vpack.i.bf16 %v19016_v39, %v19023_v38  ;;  %v12954_v49 = vunpack.c.l.bf16 %v13185_v46  ;;  %v12955_v50 = vunpack.c.h.bf16 %v13185_v46  ;;  %v13983_v46 = vld [vmem:[%s13825_s23 + $0x10] sm:$0xff]  }
  0x20   : > { %v13346_v44 = vpack.i.bf16 %v13071_v43, %v13070_v42  ;;  %v13900_v51 = vpack.i.bf16 %v12987_v48, %v12986_v47  ;;  %v19017_v54 = vunpack.c.l.bf16 %v13908_v53  ;;  %v19014_v55 = vunpack.c.h.bf16 %v13908_v53 }
  0x21   : > { %v13902_v52 = vpack.i.bf16 %v12955_v50, %v12954_v49  ;;  %v13138_v58 = vunpack.c.l.bf16 %v13231_v57  ;;  %v13139_v59 = vunpack.c.h.bf16 %v13231_v57  ;;  %v12982_v63 = vunpack.c.l.bf16 %v13192_v61 }
  0x22   : > { %v13919_v56 = vpack.i.bf16 %v19014_v55, %v19017_v54  ;;  %v12983_v0 = vunpack.c.h.bf16 %v13192_v61  ;;  %v12950_v1 = vunpack.c.l.bf16 %v13184_v62  ;;  %v12951_v2 = vunpack.c.h.bf16 %v13184_v62 }
  0x23   : > { %13282 = vperm.xlu2 %13275, %v13281_v23   ;;  %13271 = vperm.xlu1 %13264, %v13848_v24   ;;  %v13406_v60 = vpack.i.bf16 %v13139_v59, %v13138_v58  ;;  %v19015_v9 = vunpack.c.l.bf16 %v13935_v6  ;;  %v19018_v10 = vunpack.c.h.bf16 %v13935_v6  ;;  %v616_v12 = vunpack.c.l.bf16 %v607_v7 }
  0x24   : > { %13260 = vperm.xlu0 %13253, %v13850_v25   ;;  %v13927_v3 = vpack.i.bf16 %v12983_v0, %v12982_v63  ;;  %v13929_v4 = vpack.i.bf16 %v12951_v2, %v12950_v1  ;;  %v618_v61 = vunpack.c.l.bf16 %v609_v41  ;;  %v620_v63 = vunpack.c.l.bf16 %v611_v45 }
  0x25   : > { %v13952_v20 = vpack.i.bf16 %v19018_v10, %v19015_v9  ;;  %v13957_v21 = vperm.slane %v616_v12, 0  ;;  %v19020_v0 = vunpack.c.l.bf16 %v13983_v46  ;;  %v19024_v7 = vunpack.c.h.bf16 %v13983_v46 }
  0x2b   : > { %13297 = vperm.xlu2 %13275, %v13296_v26   ;;  %13292 = vperm.xlu1 %13264, %v13850_v25  }
  0x2c   : > { %13287 = vperm.xlu0 %13253, %v13839_v16  }
  0x33   : > { %13312 = vperm.xlu2 %13275, %v13865_v30   ;;  %13307 = vperm.xlu1 %13264, %v13306_v31  }
  0x34   : > { %13302 = vperm.xlu0 %13253, %v13301_v32  }
  0x3b   : > { %13327 = vperm.xlu2 %13275, %v13836_v14   ;;  %13322 = vperm.xlu1 %13264, %v13850_v25  }
  0x3c   : > { %13317 = vperm.xlu0 %13253, %v13877_v36  }
  0x43   : > { %13342 = vperm.xlu2 %13275, %v13281_v23   ;;  %13337 = vperm.xlu1 %13264, %v13834_v13  }
  0x44   : > { %13332 = vperm.xlu0 %13253, %v13891_v40  }
  0x4b   : > { %13357 = vperm.xlu2 %13275, %v13877_v36   ;;  %13352 = vperm.xlu1 %13264, %v13865_v30  }
  0x4c   : > { %13347 = vperm.xlu0 %13253, %v13346_v44  }
  0x53   : > { %13372 = vperm.xlu2 %13275, %v13839_v16   ;;  %13367 = vperm.xlu1 %13264, %v13900_v51  }
  0x54   : > { %13362 = vperm.xlu0 %13253, %v13902_v52  }
  0x5b   : > { %13387 = vperm.xlu2 %13275, %v13891_v40   ;;  %13382 = vperm.xlu1 %13264, %v13836_v14   ;;  %v617_v14 = vunpack.c.l.bf16 %v608_v8 }
  0x5c   : > { %13377 = vperm.xlu0 %13253, %v13848_v24  }
  0x5d   : > { %v13959_v22 = vperm.slane %v617_v14, 0 }
  0x63   : > { %13402 = vperm.xlu2 %13275, %v13346_v44   ;;  %13397 = vperm.xlu1 %13264, %v13281_v23   ;;  %v610_v44 = vld [vmem:[%s19205_s3 + $0x4] sm:$0x1] }
  0x64   : > { %13392 = vperm.xlu0 %13253, %v13919_v56   ;;  %v619_v62 = vunpack.c.l.bf16 %v610_v44 }
  0x6b   : > { %13417 = vperm.xlu2 %13275, %v13900_v51   ;;  %13412 = vperm.xlu1 %13264, %v13902_v52  }
  0x6c   : > { %13407 = vperm.xlu0 %13253, %v13406_v60  }
  0x73   : > { %13432 = vperm.xlu2 %13275, %v13865_v30   ;;  %13427 = vperm.xlu1 %13264, %v13927_v3  }
  0x74   : > { %13422 = vperm.xlu0 %13253, %v13929_v4  }
  0x75   : > { %v13278_v5 = vpop.permute.xlu2 %13277 }
  0x76   : > { %v13280_v17 = vunpack.i.h.bf16 %v13278_v5  ;;  %v13279_v26 = vunpack.i.l.bf16 %v13278_v5 }
  0x78   : > { %v13963_v31 = vmul.f32 %v13280_v17, %v13959_v22  ;;  %v13986_v47 = vmul.f32 %v13279_v26, %v13957_v21  ;;  %v13989_v48 = vmul.f32 %v13279_v26, %v13959_v22 }
  0x7a   : > { %v1541_v58 = vrot.slane %v13963_v31, 2  ;;  %v19029_v8 = vrot.slane %v13986_v47, 1 }
  0x7b   : > { %13447 = vperm.xlu2 %13275, %v13834_v13   ;;  %13442 = vperm.xlu1 %13264, %v13850_v25   ;;  %v606_v13 = vld [vmem:[%s19205_s3] sm:$0x1]  ;;  %v1206_v25 = vmul.f32 %v13280_v17, %v13957_v21  ;;  %v19027_v17 = vrot.slane %v13989_v48, 2 }
  0x7c   : > { %13437 = vperm.xlu0 %13253, %v13877_v36   ;;  %v615_v30 = vunpack.c.l.bf16 %v606_v13  ;;  %v14014_v13 = vperm.slane %v619_v62, 0 }
  0x7d   : > { %v13283_v15 = vpop.permute.xlu2 %13282  ;;  %v1313_v57 = vrot.slane %v1206_v25, 1 }
  0x7e   : > { %v13284_v19 = vunpack.i.l.bf16 %v13283_v15  ;;  %v13285_v23 = vunpack.i.h.bf16 %v13283_v15  ;;  %v13994_v50 = vperm.slane %v615_v30, 0  ;;  %v14026_v30 = vpack.i.bf16 %v19024_v7, %v19020_v0 }
  0x7f   : > { %v14041_v44 = vsel %vm1247_vm0, %v19029_v8, %v1313_v57 }
  0x80   : > { %v1207_v32 = vmul.f32 %v13284_v19, %v13957_v21  ;;  %v1435_v36 = vmul.f32 %v13284_v19, %v13959_v22  ;;  %v13974_v42 = vmul.f32 %v13285_v23, %v13957_v21  ;;  %v13992_v49 = vmul.f32 %v13285_v23, %v13959_v22  ;;  %19208 = vst [vmem:[#allocation13_spill] sm:$0xff] %v14026_v30 }
  0x81   : > { %v14012_v19 = vperm.slane %v618_v61, 0  ;;  %v14016_v23 = vperm.slane %v620_v63, 0 }
  0x82   : > { %19206 = vst [vmem:[#allocation11_spill] sm:$0xff] %v13974_v42  ;;  %v1315_v59 = vrot.slane %v1207_v32, 1  ;;  %v1543_v60 = vrot.slane %v1435_v36, 2  ;;  %v19012_v1 = vrot.slane %v13974_v42, 1  ;;  %v19011_v12 = vrot.slane %v13992_v49, 2 }
  0x83   : > { %13462 = vperm.xlu2 %13275, %v13952_v20   ;;  %13457 = vperm.xlu1 %13264, %v13927_v3   ;;  %19207 = vst [vmem:[#allocation12_spill] sm:$0xff] %v13992_v49 }
  0x84   : > { %13452 = vperm.xlu0 %13253, %v13929_v4   ;;  %v14005_v14 = vsel %vm1247_vm0, %v1313_v57, %v1315_v59  ;;  %v14008_v15 = vsel %vm1475_vm1, %v1541_v58, %v1543_v60  ;;  %v14031_v31 = vsel %vm1247_vm0, %v1315_v59, %v19012_v1 }
  0x85   : > { %v13298_v43 = vpop.permute.xlu2 %13297 }
  0x86   : > { %v13300_v2 = vunpack.i.h.bf16 %v13298_v43  ;;  %v13299_v5 = vunpack.i.l.bf16 %v13298_v43  ;;  %v14036_v43 = vsel %vm1475_vm1, %v1543_v60, %v19011_v12 }
  0x8b   : > { %13477 = vperm.xlu2 %13275, %v13900_v51   ;;  %13472 = vperm.xlu1 %13264, %v13902_v52   ;;  %v14019_v51 = vmul.f32 %v13300_v2, %v13994_v50  ;;  %v895_v52 = vmul.f32 %v13299_v5, %v13994_v50 }
  0x8c   : > { %13467 = vperm.xlu0 %13253, %v13919_v56  }
  0x8d   : > { %v13267_v25 = vpop.permute.xlu1 %13266  ;;  %v13313_v26 = vpop.permute.xlu2 %13312 }
  0x8e   : > { %v13269_v32 = vunpack.i.h.bf16 %v13267_v25  ;;  %v13268_v36 = vunpack.i.l.bf16 %v13267_v25  ;;  %v13256_v41 = vpop.permute.xlu0 %13255  ;;  %v13315_v62 = vunpack.i.h.bf16 %v13313_v26  ;;  %v13314_v63 = vunpack.i.l.bf16 %v13313_v26 }
  0x8f   : > { %v13258_v45 = vunpack.i.h.bf16 %v13256_v41  ;;  %v13257_v61 = vunpack.i.l.bf16 %v13256_v41 }
  0x90   : > { %v14044_v59 = vmul.f32 %v13269_v32, %v13957_v21  ;;  %v14047_v2 = vmul.f32 %v13269_v32, %v13959_v22  ;;  %v14050_v5 = vmul.f32 %v13268_v36, %v13957_v21  ;;  %v14053_v60 = vmul.f32 %v13268_v36, %v13959_v22 }
  0x91   : > { %v14056_v25 = vmul.f32 %v13258_v45, %v13957_v21  ;;  %v14059_v57 = vmul.f32 %v13258_v45, %v13959_v22  ;;  %v14062_v26 = vmul.f32 %v13257_v61, %v13957_v21  ;;  %v14065_v41 = vmul.f32 %v13257_v61, %v13959_v22 }
  0x92   : > { %19209 = vst [vmem:[#allocation14_spill] sm:$0xff] %v14044_v59  ;;  %v19019_v32 = vrot.slane %v14044_v59, 1  ;;  %v19022_v12 = vrot.slane %v14047_v2, 2  ;;  %v19035_v1 = vrot.slane %v14050_v5, 1  ;;  %v19032_v36 = vrot.slane %v14053_v60, 2 }
  0x93   : > { %19210 = vst [vmem:[#allocation15_spill] sm:$0xff] %v14047_v2  ;;  %v19031_v18 = vrot.slane %v14056_v25, 1  ;;  %v19028_v45 = vrot.slane %v14062_v26, 1  ;;  %13487 = vperm.xlu1 %13264, %v13848_v24   ;;  %13492 = vperm.xlu2 %13275, %v13952_v20   ;;  %v14079_v61 = vsel %vm1475_vm1, %v19027_v17, %v1541_v58  ;;  %v14092_v24 = vmul.f32 %v13315_v62, %v13957_v21 }
  0x94   : > { %19211 = vst [vmem:[#allocation16_spill] sm:$0xff] %v14062_v26  ;;  %v1286_v9 = vsel %vm1247_vm0, %v19035_v1, %v19019_v32  ;;  %v1514_v39 = vsel %vm1475_vm1, %v19032_v36, %v19022_v12  ;;  %v14095_v20 = vmul.f32 %v13315_v62, %v13959_v22  ;;  %13482 = vperm.xlu0 %13253, %v13839_v16  }
  0x95   : > { %19212 = vst [vmem:[#allocation17_spill] sm:$0xff] %v14065_v41  ;;  %v1375_v58 = vadd.f32 %v1286_v9, %v895_v52  ;;  %v14100_v10 = vmul.f32 %v13314_v63, %v13957_v21  ;;  %v14103_v32 = vmul.f32 %v13314_v63, %v13959_v22  ;;  %v13272_v0 = vpop.permute.xlu1 %13271  ;;  %v13328_v35 = vpop.permute.xlu2 %13327  ;;  %v14111_v16 = vsel %vm1247_vm0, %v19028_v45, %v19031_v18 }
  0x96   : > { %19213 = vst [vmem:[#allocation18_spill] sm:$0xff] %v14092_v24  ;;  %v13274_v38 = vunpack.i.h.bf16 %v13272_v0  ;;  %v13273_v7 = vunpack.i.l.bf16 %v13272_v0  ;;  %v13261_v34 = vpop.permute.xlu0 %13260  ;;  %v13330_v45 = vunpack.i.h.bf16 %v13328_v35  ;;  %v13329_v59 = vunpack.i.l.bf16 %v13328_v35 }
  0x97   : > { %19214 = vst [vmem:[#allocation19_spill] sm:$0xff] %v14095_v20  ;;  %v14113_v9 = vadd.f32 %v1514_v39, %v1375_v58  ;;  %v13263_v63 = vunpack.i.h.bf16 %v13261_v34  ;;  %v13262_v52 = vunpack.i.l.bf16 %v13261_v34 }
  0x98   : > { %19215 = vst [vmem:[#allocation20_spill] sm:$0xff] %v14100_v10  ;;  %v14118_v29 = vmul.f32 %v13274_v38, %v13957_v21  ;;  %v14121_v0 = vmul.f32 %v13274_v38, %v13959_v22  ;;  %v14124_v12 = vmul.f32 %v13273_v7, %v13957_v21  ;;  %v14127_v17 = vmul.f32 %v13273_v7, %v13959_v22 }
  0x99   : > { %19216 = vst [vmem:[#allocation21_spill] sm:$0xff] %v14103_v32  ;;  %v1190_v39 = vmul.f32 %v13263_v63, %v13957_v21  ;;  %v1418_v58 = vmul.f32 %v13263_v63, %v13959_v22  ;;  %v1189_v55 = vmul.f32 %v13262_v52, %v13957_v21  ;;  %v14138_v18 = vmul.f32 %v13262_v52, %v13959_v22 }
  0x9a   : > { %19217 = vst [vmem:[#allocation22_spill] sm:$0xff] %v14113_v9  ;;  %v19034_v62 = vrot.slane %v14118_v29, 1  ;;  %v19041_v8 = vrot.slane %v14121_v0, 2  ;;  %v19033_v38 = vrot.slane %v14124_v12, 1  ;;  %v19040_v28 = vrot.slane %v14127_v17, 2 }
  0x9b   : > { %19218 = vst [vmem:[#allocation23_spill] sm:$0xff] %v14127_v17  ;;  %v1281_v7 = vrot.slane %v1190_v39, 1  ;;  %13502 = vperm.xlu1 %13264, %v14026_v30   ;;  %13507 = vperm.xlu2 %13275, %v13891_v40   ;;  %v1509_v63 = vrot.slane %v1418_v58, 2  ;;  %v14148_v36 = vmul.f32 %v13330_v45, %v14012_v19  ;;  %v14151_v39 = vmul.f32 %v13330_v45, %v14014_v13 }
  0x9c   : > { %v1310_v34 = vsel %vm1247_vm0, %v19033_v38, %v19034_v62  ;;  %13497 = vperm.xlu0 %13253, %v13919_v56   ;;  %v1538_v40 = vsel %vm1475_vm1, %v19040_v28, %v19041_v8  ;;  %v1279_v54 = vrot.slane %v1189_v55, 1  ;;  %v14161_v38 = vmul.f32 %v13330_v45, %v14016_v23 }
  0x9d   : > { %19219 = vst [vmem:[#allocation24_spill] sm:$0xff] %v14148_v36  ;;  %v1387_v52 = vadd.f32 %v1310_v34, %v14019_v51  ;;  %v13343_v58 = vpop.permute.xlu2 %13342  ;;  %v13293_v62 = vpop.permute.xlu1 %13292  ;;  %v1507_v1 = vrot.slane %v14138_v18, 2  ;;  %v14170_v55 = vmul.f32 %v13329_v59, %v14012_v19  ;;  %v14173_v45 = vmul.f32 %v13329_v59, %v14014_v13 }
  0x9e   : > { %19220 = vst [vmem:[#allocation25_spill] sm:$0xff] %v14151_v39  ;;  %v13345_v56 = vunpack.i.h.bf16 %v13343_v58  ;;  %v13344_v42 = vunpack.i.l.bf16 %v13343_v58  ;;  %v14176_v28 = vmul.f32 %v13329_v59, %v14016_v23  ;;  %v1282_v34 = vsel %vm1247_vm0, %v1279_v54, %v1281_v7  ;;  %v13288_v51 = vpop.permute.xlu0 %13287 }
  0x9f   : > { %19221 = vst [vmem:[#allocation26_spill] sm:$0xff] %v14161_v38  ;;  %v14165_v49 = vadd.f32 %v1538_v40, %v1387_v52  ;;  %v19050_v59 = vrot.slane %v14173_v45, 3  ;;  %v19225_v8 = vrot.slane %v14151_v39, 3  ;;  %v19226_v30 = vrot.slane %v14050_v5, 1 }
  0xa0   : > { %v14179_v18 = vmul.f32 %v13345_v56, %v14012_v19  ;;  %v14182_v35 = vmul.f32 %v13345_v56, %v14014_v13  ;;  %v14185_v52 = vmul.f32 %v13345_v56, %v14016_v23  ;;  %v14188_v40 = vmul.f32 %v13344_v42, %v14012_v19 }
  0xa1   : > { %19222 = vst [vmem:[#allocation27_spill] sm:$0xff] %v14165_v49  ;;  %v14191_v58 = vmul.f32 %v13344_v42, %v14014_v13  ;;  %v2217_v2 = vsel %vm2182_vm2, %v19050_v59, %v19225_v8  ;;  %v14209_v10 = vmul.f32 %v13344_v42, %v14016_v23  ;;  %v1284_v56 = vsel %vm1247_vm0, %v1281_v7, %v19226_v30  ;;  %v949_v7 = vld [vmem:[%s13825_s23 + $0x90] sm:$0x1] }
  0xa2   : > { %19223 = vst [vmem:[#allocation28_spill] sm:$0xff] %v14182_v35  ;;  %v19227_v32 = vrot.slane %v14161_v38, 4  ;;  %v19229_v8 = vrot.slane %v14182_v35, 3  ;;  %v1510_v5 = vsel %vm1475_vm1, %v1507_v1, %v1509_v63  ;;  %v19231_v30 = vrot.slane %v14053_v60, 2 }
  0xa3   : > { %19224 = vst [vmem:[#allocation29_spill] sm:$0xff] %v14191_v58  ;;  %13517 = vperm.xlu1 %13264, %v13927_v3   ;;  %v19228_v3 = vrot.slane %v14176_v28, 4  ;;  %v19230_v59 = vrot.slane %v14191_v58, 3  ;;  %v13295_v9 = vunpack.i.h.bf16 %v13293_v62  ;;  %v19235_v60 = vrot.slane %v14059_v57, 2 }
  0xa4   : > { %13512 = vperm.xlu0 %13253, %v13929_v4   ;;  %v1512_v4 = vsel %vm1475_vm1, %v1509_v63, %v19231_v30  ;;  %v19236_v63 = vrot.slane %v14065_v41, 2  ;;  %v13290_v11 = vunpack.i.h.bf16 %v13288_v51  ;;  %v13289_v38 = vunpack.i.l.bf16 %v13288_v51 }
  0xa5   : > { %v14220_v20 = vsel %vm2410_vm3, %v19228_v3, %v19227_v32  ;;  %v14227_v42 = vsel %vm2182_vm2, %v19230_v59, %v19229_v8  ;;  %v13358_v26 = vpop.permute.xlu2 %13357  ;;  %v13308_v24 = vpop.permute.xlu1 %13307  ;;  %v19232_v32 = vrot.slane %v14148_v36, 2  ;;  %v19233_v3 = vrot.slane %v14170_v55, 2 }
  0xa6   : > { %v13294_v59 = vunpack.i.l.bf16 %v13293_v62  ;;  %v19234_v8 = vrot.slane %v14056_v25, 1  ;;  %v1506_v30 = vsel %vm1475_vm1, %v19236_v63, %v19235_v60  ;;  %v894_v36 = vmul.f32 %v13295_v9, %v13994_v50 }
  0xa7   : > { %v1989_v35 = vsel %vm1475_vm1, %v19233_v3, %v19232_v32  ;;  %v19237_v32 = vmov %v19235_v60  ;;  %v986_v3 = vunpack.c.l.bf16 %v949_v7  ;;  %v892_v25 = vmul.f32 %v13290_v11, %v13994_v50 }
  0xa8   : > { %v1280_v39 = vsel %vm1247_vm0, %v19234_v8, %v1279_v54  ;;  %v893_v49 = vmul.f32 %v13294_v59, %v13994_v50  ;;  %v1508_v62 = vsel %vm1475_vm1, %v19237_v32, %v1507_v1  ;;  %v891_v54 = vmul.f32 %v13289_v38, %v13994_v50 }
  0xa9   : > { %v13360_v8 = vunpack.i.h.bf16 %v13358_v26  ;;  %v13359_v58 = vunpack.i.l.bf16 %v13358_v26  ;;  %v1374_v41 = vadd.f32 %v1284_v56, %v894_v36  ;;  %v19238_v60 = vunpack.c.l.bf16 %v13855_v27  ;;  %v13303_v56 = vpop.permute.xlu0 %13302 }
  0xaa   : > { %v1373_v17 = vadd.f32 %v1282_v34, %v893_v49  ;;  %v13310_v63 = vunpack.i.h.bf16 %v13308_v24  ;;  %v19239_v9 = vrot.slane %v14185_v52, 4  ;;  %v19240_v59 = vrot.slane %v14209_v10, 4 }
  0xab   : > { %v13521_v51 = vpack.i.bf16 %v19238_v60, %v986_v3  ;;  %v1372_v1 = vadd.f32 %v1280_v39, %v892_v25  ;;  %v1371_v11 = vadd.f32 %v14111_v16, %v891_v54  ;;  %v14266_v38 = vmul.f32 %v13360_v8, %v13994_v50 }
  0xac   : > { %v14262_v57 = vsel %vm2410_vm3, %v19240_v59, %v19239_v9  ;;  %v14268_v26 = vadd.f32 %v1512_v4, %v1374_v41  ;;  %v1601_v49 = vadd.f32 %v1510_v5, %v1373_v17  ;;  %v911_v36 = vmul.f32 %v13310_v63, %v13994_v50 }
  0xad   : > { %13522 = vperm.xlu2 %13275, %v13521_v51   ;;  %v13309_v34 = vunpack.i.l.bf16 %v13308_v24  ;;  %v14271_v7 = vadd.f32 %v1508_v62, %v1372_v1  ;;  %v14274_v32 = vmul.f32 %v13359_v58, %v13994_v50  ;;  %v19241_v39 = vrot.slane %v13986_v47, 1  ;;  %v13373_v25 = vpop.permute.xlu2 %13372 }
  0xae   : > { %v19242_v16 = vrot.slane %v14118_v29, 1  ;;  %v19243_v41 = vrot.slane %v13989_v48, 2  ;;  %v19244_v17 = vrot.slane %v14121_v0, 2  ;;  %v2080_v4 = vadd.f32 %v1989_v35, %v1601_v49  ;;  %v13323_v35 = vpop.permute.xlu1 %13322 }
  0xaf   : > { %v14286_v24 = vadd.f32 %v1506_v30, %v1371_v11  ;;  %v1391_v62 = vadd.f32 %v14031_v31, %v911_v36  ;;  %v910_v58 = vmul.f32 %v13309_v34, %v13994_v50  ;;  %v13305_v54 = vunpack.i.h.bf16 %v13303_v56 }
  0xb0   : > { %v1312_v3 = vsel %vm1247_vm0, %v19242_v16, %v19241_v39  ;;  %v1540_v5 = vsel %vm1475_vm1, %v19244_v17, %v19243_v41  ;;  %v13304_v47 = vunpack.i.l.bf16 %v13303_v56  ;;  %v19245_v29 = vunpack.c.h.bf16 %v13855_v27 }
  0xb1   : > { %v19246_v8 = vunpack.c.l.bf16 %v13868_v33  ;;  %v19247_v48 = vunpack.c.h.bf16 %v13983_v46  ;;  %v19248_v0 = vunpack.c.l.bf16 %v13880_v37  ;;  %v2308_v30 = vadd.f32 %v2217_v2, %v2080_v4 }
  0xb2   : > { %v14299_v63 = vadd.f32 %v14036_v43, %v1391_v62  ;;  %v1390_v31 = vadd.f32 %v14005_v14, %v910_v58  ;;  %v19249_v9 = vunpack.c.h.bf16 %v13868_v33  ;;  %v19250_v59 = vunpack.c.l.bf16 %v13983_v46 }
  0xb3   : > { %v13526_v60 = vpack.i.bf16 %v19246_v8, %v19245_v29  ;;  %v13536_v51 = vpack.i.bf16 %v19248_v0, %v19247_v48  ;;  %v909_v1 = vmul.f32 %v13305_v54, %v13994_v50  ;;  %v908_v11 = vmul.f32 %v13304_v47, %v13994_v50 }
  0xb4   : > { %v13531_v27 = vpack.i.bf16 %v19250_v59, %v19249_v9  ;;  %v13375_v49 = vunpack.i.h.bf16 %v13373_v25  ;;  %v13374_v36 = vunpack.i.l.bf16 %v13373_v25  ;;  %v14309_v34 = vadd.f32 %v14008_v15, %v1390_v31 }
  0xb5   : > { %13527 = vperm.xlu0 %13253, %v13526_v60   ;;  %v19251_v43 = vrot.slane %v14179_v18, 2  ;;  %v19252_v2 = vrot.slane %v14188_v40, 2  ;;  %v13325_v33 = vunpack.i.h.bf16 %v13323_v35  ;;  %v13324_v46 = vunpack.i.l.bf16 %v13323_v35  ;;  %13537 = vperm.xlu2 %13275, %v13536_v51   ;;  %v13318_v51 = vpop.permute.xlu0 %13317 }
  0xb6   : > { %13532 = vperm.xlu1 %13264, %v13531_v27   ;;  %v1389_v56 = vadd.f32 %v14041_v44, %v909_v1  ;;  %v1388_v39 = vadd.f32 %v1312_v3, %v908_v11  ;;  %v14318_v16 = vmul.f32 %v13375_v49, %v14012_v19  ;;  %v2121_v41 = vmul.f32 %v13375_v49, %v14014_v13 }
  0xb7   : > { %v2021_v14 = vsel %vm1475_vm1, %v19252_v2, %v19251_v43  ;;  %v2349_v15 = vmul.f32 %v13375_v49, %v14016_v23  ;;  %v14323_v17 = vmul.f32 %v13374_v36, %v14012_v19  ;;  %v14326_v4 = vmul.f32 %v13374_v36, %v14014_v13 }
  0xb8   : > { %v14329_v62 = vmul.f32 %v13374_v36, %v14016_v23  ;;  %v14332_v44 = vadd.f32 %v14220_v20, %v2308_v30  ;;  %v1617_v3 = vadd.f32 %v14079_v61, %v1389_v56  ;;  %v14335_v58 = vadd.f32 %v1540_v5, %v1388_v39  ;;  %v14371_v39 = vld [vmem:[%s13825_s23 + $0x8] sm:$0xff]  }
  0xb9   : > { %v2208_v25 = vrot.slane %v2121_v41, 3  ;;  %v2436_v47 = vrot.slane %v2349_v15, 4  ;;  %v19062_v29 = vrot.slane %v14326_v4, 3  ;;  %v1896_v48 = vmul.f32 %v13325_v33, %v14012_v19 }
  0xba   : > { %v19061_v8 = vrot.slane %v14329_v62, 4  ;;  %v2096_v60 = vadd.f32 %v2021_v14, %v1617_v3  ;;  %v2123_v0 = vmul.f32 %v13325_v33, %v14014_v13  ;;  %v2351_v20 = vmul.f32 %v13325_v33, %v14016_v23 }
  0xbb   : > { %v14347_v5 = vsel %vm2182_vm2, %v19062_v29, %v2208_v25  ;;  %v14350_v35 = vmul.f32 %v13324_v46, %v14012_v19  ;;  %v2122_v30 = vmul.f32 %v13324_v46, %v14014_v13  ;;  %v1984_v9 = vrot.slane %v1896_v48, 2 }
  0xbc   : > { %v2324_v31 = vadd.f32 %v14227_v42, %v2096_v60  ;;  %v2212_v59 = vrot.slane %v2123_v0, 3  ;;  %v2440_v27 = vrot.slane %v2351_v20, 4  ;;  %v2350_v49 = vmul.f32 %v13324_v46, %v14016_v23 }
  0xbd   : > { %v19069_v1 = vrot.slane %v14350_v35, 2  ;;  %v2210_v11 = vrot.slane %v2122_v30, 3  ;;  %v13320_v36 = vunpack.i.h.bf16 %v13318_v51  ;;  %v14362_v2 = vsel %vm2410_vm3, %v19061_v8, %v2436_v47 }
  0xbe   : > { %v14357_v43 = vadd.f32 %v14262_v57, %v2324_v31  ;;  %v19253_v14 = vrot.slane %v14170_v55, 2  ;;  %v19254_v33 = vrot.slane %v14173_v45, 3  ;;  %v19255_v46 = vrot.slane %v14176_v28, 4 }
  0xbf   : > { %v1985_v41 = vsel %vm1475_vm1, %v19069_v1, %v1984_v9  ;;  %v2213_v55 = vsel %vm2182_vm2, %v2210_v11, %v2212_v59  ;;  %v2438_v60 = vrot.slane %v2350_v49, 4  ;;  %v1202_v45 = vmul.f32 %v13320_v36, %v13957_v21 }
  0xc0   : > { %v1987_v42 = vsel %vm1475_vm1, %v1984_v9, %v19253_v14  ;;  %v2215_v56 = vsel %vm2182_vm2, %v2212_v59, %v19254_v33  ;;  %v2443_v57 = vsel %vm2410_vm3, %v2440_v27, %v19255_v46  ;;  %v2078_v3 = vadd.f32 %v1985_v41, %v14286_v24 }
  0xc1   : > { %v2079_v15 = vadd.f32 %v1987_v42, %v14271_v7  ;;  %v1430_v48 = vmul.f32 %v13320_v36, %v13959_v22  ;;  %v13319_v20 = vunpack.i.l.bf16 %v13318_v51  ;;  %v19065_v28 = vunpack.c.l.bf16 %v14371_v39  ;;  %v612_v36 = vld [vmem:[%s19205_s3 + $0x6] sm:$0x1] }
  0xc2   : > { %v19256_v30 = vunpack.c.h.bf16 %v13935_v6  ;;  %v19257_v31 = vunpack.c.l.bf16 %v13908_v53  ;;  %v14390_v7 = vsel %vm2182_vm2, %v2208_v25, %v2210_v11  ;;  %v2306_v59 = vadd.f32 %v2213_v55, %v2078_v3  ;;  %v613_v25 = vld [vmem:[%s19205_s3 + $0x7] sm:$0x1]  ;;  %v19261_v3 = vld [vmem:[#allocation23_spill] sm:$0xff] }
  0xc3   : > { %v2307_v0 = vadd.f32 %v2215_v56, %v2079_v15  ;;  %v14393_v24 = vsel %vm2410_vm3, %v2436_v47, %v2438_v60  ;;  %v1305_v49 = vrot.slane %v1202_v45, 1  ;;  %v2441_v51 = vsel %vm2410_vm3, %v2438_v60, %v2440_v27  ;;  %v614_v47 = vld [vmem:[%s19205_s3 + $0x8] sm:$0x1] }
  0xc4   : > { %v13551_v9 = vpack.i.bf16 %v19257_v31, %v19256_v30  ;;  %v1533_v14 = vrot.slane %v1430_v48, 2  ;;  %v14400_v42 = vmul.f32 %v13319_v20, %v13957_v21  ;;  %v14403_v33 = vmul.f32 %v13319_v20, %v13959_v22  ;;  %v13388_v31 = vpop.permute.xlu2 %13387 }
  0xc5   : > { %v14411_v11 = vadd.f32 %v2443_v57, %v2307_v0  ;;  %v19259_v27 = vrot.slane %v14124_v12, 1  ;;  %v19260_v46 = vunpack.c.h.bf16 %v13880_v37  ;;  %v19066_v15 = vunpack.c.h.bf16 %v14371_v39 }
  0xc6   : > { %13552 = vperm.xlu2 %13275, %v13551_v9   ;;  %v19262_v60 = vrot.slane %v19261_v3, 2  ;;  %v19064_v57 = vrot.slane %v14400_v42, 1  ;;  %v19063_v48 = vrot.slane %v14403_v33, 2  ;;  %v19263_v37 = vunpack.c.l.bf16 %v13935_v6 }
  0xc7   : > { %19258 = vst [vmem:[#allocation30_spill] sm:$0xff] %v14411_v11  ;;  %v1308_v56 = vsel %vm1247_vm0, %v1305_v49, %v19259_v27  ;;  %v13541_v41 = vpack.i.bf16 %v19065_v28, %v19260_v46  ;;  %v621_v0 = vunpack.c.l.bf16 %v612_v36  ;;  %v622_v20 = vunpack.c.l.bf16 %v613_v25  ;;  %v13338_v46 = vpop.permute.xlu1 %13337 }
  0xc8   : > { %v1386_v55 = vadd.f32 %v1308_v56, %v14266_v38  ;;  %v1536_v45 = vsel %vm1475_vm1, %v1533_v14, %v19262_v60  ;;  %v13546_v12 = vpack.i.bf16 %v19263_v37, %v19066_v15  ;;  %v623_v30 = vunpack.c.l.bf16 %v614_v47 }
  0xc9   : > { %13542 = vperm.xlu0 %13253, %v13541_v41   ;;  %v14431_v9 = vadd.f32 %v2441_v51, %v2306_v59  ;;  %v1306_v27 = vsel %vm1247_vm0, %v19064_v57, %v1305_v49  ;;  %v1534_v56 = vsel %vm1475_vm1, %v19063_v48, %v1533_v14  ;;  %v14441_v41 = vpop.permute.xlu0 %13332  ;;  %v14444_v36 = vperm.slane %v621_v0, 0 }
  0xca   : > { %v14433_v38 = vadd.f32 %v1536_v45, %v1386_v55  ;;  %v1385_v6 = vadd.f32 %v1306_v27, %v14274_v32  ;;  %13547 = vperm.xlu1 %13264, %v13546_v12   ;;  %v14446_v59 = vperm.slane %v622_v20, 0  ;;  %v14448_v51 = vperm.slane %v623_v30, 0 }
  0xcb   : > { %19264 = vst [vmem:[#allocation23_spill] sm:$0xff] %v14431_v9  ;;  %v13390_v25 = vunpack.i.h.bf16 %v13388_v31  ;;  %v13389_v49 = vunpack.i.l.bf16 %v13388_v31  ;;  %v13340_v55 = vunpack.i.h.bf16 %v13338_v46  ;;  %v13339_v14 = vunpack.i.l.bf16 %v13338_v46 }
  0xcc   : > { %v14450_v47 = vadd.f32 %v1534_v56, %v1385_v6  ;;  %v13335_v3 = vunpack.i.h.bf16 %v14441_v41 }
  0xcd   : > { %v14454_v60 = vmul.f32 %v13390_v25, %v14444_v36  ;;  %v14457_v32 = vmul.f32 %v13390_v25, %v14446_v59  ;;  %v14460_v45 = vmul.f32 %v13390_v25, %v14448_v51  ;;  %v14463_v37 = vmul.f32 %v13389_v49, %v14444_v36 }
  0xce   : > { %v14466_v12 = vmul.f32 %v13389_v49, %v14446_v59  ;;  %v14469_v0 = vmul.f32 %v13389_v49, %v14448_v51  ;;  %v1912_v20 = vmul.f32 %v13340_v55, %v14012_v19  ;;  %v2139_v30 = vmul.f32 %v13340_v55, %v14014_v13 }
  0xcf   : > { %19265 = vst [vmem:[#allocation31_spill] sm:$0xff] %v14454_v60  ;;  %v19067_v31 = vrot.slane %v14454_v60, 4  ;;  %v19070_v27 = vrot.slane %v14457_v32, 5  ;;  %v19072_v56 = vrot.slane %v14460_v45, 6  ;;  %v19068_v46 = vrot.slane %v14463_v37, 4 }
  0xd0   : > { %19266 = vst [vmem:[#allocation32_spill] sm:$0xff] %v14457_v32  ;;  %v19071_v6 = vrot.slane %v14466_v12, 5  ;;  %v19073_v25 = vrot.slane %v14469_v0, 6  ;;  %v2016_v8 = vrot.slane %v1912_v20, 2  ;;  %v2244_v29 = vrot.slane %v2139_v30, 3 }
  0xd1   : > { %19267 = vst [vmem:[#allocation33_spill] sm:$0xff] %v14460_v45  ;;  %v2924_v49 = vsel %vm2410_vm3, %v19068_v46, %v19067_v31  ;;  %v2367_v48 = vmul.f32 %v13340_v55, %v14016_v23  ;;  %v14486_v57 = vmul.f32 %v13339_v14, %v14012_v19  ;;  %v14489_v28 = vmul.f32 %v13339_v14, %v14014_v13  ;;  %v19271_v46 = vld [vmem:[#allocation29_spill] sm:$0xff] }
  0xd2   : > { %19268 = vst [vmem:[#allocation34_spill] sm:$0xff] %v14466_v12  ;;  %v3015_v15 = vadd.f32 %v2924_v49, %v14332_v44  ;;  %v3152_v20 = vsel %vm3117_vm4, %v19071_v6, %v19070_v27  ;;  %v3380_v55 = vsel %vm3345_vm5, %v19073_v25, %v19072_v56  ;;  %v19270_v30 = vrot.slane %v14188_v40, 2  ;;  %v14513_v6 = vld [vmem:[%s19273_s12] ss:$0 sm:$0xff] }
  0xd3   : > { %19269 = vst [vmem:[#allocation35_spill] sm:$0xff] %v14469_v0  ;;  %v19272_v1 = vrot.slane %v19271_v46, 3  ;;  %v2472_v49 = vrot.slane %v2367_v48, 4  ;;  %v19076_v61 = vrot.slane %v14486_v57, 2  ;;  %v19075_v40 = vrot.slane %v14489_v28, 3 }
  0xd4   : > { %v2019_v31 = vsel %vm1475_vm1, %v2016_v8, %v19270_v30  ;;  %v3243_v56 = vadd.f32 %v3152_v20, %v3015_v15  ;;  %v14517_v30 = vmul.f32 %v13339_v14, %v14016_v23  ;;  %v14520_v46 = vmul.f32 %v13335_v3, %v14012_v19  ;;  %v19277_v14 = vld [vmem:[#allocation27_spill] sm:$0xff] }
  0xd5   : > { %v2247_v44 = vsel %vm2182_vm2, %v2244_v29, %v19272_v1  ;;  %v2095_v27 = vadd.f32 %v2019_v31, %v14335_v58  ;;  %v19275_v1 = vrot.slane %v14209_v10, 4  ;;  %v2017_v58 = vsel %vm1475_vm1, %v19076_v61, %v2016_v8  ;;  %v13403_v61 = vpop.permute.xlu2 %13402 }
  0xd6   : > { %19274 = vst [vmem:[#allocation29_spill] sm:$0xff] %v14520_v46  ;;  %v14529_v15 = vmul.f32 %v13335_v3, %v14014_v13  ;;  %v3471_v20 = vadd.f32 %v3380_v55, %v3243_v56  ;;  %v2094_v25 = vadd.f32 %v2017_v58, %v19277_v14  ;;  %v2245_v54 = vsel %vm2182_vm2, %v19075_v40, %v2244_v29  ;;  %v14550_v14 = vld [vmem:[%s13825_s23 + $0x68] sm:$0xff]  }
  0xd7   : > { %v2475_v48 = vsel %vm2410_vm3, %v2472_v49, %v19275_v1  ;;  %v2323_v31 = vadd.f32 %v2247_v44, %v2095_v27  ;;  %v19077_v10 = vrot.slane %v14517_v30, 4  ;;  %v13217_v1 = vld [vmem:[%s13825_s23 + $0x28] sm:$0xff]   ;;  %v14542_v44 = vmul.f32 %v13335_v3, %v14016_v23 }
  0xd8   : > { %19276 = vst [vmem:[#allocation36_spill] sm:$0xff] %v14529_v15  ;;  %v3511_v56 = vadd.f32 %v14513_v6, %v3471_v20  ;;  %v2322_v55 = vadd.f32 %v2245_v54, %v2094_v25  ;;  %v13334_v29 = vunpack.i.l.bf16 %v14441_v41  ;;  %v13083_v40 = vunpack.c.h.bf16 %v13217_v1  ;;  %v13348_v25 = vpop.permute.xlu0 %13347  ;;  %v19282_v41 = vld [vmem:[#allocation10_spill] sm:$0xff] }
  0xd9   : > { %v14537_v45 = vadd.f32 %v2475_v48, %v2323_v31  ;;  %19279 = vst [vmem:[#allocation37_spill] sm:$0xff] %v14542_v44  ;;  %v2473_v58 = vsel %vm2410_vm3, %v19077_v10, %v2472_v49  ;;  %v1657_v48 = vld [vmem:[%s13825_s23 + $0x98] sm:$0x1]  ;;  %v19281_v49 = vunpack.c.h.bf16 %v13908_v53  ;;  %v19283_v10 = vunpack.c.h.bf16 %v19282_v41 }
  0xda   : > { %v3547_v27 = vmax.f32 %v3511_v56, 0.0  ;;  %v14554_v8 = vadd.f32 %v2473_v58, %v2322_v55  ;;  %v1899_v3 = vmul.f32 %v13334_v29, %v14012_v19  ;;  %v2126_v54 = vmul.f32 %v13334_v29, %v14014_v13 }
  0xdb   : > { %19278 = vst [vmem:[#allocation27_spill] sm:$0xff] %v14537_v45  ;;  %v2354_v20 = vmul.f32 %v13334_v29, %v14016_v23  ;;  %v13556_v45 = vpack.i.bf16 %v19283_v10, %v19281_v49  ;;  %v13114_v32 = vunpack.c.l.bf16 %v14550_v14  ;;  %v1694_v31 = vunpack.c.l.bf16 %v1657_v48  ;;  %v19284_v29 = vld [vmem:[#allocation24_spill] sm:$0xff]  ;;  %v19287_v48 = vld [vmem:[#allocation25_spill] sm:$0xff] }
  0xdc   : > { %19280 = vst [vmem:[#allocation38_spill] sm:$0xff] %v14554_v8  ;;  %v1990_v56 = vrot.slane %v1899_v3, 2  ;;  %v2218_v55 = vrot.slane %v2126_v54, 3  ;;  %v13082_v58 = vunpack.c.l.bf16 %v13217_v1  ;;  %v13405_v8 = vunpack.i.h.bf16 %v13403_v61 }
  0xdd   : > { %3584 = vst.msk [vmem:[#allocation2 + $0x80] sm:$0xff] %vm3567_vm6, %v3547_v27  ;;  %v2446_v60 = vrot.slane %v2354_v20, 4  ;;  %13557 = vperm.xlu0 %13253, %v13556_v45   ;;  %v13566_v9 = vpack.i.bf16 %v13114_v32, %v13083_v40  ;;  %v13404_v0 = vunpack.i.l.bf16 %v13403_v61  ;;  %v13350_v12 = vunpack.i.h.bf16 %v13348_v25  ;;  %v19290_v61 = vld [vmem:[#allocation22_spill] sm:$0xff] }
  0xde   : > { %v19285_v11 = vrot.slane %v19284_v29, 2  ;;  %v19286_v10 = vrot.slane %v14520_v46, 2  ;;  %v19288_v41 = vrot.slane %v19287_v48, 3  ;;  %v19289_v1 = vrot.slane %v14529_v15, 3  ;;  %v19291_v40 = vld [vmem:[#allocation26_spill] sm:$0xff]  ;;  %v19311_v46 = vld [vmem:[#allocation21_spill] sm:$0xff] }
  0xdf   : > { %v19292_v54 = vrot.slane %v19291_v40, 4  ;;  %v19293_v20 = vrot.slane %v14542_v44, 4  ;;  %13567 = vperm.xlu2 %13275, %v13566_v9   ;;  %v13561_v29 = vpack.i.bf16 %v13082_v58, %v1694_v31  ;;  %v14589_v48 = vmul.f32 %v13405_v8, %v14446_v59 }
  0xe0   : > { %v1991_v53 = vsel %vm1475_vm1, %v19285_v11, %v1990_v56  ;;  %v1993_v49 = vsel %vm1475_vm1, %v1990_v56, %v19286_v10  ;;  %v2219_v27 = vsel %vm2182_vm2, %v19288_v41, %v2218_v55  ;;  %v2221_v3 = vsel %vm2182_vm2, %v2218_v55, %v19289_v1 }
  0xe1   : > { %v2081_v32 = vadd.f32 %v1991_v53, %v14268_v26  ;;  %v2082_v45 = vadd.f32 %v1993_v49, %v19290_v61  ;;  %v2447_v11 = vsel %vm2410_vm3, %v19292_v54, %v2446_v60  ;;  %v2449_v56 = vsel %vm2410_vm3, %v2446_v60, %v19293_v20  ;;  %19295 = vst [vmem:[#allocation24_spill] sm:$0xff] %v14589_v48  ;;  %v19302_v20 = vld [vmem:[#allocation18_spill] sm:$0xff] }
  0xe2   : > { %v14586_v10 = vmul.f32 %v13405_v8, %v14444_v36  ;;  %v14592_v26 = vmul.f32 %v13405_v8, %v14448_v51  ;;  %v14595_v49 = vmul.f32 %v13404_v0, %v14444_v36  ;;  %v14598_v41 = vmul.f32 %v13404_v0, %v14446_v59  ;;  %13562 = vperm.xlu1 %13264, %v13561_v29   ;;  %v19304_v29 = vld [vmem:[#allocation20_spill] sm:$0xff] }
  0xe3   : > { %v2309_v55 = vadd.f32 %v2219_v27, %v2081_v32  ;;  %v2310_v53 = vadd.f32 %v2221_v3, %v2082_v45  ;;  %v19085_v60 = vrot.slane %v14589_v48, 5  ;;  %v14604_v58 = vmul.f32 %v13404_v0, %v14448_v51  ;;  %v19313_v48 = vld [vmem:[#allocation17_spill] sm:$0xff] }
  0xe4   : > { %19294 = vst [vmem:[#allocation10_spill] sm:$0xff] %v14586_v10  ;;  %v19082_v9 = vrot.slane %v14586_v10, 4  ;;  %v19089_v31 = vrot.slane %v14592_v26, 6  ;;  %v19083_v1 = vrot.slane %v14595_v49, 4  ;;  %v19086_v3 = vrot.slane %v14598_v41, 5 }
  0xe5   : > { %19296 = vst [vmem:[#allocation25_spill] sm:$0xff] %v14592_v26  ;;  %v14606_v8 = vadd.f32 %v2447_v11, %v2309_v55  ;;  %v14608_v27 = vadd.f32 %v2449_v56, %v2310_v53  ;;  %v19090_v32 = vrot.slane %v14604_v58, 6  ;;  %v14614_v61 = vmul.f32 %v13350_v12, %v14012_v19 }
  0xe6   : > { %19297 = vst [vmem:[#allocation22_spill] sm:$0xff] %v14598_v41  ;;  %v14617_v45 = vmul.f32 %v13350_v12, %v14014_v13  ;;  %v14620_v40 = vmul.f32 %v13350_v12, %v14016_v23  ;;  %v2956_v0 = vsel %vm2410_vm3, %v19083_v1, %v19082_v9  ;;  %v3184_v54 = vsel %vm3117_vm4, %v19086_v3, %v19085_v60  ;;  %v13353_v60 = vpop.permute.xlu1 %13352  ;;  %v12933_v41 = vld [vmem:[%s13825_s23] sm:$0xff]  }
  0xe7   : > { %19298 = vst [vmem:[#allocation26_spill] sm:$0xff] %v14604_v58  ;;  %v13349_v11 = vunpack.i.l.bf16 %v13348_v25  ;;  %v19303_v56 = vrot.slane %v19302_v20, 1  ;;  %v19305_v55 = vrot.slane %v19304_v29, 1  ;;  %v3031_v53 = vadd.f32 %v2956_v0, %v14357_v43 }
  0xe8   : > { %19299 = vst [vmem:[#allocation39_spill] sm:$0xff] %v14614_v61  ;;  %v3412_v9 = vsel %vm3345_vm5, %v19090_v32, %v19089_v31  ;;  %v19308_v15 = vrot.slane %v19302_v20, 1  ;;  %v19309_v32 = vld [vmem:[#allocation19_spill] sm:$0xff]  ;;  %v19312_v26 = vrot.slane %v19311_v46, 2  ;;  %v19314_v10 = vrot.slane %v19313_v48, 2 }
  0xe9   : > { %19300 = vst [vmem:[#allocation40_spill] sm:$0xff] %v14617_v45  ;;  %v1274_v12 = vsel %vm1247_vm0, %v19305_v55, %v19303_v56  ;;  %v1915_v3 = vmul.f32 %v13349_v11, %v14012_v19  ;;  %v2142_v56 = vmul.f32 %v13349_v11, %v14014_v13  ;;  %v2370_v43 = vmul.f32 %v13349_v11, %v14016_v23  ;;  %v19306_v55 = vld [vmem:[#allocation16_spill] sm:$0xff] }
  0xea   : > { %19301 = vst [vmem:[#allocation41_spill] sm:$0xff] %v14620_v40  ;;  %v3259_v0 = vadd.f32 %v3184_v54, %v3031_v53  ;;  %v19307_v44 = vrot.slane %v19306_v55, 1  ;;  %v19310_v1 = vrot.slane %v19309_v32, 2  ;;  %v19316_v55 = vrot.slane %v14318_v16, 2 }
  0xeb   : > { %v2022_v11 = vrot.slane %v1915_v3, 2  ;;  %v2250_v54 = vrot.slane %v2142_v56, 3  ;;  %v2478_v53 = vrot.slane %v2370_v43, 4  ;;  %v19317_v20 = vrot.slane %v14323_v17, 2  ;;  %v19322_v43 = vld [vmem:[#allocation28_spill] sm:$0xff] }
  0xec   : > { %v1276_v31 = vsel %vm1247_vm0, %v19308_v15, %v19307_v44  ;;  %v1502_v25 = vsel %vm1475_vm1, %v19312_v26, %v19310_v1  ;;  %v19315_v29 = vmov %v19310_v1  ;;  %v3487_v44 = vadd.f32 %v3412_v9, %v3259_v0 }
  0xed   : > { %v1504_v58 = vsel %vm1475_vm1, %v19315_v29, %v19314_v10  ;;  %v1981_v15 = vsel %vm1475_vm1, %v19317_v20, %v19316_v55  ;;  %v19318_v46 = vrot.slane %v14350_v35, 2  ;;  %v19319_v26 = vmov %v19316_v55 }
  0xee   : > { %v13355_v1 = vunpack.i.h.bf16 %v13353_v60  ;;  %v13354_v32 = vunpack.i.l.bf16 %v13353_v60  ;;  %v19320_v10 = vrot.slane %v14179_v18, 2  ;;  %v19321_v29 = vrot.slane %v14614_v61, 2 }
  0xef   : > { %v1983_v48 = vsel %vm1475_vm1, %v19319_v26, %v19318_v46  ;;  %v19323_v55 = vrot.slane %v19322_v43, 3  ;;  %v19324_v35 = vrot.slane %v14617_v45, 3  ;;  %v3527_v46 = vadd.f32 %v14513_v6, %v3487_v44  ;;  %v13418_v43 = vpop.permute.xlu2 %13417  ;;  %v13363_v45 = vpop.permute.xlu0 %13362 }
  0xf0   : > { %v2023_v3 = vsel %vm1475_vm1, %v19320_v10, %v2022_v11  ;;  %v2025_v56 = vsel %vm1475_vm1, %v2022_v11, %v19321_v29  ;;  %v19325_v0 = vrot.slane %v14185_v52, 4  ;;  %v19326_v11 = vrot.slane %v14620_v40, 4 }
  0xf1   : > { %v2251_v9 = vsel %vm2182_vm2, %v19323_v55, %v2250_v54  ;;  %v2253_v16 = vsel %vm2182_vm2, %v2250_v54, %v19324_v35  ;;  %v2097_v60 = vadd.f32 %v2023_v3, %v14309_v34  ;;  %v2098_v18 = vadd.f32 %v2025_v56, %v14299_v63  ;;  %v13695_v56 = vld [vmem:[%s13825_s23 + $0x48] sm:$0xff]  }
  0xf2   : > { %v2479_v20 = vsel %vm2410_vm3, %v19325_v0, %v2478_v53  ;;  %v2481_v26 = vsel %vm2410_vm3, %v2478_v53, %v19326_v11  ;;  %v890_v10 = vmul.f32 %v13355_v1, %v13994_v50  ;;  %v889_v29 = vmul.f32 %v13354_v32, %v13994_v50 }
  0xf3   : > { %v12934_v54 = vunpack.c.l.bf16 %v12933_v41  ;;  %v3563_v55 = vmax.f32 %v3527_v46, 0.0  ;;  %v2325_v44 = vadd.f32 %v2251_v9, %v2097_v60  ;;  %v2326_v35 = vadd.f32 %v2253_v16, %v2098_v18  ;;  %v13368_v46 = vpop.permute.xlu1 %13367 }
  0xf4   : > { %v12935_v34 = vunpack.c.h.bf16 %v12933_v41  ;;  %v1370_v3 = vadd.f32 %v1276_v31, %v890_v10  ;;  %v1369_v63 = vadd.f32 %v1274_v12, %v889_v29  ;;  %v12899_v52 = vunpack.c.h.bf16 %v13695_v56 }
  0xf5   : > { %v13115_v0 = vunpack.c.h.bf16 %v14550_v14  ;;  %3600 = vst.msk [vmem:[#allocation2 + $0x100] sm:$0xff] %vm3567_vm6, %v3563_v55  ;;  %v14701_v53 = vadd.f32 %v2479_v20, %v2325_v44  ;;  %v14703_v1 = vadd.f32 %v2481_v26, %v2326_v35  ;;  %v13420_v11 = vunpack.i.h.bf16 %v13418_v43  ;;  %v13216_v35 = vld [vmem:[%s13825_s23 + $0x20] sm:$0xff]  }
  0xf6   : > { %v14705_v32 = vpack.i.bf16 %v12935_v34, %v12934_v54  ;;  %v1598_v9 = vadd.f32 %v1504_v58, %v1370_v3  ;;  %v1597_v16 = vadd.f32 %v1502_v25, %v1369_v63  ;;  %v19327_v41 = vunpack.c.h.bf16 %v14371_v39  ;;  %v1393_v34 = vld [vmem:[%s13825_s23] sm:$0xe]  ;;  %v19349_v3 = vld [vmem:[#allocation35_spill] sm:$0xff] }
  0xf7   : > { %v19328_v12 = vunpack.c.l.bf16 %v14371_v39  ;;  %v904_v14 = vmul.f32 %v13420_v11, %v13994_v50  ;;  %v13419_v18 = vunpack.i.l.bf16 %v13418_v43  ;;  %v13365_v20 = vunpack.i.h.bf16 %v13363_v45 }
  0xf8   : > { %v13576_v31 = vpack.i.bf16 %v12899_v52, %v19327_v41  ;;  %13582 = vperm.xlu2 %13275, %v14705_v32   ;;  %v13364_v26 = vunpack.i.l.bf16 %v13363_v45  ;;  %v2077_v10 = vadd.f32 %v1983_v48, %v1598_v9  ;;  %v2076_v29 = vadd.f32 %v1981_v15, %v1597_v16 }
  0xf9   : > { %v13571_v60 = vpack.i.bf16 %v19328_v12, %v13115_v0  ;;  %v13370_v58 = vunpack.i.h.bf16 %v13368_v46  ;;  %v13369_v25 = vunpack.i.l.bf16 %v13368_v46  ;;  %v903_v54 = vmul.f32 %v13419_v18, %v13994_v50  ;;  %v2100_v0 = vld [vmem:[%s13825_s23 + $0x98] sm:$0x3]  ;;  %v13433_v12 = vpop.permute.xlu2 %13432 }
  0xfa   : > { %13577 = vperm.xlu1 %13264, %v13576_v31   ;;  %v14715_v39 = vmul.f32 %v13365_v20, %v13957_v21  ;;  %v14718_v55 = vmul.f32 %v13365_v20, %v13959_v22  ;;  %v14721_v43 = vmul.f32 %v13364_v26, %v13957_v21  ;;  %v2305_v45 = vadd.f32 %v14390_v7, %v2077_v10 }
  0xfb   : > { %13572 = vperm.xlu0 %13253, %v13571_v60   ;;  %v2304_v15 = vadd.f32 %v14347_v5, %v2076_v29  ;;  %v14726_v48 = vmul.f32 %v13364_v26, %v13959_v22  ;;  %v1200_v44 = vmul.f32 %v13370_v58, %v13957_v21  ;;  %v1428_v52 = vmul.f32 %v13370_v58, %v13959_v22  ;;  %v13378_v26 = vpop.permute.xlu0 %13377 }
  0xfc   : > { %v14737_v7 = vadd.f32 %v14393_v24, %v2305_v45  ;;  %v14744_v16 = vmul.f32 %v13369_v25, %v13957_v21  ;;  %v14747_v41 = vmul.f32 %v13369_v25, %v13959_v22  ;;  %v13078_v31 = vunpack.c.l.bf16 %v13216_v35 }
  0xfd   : > { %v14740_v5 = vadd.f32 %v14362_v2, %v2304_v15  ;;  %v1301_v46 = vrot.slane %v1200_v44, 1  ;;  %v1529_v9 = vrot.slane %v1428_v52, 2  ;;  %v19333_v60 = vrot.slane %v14400_v42, 1  ;;  %v19335_v52 = vld [vmem:[#allocation13_spill] sm:$0xff] }
  0xfe   : > { %19329 = vst [vmem:[#allocation18_spill] sm:$0xff] %v14737_v7  ;;  %v13079_v18 = vunpack.c.h.bf16 %v13216_v35  ;;  %v1394_v20 = vunpack.c.l.bf16 %v1393_v34  ;;  %v2101_v2 = vunpack.c.l.bf16 %v2100_v0  ;;  %v19334_v29 = vrot.slane %v14403_v33, 2 }
  0xff   : > { %19330 = vst [vmem:[#allocation16_spill] sm:$0xff] %v14740_v5  ;;  %v1304_v24 = vsel %vm1247_vm0, %v1301_v46, %v19333_v60  ;;  %v19100_v45 = vrot.slane %v14744_v16, 1  ;;  %v19097_v25 = vrot.slane %v14747_v41, 2  ;;  %v13435_v42 = vunpack.i.h.bf16 %v13433_v12 }
 0x100   : > { %19331 = vst [vmem:[#allocation19_spill] sm:$0xff] %v14744_v16  ;;  %v1384_v10 = vadd.f32 %v1304_v24, %v904_v14  ;;  %v1532_v58 = vsel %vm1475_vm1, %v1529_v9, %v19334_v29  ;;  %v13596_v15 = vpack.i.bf16 %v13079_v18, %v13078_v31  ;;  %v13591_v44 = vpack.i.bf16 %v1394_v20, %v2101_v2 }
 0x101   : > { %19332 = vst [vmem:[#allocation17_spill] sm:$0xff] %v14747_v41  ;;  %v13434_v11 = vunpack.i.l.bf16 %v13433_v12  ;;  %v1302_v14 = vsel %vm1247_vm0, %v19100_v45, %v1301_v46  ;;  %v1530_v33 = vsel %vm1475_vm1, %v19097_v25, %v1529_v9  ;;  %v13380_v35 = vunpack.i.h.bf16 %v13378_v26  ;;  %v13448_v61 = vpop.permute.xlu2 %13447 }
 0x102   : > { %v14758_v60 = vadd.f32 %v1532_v58, %v1384_v10  ;;  %v1383_v34 = vadd.f32 %v1302_v14, %v903_v54  ;;  %13597 = vperm.xlu2 %13275, %v13596_v15   ;;  %13592 = vperm.xlu1 %13264, %v13591_v44   ;;  %v14767_v0 = vmul.f32 %v13435_v42, %v14012_v19  ;;  %v13379_v12 = vunpack.i.l.bf16 %v13378_v26 }
 0x103   : > { %13587 = vperm.xlu0 %13253, %v19335_v52   ;;  %v2119_v31 = vmul.f32 %v13435_v42, %v14014_v13  ;;  %v2347_v24 = vmul.f32 %v13435_v42, %v14016_v23  ;;  %v14772_v18 = vmul.f32 %v13434_v11, %v14012_v19  ;;  %v14775_v46 = vmul.f32 %v13434_v11, %v14014_v13 }
 0x104   : > { %v14778_v9 = vmul.f32 %v13434_v11, %v14016_v23  ;;  %v14780_v54 = vadd.f32 %v1530_v33, %v1383_v34  ;;  %v1910_v10 = vmul.f32 %v13380_v35, %v14012_v19  ;;  %v19338_v44 = vrot.slane %v14326_v4, 3  ;;  %v13383_v33 = vpop.permute.xlu1 %13382 }
 0x105   : > { %19336 = vst [vmem:[#allocation28_spill] sm:$0xff] %v14775_v46  ;;  %v2204_v2 = vrot.slane %v2119_v31, 3  ;;  %v2432_v29 = vrot.slane %v2347_v24, 4  ;;  %v19098_v58 = vrot.slane %v14775_v46, 3  ;;  %v2137_v42 = vmul.f32 %v13380_v35, %v14014_v13 }
 0x106   : > { %19337 = vst [vmem:[#allocation13_spill] sm:$0xff] %v14778_v9  ;;  %v19099_v15 = vrot.slane %v14778_v9, 4  ;;  %v2012_v11 = vrot.slane %v1910_v10, 2  ;;  %v2365_v14 = vmul.f32 %v13380_v35, %v14016_v23  ;;  %v19339_v4 = vrot.slane %v14329_v62, 4 }
 0x107   : > { %v14790_v52 = vsel %vm2182_vm2, %v2204_v2, %v19338_v44  ;;  %v14797_v34 = vsel %vm2182_vm2, %v19098_v58, %v2204_v2  ;;  %v14810_v10 = vmul.f32 %v13379_v12, %v14012_v19  ;;  %v19340_v35 = vrot.slane %v14486_v57, 2 }
 0x108   : > { %v14802_v31 = vsel %vm2410_vm3, %v19099_v15, %v2432_v29  ;;  %v14807_v24 = vsel %vm2410_vm3, %v2432_v29, %v19339_v4  ;;  %v2240_v25 = vrot.slane %v2137_v42, 3  ;;  %v2468_v2 = vrot.slane %v2365_v14, 4 }
 0x109   : > { %v2015_v44 = vsel %vm1475_vm1, %v2012_v11, %v19340_v35  ;;  %v14816_v58 = vmul.f32 %v13379_v12, %v14014_v13  ;;  %v19101_v15 = vrot.slane %v14810_v10, 2  ;;  %v14821_v62 = vmul.f32 %v13379_v12, %v14016_v23 }
 0x10a   : > { %v2093_v45 = vadd.f32 %v2015_v44, %v14433_v38  ;;  %v13385_v29 = vunpack.i.h.bf16 %v13383_v33  ;;  %v19341_v4 = vrot.slane %v14489_v28, 3  ;;  %v19342_v35 = vrot.slane %v14517_v30, 4  ;;  %13607 = vperm.xlu1 %13264, %v14705_v32  }
 0x10b   : > { %v19102_v14 = vrot.slane %v14816_v58, 3  ;;  %v13384_v26 = vunpack.i.l.bf16 %v13383_v33  ;;  %v2013_v38 = vsel %vm1475_vm1, %v19101_v15, %v2012_v11  ;;  %v19103_v44 = vrot.slane %v14821_v62, 4 }
 0x10c   : > { %v2243_v57 = vsel %vm2182_vm2, %v2240_v25, %v19341_v4  ;;  %v2471_v42 = vsel %vm2410_vm3, %v2468_v2, %v19342_v35  ;;  %v2831_v28 = vmul.f32 %v13385_v29, %v14444_v36  ;;  %v2092_v4 = vadd.f32 %v2013_v38, %v14450_v47  ;;  %v1621_v35 = vld [vmem:[%s13825_s23 + $0x8] sm:$0xe] }
 0x10d   : > { %v2321_v12 = vadd.f32 %v2243_v57, %v2093_v45  ;;  %v2241_v30 = vsel %vm2182_vm2, %v19102_v14, %v2240_v25  ;;  %v3058_v33 = vmul.f32 %v13385_v29, %v14446_v59  ;;  %v3286_v32 = vmul.f32 %v13385_v29, %v14448_v51  ;;  %v1622_v14 = vld [vmem:[%s13825_s23 + $0xc] sm:$0xf] }
 0x10e   : > { %v2469_v45 = vsel %vm2410_vm3, %v19103_v44, %v2468_v2  ;;  %v2919_v57 = vrot.slane %v2831_v28, 4  ;;  %v14849_v15 = vmul.f32 %v13384_v26, %v14444_v36  ;;  %v2320_v47 = vadd.f32 %v2241_v30, %v2092_v4  ;;  %v19346_v44 = vld [vmem:[#allocation30_spill] sm:$0xff] }
 0x10f   : > { %v14846_v11 = vadd.f32 %v2471_v42, %v2321_v12  ;;  %v3147_v38 = vrot.slane %v3058_v33, 5  ;;  %v3375_v20 = vrot.slane %v3286_v32, 6  ;;  %v14852_v25 = vmul.f32 %v13384_v26, %v14446_v59  ;;  %v13224_v12 = vld [vmem:[%s13825_s23 + $0x60] sm:$0xff]   ;;  %v19347_v30 = vld [vmem:[#allocation34_spill] sm:$0xff] }
 0x110   : > { %v19344_v29 = vrot.slane %v14463_v37, 4  ;;  %v19107_v56 = vrot.slane %v14849_v15, 4  ;;  %v14860_v2 = vmul.f32 %v13384_v26, %v14448_v51  ;;  %v1658_v42 = vunpack.c.l.bf16 %v1621_v35 }
 0x111   : > { %19343 = vst [vmem:[#allocation42_spill] sm:$0xff] %v14852_v25  ;;  %v2548_v28 = vadd.f32 %v2469_v45, %v2320_v47  ;;  %v19348_v33 = vrot.slane %v19347_v30, 5  ;;  %v19350_v40 = vrot.slane %v19349_v3, 6  ;;  %v19113_v26 = vrot.slane %v14852_v25, 5 }
 0x112   : > { %v2922_v63 = vsel %vm2410_vm3, %v2919_v57, %v19344_v29  ;;  %19345 = vst [vmem:[#allocation43_spill] sm:$0xff] %v14860_v2  ;;  %v2920_v29 = vsel %vm2410_vm3, %v19107_v56, %v2919_v57  ;;  %v19111_v35 = vrot.slane %v14860_v2, 6  ;;  %v1659_v45 = vunpack.c.l.bf16 %v1622_v14  ;;  %v19358_v2 = vld [vmem:[#allocation31_spill] sm:$0xff] }
 0x113   : > { %v3014_v4 = vadd.f32 %v2922_v63, %v19346_v44  ;;  %v3150_v32 = vsel %vm3117_vm4, %v3147_v38, %v19348_v33  ;;  %v3378_v37 = vsel %vm3345_vm5, %v3375_v20, %v19350_v40  ;;  %v19351_v63 = vld [vmem:[#allocation23_spill] sm:$0xff]  ;;  %v13110_v30 = vunpack.c.l.bf16 %v13224_v12  ;;  %v13393_v33 = vpop.permute.xlu0 %13392 }
 0x114   : > { %v3013_v44 = vadd.f32 %v2920_v29, %v19351_v63  ;;  %v13111_v9 = vunpack.c.h.bf16 %v13224_v12  ;;  %v3148_v40 = vsel %vm3117_vm4, %v19113_v26, %v3147_v38  ;;  %v3376_v3 = vsel %vm3345_vm5, %v19111_v35, %v3375_v20  ;;  %v2328_v35 = vld [vmem:[%s13825_s23 + $0x8] sm:$0xc]  ;;  %v2556_v26 = vld [vmem:[%s13825_s23 + $0x10] sm:$0xc] }
 0x115   : > { %v3242_v47 = vadd.f32 %v3150_v32, %v3014_v4  ;;  %v13611_v57 = vpack.i.bf16 %v1659_v45, %v1658_v42  ;;  %v13450_v56 = vunpack.i.h.bf16 %v13448_v61  ;;  %v13449_v14 = vunpack.i.l.bf16 %v13448_v61 }
 0x116   : > { %v3241_v41 = vadd.f32 %v3148_v40, %v3013_v44  ;;  %v13601_v16 = vpack.i.bf16 %v13111_v9, %v13110_v30  ;;  %v13395_v38 = vunpack.i.h.bf16 %v13393_v33  ;;  %v19359_v7 = vrot.slane %v19358_v2, 4 }
 0x117   : > { %v3470_v46 = vadd.f32 %v3378_v37, %v3242_v47  ;;  %13612 = vperm.xlu2 %13275, %v13611_v57   ;;  %v14883_v4 = vmul.f32 %v13450_v56, %v14444_v36  ;;  %v14886_v12 = vmul.f32 %v13450_v56, %v14446_v59  ;;  %v14889_v32 = vmul.f32 %v13450_v56, %v14448_v51 }
 0x118   : > { %v3469_v20 = vadd.f32 %v3376_v3, %v3241_v41  ;;  %13602 = vperm.xlu0 %13253, %v13601_v16   ;;  %v14893_v42 = vmul.f32 %v13449_v14, %v14444_v36  ;;  %v14896_v61 = vmul.f32 %v13449_v14, %v14446_v59  ;;  %v14902_v56 = vmul.f32 %v13449_v14, %v14448_v51 }
 0x119   : > { %v3510_v29 = vadd.f32 %v14513_v6, %v3470_v46  ;;  %v19114_v9 = vrot.slane %v14883_v4, 4  ;;  %v19116_v37 = vrot.slane %v14886_v12, 5  ;;  %v19120_v45 = vrot.slane %v14889_v32, 6 }
 0x11a   : > { %19352 = vst [vmem:[#allocation30_spill] sm:$0xff] %v14893_v42  ;;  %v3509_v41 = vadd.f32 %v14513_v6, %v3469_v20  ;;  %v19112_v16 = vrot.slane %v14893_v42, 4  ;;  %v19115_v46 = vrot.slane %v14896_v61, 5  ;;  %v19119_v63 = vrot.slane %v14902_v56, 6  ;;  %v13398_v20 = vpop.permute.xlu1 %13397 }
 0x11b   : > { %19353 = vst [vmem:[#allocation34_spill] sm:$0xff] %v14896_v61  ;;  %v3546_v47 = vmax.f32 %v3510_v29, 0.0  ;;  %v14909_v44 = vmul.f32 %v13395_v38, %v14444_v36  ;;  %v14912_v30 = vmul.f32 %v13395_v38, %v14446_v59  ;;  %v14915_v40 = vmul.f32 %v13395_v38, %v14448_v51 }
 0x11c   : > { %19354 = vst [vmem:[#allocation35_spill] sm:$0xff] %v14902_v56  ;;  %v3545_v3 = vmax.f32 %v3509_v41, 0.0  ;;  %v2948_v57 = vsel %vm2410_vm3, %v19112_v16, %v19114_v9  ;;  %v3176_v14 = vsel %vm3117_vm4, %v19115_v46, %v19116_v37  ;;  %v13394_v29 = vunpack.i.l.bf16 %v13393_v33 }
 0x11d   : > { %19355 = vst [vmem:[#allocation23_spill] sm:$0xff] %v14909_v44  ;;  %v3027_v38 = vadd.f32 %v2948_v57, %v2548_v28  ;;  %v13400_v37 = vunpack.i.h.bf16 %v13398_v20  ;;  %v13399_v56 = vunpack.i.l.bf16 %v13398_v20  ;;  %v2329_v61 = vunpack.c.l.bf16 %v2328_v35 }
 0x11e   : > { %19356 = vst [vmem:[#allocation44_spill] sm:$0xff] %v14912_v30  ;;  %v2834_v33 = vmul.f32 %v13394_v29, %v14444_v36  ;;  %v3061_v46 = vmul.f32 %v13394_v29, %v14446_v59  ;;  %v3289_v28 = vmul.f32 %v13394_v29, %v14448_v51  ;;  %v2593_v42 = vunpack.c.l.bf16 %v2556_v26  ;;  %v19361_v29 = vld [vmem:[#allocation32_spill] sm:$0xff] }
 0x11f   : > { %19357 = vst [vmem:[#allocation45_spill] sm:$0xff] %v14915_v40  ;;  %v3255_v57 = vadd.f32 %v3176_v14, %v3027_v38  ;;  %v2847_v5 = vmul.f32 %v13400_v37, %v14444_v36  ;;  %v3302_v9 = vmul.f32 %v13400_v37, %v14448_v51  ;;  %v19360_v14 = vrot.slane %v14909_v44, 4 }
 0x120   : > { %3583 = vst.msk [vmem:[#allocation2 + $0x78] sm:$0xff] %vm3567_vm6, %v3546_v47  ;;  %v3404_v47 = vsel %vm3345_vm5, %v19119_v63, %v19120_v45  ;;  %v2925_v63 = vrot.slane %v2834_v33, 4  ;;  %v3153_v45 = vrot.slane %v3061_v46, 5  ;;  %v3381_v41 = vrot.slane %v3289_v28, 6 }
 0x121   : > { %3582 = vst.msk [vmem:[#allocation2 + $0x70] sm:$0xff] %vm3567_vm6, %v3545_v3  ;;  %v3483_v16 = vadd.f32 %v3404_v47, %v3255_v57  ;;  %v3074_v3 = vmul.f32 %v13400_v37, %v14446_v59  ;;  %v19362_v46 = vrot.slane %v19361_v29, 5  ;;  %v19363_v20 = vrot.slane %v14912_v30, 5 }
 0x122   : > { %v2926_v25 = vsel %vm2410_vm3, %v19359_v7, %v2925_v63  ;;  %v2928_v35 = vsel %vm2410_vm3, %v2925_v63, %v19360_v14  ;;  %v19364_v7 = vld [vmem:[#allocation33_spill] sm:$0xff]  ;;  %v19366_v63 = vrot.slane %v14915_v40, 6  ;;  %v2951_v14 = vrot.slane %v2847_v5, 4 }
 0x123   : > { %v3154_v26 = vsel %vm3117_vm4, %v19362_v46, %v3153_v45  ;;  %v3156_v38 = vsel %vm3117_vm4, %v3153_v45, %v19363_v20  ;;  %v3523_v47 = vadd.f32 %v14513_v6, %v3483_v16  ;;  %v3016_v37 = vadd.f32 %v2926_v25, %v14606_v8  ;;  %v13215_v20 = vld [vmem:[%s13825_s23 + $0x18] sm:$0xff]   ;;  %v19368_v25 = vld [vmem:[#allocation22_spill] sm:$0xff] }
 0x124   : > { %v3017_v2 = vadd.f32 %v2928_v35, %v14608_v27  ;;  %v19365_v33 = vrot.slane %v19364_v7, 6  ;;  %v3384_v57 = vsel %vm3345_vm5, %v3381_v41, %v19366_v63  ;;  %v3179_v29 = vrot.slane %v3074_v3, 5 }
 0x125   : > { %v3407_v46 = vrot.slane %v3302_v9, 6  ;;  %v3559_v30 = vmax.f32 %v3523_v47, 0.0  ;;  %v3244_v44 = vadd.f32 %v3154_v26, %v3016_v37  ;;  %v2846_v16 = vmul.f32 %v13399_v56, %v14444_v36  ;;  %v19372_v26 = vld [vmem:[#allocation27_spill] sm:$0xff] }
 0x126   : > { %v3382_v28 = vsel %vm3345_vm5, %v19365_v33, %v3381_v41  ;;  %v3245_v45 = vadd.f32 %v3156_v38, %v3017_v2  ;;  %v19367_v8 = vrot.slane %v14595_v49, 4  ;;  %v19369_v35 = vrot.slane %v19368_v25, 5  ;;  %v19370_v33 = vld [vmem:[#allocation26_spill] sm:$0xff] }
 0x127   : > { %v19371_v40 = vrot.slane %v19370_v33, 6  ;;  %v3073_v9 = vmul.f32 %v13399_v56, %v14446_v59  ;;  %3596 = vst.msk [vmem:[#allocation2 + $0xe0] sm:$0xff] %vm3567_vm6, %v3559_v30  ;;  %v3472_v41 = vadd.f32 %v3382_v28, %v3244_v44  ;;  %v2949_v49 = vrot.slane %v2846_v16, 4  ;;  %v2592_v44 = vld [vmem:[%s13825_s23 + $0xa0] sm:$0x3]  ;;  %v13463_v16 = vpop.permute.xlu2 %13462 }
 0x128   : > { %v2954_v27 = vsel %vm2410_vm3, %v2951_v14, %v19367_v8  ;;  %v3182_v7 = vsel %vm3117_vm4, %v3179_v29, %v19369_v35  ;;  %v3473_v3 = vadd.f32 %v3384_v57, %v3245_v45  ;;  %v3301_v37 = vmul.f32 %v13399_v56, %v14448_v51 }
 0x129   : > { %v3410_v5 = vsel %vm3345_vm5, %v3407_v46, %v19371_v40  ;;  %v3030_v38 = vadd.f32 %v2954_v27, %v19372_v26  ;;  %v3177_v47 = vrot.slane %v3073_v9, 5  ;;  %v13626_v2 = vpack.i.bf16 %v2593_v42, %v2329_v61  ;;  %v3035_v61 = vld [vmem:[%s13825_s23 + $0xa0] sm:$0x7] }
 0x12a   : > { %v13074_v63 = vunpack.c.l.bf16 %v13215_v20  ;;  %v3512_v8 = vadd.f32 %v14513_v6, %v3472_v41  ;;  %v3513_v25 = vadd.f32 %v14513_v6, %v3473_v3  ;;  %v19373_v35 = vrot.slane %v14883_v4, 4  ;;  %v19375_v4 = vld [vmem:[#allocation38_spill] sm:$0xff] }
 0x12b   : > { %v3258_v40 = vadd.f32 %v3182_v7, %v3030_v38  ;;  %v2952_v28 = vsel %vm2410_vm3, %v2949_v49, %v2951_v14  ;;  %v19374_v45 = vrot.slane %v14886_v12, 5  ;;  %v3180_v42 = vsel %vm3117_vm4, %v3177_v47, %v3179_v29  ;;  %13627 = vperm.xlu2 %13275, %v13626_v2  }
 0x12c   : > { %v2950_v30 = vsel %vm2410_vm3, %v19373_v35, %v2949_v49  ;;  %v3548_v27 = vmax.f32 %v3512_v8, 0.0  ;;  %v3549_v7 = vmax.f32 %v3513_v25, 0.0  ;;  %v3029_v9 = vadd.f32 %v2952_v28, %v19375_v4 }
 0x12d   : > { %v3028_v57 = vadd.f32 %v2950_v30, %v14846_v11  ;;  %v3178_v56 = vsel %vm3117_vm4, %v19374_v45, %v3177_v47  ;;  %v3486_v33 = vadd.f32 %v3410_v5, %v3258_v40  ;;  %v3405_v3 = vrot.slane %v3301_v37, 6  ;;  %v13408_v37 = vpop.permute.xlu0 %13407 }
 0x12e   : > { %v2629_v26 = vunpack.c.l.bf16 %v2592_v44  ;;  %v13075_v14 = vunpack.c.h.bf16 %v13215_v20  ;;  %3585 = vst.msk [vmem:[#allocation2 + $0x88] sm:$0xff] %vm3567_vm6, %v3548_v27  ;;  %v3257_v12 = vadd.f32 %v3180_v42, %v3029_v9  ;;  %v3036_v38 = vunpack.c.l.bf16 %v3035_v61 }
 0x12f   : > { %v3256_v41 = vadd.f32 %v3178_v56, %v3028_v57  ;;  %v3526_v11 = vadd.f32 %v14513_v6, %v3486_v33  ;;  %v13465_v49 = vunpack.i.h.bf16 %v13463_v16  ;;  %3586 = vst.msk [vmem:[#allocation2 + $0x90] sm:$0xff] %vm3567_vm6, %v3549_v7  ;;  %v19376_v29 = vrot.slane %v14889_v32, 6 }
 0x130   : > { %v3408_v5 = vsel %vm3345_vm5, %v3405_v3, %v3407_v46  ;;  %v13616_v2 = vpack.i.bf16 %v13074_v63, %v2629_v26  ;;  %v13464_v8 = vunpack.i.l.bf16 %v13463_v16  ;;  %v13621_v35 = vpack.i.bf16 %v3036_v38, %v13075_v14  ;;  %v13413_v46 = vpop.permute.xlu1 %13412 }
 0x131   : > { %v3406_v47 = vsel %vm3345_vm5, %v19376_v29, %v3405_v3  ;;  %v3562_v25 = vmax.f32 %v3526_v11, 0.0  ;;  %v3485_v40 = vadd.f32 %v3408_v5, %v3257_v12  ;;  %v15003_v30 = vmul.f32 %v13465_v49, %v13957_v21 }
 0x132   : > { %v3484_v20 = vadd.f32 %v3406_v47, %v3256_v41  ;;  %13617 = vperm.xlu0 %13253, %v13616_v2   ;;  %v15006_v44 = vmul.f32 %v13465_v49, %v13959_v22  ;;  %v15009_v32 = vmul.f32 %v13464_v8, %v13957_v21  ;;  %v15012_v28 = vmul.f32 %v13464_v8, %v13959_v22  ;;  %v19384_v47 = vld [vmem:[#allocation20_spill] sm:$0xff] }
 0x133   : > { %3599 = vst.msk [vmem:[#allocation2 + $0xf8] sm:$0xff] %vm3567_vm6, %v3562_v25  ;;  %v3525_v57 = vadd.f32 %v14513_v6, %v3485_v40  ;;  %13622 = vperm.xlu1 %13264, %v13621_v35   ;;  %v13410_v45 = vunpack.i.h.bf16 %v13408_v37  ;;  %v13409_v56 = vunpack.i.l.bf16 %v13408_v37  ;;  %v19382_v38 = vrot.slane %v14715_v39, 1 }
 0x134   : > { %19377 = vst [vmem:[#allocation31_spill] sm:$0xff] %v15009_v32  ;;  %v3524_v63 = vadd.f32 %v14513_v6, %v3484_v20  ;;  %v19383_v49 = vrot.slane %v14721_v43, 1  ;;  %v19385_v5 = vrot.slane %v19384_v47, 1  ;;  %v19387_v35 = vrot.slane %v14718_v55, 2  ;;  %v2557_v47 = vld [vmem:[%s13825_s23 + $0x14] sm:$0xf] }
 0x135   : > { %19378 = vst [vmem:[#allocation32_spill] sm:$0xff] %v15012_v28  ;;  %v3561_v33 = vmax.f32 %v3525_v57, 0.0  ;;  %v15022_v4 = vmul.f32 %v13410_v45, %v14444_v36  ;;  %v15025_v9 = vmul.f32 %v13410_v45, %v14446_v59  ;;  %v15028_v41 = vmul.f32 %v13410_v45, %v14448_v51  ;;  %v19389_v45 = vld [vmem:[#allocation21_spill] sm:$0xff] }
 0x136   : > { %v3560_v7 = vmax.f32 %v3524_v63, 0.0  ;;  %v2850_v3 = vmul.f32 %v13409_v56, %v14444_v36  ;;  %v3077_v26 = vmul.f32 %v13409_v56, %v14446_v59  ;;  %v3305_v14 = vmul.f32 %v13409_v56, %v14448_v51 }
 0x137   : > { %19379 = vst [vmem:[#allocation33_spill] sm:$0xff] %v15022_v4  ;;  %v19127_v11 = vrot.slane %v15022_v4, 4  ;;  %v19128_v12 = vrot.slane %v15025_v9, 5  ;;  %v1270_v29 = vsel %vm1247_vm0, %v19383_v49, %v19382_v38  ;;  %v19386_v2 = vmov %v19382_v38 }
 0x138   : > { %19380 = vst [vmem:[#allocation22_spill] sm:$0xff] %v15025_v9  ;;  %v1272_v8 = vsel %vm1247_vm0, %v19386_v2, %v19385_v5  ;;  %v19129_v37 = vrot.slane %v15028_v41, 6  ;;  %v2957_v25 = vrot.slane %v2850_v3, 4  ;;  %v3185_v20 = vrot.slane %v3077_v26, 5  ;;  %v3263_v5 = vld [vmem:[%s13825_s23 + $0x10] sm:$0x8]  ;;  %v15090_v61 = vpop.permute.xlu1 %13427 }
 0x139   : > { %19381 = vst [vmem:[#allocation26_spill] sm:$0xff] %v15028_v41  ;;  %v3413_v40 = vrot.slane %v3305_v14, 6  ;;  %v19388_v63 = vrot.slane %v14726_v48, 2  ;;  %v19390_v56 = vrot.slane %v19389_v45, 2  ;;  %v19392_v38 = vrot.slane %v14767_v0, 2  ;;  %v19396_v2 = vld [vmem:[#allocation10_spill] sm:$0xff]  ;;  %v13478_v0 = vpop.permute.xlu2 %13477 }
 0x13a   : > { %3597 = vst.msk [vmem:[#allocation2 + $0xe8] sm:$0xff] %vm3567_vm6, %v3560_v7  ;;  %v19391_v7 = vmov %v19387_v35  ;;  %v19394_v26 = vrot.slane %v14323_v17, 2  ;;  %v19398_v45 = vld [vmem:[#allocation24_spill] sm:$0xff]  ;;  %v3188_v17 = vsel %vm3117_vm4, %v3185_v20, %v19128_v12  ;;  %v3264_v27 = vunpack.c.l.bf16 %v3263_v5 }
 0x13b   : > { %3598 = vst.msk [vmem:[#allocation2 + $0xf0] sm:$0xff] %vm3567_vm6, %v3561_v33  ;;  %v1498_v57 = vsel %vm1475_vm1, %v19388_v63, %v19387_v35  ;;  %v1500_v39 = vsel %vm1475_vm1, %v19391_v7, %v19390_v56  ;;  %v19393_v33 = vrot.slane %v14772_v18, 2  ;;  %v19395_v14 = vmov %v19392_v38 }
 0x13c   : > { %v1979_v49 = vsel %vm1475_vm1, %v19395_v14, %v19394_v26  ;;  %v19397_v35 = vrot.slane %v19396_v2, 4  ;;  %v2960_v63 = vsel %vm2410_vm3, %v2957_v25, %v19127_v11  ;;  %v19399_v56 = vrot.slane %v19398_v45, 5  ;;  %v19400_v26 = vld [vmem:[#allocation25_spill] sm:$0xff]  ;;  %3267 = vperm.xlu1 %13264, %v3264_v27  }
 0x13d   : > { %v1977_v3 = vsel %vm1475_vm1, %v19393_v33, %v19392_v38  ;;  %v3033_v33 = vadd.f32 %v2960_v63, %v14703_v1  ;;  %v19401_v14 = vrot.slane %v19400_v26, 6  ;;  %v13415_v45 = vunpack.i.h.bf16 %v13413_v46 }
 0x13e   : > { %v2958_v55 = vsel %vm2410_vm3, %v19397_v35, %v2957_v25  ;;  %v3186_v7 = vsel %vm3117_vm4, %v19399_v56, %v3185_v20  ;;  %v3416_v25 = vsel %vm3345_vm5, %v3413_v40, %v19129_v37  ;;  %v13423_v35 = vpop.permute.xlu0 %13422  ;;  %v13414_v56 = vunpack.i.l.bf16 %v13413_v46 }
 0x13f   : > { %v3032_v38 = vadd.f32 %v2958_v55, %v14701_v53  ;;  %v3414_v2 = vsel %vm3345_vm5, %v19401_v14, %v3413_v40  ;;  %v2594_v11 = vunpack.c.l.bf16 %v2557_v47  ;;  %v3261_v12 = vadd.f32 %v3188_v17, %v3033_v33 }
 0x140   : > { %v13480_v53 = vunpack.i.h.bf16 %v13478_v0  ;;  %v13479_v55 = vunpack.i.l.bf16 %v13478_v0  ;;  %v888_v1 = vmul.f32 %v13415_v45, %v13994_v50  ;;  %v887_v63 = vmul.f32 %v13414_v56, %v13994_v50 }
 0x141   : > { %v3260_v20 = vadd.f32 %v3186_v7, %v3032_v38  ;;  %2637 = vperm.xlu0 %13253, %v2594_v11   ;;  %v13425_v26 = vunpack.i.h.bf16 %v13423_v35  ;;  %v13424_v14 = vunpack.i.l.bf16 %v13423_v35  ;;  %v3489_v37 = vadd.f32 %v3416_v25, %v3261_v12 }
 0x142   : > { %v15095_v46 = vmul.f32 %v13480_v53, %v14012_v19  ;;  %v15098_v47 = vmul.f32 %v13480_v53, %v14014_v13  ;;  %v1368_v5 = vadd.f32 %v1272_v8, %v888_v1  ;;  %v1367_v7 = vadd.f32 %v1270_v29, %v887_v63 }
 0x143   : > { %v3488_v40 = vadd.f32 %v3414_v2, %v3260_v20  ;;  %v15101_v17 = vmul.f32 %v13480_v53, %v14016_v23  ;;  %v15104_v0 = vmul.f32 %v13479_v55, %v14012_v19  ;;  %v3529_v11 = vadd.f32 %v14513_v6, %v3489_v37 }
 0x144   : > { %v19133_v38 = vrot.slane %v15098_v47, 3  ;;  %v1596_v33 = vadd.f32 %v1500_v39, %v1368_v5  ;;  %v1595_v2 = vadd.f32 %v1498_v57, %v1367_v7  ;;  %v15113_v45 = vmul.f32 %v13479_v55, %v14014_v13  ;;  %v13443_v5 = vpop.permute.xlu1 %13442 }
 0x145   : > { %v3528_v27 = vadd.f32 %v14513_v6, %v3488_v40  ;;  %v19132_v25 = vrot.slane %v15101_v17, 4  ;;  %v3565_v35 = vmax.f32 %v3529_v11, 0.0  ;;  %v15116_v56 = vmul.f32 %v13479_v55, %v14016_v23 }
 0x146   : > { %19402 = vst [vmem:[#allocation27_spill] sm:$0xff] %v15113_v45  ;;  %v2075_v20 = vadd.f32 %v1979_v49, %v1596_v33  ;;  %v2074_v6 = vadd.f32 %v1977_v3, %v1595_v2  ;;  %v15119_v37 = vmul.f32 %v13425_v26, %v13957_v21  ;;  %v15122_v39 = vmul.f32 %v13425_v26, %v13959_v22  ;;  %v13438_v40 = vpop.permute.xlu0 %13437 }
 0x147   : > { %v3564_v8 = vmax.f32 %v3528_v27, 0.0  ;;  %19403 = vst [vmem:[#allocation38_spill] sm:$0xff] %v15116_v56  ;;  %v19131_v57 = vrot.slane %v15113_v45, 3  ;;  %v19130_v53 = vrot.slane %v15116_v56, 4  ;;  %v15128_v1 = vmul.f32 %v13424_v14, %v13957_v21  ;;  %v3755_v56 = vld [vmem:[#allocation2 + $0x8b] sm:$0xff] }
 0x148   : > { %v15131_v55 = vmul.f32 %v13424_v14, %v13959_v22  ;;  %3602 = vst.msk [vmem:[#allocation2 + $0x110] sm:$0xff] %vm3567_vm6, %v3565_v35  ;;  %v2303_v3 = vadd.f32 %v14790_v52, %v2075_v20  ;;  %v2302_v49 = vadd.f32 %v14797_v34, %v2074_v6  ;;  %v13430_v33 = vunpack.i.h.bf16 %v15090_v61 }
 0x149   : > { %3601 = vst.msk [vmem:[#allocation2 + $0x108] sm:$0xff] %vm3567_vm6, %v3564_v8  ;;  %v15143_v7 = vsel %vm2182_vm2, %v19131_v57, %v19133_v38  ;;  %v15150_v52 = vsel %vm2410_vm3, %v19130_v53, %v19132_v25  ;;  %v13429_v2 = vunpack.i.l.bf16 %v15090_v61  ;;  %v13440_v8 = vunpack.i.h.bf16 %v13438_v40 }
 0x14a   : > { %v15155_v27 = vadd.f32 %v14807_v24, %v2303_v3  ;;  %v15158_v11 = vadd.f32 %v14802_v31, %v2302_v49  ;;  %v13439_v35 = vunpack.i.l.bf16 %v13438_v40  ;;  %v13445_v20 = vunpack.i.h.bf16 %v13443_v5 }
 0x14b   : > { %v13444_v6 = vunpack.i.l.bf16 %v13443_v5  ;;  %v15163_v53 = vmul.f32 %v13430_v33, %v13957_v21  ;;  %v15166_v57 = vmul.f32 %v13430_v33, %v13959_v22  ;;  %v15169_v24 = vmul.f32 %v13429_v2, %v13957_v21 }
 0x14c   : > { %19404 = vst [vmem:[#allocation20_spill] sm:$0xff] %v15158_v11  ;;  %v15172_v31 = vmul.f32 %v13429_v2, %v13959_v22  ;;  %v1908_v3 = vmul.f32 %v13440_v8, %v14012_v19  ;;  %v2135_v61 = vmul.f32 %v13440_v8, %v14014_v13  ;;  %v2363_v49 = vmul.f32 %v13440_v8, %v14016_v23 }
 0x14d   : > { %v15178_v40 = vmul.f32 %v13439_v35, %v14012_v19  ;;  %v2134_v34 = vmul.f32 %v13439_v35, %v14014_v13  ;;  %v2362_v8 = vmul.f32 %v13439_v35, %v14016_v23  ;;  %v2829_v16 = vmul.f32 %v13445_v20, %v14444_v36 }
 0x14e   : > { %v2008_v29 = vrot.slane %v1908_v3, 2  ;;  %v2236_v2 = vrot.slane %v2135_v61, 3  ;;  %v2464_v12 = vrot.slane %v2363_v49, 4  ;;  %v3056_v42 = vmul.f32 %v13445_v20, %v14446_v59 }
 0x14f   : > { %v19136_v14 = vrot.slane %v15178_v40, 2  ;;  %v19405_v26 = vrot.slane %v14810_v10, 2  ;;  %v19406_v61 = vrot.slane %v14816_v58, 3  ;;  %v19407_v63 = vrot.slane %v14821_v62, 4 }
 0x150   : > { %v2234_v38 = vrot.slane %v2134_v34, 3  ;;  %v2462_v41 = vrot.slane %v2362_v8, 4  ;;  %v2915_v9 = vrot.slane %v2829_v16, 4  ;;  %v3284_v10 = vmul.f32 %v13445_v20, %v14448_v51 }
 0x151   : > { %v2009_v33 = vsel %vm1475_vm1, %v19136_v14, %v2008_v29  ;;  %v2011_v3 = vsel %vm1475_vm1, %v2008_v29, %v19405_v26  ;;  %v2239_v49 = vsel %vm2182_vm2, %v2236_v2, %v19406_v61  ;;  %v2467_v35 = vsel %vm2410_vm3, %v2464_v12, %v19407_v63 }
 0x152   : > { %v2090_v5 = vadd.f32 %v2009_v33, %v14780_v54  ;;  %v2091_v25 = vadd.f32 %v2011_v3, %v14758_v60  ;;  %v3143_v14 = vrot.slane %v3056_v42, 5  ;;  %v15205_v29 = vmul.f32 %v13444_v6, %v14444_v36  ;;  %v19411_v33 = vld [vmem:[#allocation42_spill] sm:$0xff] }
 0x153   : > { %v19408_v58 = vrot.slane %v15098_v47, 3  ;;  %v2237_v62 = vsel %vm2182_vm2, %v2234_v38, %v2236_v2  ;;  %v19409_v54 = vrot.slane %v15101_v17, 4  ;;  %v2465_v42 = vsel %vm2410_vm3, %v2462_v41, %v2464_v12 }
 0x154   : > { %v2319_v63 = vadd.f32 %v2239_v49, %v2091_v25  ;;  %v2318_v16 = vadd.f32 %v2237_v62, %v2090_v5  ;;  %v19410_v34 = vrot.slane %v14849_v15, 4  ;;  %v19412_v47 = vrot.slane %v19411_v33, 5  ;;  %v3652_v33 = vld [vmem:[#allocation2 + $0x71] sm:$0xff] }
 0x155   : > { %v15210_v26 = vsel %vm2182_vm2, %v19408_v58, %v2234_v38  ;;  %v15216_v60 = vsel %vm2410_vm3, %v19409_v54, %v2462_v41  ;;  %v19413_v38 = vld [vmem:[#allocation18_spill] sm:$0xff]  ;;  %v3371_v2 = vrot.slane %v3284_v10, 6  ;;  %v19137_v17 = vrot.slane %v15205_v29, 4  ;;  %v19416_v10 = vld [vmem:[#allocation43_spill] sm:$0xff] }
 0x156   : > { %v2918_v20 = vsel %vm2410_vm3, %v2915_v9, %v19410_v34  ;;  %v3146_v8 = vsel %vm3117_vm4, %v3143_v14, %v19412_v47  ;;  %v15225_v3 = vadd.f32 %v2467_v35, %v2319_v63  ;;  %v15229_v61 = vadd.f32 %v2465_v42, %v2318_v16  ;;  %v13493_v35 = vpop.permute.xlu2 %13492  ;;  %v3618_v58 = vld [vmem:[#allocation2 + $0x70] sm:$0xff]  ;;  %v3653_v47 = vld [vmem:[#allocation2 + $0x79] sm:$0xff] }
 0x157   : > { %v3012_v25 = vadd.f32 %v2918_v20, %v19413_v38  ;;  %v15232_v5 = vmul.f32 %v13444_v6, %v14446_v59  ;;  %v15235_v15 = vmul.f32 %v13444_v6, %v14448_v51  ;;  %v19414_v41 = vrot.slane %v15003_v30, 1  ;;  %v3619_v20 = vld [vmem:[#allocation2 + $0x78] sm:$0xff] }
 0x158   : > { %v19415_v12 = vrot.slane %v15009_v32, 1  ;;  %v19417_v63 = vrot.slane %v19416_v10, 6  ;;  %v2916_v16 = vsel %vm2410_vm3, %v19137_v17, %v2915_v9  ;;  %v19418_v6 = vrot.slane %v15128_v1, 1  ;;  %v19420_v38 = vld [vmem:[#allocation16_spill] sm:$0xff]  ;;  %v13458_v32 = vpop.permute.xlu1 %13457 }
 0x159   : > { %v3240_v62 = vadd.f32 %v3146_v8, %v3012_v25  ;;  %v19419_v42 = vmov %v19414_v41  ;;  %v19422_v10 = vrot.slane %v15012_v28, 2  ;;  %v19423_v30 = vrot.slane %v15131_v55, 2  ;;  %v3754_v8 = vld [vmem:[#allocation2 + $0x83] sm:$0xff] }
 0x15a   : > { %v1262_v49 = vsel %vm1247_vm0, %v19415_v12, %v19414_v41  ;;  %v3374_v54 = vsel %vm3345_vm5, %v3371_v2, %v19417_v63  ;;  %v1264_v34 = vsel %vm1247_vm0, %v19419_v42, %v19418_v6  ;;  %v3011_v41 = vadd.f32 %v2916_v16, %v19420_v38  ;;  %v3720_v63 = vld [vmem:[#allocation2 + $0x82] sm:$0xff]  ;;  %v3721_v38 = vld [vmem:[#allocation2 + $0x8a] sm:$0xff] }
 0x15b   : > { %v19421_v12 = vrot.slane %v15006_v44, 2  ;;  %v3468_v17 = vadd.f32 %v3374_v54, %v3240_v62  ;;  %v13495_v4 = vunpack.i.h.bf16 %v13493_v35  ;;  %v13494_v16 = vunpack.i.l.bf16 %v13493_v35  ;;  %v15275_v44 = vld [vmem:[%s19273_s12] ss:$0 sm:$0xff] }
 0x15c   : > { %v19425_v25 = vrot.slane %v15232_v5, 5  ;;  %v19426_v28 = vrot.slane %v15235_v15, 6  ;;  %v3686_v62 = vmax.f32 %v3618_v58, %v3652_v33  ;;  %v3687_v54 = vmax.f32 %v3619_v20, %v3653_v47 }
 0x15d   : > { %v1490_v9 = vsel %vm1475_vm1, %v19422_v10, %v19421_v12  ;;  %v19424_v6 = vmov %v19421_v12  ;;  %v3508_v35 = vadd.f32 %v15275_v44, %v3468_v17  ;;  %v19427_v11 = vrot.slane %v15095_v46, 2 }
 0x15e   : > { %v1492_v42 = vsel %vm1475_vm1, %v19424_v6, %v19423_v30  ;;  %v3144_v45 = vsel %vm3117_vm4, %v19425_v25, %v3143_v14  ;;  %v3372_v12 = vsel %vm3345_vm5, %v19426_v28, %v3371_v2  ;;  %v884_v30 = vmul.f32 %v13495_v4, %v13994_v50 }
 0x15f   : > { %v3239_v10 = vadd.f32 %v3144_v45, %v3011_v41  ;;  %v883_v6 = vmul.f32 %v13494_v16, %v13994_v50  ;;  %v3788_v14 = vmax.f32 %v3720_v63, %v3754_v8  ;;  %v3789_v25 = vmax.f32 %v3721_v38, %v3755_v56  ;;  %v13453_v63 = vpop.permute.xlu0 %13452 }
 0x160   : > { %v19428_v28 = vrot.slane %v15104_v0, 2  ;;  %v19429_v58 = vrot.slane %v15178_v40, 2  ;;  %v19430_v20 = vmov %v19427_v11  ;;  %v3544_v45 = vmax.f32 %v3508_v35, 0.0 }
 0x161   : > { %v3467_v33 = vadd.f32 %v3372_v12, %v3239_v10  ;;  %v1364_v4 = vadd.f32 %v1264_v34, %v884_v30  ;;  %v1363_v47 = vadd.f32 %v1262_v49, %v883_v6  ;;  %v3822_v41 = vmax.f32 %v3686_v62, %v3788_v14  ;;  %v19433_v62 = vld [vmem:[#allocation19_spill] sm:$0xff]  ;;  %v13508_v30 = vpop.permute.xlu2 %13507 }
 0x162   : > { %v2005_v2 = vsel %vm1475_vm1, %v19428_v28, %v19427_v11  ;;  %v2007_v17 = vsel %vm1475_vm1, %v19430_v20, %v19429_v58  ;;  %v3823_v16 = vmax.f32 %v3687_v54, %v3789_v25  ;;  %v13460_v8 = vunpack.i.h.bf16 %v13458_v32  ;;  %3581 = vst.msk [vmem:[#allocation2 + $0x68] sm:$0xff] %vm3567_vm6, %v3544_v45  ;;  %v19438_v28 = vld [vmem:[#allocation17_spill] sm:$0xff] }
 0x163   : > { %v13459_v56 = vunpack.i.l.bf16 %v13458_v32  ;;  %v3507_v38 = vadd.f32 %v15275_v44, %v3467_v33  ;;  %v15292_v11 = vadd.f32 %v1492_v42, %v1364_v4  ;;  %v15294_v40 = vadd.f32 %v1490_v9, %v1363_v47  ;;  %v3634_v47 = vld [vmem:[#allocation2 + $0xf0] sm:$0xff] }
 0x164   : > { %v19431_v46 = vrot.slane %v15163_v53, 1  ;;  %v19432_v35 = vrot.slane %v15169_v24, 1  ;;  %v3877_v49 = vpack.c.bf16 %v3823_v16, %v3822_v41  ;;  %v902_v12 = vmul.f32 %v13460_v8, %v13994_v50  ;;  %v3668_v41 = vld [vmem:[#allocation2 + $0xf1] sm:$0xff] }
 0x165   : > { %v901_v32 = vmul.f32 %v13459_v56, %v13994_v50  ;;  %v19434_v54 = vrot.slane %v19433_v62, 1  ;;  %v3543_v9 = vmax.f32 %v3507_v38, 0.0  ;;  %v19436_v6 = vrot.slane %v15166_v57, 2 }
 0x166   : > { %v1298_v34 = vsel %vm1247_vm0, %v19432_v35, %v19431_v46  ;;  %v19435_v10 = vmov %v19431_v46  ;;  %v19437_v14 = vrot.slane %v15172_v31, 2  ;;  %v19439_v58 = vrot.slane %v19438_v28, 2  ;;  %4019 = vmatpush.bf16.msra.mxu0 %v3877_v49 }
 0x167   : > { %v1300_v42 = vsel %vm1247_vm0, %v19435_v10, %v19434_v54  ;;  %v19440_v20 = vmov %v19436_v6  ;;  %v19441_v33 = vrot.slane %v15119_v37, 1  ;;  %v19442_v53 = vrot.slane %v15128_v1, 1  ;;  %3580 = vst.msk [vmem:[#allocation2 + $0x60] sm:$0xff] %vm3567_vm6, %v3543_v9 }
 0x168   : > { %v1526_v25 = vsel %vm1475_vm1, %v19437_v14, %v19436_v6  ;;  %v1528_v45 = vsel %vm1475_vm1, %v19440_v20, %v19439_v58  ;;  %v1381_v16 = vadd.f32 %v1298_v34, %v901_v32  ;;  %v1382_v8 = vadd.f32 %v1300_v42, %v902_v12  ;;  %v3736_v58 = vld [vmem:[#allocation2 + $0x102] sm:$0xff] }
 0x169   : > { %v1266_v4 = vsel %vm1247_vm0, %v19442_v53, %v19441_v33  ;;  %v19443_v56 = vrot.slane %v14721_v43, 1  ;;  %v19444_v38 = vmov %v19441_v33  ;;  %v19445_v57 = vrot.slane %v15122_v39, 2  ;;  %v3635_v39 = vld [vmem:[#allocation2 + $0xf8] sm:$0xff]  ;;  %v3770_v20 = vld [vmem:[#allocation2 + $0x103] sm:$0xff] }
 0x16a   : > { %v19446_v35 = vrot.slane %v15131_v55, 2  ;;  %v19447_v1 = vrot.slane %v14726_v48, 2  ;;  %v13455_v12 = vunpack.i.h.bf16 %v13453_v63  ;;  %v13454_v43 = vunpack.i.l.bf16 %v13453_v63 }
 0x16b   : > { %v1268_v46 = vsel %vm1247_vm0, %v19444_v38, %v19443_v56  ;;  %v19448_v49 = vmov %v19445_v57  ;;  %v13510_v32 = vunpack.i.h.bf16 %v13508_v30  ;;  %v1609_v37 = vadd.f32 %v1526_v25, %v1381_v16  ;;  %v3771_v16 = vld [vmem:[#allocation2 + $0x10b] sm:$0xff] }
 0x16c   : > { %v1494_v62 = vsel %vm1475_vm1, %v19446_v35, %v19445_v57  ;;  %v1496_v34 = vsel %vm1475_vm1, %v19448_v49, %v19447_v1  ;;  %v1610_v54 = vadd.f32 %v1528_v45, %v1382_v8  ;;  %v13509_v10 = vunpack.i.l.bf16 %v13508_v30  ;;  %v3669_v30 = vld [vmem:[#allocation2 + $0xf9] sm:$0xff]  ;;  %v13473_v8 = vpop.permute.xlu1 %13472  ;;  %v13468_v57 = vpop.permute.xlu0 %13467 }
 0x16d   : > { %v3702_v42 = vmax.f32 %v3634_v47, %v3668_v41  ;;  %v886_v6 = vmul.f32 %v13455_v12, %v13994_v50  ;;  %v885_v55 = vmul.f32 %v13454_v43, %v13994_v50  ;;  %v15342_v14 = vmul.f32 %v13510_v32, %v13957_v21  ;;  %v3737_v41 = vld [vmem:[#allocation2 + $0x10a] sm:$0xff] }
 0x16e   : > { %v15345_v48 = vmul.f32 %v13510_v32, %v13959_v22  ;;  %v2088_v9 = vadd.f32 %v2005_v2, %v1609_v37  ;;  %v2089_v28 = vadd.f32 %v2007_v17, %v1610_v54  ;;  %v15348_v63 = vmul.f32 %v13509_v10, %v13957_v21 }
 0x16f   : > { %19449 = vst [vmem:[#allocation21_spill] sm:$0xff] %v15342_v14  ;;  %v15351_v25 = vmul.f32 %v13509_v10, %v13959_v22  ;;  %v1366_v45 = vadd.f32 %v1268_v46, %v886_v6  ;;  %v1365_v33 = vadd.f32 %v1266_v4, %v885_v55  ;;  %v19147_v53 = vrot.slane %v15342_v14, 1  ;;  %v19480_v14 = vld [vmem:[#allocation32_spill] sm:$0xff] }
 0x170   : > { %19450 = vst [vmem:[#allocation10_spill] sm:$0xff] %v15345_v48  ;;  %v2316_v2 = vadd.f32 %v15143_v7, %v2088_v9  ;;  %v2317_v17 = vadd.f32 %v15210_v26, %v2089_v28  ;;  %v19146_v56 = vrot.slane %v15348_v63, 1  ;;  %v3703_v46 = vmax.f32 %v3635_v39, %v3669_v30 }
 0x171   : > { %19451 = vst [vmem:[#allocation24_spill] sm:$0xff] %v15348_v63  ;;  %v1594_v35 = vadd.f32 %v1496_v34, %v1366_v45  ;;  %v1593_v1 = vadd.f32 %v1494_v62, %v1365_v33  ;;  %v3804_v4 = vmax.f32 %v3736_v58, %v3770_v20  ;;  %v3805_v43 = vmax.f32 %v3737_v41, %v3771_v16 }
 0x172   : > { %19452 = vst [vmem:[#allocation25_spill] sm:$0xff] %v15351_v25  ;;  %v15360_v49 = vadd.f32 %v15150_v52, %v2316_v2  ;;  %v15363_v12 = vadd.f32 %v15216_v60, %v2317_v17  ;;  %v13475_v32 = vunpack.i.h.bf16 %v13473_v8  ;;  %v13474_v37 = vunpack.i.l.bf16 %v13473_v8  ;;  %v19455_v8 = vld [vmem:[#allocation28_spill] sm:$0xff] }
 0x173   : > { %v3838_v7 = vmax.f32 %v3702_v42, %v3804_v4  ;;  %v13470_v26 = vunpack.i.h.bf16 %v13468_v57  ;;  %v13469_v54 = vunpack.i.l.bf16 %v13468_v57  ;;  %v3839_v10 = vmax.f32 %v3703_v46, %v3805_v43  ;;  %v19457_v57 = vld [vmem:[#allocation13_spill] sm:$0xff] }
 0x174   : > { %19453 = vst [vmem:[#allocation42_spill] sm:$0xff] %v15363_v12  ;;  %v1890_v6 = vmul.f32 %v13475_v32, %v14012_v19  ;;  %v2117_v34 = vmul.f32 %v13475_v32, %v14014_v13  ;;  %v2345_v62 = vmul.f32 %v13475_v32, %v14016_v23  ;;  %v15369_v55 = vmul.f32 %v13474_v37, %v14012_v19  ;;  %v13523_v32 = vpop.permute.xlu2 %13522 }
 0x175   : > { %v15372_v52 = vmul.f32 %v13474_v37, %v14014_v13  ;;  %v15375_v60 = vmul.f32 %v13474_v37, %v14016_v23  ;;  %v15378_v42 = vmul.f32 %v13470_v26, %v13957_v21  ;;  %v3885_v39 = vpack.c.bf16 %v3839_v10, %v3838_v7  ;;  %v3632_v7 = vld [vmem:[#allocation2 + $0xe0] sm:$0xff] }
 0x176   : > { %v1972_v9 = vrot.slane %v1890_v6, 2  ;;  %v2200_v28 = vrot.slane %v2117_v34, 3  ;;  %v2428_v30 = vrot.slane %v2345_v62, 4  ;;  %v19145_v58 = vrot.slane %v15369_v55, 2  ;;  %v3666_v37 = vld [vmem:[#allocation2 + $0xe1] sm:$0xff] }
 0x177   : > { %v19143_v20 = vrot.slane %v15372_v52, 3  ;;  %v19144_v45 = vrot.slane %v15375_v60, 4  ;;  %4063 = vmatpush.bf16.msra.mxu1 %v3885_v39  ;;  %v19454_v41 = vrot.slane %v14772_v18, 2  ;;  %v19456_v2 = vrot.slane %v19455_v8, 3  ;;  %v3633_v62 = vld [vmem:[#allocation2 + $0xe8] sm:$0xff] }
 0x178   : > { %v19458_v46 = vrot.slane %v19457_v57, 4  ;;  %v15394_v43 = vmul.f32 %v13470_v26, %v13959_v22  ;;  %v1973_v18 = vsel %vm1475_vm1, %v19145_v58, %v1972_v9  ;;  %v3667_v39 = vld [vmem:[#allocation2 + $0xe9] sm:$0xff]  ;;  %v15407_v8 = vmul.f32 %v13469_v54, %v13957_v21  ;;  %v3769_v58 = vld [vmem:[#allocation2 + $0xfb] sm:$0xff] }
 0x179   : > { %v1975_v16 = vsel %vm1475_vm1, %v1972_v9, %v19454_v41  ;;  %v2203_v17 = vsel %vm2182_vm2, %v2200_v28, %v19456_v2  ;;  %v2201_v6 = vsel %vm2182_vm2, %v19143_v20, %v2200_v28  ;;  %v2429_v34 = vsel %vm2410_vm3, %v19144_v45, %v2428_v30  ;;  %v3734_v28 = vld [vmem:[#allocation2 + $0xf2] sm:$0xff] }
 0x17a   : > { %v2431_v4 = vsel %vm2410_vm3, %v2428_v30, %v19458_v46  ;;  %v2073_v10 = vadd.f32 %v1975_v16, %v1594_v35  ;;  %v2072_v26 = vadd.f32 %v1973_v18, %v1593_v1  ;;  %v15410_v2 = vmul.f32 %v13469_v54, %v13959_v22  ;;  %v3768_v46 = vld [vmem:[#allocation2 + $0xf3] sm:$0xff] }
 0x17b   : > { %v13525_v9 = vunpack.i.h.bf16 %v13523_v32  ;;  %v13524_v16 = vunpack.i.l.bf16 %v13523_v32  ;;  %v3700_v57 = vmax.f32 %v3632_v7, %v3666_v37  ;;  %v3701_v1 = vmax.f32 %v3633_v62, %v3667_v39  ;;  %v3735_v18 = vld [vmem:[#allocation2 + $0xfa] sm:$0xff]  ;;  %v13488_v32 = vpop.permute.xlu1 %13487 }
 0x17c   : > { %v2301_v35 = vadd.f32 %v2203_v17, %v2073_v10  ;;  %v2300_v20 = vadd.f32 %v2201_v6, %v2072_v26  ;;  %v13483_v6 = vpop.permute.xlu0 %13482  ;;  %v13490_v45 = vunpack.i.h.bf16 %v13488_v32  ;;  %v13489_v38 = vunpack.i.l.bf16 %v13488_v32 }
 0x17d   : > { %v15417_v33 = vmul.f32 %v13525_v9, %v14444_v36  ;;  %v15420_v54 = vmul.f32 %v13525_v9, %v14446_v59  ;;  %v15423_v17 = vmul.f32 %v13525_v9, %v14448_v51  ;;  %v15428_v37 = vmul.f32 %v13524_v16, %v13957_v21  ;;  %v19462_v9 = vld [vmem:[#allocation30_spill] sm:$0xff] }
 0x17e   : > { %v15414_v41 = vadd.f32 %v2431_v4, %v2301_v35  ;;  %v15425_v7 = vadd.f32 %v2429_v34, %v2300_v20  ;;  %v15431_v10 = vmul.f32 %v13524_v16, %v13959_v22  ;;  %v3802_v4 = vmax.f32 %v3734_v28, %v3768_v46 }
 0x17f   : > { %19459 = vst [vmem:[#allocation18_spill] sm:$0xff] %v15428_v37  ;;  %v3803_v35 = vmax.f32 %v3735_v18, %v3769_v58  ;;  %v13485_v47 = vunpack.i.h.bf16 %v13483_v6  ;;  %v13484_v16 = vunpack.i.l.bf16 %v13483_v6  ;;  %v2843_v28 = vmul.f32 %v13490_v45, %v14444_v36  ;;  %v3651_v37 = vld [vmem:[#allocation2 + $0x69] sm:$0xff] }
 0x180   : > { %19460 = vst [vmem:[#allocation43_spill] sm:$0xff] %v15431_v10  ;;  %v3836_v34 = vmax.f32 %v3700_v57, %v3802_v4  ;;  %v3070_v46 = vmul.f32 %v13490_v45, %v14446_v59  ;;  %v3298_v62 = vmul.f32 %v13490_v45, %v14448_v51  ;;  %v15446_v58 = vsel %vm1247_vm0, %v19146_v56, %v19147_v53 }
 0x181   : > { %v3837_v30 = vmax.f32 %v3701_v1, %v3803_v35  ;;  %v15449_v57 = vmul.f32 %v13489_v38, %v14444_v36  ;;  %v15452_v1 = vmul.f32 %v13489_v38, %v14446_v59  ;;  %v15455_v32 = vmul.f32 %v13489_v38, %v14448_v51  ;;  %v19464_v38 = vld [vmem:[#allocation34_spill] sm:$0xff] }
 0x182   : > { %v2943_v4 = vrot.slane %v2843_v28, 4  ;;  %v3171_v6 = vrot.slane %v3070_v46, 5  ;;  %v3399_v45 = vrot.slane %v3298_v62, 6  ;;  %v2827_v35 = vmul.f32 %v13485_v47, %v14444_v36  ;;  %v19466_v62 = vld [vmem:[#allocation35_spill] sm:$0xff] }
 0x183   : > { %v3884_v18 = vpack.c.bf16 %v3837_v30, %v3836_v34  ;;  %19461 = vst [vmem:[#allocation16_spill] sm:$0xff] %v15455_v32  ;;  %v3054_v34 = vmul.f32 %v13485_v47, %v14446_v59  ;;  %v19463_v53 = vrot.slane %v19462_v9, 4  ;;  %v19465_v39 = vrot.slane %v19464_v38, 5 }
 0x184   : > { %v19467_v46 = vrot.slane %v19466_v62, 6  ;;  %v2911_v63 = vrot.slane %v2827_v35, 4  ;;  %v19468_v56 = vrot.slane %v15449_v57, 4  ;;  %v19469_v10 = vrot.slane %v15452_v1, 5 }
 0x185   : > { %4064 = vmatpush.bf16.msra.mxu1 %v3884_v18  ;;  %v2946_v26 = vsel %vm2410_vm3, %v2943_v4, %v19463_v53  ;;  %v3174_v28 = vsel %vm3117_vm4, %v3171_v6, %v19465_v39  ;;  %v19470_v53 = vrot.slane %v15455_v32, 6  ;;  %v19471_v62 = vrot.slane %v15205_v29, 4 }
 0x186   : > { %v3402_v18 = vsel %vm3345_vm5, %v3399_v45, %v19467_v46  ;;  %v3026_v20 = vadd.f32 %v2946_v26, %v15225_v3  ;;  %v2944_v30 = vsel %vm2410_vm3, %v19468_v56, %v2943_v4  ;;  %v3172_v9 = vsel %vm3117_vm4, %v19469_v10, %v3171_v6 }
 0x187   : > { %v3400_v38 = vsel %vm3345_vm5, %v19470_v53, %v3399_v45  ;;  %v3025_v39 = vadd.f32 %v2944_v30, %v15229_v61  ;;  %v2914_v35 = vsel %vm2410_vm3, %v2911_v63, %v19471_v62  ;;  %v3139_v46 = vrot.slane %v3054_v34, 5 }
 0x188   : > { %v3282_v3 = vmul.f32 %v13485_v47, %v14448_v51  ;;  %v3254_v26 = vadd.f32 %v3174_v28, %v3026_v20  ;;  %v3010_v56 = vadd.f32 %v2914_v35, %v15155_v27  ;;  %v15488_v4 = vmul.f32 %v13484_v16, %v14444_v36  ;;  %v13538_v28 = vpop.permute.xlu2 %13537 }
 0x189   : > { %v15491_v10 = vmul.f32 %v13484_v16, %v14446_v59  ;;  %v3253_v6 = vadd.f32 %v3172_v9, %v3025_v39  ;;  %v19472_v45 = vrot.slane %v15232_v5, 5  ;;  %v15497_v30 = vmul.f32 %v13484_v16, %v14448_v51 }
 0x18a   : > { %v3367_v29 = vrot.slane %v3282_v3, 6  ;;  %v3482_v34 = vadd.f32 %v3402_v18, %v3254_v26  ;;  %v19150_v20 = vrot.slane %v15488_v4, 4  ;;  %v19473_v62 = vrot.slane %v15235_v15, 6  ;;  %v13503_v18 = vpop.permute.xlu1 %13502 }
 0x18b   : > { %v3142_v61 = vsel %vm3117_vm4, %v3139_v46, %v19472_v45  ;;  %v19152_v27 = vrot.slane %v15491_v10, 5  ;;  %v3481_v53 = vadd.f32 %v3400_v38, %v3253_v6  ;;  %v19154_v5 = vrot.slane %v15497_v30, 6  ;;  %v19476_v6 = vld [vmem:[#allocation20_spill] sm:$0xff] }
 0x18c   : > { %v3238_v47 = vadd.f32 %v3142_v61, %v3010_v56  ;;  %v3370_v9 = vsel %vm3345_vm5, %v3367_v29, %v19473_v62  ;;  %v19474_v39 = vrot.slane %v15345_v48, 2  ;;  %v19475_v35 = vrot.slane %v15351_v25, 2 }
 0x18d   : > { %v3522_v3 = vadd.f32 %v15275_v44, %v3482_v34  ;;  %v2912_v38 = vsel %vm2410_vm3, %v19150_v20, %v2911_v63  ;;  %v3140_v15 = vsel %vm3117_vm4, %v19152_v27, %v3139_v46  ;;  %v3521_v56 = vadd.f32 %v15275_v44, %v3481_v53  ;;  %v3617_v27 = vld [vmem:[#allocation2 + $0x68] sm:$0xff] }
 0x18e   : > { %v1518_v16 = vsel %vm1475_vm1, %v19475_v35, %v19474_v39  ;;  %v3466_v26 = vadd.f32 %v3370_v9, %v3238_v47  ;;  %v3009_v45 = vadd.f32 %v2912_v38, %v19476_v6  ;;  %v3368_v61 = vsel %vm3345_vm5, %v19154_v5, %v3367_v29  ;;  %v3616_v35 = vld [vmem:[#allocation2 + $0x60] sm:$0xff]  ;;  %v19478_v5 = vld [vmem:[#allocation31_spill] sm:$0xff] }
 0x18f   : > { %v13540_v62 = vunpack.i.h.bf16 %v13538_v28  ;;  %v3558_v39 = vmax.f32 %v3522_v3, 0.0  ;;  %v13539_v47 = vunpack.i.l.bf16 %v13538_v28  ;;  %v13505_v9 = vunpack.i.h.bf16 %v13503_v18  ;;  %v3650_v53 = vld [vmem:[#allocation2 + $0x61] sm:$0xff] }
 0x190   : > { %v3506_v34 = vadd.f32 %v15275_v44, %v3466_v26  ;;  %v3557_v63 = vmax.f32 %v3521_v56, 0.0  ;;  %v3237_v20 = vadd.f32 %v3140_v15, %v3009_v45  ;;  %v13504_v46 = vunpack.i.l.bf16 %v13503_v18  ;;  %v3718_v26 = vld [vmem:[#allocation2 + $0x72] sm:$0xff]  ;;  %v3719_v45 = vld [vmem:[#allocation2 + $0x7a] sm:$0xff] }
 0x191   : > { %v897_v25 = vmul.f32 %v13540_v62, %v13994_v50  ;;  %3595 = vst.msk [vmem:[#allocation2 + $0xd8] sm:$0xff] %vm3567_vm6, %v3558_v39  ;;  %v882_v29 = vmul.f32 %v13539_v47, %v13994_v50  ;;  %v15527_v3 = vmul.f32 %v13505_v9, %v13957_v21  ;;  %v15530_v28 = vmul.f32 %v13505_v9, %v13959_v22  ;;  %v3752_v62 = vld [vmem:[#allocation2 + $0x73] sm:$0xff]  ;;  %v3753_v39 = vld [vmem:[#allocation2 + $0x7b] sm:$0xff] }
 0x192   : > { %v3542_v38 = vmax.f32 %v3506_v34, 0.0  ;;  %3594 = vst.msk [vmem:[#allocation2 + $0xd0] sm:$0xff] %vm3567_vm6, %v3557_v63  ;;  %v3465_v15 = vadd.f32 %v3368_v61, %v3237_v20  ;;  %v15535_v56 = vmul.f32 %v13504_v46, %v13957_v21  ;;  %v15538_v6 = vmul.f32 %v13504_v46, %v13959_v22  ;;  %v13498_v20 = vpop.permute.xlu0 %13497  ;;  %v13553_v61 = vpop.permute.xlu2 %13552 }
 0x193   : > { %v1377_v18 = vadd.f32 %v15446_v58, %v897_v25  ;;  %v19158_v34 = vrot.slane %v15527_v3, 1  ;;  %v19160_v47 = vrot.slane %v15530_v28, 2  ;;  %v3684_v9 = vmax.f32 %v3616_v35, %v3650_v53 }
 0x194   : > { %3579 = vst.msk [vmem:[#allocation2 + $0x58] sm:$0xff] %vm3567_vm6, %v3542_v38  ;;  %v3685_v63 = vmax.f32 %v3617_v27, %v3651_v37  ;;  %v3505_v25 = vadd.f32 %v15275_v44, %v3465_v15  ;;  %v19479_v48 = vrot.slane %v19478_v5, 1  ;;  %v19481_v32 = vrot.slane %v19480_v14, 2 }
 0x195   : > { %v15544_v58 = vadd.f32 %v1518_v16, %v1377_v18  ;;  %v3786_v27 = vmax.f32 %v3718_v26, %v3752_v62  ;;  %v3787_v35 = vmax.f32 %v3719_v45, %v3753_v39  ;;  %v13500_v15 = vunpack.i.h.bf16 %v13498_v20  ;;  %v13518_v26 = vpop.permute.xlu1 %13517 }
 0x196   : > { %v1260_v38 = vsel %vm1247_vm0, %v19158_v34, %v19479_v48  ;;  %v1488_v37 = vsel %vm1475_vm1, %v19160_v47, %v19481_v32  ;;  %v3541_v16 = vmax.f32 %v3505_v25, 0.0  ;;  %v13499_v18 = vunpack.i.l.bf16 %v13498_v20 }
 0x197   : > { %19477 = vst [vmem:[#allocation19_spill] sm:$0xff] %v15544_v58  ;;  %v1362_v53 = vadd.f32 %v1260_v38, %v882_v29  ;;  %v3820_v46 = vmax.f32 %v3684_v9, %v3786_v27  ;;  %v3821_v58 = vmax.f32 %v3685_v63, %v3787_v35  ;;  %v19482_v5 = vrot.slane %v15378_v42, 1 }
 0x198   : > { %v19483_v12 = vrot.slane %v15407_v8, 1  ;;  %v19484_v14 = vrot.slane %v15169_v24, 1  ;;  %3578 = vst.msk [vmem:[#allocation2 + $0x50] sm:$0xff] %vm3567_vm6, %v3541_v16  ;;  %v900_v45 = vmul.f32 %v13500_v15, %v13994_v50  ;;  %v899_v62 = vmul.f32 %v13499_v18, %v13994_v50 }
 0x199   : > { %v19485_v34 = vmov %v19482_v5  ;;  %v15569_v29 = vadd.f32 %v1488_v37, %v1362_v53  ;;  %v19486_v39 = vrot.slane %v15394_v43, 2  ;;  %v19487_v9 = vrot.slane %v15410_v2, 2 }
 0x19a   : > { %v1294_v48 = vsel %vm1247_vm0, %v19483_v12, %v19482_v5  ;;  %v1296_v32 = vsel %vm1247_vm0, %v19485_v34, %v19484_v14  ;;  %v3876_v24 = vpack.c.bf16 %v3821_v58, %v3820_v46  ;;  %v19488_v42 = vrot.slane %v15172_v31, 2  ;;  %v19501_v14 = vld [vmem:[#allocation38_spill] sm:$0xff] }
 0x19b   : > { %v1522_v12 = vsel %vm1475_vm1, %v19487_v9, %v19486_v39  ;;  %v19489_v34 = vmov %v19486_v39  ;;  %v13555_v20 = vunpack.i.h.bf16 %v13553_v61  ;;  %v13554_v25 = vunpack.i.l.bf16 %v13553_v61  ;;  %v13513_v39 = vpop.permute.xlu0 %13512  ;;  %v19492_v9 = vld [vmem:[#allocation36_spill] sm:$0xff] }
 0x19c   : > { %v1524_v63 = vsel %vm1475_vm1, %v19489_v34, %v19488_v42  ;;  %v1379_v38 = vadd.f32 %v1294_v48, %v899_v62  ;;  %v1380_v37 = vadd.f32 %v1296_v32, %v900_v45  ;;  %v13520_v27 = vunpack.i.h.bf16 %v13518_v26  ;;  %4020 = vmatpush.bf16.msra.mxu0 %v3876_v24  ;;  %v19495_v42 = vld [vmem:[#allocation37_spill] sm:$0xff] }
 0x19d   : > { %v13519_v35 = vunpack.i.l.bf16 %v13518_v26  ;;  %v15584_v16 = vmul.f32 %v13555_v20, %v14012_v19  ;;  %v15587_v53 = vmul.f32 %v13555_v20, %v14014_v13  ;;  %v15590_v58 = vmul.f32 %v13555_v20, %v14016_v23 }
 0x19e   : > { %v15593_v31 = vmul.f32 %v13554_v25, %v14012_v19  ;;  %v1607_v43 = vadd.f32 %v1522_v12, %v1379_v38  ;;  %v1608_v46 = vadd.f32 %v1524_v63, %v1380_v37  ;;  %v15596_v61 = vmul.f32 %v13554_v25, %v14014_v13 }
 0x19f   : > { %19490 = vst [vmem:[#allocation17_spill] sm:$0xff] %v15587_v53  ;;  %v15599_v15 = vmul.f32 %v13554_v25, %v14016_v23  ;;  %v19159_v5 = vrot.slane %v15587_v53, 3  ;;  %v19161_v48 = vrot.slane %v15590_v58, 4  ;;  %v1904_v45 = vmul.f32 %v13520_v27, %v14012_v19 }
 0x1a0   : > { %19491 = vst [vmem:[#allocation28_spill] sm:$0xff] %v15590_v58  ;;  %v2131_v62 = vmul.f32 %v13520_v27, %v14014_v13  ;;  %v19493_v12 = vrot.slane %v19492_v9, 3  ;;  %v19496_v34 = vrot.slane %v19495_v42, 4  ;;  %v2359_v20 = vmul.f32 %v13520_v27, %v14016_v23 }
 0x1a1   : > { %v15625_v25 = vmul.f32 %v13519_v35, %v14012_v19  ;;  %v2000_v38 = vrot.slane %v1904_v45, 2  ;;  %v15628_v18 = vmul.f32 %v13519_v35, %v14014_v13  ;;  %v15631_v9 = vmul.f32 %v13519_v35, %v14016_v23 }
 0x1a2   : > { %v15614_v24 = vsel %vm2182_vm2, %v19493_v12, %v19159_v5  ;;  %v15621_v63 = vsel %vm2410_vm3, %v19496_v34, %v19161_v48  ;;  %v2228_v37 = vrot.slane %v2131_v62, 3  ;;  %v2456_v12 = vrot.slane %v2359_v20, 4  ;;  %v19499_v48 = vld [vmem:[#allocation27_spill] sm:$0xff] }
 0x1a3   : > { %19494 = vst [vmem:[#allocation13_spill] sm:$0xff] %v15614_v24  ;;  %v19166_v5 = vrot.slane %v15625_v25, 2  ;;  %v13515_v42 = vunpack.i.h.bf16 %v13513_v39  ;;  %v13514_v47 = vunpack.i.l.bf16 %v13513_v39  ;;  %v19498_v34 = vrot.slane %v15104_v0, 2  ;;  %v13568_v24 = vpop.permute.xlu2 %13567 }
 0x1a4   : > { %19497 = vst [vmem:[#allocation30_spill] sm:$0xff] %v15621_v63  ;;  %v19500_v26 = vrot.slane %v19499_v48, 3  ;;  %v19164_v62 = vrot.slane %v15628_v18, 3  ;;  %v19165_v32 = vrot.slane %v15631_v9, 4  ;;  %v19502_v35 = vrot.slane %v19501_v14, 4 }
 0x1a5   : > { %v2003_v27 = vsel %vm1475_vm1, %v2000_v38, %v19498_v34  ;;  %v2001_v39 = vsel %vm1475_vm1, %v19166_v5, %v2000_v38  ;;  %v1888_v0 = vmul.f32 %v13515_v42, %v14012_v19  ;;  %v2115_v14 = vmul.f32 %v13515_v42, %v14014_v13 }
 0x1a6   : > { %v2231_v45 = vsel %vm2182_vm2, %v2228_v37, %v19500_v26  ;;  %v2459_v20 = vsel %vm2410_vm3, %v2456_v12, %v19502_v35  ;;  %v2087_v63 = vadd.f32 %v2003_v27, %v1608_v46  ;;  %v2086_v34 = vadd.f32 %v2001_v39, %v1607_v43 }
 0x1a7   : > { %v2229_v48 = vsel %vm2182_vm2, %v19164_v62, %v2228_v37  ;;  %v2457_v26 = vsel %vm2410_vm3, %v19165_v32, %v2456_v12  ;;  %v1968_v58 = vrot.slane %v1888_v0, 2  ;;  %v2343_v53 = vmul.f32 %v13515_v42, %v14016_v23 }
 0x1a8   : > { %v2315_v35 = vadd.f32 %v2231_v45, %v2087_v63  ;;  %v1887_v46 = vmul.f32 %v13514_v47, %v14012_v19  ;;  %v2314_v38 = vadd.f32 %v2229_v48, %v2086_v34  ;;  %v2196_v27 = vrot.slane %v2115_v14, 3 }
 0x1a9   : > { %v2114_v43 = vmul.f32 %v13514_v47, %v14014_v13  ;;  %v2342_v39 = vmul.f32 %v13514_v47, %v14016_v23  ;;  %v19504_v62 = vrot.slane %v15369_v55, 2  ;;  %v2424_v32 = vrot.slane %v2343_v53, 4 }
 0x1aa   : > { %v15660_v37 = vadd.f32 %v2459_v20, %v2315_v35  ;;  %v1966_v5 = vrot.slane %v1887_v46, 2  ;;  %v15665_v63 = vadd.f32 %v2457_v26, %v2314_v38  ;;  %v19506_v42 = vrot.slane %v15372_v52, 3  ;;  %v13528_v26 = vpop.permute.xlu0 %13527 }
 0x1ab   : > { %v1971_v12 = vsel %vm1475_vm1, %v1968_v58, %v19504_v62  ;;  %v2194_v34 = vrot.slane %v2114_v43, 3  ;;  %v19507_v48 = vrot.slane %v15375_v60, 4  ;;  %v19508_v20 = vrot.slane %v15593_v31, 2 }
 0x1ac   : > { %19503 = vst [vmem:[#allocation34_spill] sm:$0xff] %v15660_v37  ;;  %v2199_v45 = vsel %vm2182_vm2, %v2196_v27, %v19506_v42  ;;  %v2071_v0 = vadd.f32 %v1971_v12, %v15292_v11  ;;  %v1969_v53 = vsel %vm1475_vm1, %v1966_v5, %v1968_v58  ;;  %v2422_v62 = vrot.slane %v2342_v39, 4 }
 0x1ad   : > { %19505 = vst [vmem:[#allocation35_spill] sm:$0xff] %v15665_v63  ;;  %v2427_v47 = vsel %vm2410_vm3, %v2424_v32, %v19507_v48  ;;  %v1967_v55 = vsel %vm1475_vm1, %v19508_v20, %v1966_v5  ;;  %v2070_v52 = vadd.f32 %v1969_v53, %v15294_v40  ;;  %v19509_v35 = vrot.slane %v15596_v61, 3  ;;  %v3767_v63 = vld [vmem:[#allocation2 + $0xeb] sm:$0xff] }
 0x1ae   : > { %v2069_v14 = vadd.f32 %v1967_v55, %v15569_v29  ;;  %v2197_v60 = vsel %vm2182_vm2, %v2194_v34, %v2196_v27  ;;  %v2299_v46 = vadd.f32 %v2199_v45, %v2071_v0  ;;  %v19510_v38 = vrot.slane %v15599_v15, 4 }
 0x1af   : > { %v2195_v11 = vsel %vm2182_vm2, %v19509_v35, %v2194_v34  ;;  %v2425_v12 = vsel %vm2410_vm3, %v2422_v62, %v2424_v32  ;;  %v13570_v58 = vunpack.i.h.bf16 %v13568_v24  ;;  %v2298_v39 = vadd.f32 %v2197_v60, %v2070_v52  ;;  %v13583_v34 = vpop.permute.xlu2 %13582 }
 0x1b0   : > { %v2423_v43 = vsel %vm2410_vm3, %v19510_v38, %v2422_v62  ;;  %v2297_v5 = vadd.f32 %v2195_v11, %v2069_v14  ;;  %v13569_v42 = vunpack.i.l.bf16 %v13568_v24  ;;  %v13530_v29 = vunpack.i.h.bf16 %v13528_v26 }
 0x1b1   : > { %v2527_v48 = vadd.f32 %v2427_v47, %v2299_v46  ;;  %v15689_v40 = vmul.f32 %v13570_v58, %v14444_v36  ;;  %v15692_v20 = vmul.f32 %v13570_v58, %v14446_v59  ;;  %v15695_v27 = vmul.f32 %v13570_v58, %v14448_v51 }
 0x1b2   : > { %v15697_v45 = vadd.f32 %v2423_v43, %v2297_v5  ;;  %v15699_v0 = vadd.f32 %v2425_v12, %v2298_v39  ;;  %v15702_v32 = vmul.f32 %v13569_v42, %v14444_v36  ;;  %v15705_v24 = vmul.f32 %v13569_v42, %v14446_v59 }
 0x1b3   : > { %19511 = vst [vmem:[#allocation20_spill] sm:$0xff] %v15689_v40  ;;  %v15711_v62 = vmul.f32 %v13569_v42, %v14448_v51  ;;  %v15716_v35 = vmul.f32 %v13530_v29, %v14444_v36  ;;  %v15719_v11 = vmul.f32 %v13530_v29, %v14446_v59  ;;  %v15723_v46 = vmul.f32 %v13530_v29, %v14448_v51 }
 0x1b4   : > { %19512 = vst [vmem:[#allocation31_spill] sm:$0xff] %v15692_v20  ;;  %v19167_v14 = vrot.slane %v15702_v32, 4  ;;  %v19170_v52 = vrot.slane %v15705_v24, 5  ;;  %v13529_v38 = vunpack.i.l.bf16 %v13528_v26  ;;  %v13585_v43 = vunpack.i.h.bf16 %v13583_v34 }
 0x1b5   : > { %19513 = vst [vmem:[#allocation32_spill] sm:$0xff] %v15695_v27  ;;  %v19171_v60 = vrot.slane %v15711_v62, 6  ;;  %v19514_v12 = vrot.slane %v15417_v33, 4  ;;  %v19515_v5 = vrot.slane %v15420_v54, 5  ;;  %v19516_v26 = vrot.slane %v15423_v17, 6 }
 0x1b6   : > { %v3280_v27 = vmul.f32 %v13529_v38, %v14448_v51  ;;  %v13584_v53 = vunpack.i.l.bf16 %v13583_v34  ;;  %v19519_v42 = vrot.slane %v15527_v3, 1  ;;  %v19521_v40 = vrot.slane %v15417_v33, 4 }
 0x1b7   : > { %v2906_v58 = vsel %vm2410_vm3, %v19167_v14, %v19514_v12  ;;  %v3134_v39 = vsel %vm3117_vm4, %v19170_v52, %v19515_v5  ;;  %v3362_v55 = vsel %vm3345_vm5, %v19171_v60, %v19516_v26  ;;  %v2825_v12 = vmul.f32 %v13529_v38, %v14444_v36 }
 0x1b8   : > { %v3006_v29 = vadd.f32 %v2906_v58, %v2527_v48  ;;  %v3052_v14 = vmul.f32 %v13529_v38, %v14446_v59  ;;  %v15747_v5 = vmul.f32 %v13585_v43, %v13957_v21  ;;  %v15750_v52 = vmul.f32 %v13585_v43, %v13959_v22 }
 0x1b9   : > { %v2907_v58 = vrot.slane %v2825_v12, 4  ;;  %v19520_v26 = vrot.slane %v15535_v56, 1  ;;  %v3363_v37 = vrot.slane %v3280_v27, 6  ;;  %v15766_v3 = vmul.f32 %v13584_v53, %v13957_v21 }
 0x1ba   : > { %19517 = vst [vmem:[#allocation36_spill] sm:$0xff] %v15747_v5  ;;  %v3234_v48 = vadd.f32 %v3134_v39, %v3006_v29  ;;  %v3135_v47 = vrot.slane %v3052_v14, 5  ;;  %v19522_v39 = vrot.slane %v15488_v4, 4  ;;  %v13533_v29 = vpop.permute.xlu1 %13532  ;;  %v19524_v12 = vrot.slane %v15420_v54, 5  ;;  %v3631_v4 = vld [vmem:[#allocation2 + $0xd8] sm:$0xff] }
 0x1bb   : > { %19518 = vst [vmem:[#allocation37_spill] sm:$0xff] %v15750_v52  ;;  %v1258_v60 = vsel %vm1247_vm0, %v19520_v26, %v19519_v42  ;;  %v2908_v43 = vsel %vm2410_vm3, %v19521_v40, %v2907_v58  ;;  %v3630_v42 = vld [vmem:[#allocation2 + $0xd0] sm:$0xff]  ;;  %v19525_v33 = vrot.slane %v15491_v10, 5  ;;  %v19526_v26 = vrot.slane %v15423_v17, 6 }
 0x1bc   : > { %v3462_v20 = vadd.f32 %v3362_v55, %v3234_v48  ;;  %v2910_v34 = vsel %vm2410_vm3, %v2907_v58, %v19522_v39  ;;  %19523 = vst [vmem:[#allocation27_spill] sm:$0xff] %v15766_v3  ;;  %v3007_v27 = vadd.f32 %v2908_v43, %v15425_v7  ;;  %v3136_v55 = vsel %vm3117_vm4, %v19524_v12, %v3135_v47  ;;  %v3664_v48 = vld [vmem:[#allocation2 + $0xd1] sm:$0xff]  ;;  %v3665_v58 = vld [vmem:[#allocation2 + $0xd9] sm:$0xff]  ;;  %v3732_v43 = vld [vmem:[#allocation2 + $0xe2] sm:$0xff] }
 0x1bd   : > { %v3008_v14 = vadd.f32 %v2910_v34, %v15414_v41  ;;  %v3138_v40 = vsel %vm3117_vm4, %v3135_v47, %v19525_v33  ;;  %v3364_v39 = vsel %vm3345_vm5, %v19526_v26, %v3363_v37  ;;  %v19527_v7 = vrot.slane %v15497_v30, 6  ;;  %v3766_v34 = vld [vmem:[#allocation2 + $0xe3] sm:$0xff] }
 0x1be   : > { %v3502_v53 = vadd.f32 %v15275_v44, %v3462_v20  ;;  %v3235_v10 = vadd.f32 %v3136_v55, %v3007_v27  ;;  %v19528_v47 = vrot.slane %v15530_v28, 2  ;;  %v19529_v33 = vrot.slane %v15538_v6, 2  ;;  %v3733_v17 = vld [vmem:[#allocation2 + $0xea] sm:$0xff] }
 0x1bf   : > { %v3366_v41 = vsel %vm3345_vm5, %v3363_v37, %v19527_v7  ;;  %v3236_v12 = vadd.f32 %v3138_v40, %v3008_v14  ;;  %v13535_v38 = vunpack.i.h.bf16 %v13533_v29  ;;  %v13534_v52 = vunpack.i.l.bf16 %v13533_v29  ;;  %v13543_v40 = vpop.permute.xlu0 %13542 }
 0x1c0   : > { %v1486_v20 = vsel %vm1475_vm1, %v19529_v33, %v19528_v47  ;;  %v3538_v26 = vmax.f32 %v3502_v53, 0.0  ;;  %v3698_v30 = vmax.f32 %v3630_v42, %v3664_v48  ;;  %v3699_v5 = vmax.f32 %v3631_v4, %v3665_v58 }
 0x1c1   : > { %v3463_v37 = vadd.f32 %v3364_v39, %v3235_v10  ;;  %v3464_v7 = vadd.f32 %v3366_v41, %v3236_v12  ;;  %v881_v54 = vmul.f32 %v13535_v38, %v13994_v50  ;;  %v3800_v3 = vmax.f32 %v3732_v43, %v3766_v34 }
 0x1c2   : > { %3575 = vst.msk [vmem:[#allocation2 + $0x38] sm:$0xff] %vm3567_vm6, %v3538_v26  ;;  %v2841_v28 = vmul.f32 %v13534_v52, %v14444_v36  ;;  %v3068_v27 = vmul.f32 %v13534_v52, %v14446_v59  ;;  %v3296_v14 = vmul.f32 %v13534_v52, %v14448_v51  ;;  %v3801_v55 = vmax.f32 %v3733_v17, %v3767_v63 }
 0x1c3   : > { %v3503_v53 = vadd.f32 %v15275_v44, %v3463_v37  ;;  %v3504_v29 = vadd.f32 %v15275_v44, %v3464_v7  ;;  %v1361_v42 = vadd.f32 %v1258_v60, %v881_v54  ;;  %v3834_v4 = vmax.f32 %v3698_v30, %v3800_v3  ;;  %v19536_v30 = vld [vmem:[#allocation16_spill] sm:$0xff] }
 0x1c4   : > { %v2939_v48 = vrot.slane %v2841_v28, 4  ;;  %v3167_v58 = vrot.slane %v3068_v27, 5  ;;  %v3395_v38 = vrot.slane %v3296_v14, 6  ;;  %v3835_v39 = vmax.f32 %v3699_v5, %v3801_v55  ;;  %v3614_v28 = vld [vmem:[#allocation2 + $0x50] sm:$0xff]  ;;  %v3615_v27 = vld [vmem:[#allocation2 + $0x58] sm:$0xff] }
 0x1c5   : > { %v3539_v41 = vmax.f32 %v3503_v53, 0.0  ;;  %v3540_v43 = vmax.f32 %v3504_v29, 0.0  ;;  %v15796_v34 = vadd.f32 %v1486_v20, %v1361_v42  ;;  %v13545_v10 = vunpack.i.h.bf16 %v13543_v40  ;;  %v19534_v20 = vld [vmem:[#allocation42_spill] sm:$0xff]  ;;  %v3649_v29 = vld [vmem:[#allocation2 + $0x59] sm:$0xff]  ;;  %v3716_v42 = vld [vmem:[#allocation2 + $0x62] sm:$0xff] }
 0x1c6   : > { %v19530_v12 = vrot.slane %v15716_v35, 4  ;;  %v19531_v52 = vrot.slane %v15449_v57, 4  ;;  %v19532_v60 = vrot.slane %v15719_v11, 5  ;;  %v19533_v54 = vrot.slane %v15452_v1, 5  ;;  %v3648_v14 = vld [vmem:[#allocation2 + $0x51] sm:$0xff] }
 0x1c7   : > { %3576 = vst.msk [vmem:[#allocation2 + $0x40] sm:$0xff] %vm3567_vm6, %v3539_v41  ;;  %v19535_v26 = vrot.slane %v15723_v46, 6  ;;  %v19537_v37 = vrot.slane %v19536_v30, 6  ;;  %v3883_v1 = vpack.c.bf16 %v3835_v39, %v3834_v4  ;;  %v15821_v55 = vmul.f32 %v13545_v10, %v13957_v21  ;;  %v19542_v39 = vld [vmem:[#allocation10_spill] sm:$0xff] }
 0x1c8   : > { %v2940_v63 = vsel %vm2410_vm3, %v19530_v12, %v2939_v48  ;;  %v2942_v47 = vsel %vm2410_vm3, %v2939_v48, %v19531_v52  ;;  %v3168_v3 = vsel %vm3117_vm4, %v19532_v60, %v3167_v58  ;;  %v3170_v5 = vsel %vm3117_vm4, %v3167_v58, %v19533_v54  ;;  %3577 = vst.msk [vmem:[#allocation2 + $0x48] sm:$0xff] %vm3567_vm6, %v3540_v43  ;;  %v3750_v48 = vld [vmem:[#allocation2 + $0x63] sm:$0xff]  ;;  %v3751_v60 = vld [vmem:[#allocation2 + $0x6b] sm:$0xff] }
 0x1c9   : > { %v3023_v33 = vadd.f32 %v2940_v63, %v15360_v49  ;;  %v3024_v17 = vadd.f32 %v2942_v47, %v19534_v20  ;;  %v3396_v57 = vsel %vm3345_vm5, %v19535_v26, %v3395_v38  ;;  %v3398_v7 = vsel %vm3345_vm5, %v3395_v38, %v19537_v37  ;;  %v19539_v12 = vld [vmem:[#allocation21_spill] sm:$0xff]  ;;  %4065 = vmatpush.bf16.msra.mxu1 %v3883_v1  ;;  %v19554_v54 = vld [vmem:[#allocation12_spill] sm:$0xff] }
 0x1ca   : > { %v15824_v49 = vmul.f32 %v13545_v10, %v13959_v22  ;;  %v13544_v53 = vunpack.i.l.bf16 %v13543_v40  ;;  %v19538_v38 = vrot.slane %v15407_v8, 1  ;;  %v19540_v63 = vrot.slane %v19539_v12, 1  ;;  %v3717_v10 = vld [vmem:[#allocation2 + $0x6a] sm:$0xff]  ;;  %v13598_v40 = vpop.permute.xlu2 %13597 }
 0x1cb   : > { %v3251_v58 = vadd.f32 %v3168_v3, %v3023_v33  ;;  %v3252_v41 = vadd.f32 %v3170_v5, %v3024_v17  ;;  %v19541_v4 = vrot.slane %v15410_v2, 2  ;;  %v19543_v43 = vrot.slane %v19542_v39, 2  ;;  %v13548_v33 = vpop.permute.xlu1 %13547 }
 0x1cc   : > { %v1292_v52 = vsel %vm1247_vm0, %v19540_v63, %v19538_v38  ;;  %v898_v8 = vmul.f32 %v13544_v53, %v13994_v50  ;;  %v3682_v5 = vmax.f32 %v3614_v28, %v3648_v14  ;;  %v3683_v26 = vmax.f32 %v3615_v27, %v3649_v29 }
 0x1cd   : > { %v1520_v47 = vsel %vm1475_vm1, %v19543_v43, %v19541_v4  ;;  %v3479_v20 = vadd.f32 %v3396_v57, %v3251_v58  ;;  %v3480_v17 = vadd.f32 %v3398_v7, %v3252_v41  ;;  %v3784_v2 = vmax.f32 %v3716_v42, %v3750_v48  ;;  %v13558_v58 = vpop.permute.xlu0 %13557 }
 0x1ce   : > { %v1378_v30 = vadd.f32 %v1292_v52, %v898_v8  ;;  %v3785_v37 = vmax.f32 %v3717_v10, %v3751_v60  ;;  %v13600_v38 = vunpack.i.h.bf16 %v13598_v40  ;;  %v13599_v12 = vunpack.i.l.bf16 %v13598_v40 }
 0x1cf   : > { %v3519_v63 = vadd.f32 %v15275_v44, %v3479_v20  ;;  %v3520_v1 = vadd.f32 %v15275_v44, %v3480_v17  ;;  %v3818_v4 = vmax.f32 %v3682_v5, %v3784_v2  ;;  %v13550_v39 = vunpack.i.h.bf16 %v13548_v33 }
 0x1d0   : > { %v15841_v43 = vadd.f32 %v1520_v47, %v1378_v30  ;;  %v3819_v3 = vmax.f32 %v3683_v26, %v3785_v37  ;;  %v15844_v28 = vmul.f32 %v13600_v38, %v14444_v36  ;;  %v15847_v57 = vmul.f32 %v13600_v38, %v14446_v59 }
 0x1d1   : > { %v3555_v7 = vmax.f32 %v3519_v63, 0.0  ;;  %v3556_v27 = vmax.f32 %v3520_v1, 0.0  ;;  %v15850_v14 = vmul.f32 %v13600_v38, %v14448_v51  ;;  %v15853_v53 = vmul.f32 %v13599_v12, %v14444_v36 }
 0x1d2   : > { %v3875_v44 = vpack.c.bf16 %v3819_v3, %v3818_v4  ;;  %v19189_v29 = vrot.slane %v15844_v28, 4  ;;  %v19188_v42 = vrot.slane %v15847_v57, 5  ;;  %v15858_v48 = vmul.f32 %v13599_v12, %v14446_v59 }
 0x1d3   : > { %3592 = vst.msk [vmem:[#allocation2 + $0xc0] sm:$0xff] %vm3567_vm6, %v3555_v7  ;;  %v19186_v41 = vrot.slane %v15850_v14, 6  ;;  %v19183_v52 = vrot.slane %v15853_v53, 4  ;;  %v15864_v47 = vmul.f32 %v13599_v12, %v14448_v51  ;;  %v15867_v10 = vmul.f32 %v13550_v39, %v14012_v19 }
 0x1d4   : > { %3593 = vst.msk [vmem:[#allocation2 + $0xc8] sm:$0xff] %vm3567_vm6, %v3556_v27  ;;  %4021 = vmatpush.bf16.msra.mxu0 %v3875_v44  ;;  %v19182_v60 = vrot.slane %v15858_v48, 5  ;;  %v15872_v40 = vmul.f32 %v13550_v39, %v14014_v13  ;;  %v15875_v3 = vmul.f32 %v13550_v39, %v14016_v23  ;;  %v13549_v8 = vunpack.i.l.bf16 %v13548_v33  ;;  %v13613_v39 = vpop.permute.xlu2 %13612 }
 0x1d5   : > { %19544 = vst [vmem:[#allocation38_spill] sm:$0xff] %v15864_v47  ;;  %v2900_v5 = vsel %vm2410_vm3, %v19183_v52, %v19189_v29  ;;  %v19181_v20 = vrot.slane %v15864_v47, 6  ;;  %v19184_v17 = vrot.slane %v15867_v10, 2  ;;  %v13560_v26 = vunpack.i.h.bf16 %v13558_v58  ;;  %v19550_v52 = vld [vmem:[#allocation11_spill] sm:$0xff] }
 0x1d6   : > { %v3128_v2 = vsel %vm3117_vm4, %v19182_v60, %v19188_v42  ;;  %v19185_v30 = vrot.slane %v15872_v40, 3  ;;  %v19187_v33 = vrot.slane %v15875_v3, 4  ;;  %v15892_v37 = vmul.f32 %v13549_v8, %v13957_v21 }
 0x1d7   : > { %v3356_v38 = vsel %vm3345_vm5, %v19181_v20, %v19186_v41  ;;  %v19545_v12 = vrot.slane %v15593_v31, 2  ;;  %v15905_v1 = vmul.f32 %v13549_v8, %v13959_v22  ;;  %v912_v4 = vmul.f32 %v13560_v26, %v13994_v50 }
 0x1d8   : > { %v19546_v21 = vrot.slane %v15596_v61, 3  ;;  %v19547_v27 = vrot.slane %v15599_v15, 4  ;;  %v13559_v20 = vunpack.i.l.bf16 %v13558_v58  ;;  %v19548_v61 = vld [vmem:[#allocation18_spill] sm:$0xff]  ;;  %v19552_v15 = vld [vmem:[#allocation43_spill] sm:$0xff]  ;;  %v19555_v41 = vrot.slane %v19554_v54, 2 }
 0x1d9   : > { %v1965_v63 = vsel %vm1475_vm1, %v19184_v17, %v19545_v12  ;;  %v15920_v12 = vpop.permute.xlu1 %13562  ;;  %v19549_v60 = vrot.slane %v19548_v61, 1  ;;  %v19551_v17 = vrot.slane %v19550_v52, 1 }
 0x1da   : > { %v2193_v7 = vsel %vm2182_vm2, %v19185_v30, %v19546_v21  ;;  %v2421_v31 = vsel %vm2410_vm3, %v19187_v33, %v19547_v27  ;;  %v2068_v8 = vadd.f32 %v1965_v63, %v15796_v34  ;;  %v19553_v30 = vrot.slane %v19552_v15, 2  ;;  %v19558_v15 = vld [vmem:[#allocation17_spill] sm:$0xff] }
 0x1db   : > { %v1320_v21 = vsel %vm1247_vm0, %v19551_v17, %v19549_v60  ;;  %v13615_v34 = vunpack.i.h.bf16 %v13613_v39  ;;  %v13614_v63 = vunpack.i.l.bf16 %v13613_v39  ;;  %v1902_v42 = vmul.f32 %v13559_v20, %v14012_v19 }
 0x1dc   : > { %v1548_v27 = vsel %vm1475_vm1, %v19555_v41, %v19553_v30  ;;  %v2296_v33 = vadd.f32 %v2193_v7, %v2068_v8  ;;  %v1392_v44 = vadd.f32 %v1320_v21, %v912_v4  ;;  %v2129_v58 = vmul.f32 %v13559_v20, %v14014_v13 }
 0x1dd   : > { %v2357_v61 = vmul.f32 %v13559_v20, %v14016_v23  ;;  %v13565_v52 = vunpack.i.h.bf16 %v15920_v12  ;;  %v15940_v17 = vmul.f32 %v13615_v34, %v14012_v19  ;;  %v15943_v54 = vmul.f32 %v13615_v34, %v14014_v13  ;;  %v19562_v20 = vld [vmem:[#allocation28_spill] sm:$0xff] }
 0x1de   : > { %v2524_v26 = vadd.f32 %v2421_v31, %v2296_v33  ;;  %v15937_v60 = vadd.f32 %v1548_v27, %v1392_v44  ;;  %v1996_v41 = vrot.slane %v1902_v42, 2  ;;  %v2224_v30 = vrot.slane %v2129_v58, 3 }
 0x1df   : > { %v2452_v4 = vrot.slane %v2357_v61, 4  ;;  %v15946_v39 = vmul.f32 %v13615_v34, %v14016_v23  ;;  %v1881_v33 = vmul.f32 %v13614_v63, %v14012_v19  ;;  %v19556_v31 = vrot.slane %v15584_v16, 2  ;;  %v19561_v61 = vld [vmem:[#allocation19_spill] sm:$0xff] }
 0x1e0   : > { %v3003_v7 = vadd.f32 %v2900_v5, %v2524_v26  ;;  %v19557_v21 = vrot.slane %v15625_v25, 2  ;;  %v19559_v27 = vrot.slane %v19558_v15, 3  ;;  %v19560_v5 = vrot.slane %v15628_v18, 3 }
 0x1e1   : > { %v1997_v44 = vsel %vm1475_vm1, %v19556_v31, %v1996_v41  ;;  %v19563_v47 = vrot.slane %v19562_v20, 4  ;;  %v19564_v25 = vrot.slane %v15631_v9, 4  ;;  %v1955_v15 = vrot.slane %v1881_v33, 2 }
 0x1e2   : > { %v1999_v42 = vsel %vm1475_vm1, %v1996_v41, %v19557_v21  ;;  %v2225_v34 = vsel %vm2182_vm2, %v19559_v27, %v2224_v30  ;;  %v2227_v26 = vsel %vm2182_vm2, %v2224_v30, %v19560_v5  ;;  %v3231_v58 = vadd.f32 %v3128_v2, %v3003_v7 }
 0x1e3   : > { %v2084_v29 = vadd.f32 %v1997_v44, %v19561_v61  ;;  %v2085_v8 = vadd.f32 %v1999_v42, %v15841_v43  ;;  %v2453_v31 = vsel %vm2410_vm3, %v19563_v47, %v2452_v4  ;;  %v2455_v41 = vsel %vm2410_vm3, %v2452_v4, %v19564_v25  ;;  %v13628_v44 = vpop.permute.xlu2 %13627 }
 0x1e4   : > { %v19191_v21 = vrot.slane %v15946_v39, 4  ;;  %v2108_v18 = vmul.f32 %v13614_v63, %v14014_v13  ;;  %v3459_v27 = vadd.f32 %v3356_v38, %v3231_v58  ;;  %v2822_v7 = vmul.f32 %v13565_v52, %v14444_v36  ;;  %v15984_v63 = vld [vmem:[%s19273_s12] ss:$0 sm:$0xff] }
 0x1e5   : > { %v2312_v30 = vadd.f32 %v2225_v34, %v2084_v29  ;;  %v2313_v2 = vadd.f32 %v2227_v26, %v2085_v8  ;;  %v19565_v43 = vrot.slane %v15940_v17, 2  ;;  %v3049_v9 = vmul.f32 %v13565_v52, %v14446_v59 }
 0x1e6   : > { %v2183_v47 = vrot.slane %v2108_v18, 3  ;;  %v3277_v4 = vmul.f32 %v13565_v52, %v14448_v51  ;;  %v3499_v29 = vadd.f32 %v15984_v63, %v3459_v27  ;;  %v2901_v33 = vrot.slane %v2822_v7, 4 }
 0x1e7   : > { %v15977_v20 = vsel %vm1475_vm1, %v1955_v15, %v19565_v43  ;;  %v15987_v38 = vadd.f32 %v2453_v31, %v2312_v30  ;;  %v15989_v8 = vadd.f32 %v2455_v41, %v2313_v2  ;;  %v19566_v42 = vrot.slane %v15943_v54, 3 }
 0x1e8   : > { %v3129_v5 = vrot.slane %v3049_v9, 5  ;;  %v3357_v52 = vrot.slane %v3277_v4, 6  ;;  %v13564_v26 = vunpack.i.l.bf16 %v15920_v12  ;;  %v3535_v58 = vmax.f32 %v3499_v29, 0.0 }
 0x1e9   : > { %v15994_v34 = vsel %vm2182_vm2, %v2183_v47, %v19566_v42  ;;  %v19567_v61 = vrot.slane %v15844_v28, 4  ;;  %v19568_v31 = vrot.slane %v15702_v32, 4  ;;  %v13630_v15 = vunpack.i.h.bf16 %v13628_v44 }
 0x1ea   : > { %v19569_v30 = vrot.slane %v15847_v57, 5  ;;  %v19570_v12 = vrot.slane %v15705_v24, 5  ;;  %3572 = vst.msk [vmem:[#allocation2 + $0x20] sm:$0xff] %vm3567_vm6, %v3535_v58  ;;  %v19571_v28 = vrot.slane %v15850_v14, 6  ;;  %v19572_v43 = vrot.slane %v15711_v62, 6 }
 0x1eb   : > { %v2902_v25 = vsel %vm2410_vm3, %v19567_v61, %v2901_v33  ;;  %v2904_v41 = vsel %vm2410_vm3, %v2901_v33, %v19568_v31  ;;  %v16020_v57 = vmul.f32 %v13630_v15, %v14444_v36  ;;  %v16023_v24 = vmul.f32 %v13630_v15, %v14446_v59  ;;  %v13578_v15 = vpop.permute.xlu1 %13577 }
 0x1ec   : > { %v3004_v18 = vadd.f32 %v2902_v25, %v15697_v45  ;;  %v3005_v27 = vadd.f32 %v2904_v41, %v15699_v0  ;;  %v3130_v2 = vsel %vm3117_vm4, %v19569_v30, %v3129_v5  ;;  %v3132_v7 = vsel %vm3117_vm4, %v3129_v5, %v19570_v12  ;;  %v19577_v5 = vld [vmem:[#allocation24_spill] sm:$0xff] }
 0x1ed   : > { %v3358_v32 = vsel %vm3345_vm5, %v19571_v28, %v3357_v52  ;;  %v3360_v45 = vsel %vm3345_vm5, %v3357_v52, %v19572_v43  ;;  %v1917_v0 = vmul.f32 %v13564_v26, %v14012_v19  ;;  %19573 = vst [vmem:[#allocation42_spill] sm:$0xff] %v16020_v57  ;;  %v13629_v4 = vunpack.i.l.bf16 %v13628_v44  ;;  %v19579_v26 = vld [vmem:[#allocation14_spill] sm:$0xff]  ;;  %v19585_v28 = vld [vmem:[#allocation25_spill] sm:$0xff] }
 0x1ee   : > { %v3232_v47 = vadd.f32 %v3130_v2, %v3004_v18  ;;  %v3233_v9 = vadd.f32 %v3132_v7, %v3005_v27  ;;  %19574 = vst [vmem:[#allocation16_spill] sm:$0xff] %v16023_v24  ;;  %v19575_v33 = vrot.slane %v15535_v56, 1  ;;  %v19576_v62 = vrot.slane %v15892_v37, 1  ;;  %v13573_v18 = vpop.permute.xlu0 %13572  ;;  %v19581_v27 = vld [vmem:[#allocation39_spill] sm:$0xff] }
 0x1ef   : > { %v2026_v29 = vrot.slane %v1917_v0, 2  ;;  %v19578_v52 = vrot.slane %v19577_v5, 1  ;;  %v19580_v58 = vrot.slane %v19579_v26, 1  ;;  %v2336_v44 = vmul.f32 %v13629_v4, %v14016_v23 }
 0x1f0   : > { %v1256_v42 = vsel %vm1247_vm0, %v19576_v62, %v19575_v33  ;;  %v3460_v25 = vadd.f32 %v3358_v32, %v3232_v47  ;;  %v3461_v31 = vadd.f32 %v3360_v45, %v3233_v9  ;;  %v19582_v56 = vrot.slane %v19581_v27, 2  ;;  %v19587_v32 = vld [vmem:[#allocation15_spill] sm:$0xff]  ;;  %v19590_v9 = vld [vmem:[#allocation29_spill] sm:$0xff] }
 0x1f1   : > { %v1288_v61 = vsel %vm1247_vm0, %v19580_v58, %v19578_v52  ;;  %v19583_v2 = vrot.slane %v15538_v6, 2  ;;  %v19584_v12 = vrot.slane %v15905_v1, 2  ;;  %v19586_v43 = vrot.slane %v19585_v28, 2  ;;  %v3612_v62 = vld [vmem:[#allocation2 + $0x40] sm:$0xff]  ;;  %v3647_v27 = vld [vmem:[#allocation2 + $0x49] sm:$0xff] }
 0x1f2   : > { %v2027_v30 = vsel %vm1475_vm1, %v19582_v56, %v2026_v29  ;;  %v19588_v45 = vrot.slane %v19587_v32, 2  ;;  %v19589_v47 = vrot.slane %v15584_v16, 2  ;;  %v19591_v4 = vrot.slane %v19590_v9, 2  ;;  %v3613_v29 = vld [vmem:[#allocation2 + $0x48] sm:$0xff]  ;;  %v3714_v56 = vld [vmem:[#allocation2 + $0x52] sm:$0xff] }
 0x1f3   : > { %v1484_v7 = vsel %vm1475_vm1, %v19584_v12, %v19583_v2  ;;  %v3500_v6 = vadd.f32 %v15984_v63, %v3460_v25  ;;  %v3501_v5 = vadd.f32 %v15984_v63, %v3461_v31  ;;  %v16059_v52 = vadd.f32 %v2027_v30, %v15937_v60  ;;  %v3646_v58 = vld [vmem:[#allocation2 + $0x41] sm:$0xff]  ;;  %v3748_v30 = vld [vmem:[#allocation2 + $0x53] sm:$0xff] }
 0x1f4   : > { %v1516_v0 = vsel %vm1475_vm1, %v19588_v45, %v19586_v43  ;;  %v1995_v33 = vsel %vm1475_vm1, %v19591_v4, %v19589_v47  ;;  %v2411_v26 = vrot.slane %v2336_v44, 4  ;;  %v13580_v2 = vunpack.i.h.bf16 %v13578_v15  ;;  %v3715_v60 = vld [vmem:[#allocation2 + $0x5a] sm:$0xff] }
 0x1f5   : > { %v13579_v12 = vunpack.i.l.bf16 %v13578_v15  ;;  %v19592_v16 = vrot.slane %v15892_v37, 1  ;;  %v19593_v28 = vrot.slane %v15821_v55, 1  ;;  %v19594_v32 = vrot.slane %v15905_v1, 2  ;;  %v3749_v44 = vld [vmem:[#allocation2 + $0x5b] sm:$0xff] }
 0x1f6   : > { %v19595_v25 = vrot.slane %v15824_v49, 2  ;;  %v3536_v45 = vmax.f32 %v3500_v6, 0.0  ;;  %v3537_v47 = vmax.f32 %v3501_v5, 0.0  ;;  %v16074_v15 = vsel %vm2410_vm3, %v2411_v26, %v19191_v21  ;;  %v3662_v21 = vld [vmem:[#allocation2 + $0xc1] sm:$0xff] }
 0x1f7   : > { %v1254_v43 = vsel %vm1247_vm0, %v19593_v28, %v19592_v16  ;;  %19596 = vst [vmem:[#allocation21_spill] sm:$0xff] %v16074_v15  ;;  %v13575_v37 = vunpack.i.h.bf16 %v13573_v18  ;;  %v896_v9 = vmul.f32 %v13580_v2, %v13994_v50  ;;  %v880_v4 = vmul.f32 %v13579_v12, %v13994_v50  ;;  %v3628_v2 = vld [vmem:[#allocation2 + $0xc0] sm:$0xff] }
 0x1f8   : > { %v1482_v31 = vsel %vm1475_vm1, %v19595_v25, %v19594_v32  ;;  %v13574_v1 = vunpack.i.l.bf16 %v13573_v18  ;;  %v3680_v16 = vmax.f32 %v3612_v62, %v3646_v58  ;;  %3573 = vst.msk [vmem:[#allocation2 + $0x28] sm:$0xff] %vm3567_vm6, %v3536_v45  ;;  %v3681_v32 = vmax.f32 %v3613_v29, %v3647_v27 }
 0x1f9   : > { %v879_v28 = vmul.f32 %v13575_v37, %v13994_v50  ;;  %v3782_v25 = vmax.f32 %v3714_v56, %v3748_v30  ;;  %v3783_v6 = vmax.f32 %v3715_v60, %v3749_v44  ;;  %3574 = vst.msk [vmem:[#allocation2 + $0x30] sm:$0xff] %vm3567_vm6, %v3537_v47  ;;  %v1376_v5 = vadd.f32 %v1288_v61, %v896_v9  ;;  %v3629_v56 = vld [vmem:[#allocation2 + $0xc8] sm:$0xff]  ;;  %v3730_v47 = vld [vmem:[#allocation2 + $0xd2] sm:$0xff] }
 0x1fa   : > { %v1360_v41 = vadd.f32 %v1256_v42, %v880_v4  ;;  %v2839_v26 = vmul.f32 %v13574_v1, %v14444_v36  ;;  %v3066_v14 = vmul.f32 %v13574_v1, %v14446_v59  ;;  %v3294_v18 = vmul.f32 %v13574_v1, %v14448_v51  ;;  %v3663_v30 = vld [vmem:[#allocation2 + $0xc9] sm:$0xff]  ;;  %v3764_v9 = vld [vmem:[#allocation2 + $0xd3] sm:$0xff]  ;;  %v13588_v4 = vpop.permute.xlu0 %13587 }
 0x1fb   : > { %v1359_v12 = vadd.f32 %v1254_v43, %v879_v28  ;;  %v3816_v62 = vmax.f32 %v3680_v16, %v3782_v25  ;;  %v3817_v58 = vmax.f32 %v3681_v32, %v3783_v6  ;;  %v1604_v45 = vadd.f32 %v1516_v0, %v1376_v5  ;;  %v19597_v28 = vld [vmem:[#allocation20_spill] sm:$0xff]  ;;  %v13593_v6 = vpop.permute.xlu1 %13592 }
 0x1fc   : > { %v16084_v37 = vadd.f32 %v1484_v7, %v1360_v41  ;;  %v2935_v29 = vrot.slane %v2839_v26, 4  ;;  %v3163_v27 = vrot.slane %v3066_v14, 5  ;;  %v3391_v42 = vrot.slane %v3294_v18, 6  ;;  %v19600_v14 = vld [vmem:[#allocation31_spill] sm:$0xff]  ;;  %v19603_v26 = vld [vmem:[#allocation34_spill] sm:$0xff]  ;;  %v19605_v18 = vld [vmem:[#allocation32_spill] sm:$0xff] }
 0x1fd   : > { %v16086_v60 = vadd.f32 %v1482_v31, %v1359_v12  ;;  %v3874_v61 = vpack.c.bf16 %v3817_v58, %v3816_v62  ;;  %v3696_v44 = vmax.f32 %v3628_v2, %v3662_v21  ;;  %v2083_v43 = vadd.f32 %v1995_v33, %v1604_v45  ;;  %v3731_v32 = vld [vmem:[#allocation2 + $0xda] sm:$0xff]  ;;  %v19607_v58 = vld [vmem:[#allocation13_spill] sm:$0xff] }
 0x1fe   : > { %v19598_v1 = vrot.slane %v19597_v28, 4  ;;  %v19599_v41 = vrot.slane %v15716_v35, 4  ;;  %v19601_v0 = vrot.slane %v19600_v14, 5  ;;  %v3765_v25 = vld [vmem:[#allocation2 + $0xdb] sm:$0xff]  ;;  %v19604_v33 = vrot.slane %v15719_v11, 5  ;;  %v19609_v11 = vld [vmem:[#allocation30_spill] sm:$0xff] }
 0x1ff   : > { %v19602_v21 = vld [vmem:[#allocation35_spill] sm:$0xff]  ;;  %v19606_v62 = vrot.slane %v19605_v18, 6  ;;  %4022 = vmatpush.bf16.msra.mxu0 %v3874_v61  ;;  %v2311_v45 = vadd.f32 %v19607_v58, %v2083_v43  ;;  %v13590_v57 = vunpack.i.h.bf16 %v13588_v4 }
 0x200   : > { %v2936_v16 = vsel %vm2410_vm3, %v19598_v1, %v2935_v29  ;;  %v2938_v7 = vsel %vm2410_vm3, %v2935_v29, %v19599_v41  ;;  %v3164_v31 = vsel %vm3117_vm4, %v19601_v0, %v3163_v27  ;;  %v3166_v12 = vsel %vm3117_vm4, %v3163_v27, %v19604_v33 }
 0x201   : > { %v3021_v5 = vadd.f32 %v2936_v16, %v19602_v21  ;;  %v3022_v2 = vadd.f32 %v2938_v7, %v19603_v26  ;;  %v3392_v35 = vsel %vm3345_vm5, %v19606_v62, %v3391_v42  ;;  %v19608_v29 = vrot.slane %v15723_v46, 6 }
 0x202   : > { %v3697_v41 = vmax.f32 %v3629_v56, %v3663_v30  ;;  %v3798_v0 = vmax.f32 %v3730_v47, %v3764_v9  ;;  %v3799_v7 = vmax.f32 %v3731_v32, %v3765_v25  ;;  %v13595_v26 = vunpack.i.h.bf16 %v13593_v6  ;;  %v13603_v58 = vpop.permute.xlu0 %13602 }
 0x203   : > { %v3394_v1 = vsel %vm3345_vm5, %v3391_v42, %v19608_v29  ;;  %v3249_v16 = vadd.f32 %v3164_v31, %v3021_v5  ;;  %v3250_v21 = vadd.f32 %v3166_v12, %v3022_v2  ;;  %v16110_v24 = vadd.f32 %v19609_v11, %v2311_v45  ;;  %v19610_v45 = vld [vmem:[#allocation40_spill] sm:$0xff] }
 0x204   : > { %v3832_v27 = vmax.f32 %v3696_v44, %v3798_v0  ;;  %v13594_v33 = vunpack.i.l.bf16 %v13593_v6  ;;  %v3833_v15 = vmax.f32 %v3697_v41, %v3799_v7  ;;  %v16113_v43 = vmul.f32 %v13595_v26, %v13959_v22  ;;  %v19612_v41 = vld [vmem:[#allocation41_spill] sm:$0xff] }
 0x205   : > { %v3477_v62 = vadd.f32 %v3392_v35, %v3249_v16  ;;  %v3478_v61 = vadd.f32 %v3394_v1, %v3250_v21  ;;  %v1884_v42 = vmul.f32 %v13590_v57, %v14012_v19  ;;  %v2111_v30 = vmul.f32 %v13590_v57, %v14014_v13 }
 0x206   : > { %v2144_v46 = vmul.f32 %v13594_v33, %v14014_v13  ;;  %v2372_v56 = vmul.f32 %v13594_v33, %v14016_v23  ;;  %v3882_v9 = vpack.c.bf16 %v3833_v15, %v3832_v27  ;;  %v1476_v31 = vrot.slane %v16113_v43, 2 }
 0x207   : > { %v3517_v47 = vadd.f32 %v15984_v63, %v3477_v62  ;;  %v3518_v44 = vadd.f32 %v15984_v63, %v3478_v61  ;;  %v1960_v6 = vrot.slane %v1884_v42, 2  ;;  %v2188_v22 = vrot.slane %v2111_v30, 3 }
 0x208   : > { %v2254_v32 = vrot.slane %v2144_v46, 3  ;;  %v2482_v25 = vrot.slane %v2372_v56, 4  ;;  %4066 = vmatpush.bf16.msra.mxu1 %v3882_v9  ;;  %v2339_v12 = vmul.f32 %v13590_v57, %v14016_v23  ;;  %v13589_v35 = vunpack.i.l.bf16 %v13588_v4 }
 0x209   : > { %v3553_v5 = vmax.f32 %v3517_v47, 0.0  ;;  %v3554_v2 = vmax.f32 %v3518_v44, 0.0  ;;  %v19611_v29 = vrot.slane %v19610_v45, 3  ;;  %v19613_v0 = vrot.slane %v19612_v41, 4  ;;  %v19620_v41 = vld [vmem:[#allocation27_spill] sm:$0xff] }
 0x20a   : > { %v19614_v16 = vrot.slane %v15867_v10, 2  ;;  %v19615_v7 = vrot.slane %v15872_v40, 3  ;;  %v2416_v11 = vrot.slane %v2339_v12, 4  ;;  %v1883_v27 = vmul.f32 %v13589_v35, %v14012_v19 }
 0x20b   : > { %v2255_v1 = vsel %vm2182_vm2, %v19611_v29, %v2254_v32  ;;  %v2483_v15 = vsel %vm2410_vm3, %v19613_v0, %v2482_v25  ;;  %3590 = vst.msk [vmem:[#allocation2 + $0xb0] sm:$0xff] %vm3567_vm6, %v3553_v5  ;;  %v2110_v33 = vmul.f32 %v13589_v35, %v14014_v13  ;;  %v16142_v10 = vmul.f32 %v13589_v35, %v14016_v23 }
 0x20c   : > { %v1963_v21 = vsel %vm1475_vm1, %v1960_v6, %v19614_v16  ;;  %v2191_v26 = vsel %vm2182_vm2, %v2188_v22, %v19615_v7  ;;  %v2327_v57 = vadd.f32 %v2255_v1, %v16059_v52  ;;  %3591 = vst.msk [vmem:[#allocation2 + $0xb8] sm:$0xff] %vm3567_vm6, %v3554_v2  ;;  %v13605_v62 = vunpack.i.h.bf16 %v13603_v58  ;;  %v19618_v1 = vld [vmem:[#allocation36_spill] sm:$0xff] }
 0x20d   : > { %v2067_v4 = vadd.f32 %v1963_v21, %v16084_v37  ;;  %v13604_v40 = vunpack.i.l.bf16 %v13603_v58  ;;  %v19616_v56 = vrot.slane %v15875_v3, 4  ;;  %v1958_v37 = vrot.slane %v1883_v27, 2 }
 0x20e   : > { %v16144_v61 = vadd.f32 %v2483_v15, %v2327_v57  ;;  %v2186_v42 = vrot.slane %v2110_v33, 3  ;;  %v2414_v19 = vrot.slane %v16142_v10, 4  ;;  %v2837_v30 = vmul.f32 %v13605_v62, %v14444_v36  ;;  %v13608_v33 = vpop.permute.xlu1 %13607 }
 0x20f   : > { %v2295_v46 = vadd.f32 %v2191_v26, %v2067_v4  ;;  %v2419_v52 = vsel %vm2410_vm3, %v2416_v11, %v19616_v56  ;;  %v3064_v13 = vmul.f32 %v13605_v62, %v14446_v59  ;;  %v1961_v23 = vsel %vm1475_vm1, %v1958_v37, %v1960_v6  ;;  %v19625_v4 = vld [vmem:[#allocation23_spill] sm:$0xff] }
 0x210   : > { %v3292_v44 = vmul.f32 %v13605_v62, %v14448_v51  ;;  %v2836_v9 = vmul.f32 %v13604_v40, %v14444_v36  ;;  %v2066_v3 = vadd.f32 %v1961_v23, %v16086_v60  ;;  %v19617_v32 = vrot.slane %v15943_v54, 3  ;;  %v3712_v23 = vld [vmem:[#allocation2 + $0x42] sm:$0xff] }
 0x211   : > { %v16152_v47 = vadd.f32 %v2419_v52, %v2295_v46  ;;  %v2189_v5 = vsel %vm2182_vm2, %v2186_v42, %v2188_v22  ;;  %v2417_v2 = vsel %vm2410_vm3, %v2414_v19, %v2416_v11  ;;  %v2931_v12 = vrot.slane %v2837_v30, 4 }
 0x212   : > { %v16161_v25 = vsel %vm2182_vm2, %v19617_v32, %v2186_v42  ;;  %v3159_v35 = vrot.slane %v3064_v13, 5  ;;  %v3387_v6 = vrot.slane %v3292_v44, 6  ;;  %v2929_v58 = vrot.slane %v2836_v9, 4  ;;  %v3645_v13 = vld [vmem:[#allocation2 + $0x39] sm:$0xff]  ;;  %v19629_v9 = vld [vmem:[#allocation37_spill] sm:$0xff] }
 0x213   : > { %v2294_v45 = vadd.f32 %v2189_v5, %v2066_v3  ;;  %v3063_v29 = vmul.f32 %v13604_v40, %v14446_v59  ;;  %v3291_v60 = vmul.f32 %v13604_v40, %v14448_v51  ;;  %v19619_v54 = vrot.slane %v19618_v1, 1 }
 0x214   : > { %v19621_v0 = vrot.slane %v19620_v41, 1  ;;  %v19622_v22 = vrot.slane %v19597_v28, 4  ;;  %v19623_v21 = vrot.slane %v19600_v14, 5  ;;  %v19624_v26 = vrot.slane %v19605_v18, 6 }
 0x215   : > { %v19626_v11 = vrot.slane %v19625_v4, 4  ;;  %v16186_v62 = vadd.f32 %v2417_v2, %v2294_v45  ;;  %v2932_v28 = vsel %vm2410_vm3, %v2929_v58, %v2931_v12  ;;  %v3157_v56 = vrot.slane %v3063_v29, 5  ;;  %v3610_v2 = vld [vmem:[#allocation2 + $0x30] sm:$0xff]  ;;  %v19634_v45 = vld [vmem:[#allocation44_spill] sm:$0xff] }
 0x216   : > { %v1250_v15 = vsel %vm1247_vm0, %v19621_v0, %v19619_v54  ;;  %v2934_v16 = vsel %vm2410_vm3, %v2931_v12, %v19622_v22  ;;  %v3162_v7 = vsel %vm3117_vm4, %v3159_v35, %v19623_v21  ;;  %v3390_v57 = vsel %vm3345_vm5, %v3387_v6, %v19624_v26  ;;  %v3644_v12 = vld [vmem:[#allocation2 + $0x31] sm:$0xff] }
 0x217   : > { %v2930_v27 = vsel %vm2410_vm3, %v19626_v11, %v2929_v58  ;;  %v3020_v40 = vadd.f32 %v2934_v16, %v15989_v8  ;;  %v3019_v14 = vadd.f32 %v2932_v28, %v15987_v38  ;;  %v3385_v52 = vrot.slane %v3291_v60, 6  ;;  %v3746_v58 = vld [vmem:[#allocation2 + $0x43] sm:$0xff]  ;;  %v3747_v21 = vld [vmem:[#allocation2 + $0x4b] sm:$0xff] }
 0x218   : > { %v3018_v46 = vadd.f32 %v2930_v27, %v16110_v24  ;;  %v19627_v18 = vrot.slane %v15821_v55, 1  ;;  %v19628_v42 = vmov %v19619_v54  ;;  %v19630_v3 = vrot.slane %v19629_v9, 2  ;;  %v3713_v16 = vld [vmem:[#allocation2 + $0x4a] sm:$0xff] }
 0x219   : > { %v3248_v44 = vadd.f32 %v3162_v7, %v3020_v40  ;;  %v19631_v24 = vrot.slane %v15824_v49, 2  ;;  %v19633_v55 = vrot.slane %v15940_v17, 2  ;;  %v19635_v29 = vrot.slane %v19634_v45, 5  ;;  %v13618_v7 = vpop.permute.xlu0 %13617 }
 0x21a   : > { %v1252_v30 = vsel %vm1247_vm0, %v19628_v42, %v19627_v18  ;;  %v1478_v8 = vsel %vm1475_vm1, %v1476_v31, %v19630_v3  ;;  %v19632_v38 = vmov %v19630_v3  ;;  %v3160_v43 = vsel %vm3117_vm4, %v3157_v56, %v3159_v35  ;;  %v19636_v31 = vld [vmem:[#allocation45_spill] sm:$0xff]  ;;  %v13623_v3 = vpop.permute.xlu1 %13622 }
 0x21b   : > { %v1480_v32 = vsel %vm1475_vm1, %v19632_v38, %v19631_v24  ;;  %v1959_v5 = vsel %vm1475_vm1, %v19633_v55, %v1958_v37  ;;  %v3158_v60 = vsel %vm3117_vm4, %v19635_v29, %v3157_v56  ;;  %v19637_v1 = vrot.slane %v19636_v31, 6  ;;  %v3611_v37 = vld [vmem:[#allocation2 + $0x38] sm:$0xff] }
 0x21c   : > { %v3388_v54 = vsel %vm3345_vm5, %v3385_v52, %v3387_v6  ;;  %v3476_v41 = vadd.f32 %v3390_v57, %v3248_v44  ;;  %v3246_v0 = vadd.f32 %v3158_v60, %v3018_v46  ;;  %v3247_v17 = vadd.f32 %v3160_v43, %v3019_v14  ;;  %v3710_v60 = vld [vmem:[#allocation2 + $0x32] sm:$0xff] }
 0x21d   : > { %v3386_v49 = vsel %vm3345_vm5, %v19637_v1, %v3385_v52  ;;  %v13610_v22 = vunpack.i.h.bf16 %v13608_v33  ;;  %v13609_v26 = vunpack.i.l.bf16 %v13608_v33  ;;  %v3678_v4 = vmax.f32 %v3610_v2, %v3644_v12  ;;  %v3609_v2 = vld [vmem:[#allocation2 + $0x28] sm:$0xff]  ;;  %v3744_v43 = vld [vmem:[#allocation2 + $0x33] sm:$0xff] }
 0x21e   : > { %v3679_v11 = vmax.f32 %v3611_v37, %v3645_v13  ;;  %v3780_v27 = vmax.f32 %v3712_v23, %v3746_v58  ;;  %v3516_v35 = vadd.f32 %v15984_v63, %v3476_v41  ;;  %v3474_v40 = vadd.f32 %v3386_v49, %v3246_v0  ;;  %v3642_v12 = vld [vmem:[#allocation2 + $0x21] sm:$0xff] }
 0x21f   : > { %v3475_v28 = vadd.f32 %v3388_v54, %v3247_v17  ;;  %v878_v56 = vmul.f32 %v13610_v22, %v13994_v50  ;;  %v877_v6 = vmul.f32 %v13609_v26, %v13994_v50  ;;  %v3781_v57 = vmax.f32 %v3713_v16, %v3747_v21  ;;  %v3608_v54 = vld [vmem:[#allocation2 + $0x20] sm:$0xff] }
 0x220   : > { %v3814_v46 = vmax.f32 %v3678_v4, %v3780_v27  ;;  %v13620_v14 = vunpack.i.h.bf16 %v13618_v7  ;;  %v3552_v52 = vmax.f32 %v3516_v35, 0.0  ;;  %v3514_v18 = vadd.f32 %v15984_v63, %v3474_v40  ;;  %v3711_v41 = vld [vmem:[#allocation2 + $0x3a] sm:$0xff] }
 0x221   : > { %v3515_v42 = vadd.f32 %v15984_v63, %v3475_v28  ;;  %v1358_v33 = vadd.f32 %v1252_v30, %v878_v56  ;;  %v1357_v44 = vadd.f32 %v1250_v15, %v877_v6  ;;  %v3815_v13 = vmax.f32 %v3679_v11, %v3781_v57  ;;  %v3643_v30 = vld [vmem:[#allocation2 + $0x29] sm:$0xff]  ;;  %v3745_v0 = vld [vmem:[#allocation2 + $0x3b] sm:$0xff] }
 0x222   : > { %v16224_v23 = vmul.f32 %v13620_v14, %v14444_v36  ;;  %v16227_v9 = vmul.f32 %v13620_v14, %v14446_v59  ;;  %3589 = vst.msk [vmem:[#allocation2 + $0xa8] sm:$0xff] %vm3567_vm6, %v3552_v52  ;;  %v3550_v50 = vmax.f32 %v3514_v18, 0.0  ;;  %v16231_v55 = vmul.f32 %v13620_v14, %v14448_v51  ;;  %v19638_v14 = vld [vmem:[#allocation33_spill] sm:$0xff] }
 0x223   : > { %v3551_v24 = vmax.f32 %v3515_v42, 0.0  ;;  %v1586_v38 = vadd.f32 %v1480_v32, %v1358_v33  ;;  %v1585_v15 = vadd.f32 %v1478_v8, %v1357_v44  ;;  %v3873_v58 = vpack.c.bf16 %v3815_v13, %v3814_v46  ;;  %v19640_v42 = vld [vmem:[#allocation22_spill] sm:$0xff] }
 0x224   : > { %v2893_v45 = vrot.slane %v16224_v23, 4  ;;  %v3121_v29 = vrot.slane %v16227_v9, 5  ;;  %3587 = vst.msk [vmem:[#allocation2 + $0x98] sm:$0xff] %vm3567_vm6, %v3550_v50  ;;  %v3349_v1 = vrot.slane %v16231_v55, 6  ;;  %v13619_v32 = vunpack.i.l.bf16 %v13618_v7  ;;  %v19642_v13 = vld [vmem:[#allocation26_spill] sm:$0xff] }
 0x225   : > { %v2065_v31 = vadd.f32 %v1959_v5, %v1586_v38  ;;  %v13625_v49 = vunpack.i.h.bf16 %v13623_v3  ;;  %3588 = vst.msk [vmem:[#allocation2 + $0xa0] sm:$0xff] %vm3567_vm6, %v3551_v24  ;;  %v2064_v8 = vadd.f32 %v15977_v20, %v1585_v15  ;;  %4023 = vmatpush.bf16.msra.mxu0 %v3873_v58  ;;  %v13624_v17 = vunpack.i.l.bf16 %v13623_v3 }
 0x226   : > { %v3676_v22 = vmax.f32 %v3608_v54, %v3642_v12  ;;  %v3677_v37 = vmax.f32 %v3609_v2, %v3643_v30  ;;  %v2852_v16 = vmul.f32 %v13619_v32, %v14444_v36  ;;  %v3778_v26 = vmax.f32 %v3710_v60, %v3744_v43  ;;  %v2638_v32 = vpop.permute.xlu0 %2637 }
 0x227   : > { %v3079_v21 = vmul.f32 %v13625_v49, %v14446_v59  ;;  %v3307_v5 = vmul.f32 %v13625_v49, %v14448_v51  ;;  %v2819_v7 = vmul.f32 %v13624_v17, %v14444_v36  ;;  %v3046_v4 = vmul.f32 %v13624_v17, %v14446_v59  ;;  %v19646_v49 = vld [vmem:[#allocation38_spill] sm:$0xff] }
 0x228   : > { %v3274_v11 = vmul.f32 %v13624_v17, %v14448_v51  ;;  %v3779_v27 = vmax.f32 %v3711_v41, %v3745_v0  ;;  %v2961_v35 = vrot.slane %v2852_v16, 4  ;;  %v3812_v28 = vmax.f32 %v3676_v22, %v3778_v26  ;;  %v3660_v17 = vld [vmem:[#allocation2 + $0xb1] sm:$0xff]  ;;  %v19649_v16 = vld [vmem:[#allocation21_spill] sm:$0xff]  ;;  %v3661_v26 = vld [vmem:[#allocation2 + $0xb9] sm:$0xff] }
 0x229   : > { %v3189_v20 = vrot.slane %v3079_v21, 5  ;;  %v3417_v40 = vrot.slane %v3307_v5, 6  ;;  %v2895_v56 = vrot.slane %v2819_v7, 4  ;;  %v3123_v6 = vrot.slane %v3046_v4, 5  ;;  %v3627_v5 = vld [vmem:[#allocation2 + $0xb8] sm:$0xff] }
 0x22a   : > { %v3351_v57 = vrot.slane %v3274_v11, 6  ;;  %v3813_v46 = vmax.f32 %v3677_v37, %v3779_v27  ;;  %v19639_v52 = vrot.slane %v19638_v14, 4  ;;  %v19641_v33 = vrot.slane %v19640_v42, 5  ;;  %v3762_v27 = vld [vmem:[#allocation2 + $0xc3] sm:$0xff] }
 0x22b   : > { %v19643_v3 = vrot.slane %v19642_v13, 6  ;;  %v2292_v24 = vadd.f32 %v15994_v34, %v2064_v8  ;;  %v2896_v2 = vsel %vm2410_vm3, %v2893_v45, %v2895_v56  ;;  %v19644_v12 = vrot.slane %v15853_v53, 4 }
 0x22c   : > { %v2962_v18 = vsel %vm2410_vm3, %v19639_v52, %v2961_v35  ;;  %v3190_v44 = vsel %vm3117_vm4, %v19641_v33, %v3189_v20  ;;  %v3124_v15 = vsel %vm3117_vm4, %v3121_v29, %v3123_v6  ;;  %v3001_v58 = vadd.f32 %v2896_v2, %v16186_v62  ;;  %v3626_v62 = vld [vmem:[#allocation2 + $0xb0] sm:$0xff]  ;;  %v3268_v2 = vpop.permute.xlu1 %3267  ;;  %v3724_v9 = vld [vmem:[#allocation2 + $0xa2] sm:$0xff] }
 0x22d   : > { %v3418_v50 = vsel %vm3345_vm5, %v19643_v3, %v3417_v40  ;;  %v3034_v38 = vadd.f32 %v2962_v18, %v16144_v61  ;;  %v2898_v30 = vsel %vm2410_vm3, %v2895_v56, %v19644_v12  ;;  %v19645_v34 = vrot.slane %v15858_v48, 5  ;;  %v3726_v52 = vld [vmem:[#allocation2 + $0xb2] sm:$0xff]  ;;  %v3727_v18 = vld [vmem:[#allocation2 + $0xba] sm:$0xff] }
 0x22e   : > { %v3002_v60 = vadd.f32 %v2898_v30, %v16152_v47  ;;  %v3352_v43 = vsel %vm3345_vm5, %v3349_v1, %v3351_v57  ;;  %v19647_v54 = vrot.slane %v19646_v49, 6  ;;  %v3872_v0 = vpack.c.bf16 %v3813_v46, %v3812_v28  ;;  %v3763_v46 = vld [vmem:[#allocation2 + $0xcb] sm:$0xff]  ;;  %v3624_v12 = vld [vmem:[#allocation2 + $0xa0] sm:$0xff] }
 0x22f   : > { %v3126_v61 = vsel %vm3117_vm4, %v3123_v6, %v19645_v34  ;;  %v3262_v53 = vadd.f32 %v3190_v44, %v3034_v38  ;;  %v2293_v8 = vadd.f32 %v16161_v25, %v2065_v31  ;;  %v3229_v47 = vadd.f32 %v3124_v15, %v3001_v58  ;;  %v3728_v31 = vld [vmem:[#allocation2 + $0xc2] sm:$0xff]  ;;  %v3729_v6 = vld [vmem:[#allocation2 + $0xca] sm:$0xff]  ;;  %v3760_v15 = vld [vmem:[#allocation2 + $0xb3] sm:$0xff] }
 0x230   : > { %v3354_v41 = vsel %vm3345_vm5, %v3351_v57, %v19647_v54  ;;  %v3230_v22 = vadd.f32 %v3126_v61, %v3002_v60  ;;  %v19648_v48 = vrot.slane %v15946_v39, 4  ;;  %v2520_v21 = vadd.f32 %v19649_v16, %v2292_v24  ;;  %4024 = vmatpush.bf16.msra.mxu0 %v3872_v0  ;;  %v19650_v33 = vld [vmem:[#allocation42_spill] sm:$0xff]  ;;  %v3658_v30 = vld [vmem:[#allocation2 + $0xa1] sm:$0xff] }
 0x231   : > { %v3490_v7 = vadd.f32 %v3418_v50, %v3262_v53  ;;  %v2817_v11 = vmul.f32 %v14444_v36, %v2638_v32  ;;  %v3044_v25 = vmul.f32 %v14446_v59, %v2638_v32  ;;  %v3457_v35 = vadd.f32 %v3352_v43, %v3229_v47  ;;  %v19652_v50 = vld [vmem:[#allocation16_spill] sm:$0xff]  ;;  %v3625_v43 = vld [vmem:[#allocation2 + $0xa8] sm:$0xff]  ;;  %v3656_v0 = vld [vmem:[#allocation2 + $0x91] sm:$0xff] }
 0x232   : > { %v2415_v37 = vsel %vm2410_vm3, %v19648_v48, %v2414_v19  ;;  %v3458_v20 = vadd.f32 %v3354_v41, %v3230_v22  ;;  %v16286_v10 = vmul.f32 %v14448_v51, %v2638_v32  ;;  %v3694_v39 = vmax.f32 %v3626_v62, %v3660_v17  ;;  %v3659_v32 = vld [vmem:[#allocation2 + $0xa9] sm:$0xff]  ;;  %v3761_v53 = vld [vmem:[#allocation2 + $0xbb] sm:$0xff] }
 0x233   : > { %v2521_v4 = vadd.f32 %v2415_v37, %v2293_v8  ;;  %v3530_v19 = vadd.f32 %v15984_v63, %v3490_v7  ;;  %v2891_v40 = vrot.slane %v2817_v11, 4  ;;  %v3119_v28 = vrot.slane %v3044_v25, 5  ;;  %v3623_v41 = vld [vmem:[#allocation2 + $0x98] sm:$0xff]  ;;  %v3622_v48 = vld [vmem:[#allocation2 + $0x90] sm:$0xff]  ;;  %v3758_v37 = vld [vmem:[#allocation2 + $0xa3] sm:$0xff] }
 0x234   : > { %v3695_v56 = vmax.f32 %v3627_v5, %v3661_v26  ;;  %v3497_v57 = vadd.f32 %v15984_v63, %v3457_v35  ;;  %v3498_v36 = vadd.f32 %v15984_v63, %v3458_v20  ;;  %v3347_v59 = vrot.slane %v16286_v10, 6  ;;  %v3657_v8 = vld [vmem:[#allocation2 + $0x99] sm:$0xff]  ;;  %v3759_v5 = vld [vmem:[#allocation2 + $0xab] sm:$0xff]  ;;  %v3654_v26 = vld [vmem:[#allocation2 + $0x81] sm:$0xff] }
 0x235   : > { %v3796_v14 = vmax.f32 %v3728_v31, %v3762_v27  ;;  %v3566_v42 = vmax.f32 %v3530_v19, 0.0  ;;  %v19651_v44 = vrot.slane %v19650_v33, 4  ;;  %v2894_v3 = vsel %vm2410_vm3, %v2891_v40, %v2893_v45  ;;  %v3708_v31 = vld [vmem:[#allocation2 + $0x22] sm:$0xff] }
 0x236   : > { %v19653_v24 = vrot.slane %v19652_v50, 5  ;;  %v3533_v58 = vmax.f32 %v3497_v57, 0.0  ;;  %v3534_v60 = vmax.f32 %v3498_v36, 0.0  ;;  %v3000_v61 = vadd.f32 %v2894_v3, %v2521_v4  ;;  %v3742_v27 = vld [vmem:[#allocation2 + $0x23] sm:$0xff] }
 0x237   : > { %v2892_v13 = vsel %vm2410_vm3, %v19651_v44, %v2891_v40  ;;  %3603 = vst.msk [vmem:[#allocation2 + $0x118] sm:$0xff] %vm3567_vm6, %v3566_v42  ;;  %v3122_v23 = vsel %vm3117_vm4, %v3119_v28, %v3121_v29  ;;  %v3350_v45 = vsel %vm3345_vm5, %v3347_v59, %v3349_v1  ;;  %v3797_v49 = vmax.f32 %v3729_v6, %v3763_v46  ;;  %v3655_v35 = vld [vmem:[#allocation2 + $0x89] sm:$0xff]  ;;  %v3722_v6 = vld [vmem:[#allocation2 + $0x92] sm:$0xff]  ;;  %v3670_v50 = vld [vmem:[#allocation2 + $0x101] sm:$0xff] }
 0x238   : > { %v3120_v38 = vsel %vm3117_vm4, %v19653_v24, %v3119_v28  ;;  %v2999_v34 = vadd.f32 %v2892_v13, %v2520_v21  ;;  %v3830_v54 = vmax.f32 %v3694_v39, %v3796_v14  ;;  %3570 = vst.msk [vmem:[#allocation2 + $0x10] sm:$0xff] %vm3567_vm6, %v3533_v58  ;;  %v3228_v17 = vadd.f32 %v3122_v23, %v3000_v61  ;;  %v3725_v21 = vld [vmem:[#allocation2 + $0xaa] sm:$0xff]  ;;  %v3723_v14 = vld [vmem:[#allocation2 + $0x9a] sm:$0xff] }
 0x239   : > { %v3271_v47 = vmul.f32 %v14448_v51, %v3268_v2  ;;  %v3692_v22 = vmax.f32 %v3624_v12, %v3658_v30  ;;  %3571 = vst.msk [vmem:[#allocation2 + $0x18] sm:$0xff] %vm3567_vm6, %v3534_v60  ;;  %v3831_v55 = vmax.f32 %v3695_v56, %v3797_v49  ;;  %v3693_v29 = vmax.f32 %v3625_v43, %v3659_v32  ;;  %v3621_v51 = vld [vmem:[#allocation2 + $0x88] sm:$0xff]  ;;  %v3620_v56 = vld [vmem:[#allocation2 + $0x80] sm:$0xff] }
 0x23a   : > { %v3227_v62 = vadd.f32 %v3120_v38, %v2999_v34  ;;  %v3794_v1 = vmax.f32 %v3726_v52, %v3760_v15  ;;  %v3795_v16 = vmax.f32 %v3727_v18, %v3761_v53  ;;  %v3456_v7 = vadd.f32 %v3350_v45, %v3228_v17  ;;  %v3709_v40 = vld [vmem:[#allocation2 + $0x2a] sm:$0xff]  ;;  %v3756_v52 = vld [vmem:[#allocation2 + $0x93] sm:$0xff]  ;;  %v3757_v18 = vld [vmem:[#allocation2 + $0x9b] sm:$0xff] }
 0x23b   : > { %v3346_v4 = vrot.slane %v3271_v47, 6  ;;  %v3690_v11 = vmax.f32 %v3622_v48, %v3656_v0  ;;  %v3691_v25 = vmax.f32 %v3623_v41, %v3657_v8  ;;  %v3881_v20 = vpack.c.bf16 %v3831_v55, %v3830_v54  ;;  %v3743_v28 = vld [vmem:[#allocation2 + $0x2b] sm:$0xff]  ;;  %v3636_v53 = vld [vmem:[#allocation2 + $0x100] sm:$0xff] }
 0x23c   : > { %v3828_v10 = vmax.f32 %v3692_v22, %v3794_v1  ;;  %v3829_v39 = vmax.f32 %v3693_v29, %v3795_v16  ;;  %v3792_v19 = vmax.f32 %v3724_v9, %v3758_v37  ;;  %v3496_v57 = vadd.f32 %v15984_v63, %v3456_v7  ;;  %v3637_v3 = vld [vmem:[#allocation2 + $0x108] sm:$0x1f] }
 0x23d   : > { %v3348_v36 = vsel %vm3345_vm5, %v3346_v4, %v3347_v59  ;;  %v3793_v46 = vmax.f32 %v3725_v21, %v3759_v5  ;;  %4067 = vmatpush.bf16.msra.mxu1 %v3881_v20  ;;  %v3776_v13 = vmax.f32 %v3708_v31, %v3742_v27  ;;  %v3671_v24 = vld [vmem:[#allocation2 + $0x109] sm:$0x1f]  ;;  %v3777_v12 = vmax.f32 %v3709_v40, %v3743_v28  ;;  %v12634_v4 = vld [vmem:[%s19001_s13 + $0x10] sm:$0xf0]  ;;  %v11254_v31 = vld [vmem:[%s19001_s13 + $0xc] sm:$0xf0] }
 0x23e   : > { %v3455_v42 = vadd.f32 %v3348_v36, %v3227_v62  ;;  %v3880_v33 = vpack.c.bf16 %v3829_v39, %v3828_v10  ;;  %v3826_v44 = vmax.f32 %v3690_v11, %v3792_v19  ;;  %v3532_v38 = vmax.f32 %v3496_v57, 0.0  ;;  %v3738_v15 = vld [vmem:[#allocation2 + $0x112] sm:$0xff]  ;;  %v3739_v58 = vld [vmem:[#allocation2 + $0x11a] sm:$0x1f]  ;;  %v11260_v7 = vld [vmem:[%s19001_s13 + $0x8] sm:$0xf] }
 0x23f   : > { %v3827_v2 = vmax.f32 %v3691_v25, %v3793_v46  ;;  %v3688_v30 = vmax.f32 %v3620_v56, %v3654_v26  ;;  %v3772_v60 = vld [vmem:[#allocation2 + $0x113] sm:$0xff]  ;;  %v3689_v61 = vmax.f32 %v3621_v51, %v3655_v35  ;;  %v3790_v43 = vmax.f32 %v3722_v6, %v3756_v52  ;;  %v3773_v23 = vld [vmem:[#allocation2 + $0x11b] sm:$0x1f]  ;;  %v12632_v25 = vld [vmem:[%s19001_s13 + $0x4] sm:$0xf] }
 0x240   : > { %v3495_v59 = vadd.f32 %v15984_v63, %v3455_v42  ;;  %v3606_v34 = vld [vmem:[#allocation2 + $0x10] sm:$0xff]  ;;  %v3791_v32 = vmax.f32 %v3723_v14, %v3757_v18  ;;  %3569 = vst.msk [vmem:[#allocation2 + $0x8] sm:$0xff] %vm3567_vm6, %v3532_v38  ;;  %v3607_v45 = vld [vmem:[#allocation2 + $0x18] sm:$0xff]  ;;  %v3704_v41 = vmax.f32 %v3636_v53, %v3670_v50  ;;  %v3705_v0 = vmax.f32 %v3637_v3, %v3671_v24  ;;  %v11272_v50 = vld [vmem:[%s19001_s13 + $0x20] sm:$0xf] }
 0x241   : > { %v3640_v49 = vld [vmem:[#allocation2 + $0x11] sm:$0xff]  ;;  %v3641_v54 = vld [vmem:[#allocation2 + $0x19] sm:$0xff]  ;;  %v3806_v8 = vmax.f32 %v3738_v15, %v3772_v60  ;;  %v3807_v62 = vmax.f32 %v3739_v58, %v3773_v23  ;;  %4068 = vmatpush.bf16.msra.mxu1 %v3880_v33  ;;  %v3879_v47 = vpack.c.bf16 %v3827_v2, %v3826_v44  ;;  %v3824_v48 = vmax.f32 %v3688_v30, %v3790_v43  ;;  %v12633_v44 = vld [vmem:[%s19001_s13 + $0x8] sm:$0xf0] }
 0x242   : > { %v3531_v17 = vmax.f32 %v3495_v59, 0.0  ;;  %v3674_v22 = vmax.f32 %v3606_v34, %v3640_v49  ;;  %v3675_v63 = vmax.f32 %v3607_v45, %v3641_v54  ;;  %v3825_v1 = vmax.f32 %v3689_v61, %v3791_v32  ;;  %v3707_v51 = vld [vmem:[#allocation2 + $0x1a] sm:$0xff]  ;;  %v3706_v56 = vld [vmem:[#allocation2 + $0x12] sm:$0xff]  ;;  %v12637_v24 = vld [vmem:[%s19001_s13 + $0x28] sm:$0xf0] }
 0x243   : > { %v3840_v9 = vmax.f32 %v3704_v41, %v3806_v8  ;;  %v3841_v37 = vmax.f32 %v3705_v0, %v3807_v62  ;;  %v19194_v16 = vmov 65535   ;;  %v3741_v35 = vld [vmem:[#allocation2 + $0x1b] sm:$0xff]  ;;  %v11261_v10 = vor.u32 %v12634_v4, %v11260_v7  ;;  %v3740_v6 = vld [vmem:[#allocation2 + $0x13] sm:$0xff]  ;;  %v11266_v2 = vld [vmem:[%s19001_s13 + $0x24] sm:$0xf0] }
 0x244   : > { %3568 = vst.msk [vmem:[#allocation2] sm:$0xff] %vm3567_vm6, %v3531_v17  ;;  %v3810_v55 = vmax.f32 %v3674_v22, %v3776_v13  ;;  %v3811_v29 = vmax.f32 %v3675_v63, %v3777_v12  ;;  %v4014_v21 = vsel %vm1475_vm1, 4294967295, %v19194_v16  ;;  %v3878_v20 = vpack.c.bf16 %v3825_v1, %v3824_v48  ;;  %v11252_v33 = vld [vmem:[%s19001_s13] sm:$0xf]  ;;  %v12635_v38 = vld [vmem:[%s19001_s13 + $0x1c] sm:$0xf] }
 0x245   : > { %v3886_v5 = vpack.c.bf16 %v3841_v37, %v3840_v9  ;;  %v4015_v26 = vsel %vm1247_vm0, %v4014_v21, 0  ;;  %4069 = vmatpush.bf16.msra.mxu1 %v3879_v47  ;;  %v11257_v40 = vor.u32 %v12632_v25, %v11254_v31  ;;  %v3775_v57 = vmax.f32 %v3707_v51, %v3741_v35  ;;  %v11264_v15 = vld [vmem:[%s19001_s13 + $0x18] sm:$0xf]  ;;  %v12636_v58 = vld [vmem:[%s19001_s13 + $0x20] sm:$0xf0] }
 0x246   : > { %v3871_v11 = vpack.c.bf16 %v3811_v29, %v3810_v55  ;;  %v3774_v52 = vmax.f32 %v3706_v56, %v3740_v6  ;;  %v11253_v3 = vor.u32 %v12633_v44, %v11252_v33  ;;  %v11273_v12 = vor.u32 %v12637_v24, %v11272_v50  ;;  %v11284_v59 = vld [vmem:[%s19001_s13 + $0x38] sm:$0xf]  ;;  %v12640_v34 = vld [vmem:[%s19001_s13 + $0x40] sm:$0xf0]  ;;  %v12638_v61 = vld [vmem:[%s19001_s13 + $0x34] sm:$0xf] }
 0x247   : > { %v4017_v27 = vand.u32 %v4015_v26, %v3886_v5  ;;  %v3605_v39 = vld [vmem:[#allocation2 + $0x8] sm:$0xff]  ;;  %v11269_v30 = vor.u32 %v12635_v38, %v11266_v2  ;;  %v11265_v60 = vor.u32 %v12636_v58, %v11264_v15  ;;  %v11278_v43 = vld [vmem:[%s19001_s13 + $0x3c] sm:$0xf0]  ;;  %v11285_v32 = vor.u32 %v12640_v34, %v11284_v59  ;;  %v11276_v23 = vld [vmem:[%s19001_s13 + $0x30] sm:$0xf] }
 0x248   : > { %4025 = vmatpush.bf16.msra.mxu0 %v3871_v11  ;;  %v3639_v19 = vld [vmem:[#allocation2 + $0x9] sm:$0xff]  ;;  %v11281_v53 = vor.u32 %v12638_v61, %v11278_v43  ;;  %v12639_v45 = vld [vmem:[%s19001_s13 + $0x38] sm:$0xf0]  ;;  %v11290_v8 = vld [vmem:[%s19001_s13 + $0x54] sm:$0xf0] }
 0x249   : > { %4114 = vmatpush.bf16.msra.mxu2 %v4017_v27  ;;  %v3673_v28 = vmax.f32 %v3605_v39, %v3639_v19  ;;  %4070 = vmatpush.bf16.msra.mxu1 %v3878_v20  ;;  %v11277_v49 = vor.u32 %v12639_v45, %v11276_v23  ;;  %v11296_v54 = vld [vmem:[%s19001_s13 + $0x50] sm:$0xf]  ;;  %v12643_v41 = vld [vmem:[%s19001_s13 + $0x58] sm:$0xf0]  ;;  %v12641_v0 = vld [vmem:[%s19001_s13 + $0x4c] sm:$0xf] }
 0x24a   : > { %v11297_v62 = vor.u32 %v12643_v41, %v11296_v54  ;;  %v11293_v17 = vor.u32 %v12641_v0, %v11290_v8  ;;  %v11288_v47 = vld [vmem:[%s19001_s13 + $0x48] sm:$0xf]  ;;  %v12642_v22 = vld [vmem:[%s19001_s13 + $0x50] sm:$0xf0]  ;;  %v12644_v37 = vld [vmem:[%s19001_s13 + $0x64] sm:$0xf] }
 0x24b   : > { %v3604_v36 = vld [vmem:[#allocation2] sm:$0xff]  ;;  %v3809_v18 = vmax.f32 %v3673_v28, %v3775_v57  ;;  %v11289_v63 = vor.u32 %v12642_v22, %v11288_v47  ;;  %v11308_v48 = vld [vmem:[%s19001_s13 + $0x68] sm:$0xf]  ;;  %v12646_v9 = vld [vmem:[%s19001_s13 + $0x70] sm:$0xf0] }
 0x24c   : > { %v3638_v46 = vld [vmem:[#allocation2 + $0x1] sm:$0xff]  ;;  %11334 = vmatmul.msk.bf16.vlgmr.msra.gmra.mxu2 %vm3992_vm7, %v11261_v10  ;;  %4071 = vmatmul.bf16.vlgmr.msra.gmra.mxu1 %v11257_v40  ;;  %v11302_v55 = vld [vmem:[%s19001_s13 + $0x6c] sm:$0xf0]  ;;  %v11309_v29 = vor.u32 %v12646_v9, %v11308_v48  ;;  %v12645_v5 = vld [vmem:[%s19001_s13 + $0x68] sm:$0xf0] }
 0x24d   : > { %v3672_v14 = vmax.f32 %v3604_v36, %v3638_v46  ;;  %v11305_v1 = vor.u32 %v12644_v37, %v11302_v55  ;;  %v11300_v21 = vld [vmem:[%s19001_s13 + $0x60] sm:$0xf]  ;;  %v12649_v4 = vld [vmem:[%s19001_s13 + $0x88] sm:$0xf0]  ;;  %v12647_v11 = vld [vmem:[%s19001_s13 + $0x7c] sm:$0xf] }
 0x24e   : > { %v11301_v26 = vor.u32 %v12645_v5, %v11300_v21  ;;  %v11320_v7 = vld [vmem:[%s19001_s13 + $0x80] sm:$0xf]  ;;  %v11314_v25 = vld [vmem:[%s19001_s13 + $0x84] sm:$0xf0]  ;;  %v11312_v51 = vld [vmem:[%s19001_s13 + $0x78] sm:$0xf] }
 0x24f   : > { %v3808_v42 = vmax.f32 %v3672_v14, %v3774_v52  ;;  %v11321_v31 = vor.u32 %v12649_v4, %v11320_v7  ;;  %v11317_v27 = vor.u32 %v12647_v11, %v11314_v25  ;;  %v12648_v35 = vld [vmem:[%s19001_s13 + $0x80] sm:$0xf0]  ;;  %v11332_v10 = vld [vmem:[%s19001_s13 + $0x98] sm:$0xf]  ;;  %v12650_v19 = vld [vmem:[%s19001_s13 + $0x94] sm:$0xf] }
 0x250   : > { %v11313_v20 = vor.u32 %v12648_v35, %v11312_v51  ;;  %v12652_v39 = vld [vmem:[%s19001_s13 + $0xa0] sm:$0x70]  ;;  %v11326_v40 = vld [vmem:[%s19001_s13 + $0x9c] sm:$0x70]  ;;  %v11324_v6 = vld [vmem:[%s19001_s13 + $0x90] sm:$0xf] }
 0x251   : > { %v3870_v13 = vpack.c.bf16 %v3809_v18, %v3808_v42  ;;  %v11333_v28 = vor.u32 %v12652_v39, %v11332_v10  ;;  %v11329_v56 = vor.u32 %v12650_v19, %v11326_v40  ;;  %v12651_v57 = vld [vmem:[%s19001_s13 + $0x98] sm:$0x70]  ;;  %v12663_v38 = vld [vmem:[%s19654_s26 + $0x30] sm:$0xff]  ;;  %v12666_v2 = vld [vmem:[%s19654_s26 + $0x48] sm:$0xff] }
 0x252   : > { %v11325_v36 = vor.u32 %v12651_v57, %v11324_v6  ;;  %v12668_v52 = vld [vmem:[%s19654_s26 + $0x58] sm:$0xff]  ;;  %v12665_v59 = vld [vmem:[%s19654_s26 + $0x40] sm:$0xff]  ;;  %v12675_v61 = vld [vmem:[%s19654_s26 + $0x70] sm:$0xff] }
 0x253   : > { %4026 = vmatpush.bf16.msra.mxu0 %v3870_v13  ;;  %v12664_v18 = vld [vmem:[%s19654_s26 + $0x38] sm:$0xff]  ;;  %4491 = vmatpush.bf16.msrb.mxu2 %v12668_v52  ;;  %v12667_v13 = vld [vmem:[%s19654_s26 + $0x50] sm:$0xff]  ;;  %v12661_v23 = vld [vmem:[%s19654_s26 + $0x20] sm:$0xff] }
 0x254   : > { %4325 = vmatpush.bf16.msra.mxu3 %v12664_v18  ;;  %v12680_v34 = vld [vmem:[%s19654_s26 + $0x98] sm:$0xff]  ;;  %v12674_v45 = vld [vmem:[%s19654_s26 + $0x68] sm:$0xff]  ;;  %v12679_v41 = vld [vmem:[%s19654_s26 + $0x90] sm:$0xff] }
 0x255   : > { %4783 = vmatpush.bf16.msrb.mxu1 %v12680_v34  ;;  %v12673_v8 = vld [vmem:[%s19654_s26 + $0x60] sm:$0xff] }
 0x256   : > { %4027 = vmatmul.bf16.vlgmr.msra.gmra.mxu0 %v11253_v3  ;;  %v12677_v9 = vld [vmem:[%s19654_s26 + $0x80] sm:$0xff] }
 0x257   : > { %4492 = vmatpush.bf16.msrb.mxu2 %v12667_v13 }
 0x258   : > { %4326 = vmatpush.bf16.msra.mxu3 %v12663_v38 }
 0x259   : > { %4784 = vmatpush.bf16.msrb.mxu1 %v12679_v41 }
 0x25b   : > { %4493 = vmatpush.bf16.msrb.mxu2 %v12666_v2 }
 0x25c   : > { %11335 = vmatmul.msk.bf16.gmra.mxu2 %vm3992_vm7, %v11273_v12  ;;  %4076 = vmatmul.bf16.gmra.mxu1 %v11269_v30  ;;  %v12676_v12 = vld [vmem:[%s19654_s26 + $0x78] sm:$0xff] }
 0x25d   : > { %4633 = vmatpush.bf16.msrb.mxu0 %v12676_v12 }
 0x25f   : > { %4494 = vmatpush.bf16.msrb.mxu2 %v12665_v59 }
 0x261   : > { %4634 = vmatpush.bf16.msrb.mxu0 %v12675_v61 }
 0x265   : > { %4635 = vmatpush.bf16.msrb.mxu0 %v12674_v45 }
 0x266   : > { %4032 = vmatmul.bf16.gmra.mxu0 %v11265_v60  ;;  %v12662_v60 = vld [vmem:[%s19654_s26 + $0x28] sm:$0xff] }
 0x267   : > { %4327 = vmatpush.bf16.msra.mxu3 %v12662_v60 }
 0x269   : > { %4636 = vmatpush.bf16.msrb.mxu0 %v12673_v8 }
 0x26b   : > { %4328 = vmatpush.bf16.msra.mxu3 %v12661_v23 }
 0x26c   : > { %11336 = vmatmul.msk.bf16.gmra.mxu2 %vm3992_vm7, %v11285_v32  ;;  %4081 = vmatmul.bf16.gmra.mxu1 %v11281_v53 }
 0x276   : > { %4037 = vmatmul.bf16.gmra.mxu0 %v11277_v49 }
 0x27c   : > { %11337 = vmatmul.msk.bf16.gmra.mxu2 %vm3992_vm7, %v11297_v62  ;;  %4086 = vmatmul.bf16.gmra.mxu1 %v11293_v17  ;;  %v12678_v62 = vld [vmem:[%s19654_s26 + $0x88] sm:$0xff] }
 0x27d   : > { %4785 = vmatpush.bf16.msrb.mxu1 %v12678_v62 }
 0x281   : > { %4786 = vmatpush.bf16.msrb.mxu1 %v12677_v9 }
 0x286   : > { %4042 = vmatmul.bf16.gmra.mxu0 %v11289_v63 }
 0x28c   : > { %11338 = vmatmul.msk.bf16.gmra.mxu2 %vm3992_vm7, %v11309_v29  ;;  %4091 = vmatmul.bf16.gmra.mxu1 %v11305_v1 }
 0x296   : > { %4047 = vmatmul.bf16.gmra.mxu0 %v11301_v26 }
 0x29c   : > { %11339 = vmatmul.msk.bf16.gmra.mxu2 %vm3992_vm7, %v11321_v31  ;;  %4096 = vmatmul.bf16.gmra.mxu1 %v11317_v27 }
 0x2a6   : > { %4052 = vmatmul.bf16.gmra.mxu0 %v11313_v20 }
 0x2ac   : > { %11340 = vmatmul.msk.bf16.gmra.mxu2 %vm3992_vm7, %v11333_v28  ;;  %4101 = vmatmul.bf16.gmra.mxu1 %v11329_v56 }
 0x2b6   : > { %4057 = vmatmul.bf16.gmra.mxu0 %v11325_v36 }
 0x2c9   : > { %v4072_v46 = vpop.f32.mrf.mxu1 }
 0x2cf   : > { %v4116_v14 = vpop.f32.mrf.mxu2 }
 0x2d1   : > { %v4074_v33 = vpop.f32.mrf.mxu1 }
 0x2d3   : > { %v4028_v42 = vpop.f32.mrf.mxu0 }
 0x2d4   : > { %v4073_v44 = vadd.f32 %v4072_v46, %v4028_v42 }
 0x2d6   : > { %v4117_v3 = vadd.f32 %v4116_v14, %v4073_v44 }
 0x2d7   : > { %v4118_v24 = vpop.f32.mrf.mxu2 }
 0x2d8   : > { %v4151_v50 = vpack.c.bf16 %v4117_v3, %v4117_v3 }
 0x2d9   : > { %v4077_v15 = vpop.f32.mrf.mxu1 }
 0x2da   : > { %4166 = vst.msk [vmem:[#allocation4] sm:$0xf] %vm4165_vm8, %v4151_v50 }
 0x2db   : > { %v4030_v30 = vpop.f32.mrf.mxu0 }
 0x2dc   : > { %v4075_v58 = vadd.f32 %v4074_v33, %v4030_v30 }
 0x2de   : > { %v4119_v43 = vadd.f32 %v4118_v24, %v4075_v58 }
 0x2df   : > { %v4121_v53 = vpop.f32.mrf.mxu2 }
 0x2e0   : > { %v4152_v32 = vpack.c.bf16 %v4119_v43, %v4119_v43 }
 0x2e1   : > { %v4079_v54 = vpop.f32.mrf.mxu1  ;;  %v13233_v31 = vld [vmem:[#allocation4] sm:$0xe] }
 0x2e2   : > { %4167 = vst.msk [vmem:[#allocation4 + $0x4] sm:$0xf] %vm4165_vm8, %v4152_v32 }
 0x2e3   : > { %v4033_v49 = vpop.f32.mrf.mxu0 }
 0x2e4   : > { %v4078_v0 = vadd.f32 %v4077_v15, %v4033_v49 }
 0x2e6   : > { %v4122_v17 = vadd.f32 %v4121_v53, %v4078_v0 }
 0x2e7   : > { %v4123_v22 = vpop.f32.mrf.mxu2 }
 0x2e8   : > { %v4153_v47 = vpack.c.bf16 %v4122_v17, %v4122_v17 }
 0x2e9   : > { %v4082_v48 = vpop.f32.mrf.mxu1  ;;  %v16504_v21 = vld [vmem:[#allocation4] sm:$0xff]  }
 0x2ea   : > { %4168 = vst.msk [vmem:[#allocation4 + $0x8] sm:$0xf] %vm4165_vm8, %v4153_v47  ;;  %v13232_v4 = vld [vmem:[#allocation4] sm:$0xf0]  ;;  %v4241_v11 = vshll.u32 %v16504_v21, 16  ;;  %v4239_v46 = vshrl.u32 %v16504_v21, 16 }
 0x2eb   : > { %v4035_v63 = vpop.f32.mrf.mxu0  ;;  %v13234_v27 = vor.u32 %v13233_v31, %v13232_v4  ;;  %v4531_v51 = vld [vmem:[#allocation4 + $0x4] sm:$0xe] }
 0x2ec   : > { %v4080_v37 = vadd.f32 %v4079_v54, %v4035_v63  ;;  %v4243_v39 = vrot.slane %v4241_v11, 1  ;;  %v4562_v40 = vunpack.c.l.b16 %v4531_v51 }
 0x2ed   : > { %v4437_v57 = vrot.slane %v13234_v27, 1 }
 0x2ee   : > { %v4124_v55 = vadd.f32 %v4123_v22, %v4080_v37  ;;  %v4244_v33 = vor.u32 %v4243_v39, %v4239_v46 }
 0x2ef   : > { %v4126_v1 = vpop.f32.mrf.mxu2 }
 0x2f0   : > { %v4154_v29 = vpack.c.bf16 %v4124_v55, %v4124_v55 }
 0x2f1   : > { %v4084_v26 = vpop.f32.mrf.mxu1 }
 0x2f2   : > { %4169 = vst.msk [vmem:[#allocation4 + $0xc] sm:$0xf] %vm4165_vm8, %v4154_v29 }
 0x2f3   : > { %v4038_v5 = vpop.f32.mrf.mxu0 }
 0x2f4   : > { %v4083_v7 = vadd.f32 %v4082_v48, %v4038_v5 }
 0x2f6   : > { %v4127_v25 = vadd.f32 %v4126_v1, %v4083_v7 }
 0x2f7   : > { %v4128_v20 = vpop.f32.mrf.mxu2 }
 0x2f8   : > { %v4155_v35 = vpack.c.bf16 %v4127_v25, %v4127_v25 }
 0x2f9   : > { %v16507_v10 = vld [vmem:[#allocation4 + $0x8] sm:$0xff]  ;;  %v4087_v6 = vpop.f32.mrf.mxu1 }
 0x2fa   : > { %v16509_v19 = vld [vmem:[#allocation4 + $0x8] sm:$0xff]   ;;  %4170 = vst.msk [vmem:[#allocation4 + $0x10] sm:$0xf] %vm4165_vm8, %v4155_v35  ;;  %v4438_v36 = vrot.slane %v16507_v10, 1  ;;  %v4246_v14 = vshll.u32 %v16507_v10, 16  ;;  %v4250_v63 = vshrl.u32 %v16507_v10, 16 }
 0x2fb   : > { %v4563_v28 = vunpack.c.l.b16 %v16509_v19  ;;  %v4040_v56 = vpop.f32.mrf.mxu0 }
 0x2fc   : > { %v4085_v52 = vadd.f32 %v4084_v26, %v4040_v56  ;;  %v4439_v42 = vsel %vm1247_vm0, %v4437_v57, %v4438_v36  ;;  %v4248_v44 = vrot.slane %v4246_v14, 1 }
 0x2fd   : > { %v4573_v18 = vpack.c.b16 %v4563_v28, %v4562_v40  ;;  %11431 = vmatmul.msk.bf16.vlgmr.msrb.gmra.mxu2 %vm3567_vm6, %v4439_v42 }
 0x2fe   : > { %v4129_v13 = vadd.f32 %v4128_v20, %v4085_v52  ;;  %v4249_v50 = vsel %vm4237_vm9, %v4244_v33, %v4248_v44  ;;  %v4252_v29 = vor.u32 %v4250_v63, %v4248_v44 }
 0x2ff   : > { %v4688_v3 = vshrl.u32 %v4573_v18, 16  ;;  %v4691_v24 = vshll.u32 %v4573_v18, 16  ;;  %11381 = vmatmul.msk.bf16.vlgmr.msra.gmra.mxu3 %vm3567_vm6, %v4249_v50  ;;  %v4131_v2 = vpop.f32.mrf.mxu2  ;;  %v4579_v30 = vrot.slane %v4573_v18, 1 }
 0x300   : > { %v4156_v38 = vpack.c.bf16 %v4129_v13, %v4129_v13 }
 0x301   : > { %v16522_v12 = vld [vmem:[#allocation4 + $0xc] sm:$0xff]  ;;  %v4690_v15 = vrot.slane %v4688_v3, 1  ;;  %v4089_v60 = vpop.f32.mrf.mxu1  ;;  %v4693_v34 = vrot.slane %v4691_v24, 2 }
 0x302   : > { %4171 = vst.msk [vmem:[#allocation4 + $0x14] sm:$0xf] %vm4165_vm8, %v4156_v38  ;;  %v4580_v59 = vrot.slane %v16522_v12, 1  ;;  %v4696_v61 = vshrl.u32 %v16522_v12, 16  ;;  %v4699_v43 = vshll.u32 %v16522_v12, 16 }
 0x303   : > { %v4043_v58 = vpop.f32.mrf.mxu0  ;;  %v4694_v54 = vor.u32 %v4693_v34, %v4690_v15  ;;  %v12691_v34 = vld [vmem:[%s19654_s26 + $0xd0] sm:$0xff] }
 0x304   : > { %v4088_v32 = vadd.f32 %v4087_v6, %v4043_v58  ;;  %v4581_v53 = vsel %vm1247_vm0, %v4579_v30, %v4580_v59  ;;  %v4698_v23 = vrot.slane %v4696_v61, 1  ;;  %v4701_v45 = vrot.slane %v4699_v43, 2  ;;  %v12659_v43 = vld [vmem:[%s19654_s26 + $0x10] sm:$0xff] }
 0x305   : > { %11476 = vmatmul.msk.bf16.vlgmr.msrb.gmra.mxu0 %vm3567_vm6, %v4581_v53 }
 0x306   : > { %v4132_v49 = vadd.f32 %v4131_v2, %v4088_v32  ;;  %v4702_v41 = vor.u32 %v4701_v45, %v4698_v23  ;;  %v12692_v2 = vld [vmem:[%s19654_s26 + $0xd8] sm:$0xff] }
 0x307   : > { %v4133_v8 = vpop.f32.mrf.mxu2  ;;  %5033 = vmatpush.bf16.msra.mxu2 %v12692_v2 }
 0x308   : > { %v4157_v0 = vpack.c.bf16 %v4132_v49, %v4132_v49  ;;  %v4703_v62 = vsel %vm4686_vm10, %v4694_v54, %v4702_v41 }
 0x309   : > { %v16531_v17 = vld [vmem:[#allocation4 + $0x10] sm:$0xff]  ;;  %11505 = vmatmul.msk.bf16.vlgmr.msrb.gmra.mxu1 %vm3567_vm6, %v4703_v62  ;;  %v4092_v37 = vpop.f32.mrf.mxu1  ;;  %v12690_v62 = vld [vmem:[%s19654_s26 + $0xc8] sm:$0xff] }
 0x30a   : > { %4172 = vst.msk [vmem:[#allocation4 + $0x18] sm:$0xf] %vm4165_vm8, %v4157_v0  ;;  %v4440_v22 = vrot.slane %v16531_v17, 1  ;;  %v4254_v48 = vshll.u32 %v16531_v17, 16  ;;  %v4258_v33 = vshrl.u32 %v16531_v17, 16 }
 0x30b   : > { %v4045_v47 = vpop.f32.mrf.mxu0  ;;  %5034 = vmatpush.bf16.msra.mxu2 %v12691_v34  ;;  %v12697_v34 = vld [vmem:[%s19654_s26 + $0x100] sm:$0xff] }
 0x30c   : > { %v4090_v9 = vadd.f32 %v4089_v60, %v4045_v47  ;;  %v4441_v55 = vsel %vm1247_vm0, %v4438_v36, %v4440_v22  ;;  %v4256_v1 = vrot.slane %v4254_v48, 1  ;;  %v12696_v47 = vld [vmem:[%s19654_s26 + $0xf8] sm:$0xff] }
 0x30d   : > { %11432 = vmatmul.msk.bf16.gmra.mxu2 %vm3567_vm6, %v4441_v55  ;;  %5183 = vmatpush.bf16.msra.mxu0 %v12696_v47 }
 0x30e   : > { %v4134_v5 = vadd.f32 %v4133_v8, %v4090_v9  ;;  %v4257_v26 = vsel %vm4237_vm9, %v4252_v29, %v4256_v1  ;;  %v4260_v50 = vor.u32 %v4258_v33, %v4256_v1  ;;  %v12689_v1 = vld [vmem:[%s19654_s26 + $0xc0] sm:$0xff]  ;;  %v12698_v33 = vld [vmem:[%s19654_s26 + $0x108] sm:$0xff] }
 0x30f   : > { %11382 = vmatmul.msk.bf16.gmra.mxu3 %vm3567_vm6, %v4257_v26  ;;  %v4136_v4 = vpop.f32.mrf.mxu2  ;;  %5035 = vmatpush.bf16.msra.mxu2 %v12690_v62  ;;  %v12700_v26 = vld [vmem:[%s19654_s26 + $0x118] sm:$0xff] }
 0x310   : > { %v4158_v7 = vpack.c.bf16 %v4134_v5, %v4134_v5  ;;  %v12695_v5 = vld [vmem:[%s19654_s26 + $0xf0] sm:$0xff]  ;;  %5291 = vmatpush.bf16.msra.mxu1 %v12700_v26 }
 0x311   : > { %v16542_v11 = vld [vmem:[#allocation4 + $0x14] sm:$0xff]  ;;  %v4094_v6 = vpop.f32.mrf.mxu1  ;;  %5184 = vmatpush.bf16.msra.mxu0 %v12695_v5 }
 0x312   : > { %4173 = vst.msk [vmem:[#allocation4 + $0x1c] sm:$0xf] %vm4165_vm8, %v4158_v7  ;;  %v4582_v31 = vrot.slane %v16542_v11, 1  ;;  %v4705_v27 = vshrl.u32 %v16542_v11, 16  ;;  %v4708_v51 = vshll.u32 %v16542_v11, 16 }
 0x313   : > { %v4048_v25 = vpop.f32.mrf.mxu0  ;;  %5036 = vmatpush.bf16.msra.mxu2 %v12689_v1 }
 0x314   : > { %v4093_v35 = vadd.f32 %v4092_v37, %v4048_v25  ;;  %v4583_v20 = vsel %vm1247_vm0, %v4580_v59, %v4582_v31  ;;  %v4707_v39 = vrot.slane %v4705_v27, 1  ;;  %v4710_v40 = vrot.slane %v4708_v51, 2  ;;  %v12660_v59 = vld [vmem:[%s19654_s26 + $0x18] sm:$0xff]  ;;  %v12657_v27 = vld [vmem:[%s19654_s26] sm:$0xff] }
 0x315   : > { %11477 = vmatmul.msk.bf16.gmra.mxu0 %vm3567_vm6, %v4583_v20  ;;  %4393 = vmatpush.bf16.msrb.mxu3 %v12660_v59 }
 0x316   : > { %v4137_v56 = vadd.f32 %v4136_v4, %v4093_v35  ;;  %v4711_v57 = vor.u32 %v4710_v40, %v4707_v39 }
 0x317   : > { %v4138_v46 = vpop.f32.mrf.mxu2 }
 0x318   : > { %v4159_v36 = vpack.c.bf16 %v4137_v56, %v4137_v56  ;;  %v4712_v14 = vsel %vm4686_vm10, %v4702_v41, %v4711_v57  ;;  %v12694_v56 = vld [vmem:[%s19654_s26 + $0xe8] sm:$0xff] }
 0x319   : > { %v16551_v52 = vld [vmem:[#allocation4 + $0x18] sm:$0xff]  ;;  %11506 = vmatmul.msk.bf16.gmra.mxu1 %vm3567_vm6, %v4712_v14  ;;  %v4097_v30 = vpop.f32.mrf.mxu1  ;;  %4394 = vmatpush.bf16.msrb.mxu3 %v12659_v43 }
 0x31a   : > { %4174 = vst.msk [vmem:[#allocation4 + $0x20] sm:$0xf] %vm4165_vm8, %v4159_v36  ;;  %v4442_v42 = vrot.slane %v16551_v52, 1  ;;  %v4262_v44 = vshll.u32 %v16551_v52, 16  ;;  %v4266_v25 = vshrl.u32 %v16551_v52, 16  ;;  %5185 = vmatpush.bf16.msra.mxu0 %v12694_v56 }
 0x31b   : > { %v4050_v18 = vpop.f32.mrf.mxu0 }
 0x31c   : > { %v4095_v13 = vadd.f32 %v4094_v6, %v4050_v18  ;;  %v4443_v3 = vsel %vm1247_vm0, %v4440_v22, %v4442_v42  ;;  %v4264_v24 = vrot.slane %v4262_v44, 1  ;;  %v12658_v22 = vld [vmem:[%s19654_s26 + $0x8] sm:$0xff]  ;;  %v12699_v6 = vld [vmem:[%s19654_s26 + $0x110] sm:$0xff] }
 0x31d   : > { %11433 = vmatmul.msk.bf16.gmra.mxu2 %vm3567_vm6, %v4443_v3  ;;  %4395 = vmatpush.bf16.msrb.mxu3 %v12658_v22 }
 0x31e   : > { %v4139_v38 = vadd.f32 %v4138_v46, %v4095_v13  ;;  %v4265_v15 = vsel %vm4237_vm9, %v4260_v50, %v4264_v24  ;;  %v4268_v20 = vor.u32 %v4266_v25, %v4264_v24  ;;  %v12693_v46 = vld [vmem:[%s19654_s26 + $0xe0] sm:$0xff]  ;;  %5292 = vmatpush.bf16.msra.mxu1 %v12699_v6  ;;  %v4963_v25 = vunpack.c.h.b16 %v16509_v19 }
 0x31f   : > { %11383 = vmatmul.msk.bf16.gmra.mxu3 %vm3567_vm6, %v4265_v15  ;;  %v4141_v60 = vpop.f32.mrf.mxu2  ;;  %5186 = vmatpush.bf16.msra.mxu0 %v12693_v46 }
 0x320   : > { %v4160_v58 = vpack.c.bf16 %v4139_v38, %v4139_v38 }
 0x321   : > { %v16571_v61 = vld [vmem:[#allocation4 + $0x1c] sm:$0xff]  ;;  %v4099_v9 = vpop.f32.mrf.mxu1  ;;  %4396 = vmatpush.bf16.msrb.mxu3 %v12657_v27  ;;  %v12685_v27 = vld [vmem:[#allocation4 + $0x10] sm:$0xff] }
 0x322   : > { %4175 = vst.msk [vmem:[#allocation4 + $0x24] sm:$0xf] %vm4165_vm8, %v4160_v58  ;;  %v4584_v53 = vrot.slane %v16571_v61, 1  ;;  %v4714_v23 = vshrl.u32 %v16571_v61, 16  ;;  %v4717_v45 = vshll.u32 %v16571_v61, 16  ;;  %5293 = vmatpush.bf16.msra.mxu1 %v12698_v33  ;;  %v5099_v56 = vshll.u32 %v12685_v27, 16 }
 0x323   : > { %v4053_v32 = vpop.f32.mrf.mxu0  ;;  %v5223_v33 = vld [vmem:[#allocation4 + $0x8] sm:$0x8] }
 0x324   : > { %v4098_v49 = vadd.f32 %v4097_v30, %v4053_v32  ;;  %v4585_v54 = vsel %vm1247_vm0, %v4582_v31, %v4584_v53  ;;  %v4716_v41 = vrot.slane %v4714_v23, 1  ;;  %v4719_v0 = vrot.slane %v4717_v45, 2 }
 0x325   : > { %11478 = vmatmul.msk.bf16.gmra.mxu0 %vm3567_vm6, %v4585_v54 }
 0x326   : > { %v4142_v8 = vadd.f32 %v4141_v60, %v4098_v49  ;;  %v4720_v63 = vor.u32 %v4719_v0, %v4716_v41  ;;  %5294 = vmatpush.bf16.msra.mxu1 %v12697_v34 }
 0x327   : > { %v4143_v55 = vpop.f32.mrf.mxu2 }
 0x328   : > { %v4161_v48 = vpack.c.bf16 %v4142_v8, %v4142_v8  ;;  %v4721_v37 = vsel %vm4686_vm10, %v4711_v57, %v4720_v63 }
 0x329   : > { %v16594_v29 = vld [vmem:[#allocation4 + $0x20] sm:$0xff]  ;;  %11507 = vmatmul.msk.bf16.gmra.mxu1 %vm3567_vm6, %v4721_v37  ;;  %v4102_v14 = vpop.f32.mrf.mxu1 }
 0x32a   : > { %4176 = vst.msk [vmem:[#allocation4 + $0x28] sm:$0xf] %vm4165_vm8, %v4161_v48  ;;  %v4444_v4 = vrot.slane %v16594_v29, 1  ;;  %v4270_v31 = vshll.u32 %v16594_v29, 16  ;;  %v4274_v8 = vshrl.u32 %v16594_v29, 16 }
 0x32b   : > { %v4055_v7 = vpop.f32.mrf.mxu0 }
 0x32c   : > { %v4100_v51 = vadd.f32 %v4099_v9, %v4055_v7  ;;  %v4445_v35 = vsel %vm1247_vm0, %v4442_v42, %v4444_v4  ;;  %v4272_v39 = vrot.slane %v4270_v31, 1  ;;  %v4931_v7 = vld [vmem:[#allocation4 + $0x8] sm:$0xc] }
 0x32d   : > { %11434 = vmatmul.msk.bf16.gmra.mxu2 %vm3567_vm6, %v4445_v35 }
 0x32e   : > { %v4144_v40 = vadd.f32 %v4143_v55, %v4100_v51  ;;  %v4273_v57 = vsel %vm4237_vm9, %v4268_v20, %v4272_v39  ;;  %v4276_v48 = vor.u32 %v4274_v8, %v4272_v39  ;;  %v4962_v51 = vunpack.c.l.b16 %v4931_v7  ;;  %v12687_v8 = vld [vmem:[#allocation4 + $0x20] sm:$0xff] }
 0x32f   : > { %11384 = vmatmul.msk.bf16.gmra.mxu3 %vm3567_vm6, %v4273_v57  ;;  %v4146_v3 = vpop.f32.mrf.mxu2  ;;  %v4980_v39 = vrot.slane %v12685_v27, 2  ;;  %v5242_v7 = vrot.slane %v12687_v8, 3 }
 0x330   : > { %v4162_v36 = vpack.c.bf16 %v4144_v40, %v4144_v40  ;;  %v4973_v35 = vpack.c.b16 %v4963_v25, %v4962_v51  ;;  %v5096_v40 = vshrl.u32 %v12685_v27, 16  ;;  %v12682_v51 = vld [vmem:[%s19654_s26 + $0xa8] sm:$0xff] }
 0x331   : > { %v16626_v18 = vld [vmem:[#allocation4 + $0x24] sm:$0xff] }
 0x332   : > { %v4199_v42 = vld [vmem:[#allocation4 + $0x28] sm:$0x1]  ;;  %4177 = vst.msk [vmem:[#allocation4 + $0x2c] sm:$0xf] %vm4165_vm8, %v4162_v36  ;;  %v4586_v50 = vrot.slane %v16626_v18, 1  ;;  %v4723_v24 = vshrl.u32 %v16626_v18, 16 }
 0x333   : > { %v4230_v44 = vunpack.c.l.b16 %v4199_v42  ;;  %v4058_v13 = vpop.f32.mrf.mxu0  ;;  %v4726_v38 = vshll.u32 %v16626_v18, 16  ;;  %v4979_v6 = vrot.slane %v4973_v35, 2  ;;  %v5088_v57 = vshrl.u32 %v4973_v35, 16 }
 0x334   : > { %v4103_v2 = vadd.f32 %v4102_v14, %v4058_v13  ;;  %v4587_v15 = vsel %vm1247_vm0, %v4584_v53, %v4586_v50  ;;  %v4725_v58 = vrot.slane %v4723_v24, 1  ;;  %v5091_v36 = vshll.u32 %v4973_v35, 16  ;;  %v12681_v35 = vld [vmem:[%s19654_s26 + $0xa0] sm:$0xff] }
 0x335   : > { %v4236_v30 = vpack.c.b16 %v4230_v44, %v4230_v44  ;;  %v4728_v60 = vrot.slane %v4726_v38, 2  ;;  %11479 = vmatmul.msk.bf16.gmra.mxu0 %vm3567_vm6, %v4587_v15  ;;  %v4981_v46 = vsel %vm1475_vm1, %v4979_v6, %v4980_v39  ;;  %v5098_v14 = vrot.slane %v5096_v40, 2  ;;  %v12686_v15 = vld [vmem:[#allocation4 + $0x18] sm:$0xff] }
 0x336   : > { %v4147_v59 = vadd.f32 %v4146_v3, %v4103_v2  ;;  %v5101_v42 = vrot.slane %v5099_v56, 3  ;;  %v5090_v44 = vrot.slane %v5088_v57, 2  ;;  %v5093_v13 = vrot.slane %v5091_v36, 3 }
 0x337   : > { %v4729_v43 = vor.u32 %v4728_v60, %v4725_v58  ;;  %v4278_v32 = vshll.u32 %v4236_v30, 16  ;;  %v4446_v49 = vrot.slane %v4236_v30, 1  ;;  %v5238_v30 = vrot.slane %v12685_v27, 3 }
 0x338   : > { %v4163_v23 = vpack.c.bf16 %v4147_v59, %v4147_v59  ;;  %v5102_v3 = vor.u32 %v5101_v42, %v5098_v14  ;;  %v5094_v24 = vor.u32 %v5093_v13, %v5090_v44  ;;  %v4982_v59 = vrot.slane %v12686_v15, 2 }
 0x339   : > { %v4730_v45 = vsel %vm4686_vm10, %v4720_v63, %v4729_v43  ;;  %v4541_v54 = vld [vmem:[#allocation4 + $0x2c] sm:$0x1]  ;;  %v4280_v62 = vrot.slane %v4278_v32, 1  ;;  %v4447_v22 = vsel %vm1247_vm0, %v4444_v4, %v4446_v49  ;;  %v5105_v34 = vshrl.u32 %v12686_v15, 16  ;;  %v4104_v49 = vpop.f32.mrf.mxu1 }
 0x33a   : > { %v4673_v41 = vld [vmem:[#allocation4 + $0x2c] sm:$0x3]  ;;  %4178 = vst.msk [vmem:[#allocation4 + $0x30] sm:$0xf] %vm4165_vm8, %v4163_v23  ;;  %11508 = vmatmul.msk.bf16.gmra.mxu1 %vm3567_vm6, %v4730_v45  ;;  %v4572_v53 = vunpack.c.l.b16 %v4541_v54  ;;  %v5103_v2 = vsel %vm5086_vm11, %v5094_v24, %v5102_v3  ;;  %v4148_v54 = vpop.f32.mrf.mxu2 }
 0x33b   : > { %v4684_v0 = vunpack.c.l.b16 %v4673_v41  ;;  %v4281_v55 = vsel %vm4237_vm9, %v4276_v48, %v4280_v62  ;;  %v5107_v32 = vrot.slane %v5105_v34, 2  ;;  %v4060_v45 = vpop.f32.mrf.mxu0  ;;  %v5114_v48 = vshrl.u32 %v12687_v8, 16 }
 0x33c   : > { %v4578_v9 = vpack.c.b16 %v4572_v53, %v4572_v53 }
 0x33d   : > { %v16646_v47 = vpack.c.b16 %v4684_v0, %v4684_v0  ;;  %11435 = vmatmul.msk.bf16.gmra.mxu2 %vm3567_vm6, %v4447_v22  ;;  %v5240_v0 = vrot.slane %v12686_v15, 3  ;;  %v4984_v22 = vrot.slane %v12687_v8, 2 }
 0x33e   : > { %v4588_v1 = vrot.slane %v4578_v9, 1  ;;  %v5117_v9 = vshll.u32 %v12687_v8, 16 }
 0x33f   : > { %v4732_v63 = vshrl.u32 %v16646_v47, 16  ;;  %v4735_v37 = vshll.u32 %v16646_v47, 16  ;;  %11385 = vmatmul.msk.bf16.gmra.mxu3 %vm3567_vm6, %v4281_v55  ;;  %v5241_v62 = vsel %vm2182_vm2, %v5238_v30, %v5240_v0 }
 0x340   : > { %v4589_v4 = vsel %vm1247_vm0, %v4586_v50, %v4588_v1  ;;  %v5234_v50 = vunpack.c.l.b16 %v5223_v33  ;;  %v5119_v55 = vrot.slane %v5117_v9, 3  ;;  %v12684_v1 = vld [vmem:[%s19654_s26 + $0xb8] sm:$0xff] }
 0x341   : > { %v4734_v5 = vrot.slane %v4732_v63, 1  ;;  %v4737_v26 = vrot.slane %v4735_v37, 2  ;;  %v4985_v63 = vsel %vm1475_vm1, %v4982_v59, %v4984_v22  ;;  %v5116_v37 = vrot.slane %v5114_v48, 2  ;;  %4891 = vmatpush.bf16.msra.mxu3 %v12684_v1  ;;  %v4941_v56 = vld [vmem:[#allocation4 + $0x30] sm:$0x3] }
 0x342   : > { %v5235_v38 = vpack.c.b16 %v4963_v25, %v5234_v50  ;;  %v12688_v25 = vld [vmem:[#allocation4 + $0x28] sm:$0xff]  ;;  %v5073_v6 = vld [vmem:[#allocation4 + $0x30] sm:$0x7]  ;;  %v4972_v36 = vunpack.c.l.b16 %v4941_v56 }
 0x343   : > { %v4738_v31 = vor.u32 %v4737_v26, %v4734_v5  ;;  %v12683_v5 = vld [vmem:[%s19654_s26 + $0xb0] sm:$0xff]  ;;  %v5126_v27 = vshll.u32 %v12688_v25, 16  ;;  %v5244_v33 = vrot.slane %v12688_v25, 3 }
 0x344   : > { %v5237_v58 = vrot.slane %v5235_v38, 3  ;;  %v4978_v44 = vpack.c.b16 %v4972_v36, %v4972_v36 }
 0x345   : > { %11480 = vmatmul.msk.bf16.gmra.mxu0 %vm3567_vm6, %v4589_v4  ;;  %v4739_v20 = vsel %vm4686_vm10, %v4729_v43, %v4738_v31  ;;  %v5108_v43 = vshll.u32 %v12686_v15, 16  ;;  %4892 = vmatpush.bf16.msra.mxu3 %v12683_v5  ;;  %v5243_v4 = vsel %vm2182_vm2, %v5240_v0, %v5242_v7  ;;  %v5123_v31 = vshrl.u32 %v12688_v25, 16 }
 0x346   : > { %v5239_v60 = vsel %vm2182_vm2, %v5237_v58, %v5238_v30  ;;  %v5128_v40 = vrot.slane %v5126_v27, 3  ;;  %v4988_v50 = vrot.slane %v4978_v44, 2  ;;  %v4840_v0 = vrot.slane %v16542_v11, 2 }
 0x347   : > { %v5110_v23 = vrot.slane %v5108_v43, 3 }
 0x349   : > { %v5111_v41 = vor.u32 %v5110_v23, %v5107_v32  ;;  %4893 = vmatpush.bf16.msra.mxu3 %v12682_v51 }
 0x34a   : > { %11509 = vmatmul.msk.bf16.gmra.mxu1 %vm3567_vm6, %v4739_v20 }
 0x34b   : > { %v5112_v53 = vsel %vm5086_vm11, %v5102_v3, %v5111_v41  ;;  %v5245_v3 = vsel %vm2182_vm2, %v5242_v7, %v5244_v33  ;;  %v4844_v7 = vrot.slane %v16626_v18, 2  ;;  %v4846_v18 = vrot.slane %v16646_v47, 2 }
 0x34d   : > { %11579 = vmatmul.msk.bf16.vlgmr.msra.gmra.mxu2 %vm3567_vm6, %v4981_v46  ;;  %4894 = vmatpush.bf16.msra.mxu3 %v12681_v35  ;;  %v5084_v46 = vunpack.c.l.b16 %v5073_v6 }
 0x34f   : > { %11402 = vmatmul.msk.bf16.vlgmr.msrb.gmra.mxu3 %vm3567_vm6, %v16504_v21  ;;  %v4983_v21 = vsel %vm1475_vm1, %v4980_v39, %v4982_v59  ;;  %v5125_v39 = vrot.slane %v5123_v31, 2  ;;  %v5085_v13 = vpack.c.b16 %v5084_v46, %v5084_v46  ;;  %v4823_v59 = vld [vmem:[#allocation4 + $0x4] sm:$0xc] }
 0x351   : > { %v5129_v57 = vor.u32 %v5128_v40, %v5125_v39  ;;  %v5132_v24 = vshrl.u32 %v5085_v13, 16  ;;  %v5135_v38 = vshll.u32 %v5085_v13, 16  ;;  %v5246_v43 = vrot.slane %v5085_v13, 3 }
 0x352   : > { %v4847_v39 = vsel %vm1475_vm1, %v4844_v7, %v4846_v18 }
 0x353   : > { %v5134_v30 = vrot.slane %v5132_v24, 2  ;;  %v5137_v15 = vrot.slane %v5135_v38, 3  ;;  %v5247_v32 = vsel %vm2182_vm2, %v5244_v33, %v5246_v43 }
 0x355   : > { %11608 = vmatmul.msk.bf16.vlgmr.msra.gmra.mxu0 %vm3567_vm6, %v5103_v2  ;;  %v5138_v58 = vor.u32 %v5137_v15, %v5134_v30 }
 0x357   : > { %v5139_v34 = vsel %vm5086_vm11, %v5129_v57, %v5138_v58 }
 0x35a   : > { %11637 = vmatmul.msk.bf16.vlgmr.msra.gmra.mxu1 %vm3567_vm6, %v5239_v60 }
 0x35d   : > { %11580 = vmatmul.msk.bf16.gmra.mxu2 %vm3567_vm6, %v4983_v21  ;;  %v4834_v21 = vunpack.c.l.b16 %v4823_v59 }
 0x35f   : > { %11403 = vmatmul.msk.bf16.gmra.mxu3 %vm3567_vm6, %v16507_v10  ;;  %v5120_v10 = vor.u32 %v5119_v55, %v5116_v37  ;;  %v4835_v23 = vpack.c.b16 %v4563_v28, %v4834_v21 }
 0x361   : > { %v5121_v26 = vsel %vm5086_vm11, %v5111_v41, %v5120_v10  ;;  %v5130_v42 = vsel %vm5086_vm11, %v5120_v10, %v5129_v57  ;;  %v4837_v49 = vrot.slane %v4835_v23, 2 }
 0x365   : > { %11609 = vmatmul.msk.bf16.gmra.mxu0 %vm3567_vm6, %v5112_v53 }
 0x36a   : > { %11638 = vmatmul.msk.bf16.gmra.mxu1 %vm3567_vm6, %v5241_v62 }
 0x36d   : > { %11581 = vmatmul.msk.bf16.gmra.mxu2 %vm3567_vm6, %v4985_v63  ;;  %v4842_v63 = vrot.slane %v16571_v61, 2 }
 0x36f   : > { %11404 = vmatmul.msk.bf16.gmra.mxu3 %vm3567_vm6, %v16531_v17  ;;  %v4986_v17 = vrot.slane %v12688_v25, 2  ;;  %v4843_v11 = vsel %vm1475_vm1, %v4840_v0, %v4842_v63 }
 0x371   : > { %v4987_v20 = vsel %vm1475_vm1, %v4984_v22, %v4986_v17  ;;  %v4989_v2 = vsel %vm1475_vm1, %v4986_v17, %v4988_v50 }
 0x375   : > { %11610 = vmatmul.msk.bf16.gmra.mxu0 %vm3567_vm6, %v5121_v26 }
 0x37a   : > { %11639 = vmatmul.msk.bf16.gmra.mxu1 %vm3567_vm6, %v5243_v4  ;;  %v4845_v4 = vsel %vm1475_vm1, %v4842_v63, %v4844_v7 }
 0x37d   : > { %11582 = vmatmul.msk.bf16.gmra.mxu2 %vm3567_vm6, %v4987_v20 }
 0x37f   : > { %11405 = vmatmul.msk.bf16.gmra.mxu3 %vm3567_vm6, %v16551_v52 }
 0x380   : > { %v4496_v8 = vpop.f32.mrf.mxu2 }
 0x382   : > { %v16699_v14 = vpop.f32.mrf.mxu3  ;;  %v4638_v28 = vpop.f32.mrf.mxu0 }
 0x385   : > { %11611 = vmatmul.msk.bf16.gmra.mxu0 %vm3567_vm6, %v5130_v42 }
 0x386   : > { %v4788_v62 = vpop.f32.mrf.mxu1 }
 0x38a   : > { %11640 = vmatmul.msk.bf16.gmra.mxu1 %vm3567_vm6, %v5245_v3  ;;  %v16705_v52 = vpop.f32.mrf.mxu3  ;;  %v16733_v48 = vpop.f32.mrf.mxu0 }
 0x38d   : > { %11583 = vmatmul.msk.bf16.gmra.mxu2 %vm3567_vm6, %v4989_v2 }
 0x38e   : > { %v16738_v37 = vpop.f32.mrf.mxu1 }
 0x38f   : > { %11406 = vmatmul.msk.bf16.gmra.mxu3 %vm3567_vm6, %v16594_v29  ;;  %v4838_v29 = vrot.slane %v16522_v12, 2  ;;  %v4498_v12 = vpop.f32.mrf.mxu2 }
 0x391   : > { %v4839_v54 = vsel %vm1475_vm1, %v4837_v49, %v4838_v29  ;;  %v4841_v19 = vsel %vm1475_vm1, %v4838_v29, %v4840_v0 }
 0x392   : > { %v16711_v60 = vpop.f32.mrf.mxu3  ;;  %v16746_v1 = vpop.f32.mrf.mxu0 }
 0x395   : > { %11612 = vmatmul.msk.bf16.gmra.mxu0 %vm3567_vm6, %v5139_v34 }
 0x396   : > { %v16748_v5 = vpop.f32.mrf.mxu1 }
 0x397   : > { %v16742_v55 = vpop.f32.mrf.mxu2 }
 0x39a   : > { %11641 = vmatmul.msk.bf16.gmra.mxu1 %vm3567_vm6, %v5247_v32  ;;  %v16719_v45 = vpop.f32.mrf.mxu3  ;;  %v16755_v61 = vpop.f32.mrf.mxu0 }
 0x39e   : > { %v16759_v17 = vpop.f32.mrf.mxu1 }
 0x39f   : > { %11534 = vmatmul.msk.bf16.vlgmr.msra.gmra.mxu3 %vm3567_vm6, %v4839_v54  ;;  %v16753_v25 = vpop.f32.mrf.mxu2 }
 0x3a2   : > { %v16724_v41 = vpop.f32.mrf.mxu3  ;;  %v16763_v51 = vpop.f32.mrf.mxu0 }
 0x3a6   : > { %v16765_v35 = vpop.f32.mrf.mxu1 }
 0x3a7   : > { %v16761_v27 = vpop.f32.mrf.mxu2 }
 0x3aa   : > { %v16726_v53 = vpop.f32.mrf.mxu3  ;;  %v16772_v56 = vpop.f32.mrf.mxu0 }
 0x3ae   : > { %v16774_v57 = vpop.f32.mrf.mxu1 }
 0x3af   : > { %11535 = vmatmul.msk.bf16.gmra.mxu3 %vm3567_vm6, %v4841_v19  ;;  %v16770_v40 = vpop.f32.mrf.mxu2 }
 0x3b2   : > { %v16731_v22 = vpop.f32.mrf.mxu3  ;;  %v16778_v42 = vpop.f32.mrf.mxu0 }
 0x3b7   : > { %v16776_v36 = vpop.f32.mrf.mxu2  ;;  %v16780_v33 = vpop.f32.mrf.mxu1 }
 0x3ba   : > { %v16735_v9 = vpop.f32.mrf.mxu3  ;;  %v16784_v13 = vpop.f32.mrf.mxu0 }
 0x3bf   : > { %11536 = vmatmul.msk.bf16.gmra.mxu3 %vm3567_vm6, %v4843_v11  ;;  %v16782_v47 = vpop.f32.mrf.mxu2  ;;  %v16786_v3 = vpop.f32.mrf.mxu1 }
 0x3c2   : > { %v16744_v10 = vpop.f32.mrf.mxu3  ;;  %v16792_v38 = vpop.f32.mrf.mxu0 }
 0x3c7   : > { %v16790_v24 = vpop.f32.mrf.mxu2  ;;  %v16794_v2 = vpop.f32.mrf.mxu1 }
 0x3c8   : > { %19655 = vst [vmem:[#allocation10_spill] sm:$0xff] %v16794_v2 }
 0x3ca   : > { %v16750_v26 = vpop.f32.mrf.mxu3  ;;  %v16800_v58 = vpop.f32.mrf.mxu0 }
 0x3cb   : > { %19656 = vst [vmem:[#allocation18_spill] sm:$0xff] %v16800_v58 }
 0x3cf   : > { %11537 = vmatmul.msk.bf16.gmra.mxu3 %vm3567_vm6, %v4845_v4  ;;  %v16798_v15 = vpop.f32.mrf.mxu2  ;;  %v16804_v34 = vpop.f32.mrf.mxu1 }
 0x3d0   : > { %19657 = vst [vmem:[#allocation11_spill] sm:$0xff] %v16804_v34 }
 0x3d2   : > { %v4398_v31 = vpop.f32.mrf.mxu3  ;;  %v5188_v32 = vpop.f32.mrf.mxu0 }
 0x3d3   : > { %v4399_v23 = vadd.f32 %v4398_v31, %v16699_v14 }
 0x3d5   : > { %v4521_v49 = vadd.f32 %v4496_v8, %v4399_v23  ;;  %v16817_v8 = vld [vmem:[%s18992_s4] ss:$0 sm:$0xff] }
 0x3d7   : > { %v5038_v43 = vpop.f32.mrf.mxu2  ;;  %v5296_v29 = vpop.f32.mrf.mxu1  ;;  %v4663_v63 = vadd.f32 %v4638_v28, %v4521_v49 }
 0x3d9   : > { %v4813_v18 = vadd.f32 %v4788_v62, %v4663_v63 }
 0x3da   : > { %v4400_v20 = vpop.f32.mrf.mxu3  ;;  %v5190_v11 = vpop.f32.mrf.mxu0 }
 0x3db   : > { %v4401_v19 = vadd.f32 %v4400_v20, %v16705_v52 }
 0x3dd   : > { %v4522_v4 = vadd.f32 %v4498_v12, %v4401_v19 }
 0x3df   : > { %11538 = vmatmul.msk.bf16.gmra.mxu3 %vm3567_vm6, %v4847_v39  ;;  %v5040_v0 = vpop.f32.mrf.mxu2  ;;  %v5298_v7 = vpop.f32.mrf.mxu1  ;;  %v4664_v2 = vadd.f32 %v16733_v48, %v4522_v4 }
 0x3e1   : > { %v4814_v62 = vadd.f32 %v16738_v37, %v4664_v2 }
 0x3e2   : > { %v4403_v6 = vpop.f32.mrf.mxu3  ;;  %v5193_v52 = vpop.f32.mrf.mxu0 }
 0x3e3   : > { %v4404_v34 = vadd.f32 %v4403_v6, %v16711_v60 }
 0x3e5   : > { %v4523_v28 = vadd.f32 %v16742_v55, %v4404_v34 }
 0x3e7   : > { %v5043_v14 = vpop.f32.mrf.mxu2  ;;  %v5301_v12 = vpop.f32.mrf.mxu1 }
 0x3ea   : > { %v4405_v46 = vpop.f32.mrf.mxu3  ;;  %v5195_v2 = vpop.f32.mrf.mxu0 }
 0x3eb   : > { %v4406_v48 = vadd.f32 %v4405_v46, %v16719_v45 }
 0x3ed   : > { %v4524_v55 = vadd.f32 %v16753_v25, %v4406_v48 }
 0x3ef   : > { %v5045_v49 = vpop.f32.mrf.mxu2  ;;  %v5303_v4 = vpop.f32.mrf.mxu1 }
 0x3f2   : > { %v4408_v44 = vpop.f32.mrf.mxu3 }
 0x3f3   : > { %v4409_v45 = vadd.f32 %v4408_v44, %v16724_v41 }
 0x3f5   : > { %v4525_v25 = vadd.f32 %v16761_v27, %v4409_v45 }
 0x3fa   : > { %v16788_v50 = vpop.f32.mrf.mxu3 }
 0x3fb   : > { %v4411_v41 = vadd.f32 %v16788_v50, %v16726_v53 }
 0x402   : > { %v16796_v30 = vpop.f32.mrf.mxu3 }
 0x403   : > { %v4414_v53 = vadd.f32 %v16796_v30, %v16731_v22 }
 0x40a   : > { %v16802_v59 = vpop.f32.mrf.mxu3 }
 0x40b   : > { %v4416_v22 = vadd.f32 %v16802_v59, %v16735_v9 }
 0x412   : > { %v16806_v21 = vpop.f32.mrf.mxu3 }
 0x413   : > { %v4419_v9 = vadd.f32 %v16806_v21, %v16744_v10 }
 0x41a   : > { %v16809_v54 = vpop.f32.mrf.mxu3 }
 0x41b   : > { %v4421_v10 = vadd.f32 %v16809_v54, %v16750_v26  ;;  %v19659_v54 = vld [vmem:[#allocation18_spill] sm:$0xff] }
 0x422   : > { %v4896_v39 = vpop.f32.mrf.mxu3 }
 0x423   : > { %v4921_v16 = vadd.f32 %v4896_v39, %v4813_v18  ;;  %v5048_v18 = vpop.f32.mrf.mxu2 }
 0x425   : > { %v5063_v58 = vadd.f32 %v5038_v43, %v4921_v16  ;;  %v4665_v43 = vadd.f32 %v16746_v1, %v4523_v28  ;;  %v4666_v1 = vadd.f32 %v16755_v61, %v4524_v55  ;;  %v4667_v61 = vadd.f32 %v16763_v51, %v4525_v25 }
 0x427   : > { %v5213_v31 = vadd.f32 %v5188_v32, %v5063_v58  ;;  %v4815_v37 = vadd.f32 %v16748_v5, %v4665_v43  ;;  %v4816_v5 = vadd.f32 %v16759_v17, %v4666_v1 }
 0x429   : > { %v5321_v20 = vadd.f32 %v5296_v29, %v5213_v31 }
 0x42a   : > { %v4898_v23 = vpop.f32.mrf.mxu3 }
 0x42b   : > { %v5335_v60 = vadd.f32 %v16817_v8, %v5321_v20  ;;  %v4922_v16 = vadd.f32 %v4898_v23, %v4814_v62  ;;  %v5198_v20 = vpop.f32.mrf.mxu0  ;;  %v5306_v62 = vpop.f32.mrf.mxu1 }
 0x42c   : > { %v5050_v48 = vpop.f32.mrf.mxu2 }
 0x42d   : > { %v5345_v6 = vmax.f32 %v5335_v60, 0.0  ;;  %v5064_v58 = vadd.f32 %v5040_v0, %v4922_v16 }
 0x42f   : > { %5356 = vst.msk [vmem:[#allocation3] sm:$0xff] %vm5355_vm12, %v5345_v6  ;;  %v5214_v32 = vadd.f32 %v5190_v11, %v5064_v58 }
 0x431   : > { %v5322_v34 = vadd.f32 %v5298_v7, %v5214_v32  ;;  %v4527_v32 = vadd.f32 %v16776_v36, %v4414_v53  ;;  %v4528_v36 = vadd.f32 %v16782_v47, %v4416_v22  ;;  %v4529_v47 = vadd.f32 %v16790_v24, %v4419_v9  ;;  %v19660_v53 = vld [vmem:[#allocation11_spill] sm:$0xff] }
 0x432   : > { %v4901_v29 = vpop.f32.mrf.mxu3  ;;  %v4530_v24 = vadd.f32 %v16798_v15, %v4421_v10 }
 0x433   : > { %v5336_v19 = vadd.f32 %v16817_v8, %v5322_v34  ;;  %v4923_v63 = vadd.f32 %v4901_v29, %v4815_v37  ;;  %v5200_v58 = vpop.f32.mrf.mxu0 }
 0x434   : > { %v5053_v29 = vpop.f32.mrf.mxu2 }
 0x435   : > { %v5346_v46 = vmax.f32 %v5336_v19, 0.0  ;;  %v5065_v0 = vadd.f32 %v5043_v14, %v4923_v63 }
 0x437   : > { %5357 = vst.msk [vmem:[#allocation3 + $0x8] sm:$0xff] %vm5355_vm12, %v5346_v46  ;;  %v5215_v11 = vadd.f32 %v5193_v52, %v5065_v0  ;;  %v4526_v52 = vadd.f32 %v16770_v40, %v4411_v41  ;;  %v5308_v40 = vpop.f32.mrf.mxu1  ;;  %v4671_v41 = vadd.f32 %v16792_v38, %v4529_v47 }
 0x439   : > { %v5323_v7 = vadd.f32 %v5301_v12, %v5215_v11  ;;  %v4817_v12 = vadd.f32 %v16765_v35, %v4667_v61  ;;  %v4668_v51 = vadd.f32 %v16772_v56, %v4526_v52  ;;  %v4669_v56 = vadd.f32 %v16778_v42, %v4527_v32 }
 0x43a   : > { %v4903_v39 = vpop.f32.mrf.mxu3  ;;  %v4670_v11 = vadd.f32 %v16784_v13, %v4528_v36 }
 0x43b   : > { %v5337_v31 = vadd.f32 %v16817_v8, %v5323_v7  ;;  %v4924_v28 = vadd.f32 %v4903_v39, %v4816_v5  ;;  %v5203_v63 = vpop.f32.mrf.mxu0 }
 0x43c   : > { %v5055_v7 = vpop.f32.mrf.mxu2 }
 0x43d   : > { %v5347_v44 = vmax.f32 %v5337_v31, 0.0  ;;  %v5066_v14 = vadd.f32 %v5045_v49, %v4924_v28  ;;  %v4818_v49 = vadd.f32 %v16774_v57, %v4668_v51  ;;  %v4819_v57 = vadd.f32 %v16780_v33, %v4669_v56 }
 0x43e   : > { %v4820_v33 = vadd.f32 %v16786_v3, %v4670_v11  ;;  %v19658_v3 = vld [vmem:[#allocation10_spill] sm:$0xff] }
 0x43f   : > { %5358 = vst.msk [vmem:[#allocation3 + $0x10] sm:$0xff] %vm5355_vm12, %v5347_v44  ;;  %v5216_v27 = vadd.f32 %v5195_v2, %v5066_v14  ;;  %v5311_v45 = vpop.f32.mrf.mxu1  ;;  %v4821_v61 = vadd.f32 %v19658_v3, %v4671_v41 }
 0x441   : > { %v5324_v17 = vadd.f32 %v5303_v4, %v5216_v27 }
 0x442   : > { %v4906_v23 = vpop.f32.mrf.mxu3 }
 0x443   : > { %v5338_v60 = vadd.f32 %v16817_v8, %v5324_v17  ;;  %v4925_v16 = vadd.f32 %v4906_v23, %v4817_v12 }
 0x445   : > { %v5348_v50 = vmax.f32 %v5338_v60, 0.0  ;;  %v5067_v6 = vadd.f32 %v5048_v18, %v4925_v16  ;;  %v5205_v18 = vpop.f32.mrf.mxu0  ;;  %v4672_v60 = vadd.f32 %v19659_v54, %v4530_v24 }
 0x447   : > { %5359 = vst.msk [vmem:[#allocation3 + $0x18] sm:$0xff] %vm5355_vm12, %v5348_v50  ;;  %v5217_v43 = vadd.f32 %v5198_v20, %v5067_v6  ;;  %v5313_v20 = vpop.f32.mrf.mxu1  ;;  %v4822_v15 = vadd.f32 %v19660_v53, %v4672_v60 }
 0x449   : > { %v5325_v35 = vadd.f32 %v5306_v62, %v5217_v43  ;;  %v5058_v62 = vpop.f32.mrf.mxu2 }
 0x44a   : > { %v4908_v55 = vpop.f32.mrf.mxu3 }
 0x44b   : > { %v5339_v34 = vadd.f32 %v16817_v8, %v5325_v35  ;;  %v4926_v37 = vadd.f32 %v4908_v55, %v4818_v49 }
 0x44d   : > { %v5349_v30 = vmax.f32 %v5339_v34, 0.0  ;;  %v5068_v2 = vadd.f32 %v5050_v48, %v4926_v37  ;;  %v5208_v12 = vpop.f32.mrf.mxu0 }
 0x44e   : > { %v5369_v54 = vld [vmem:[#allocation3 + $0x18] sm:$0xff] }
 0x44f   : > { %5360 = vst.msk [vmem:[#allocation3 + $0x20] sm:$0xff] %vm5355_vm12, %v5349_v30  ;;  %v5218_v19 = vadd.f32 %v5200_v58, %v5068_v2  ;;  %v5316_v16 = vpop.f32.mrf.mxu1 }
 0x451   : > { %v5326_v4 = vadd.f32 %v5308_v40, %v5218_v19  ;;  %v5060_v58 = vpop.f32.mrf.mxu2  ;;  %v19661_v19 = vmov 65535  }
 0x452   : > { %v4911_v46 = vpop.f32.mrf.mxu3 }
 0x453   : > { %v5340_v0 = vadd.f32 %v16817_v8, %v5326_v4  ;;  %v4927_v1 = vadd.f32 %v4911_v46, %v4819_v57 }
 0x455   : > { %v5350_v59 = vmax.f32 %v5340_v0, 0.0  ;;  %v5069_v42 = vadd.f32 %v5053_v29, %v4927_v1  ;;  %v5210_v32 = vpop.f32.mrf.mxu0 }
 0x456   : > { %v5370_v3 = vld [vmem:[#allocation3 + $0x20] sm:$0xff] }
 0x457   : > { %5361 = vst.msk [vmem:[#allocation3 + $0x28] sm:$0xff] %vm5355_vm12, %v5350_v59  ;;  %v5219_v25 = vadd.f32 %v5203_v63, %v5069_v42  ;;  %v5318_v49 = vpop.f32.mrf.mxu1  ;;  %v5465_v63 = vsel %vm3345_vm5, 4294967295, %v19661_v19 }
 0x458   : > { %v5466_v59 = vsel %vm3117_vm4, %v5465_v63, 0  ;;  %vm5974_vm4 = vcmask 195584  }
 0x459   : > { %v5327_v5 = vadd.f32 %v5311_v45, %v5219_v25 }
 0x45a   : > { %v4913_v39 = vpop.f32.mrf.mxu3 }
 0x45b   : > { %v5341_v31 = vadd.f32 %v16817_v8, %v5327_v5  ;;  %v4928_v28 = vadd.f32 %v4913_v39, %v4820_v33 }
 0x45d   : > { %v5351_v21 = vmax.f32 %v5341_v31, 0.0  ;;  %v5070_v13 = vadd.f32 %v5055_v7, %v4928_v28 }
 0x45e   : > { %v5379_v41 = vld [vmem:[#allocation3 + $0x21] sm:$0xff] }
 0x45f   : > { %5362 = vst.msk [vmem:[#allocation3 + $0x30] sm:$0xff] %vm5355_vm12, %v5351_v21  ;;  %v5220_v44 = vadd.f32 %v5205_v18, %v5070_v13  ;;  %v5371_v21 = vld [vmem:[#allocation3 + $0x28] sm:$0xff] }
 0x460   : > { %v5405_v24 = vld [vmem:[#allocation3 + $0x23] sm:$0xff] }
 0x461   : > { %v5328_v14 = vadd.f32 %v5313_v20, %v5220_v44  ;;  %v5396_v44 = vld [vmem:[#allocation3 + $0x22] sm:$0xff] }
 0x462   : > { %v4916_v27 = vpop.f32.mrf.mxu3  ;;  %v5414_v60 = vmax.f32 %v5396_v44, %v5405_v24 }
 0x463   : > { %v5342_v52 = vadd.f32 %v16817_v8, %v5328_v14  ;;  %v4929_v17 = vadd.f32 %v4916_v27, %v4821_v61  ;;  %v5378_v27 = vld [vmem:[#allocation3 + $0x19] sm:$0xff] }
 0x465   : > { %v5352_v23 = vmax.f32 %v5342_v52, 0.0  ;;  %v5071_v26 = vadd.f32 %v5058_v62, %v4929_v17  ;;  %v5395_v52 = vld [vmem:[#allocation3 + $0x1a] sm:$0xff] }
 0x466   : > { %v5372_v47 = vld [vmem:[#allocation3 + $0x30] sm:$0xff]  ;;  %v5404_v17 = vld [vmem:[#allocation3 + $0x1b] sm:$0xff] }
 0x467   : > { %5363 = vst.msk [vmem:[#allocation3 + $0x38] sm:$0xff] %vm5355_vm12, %v5352_v23  ;;  %v5221_v38 = vadd.f32 %v5208_v12, %v5071_v26  ;;  %v5380_v18 = vld [vmem:[#allocation3 + $0x29] sm:$0xff]  ;;  %v5388_v23 = vmax.f32 %v5370_v3, %v5379_v41 }
 0x468   : > { %v5397_v39 = vld [vmem:[#allocation3 + $0x2a] sm:$0xff]  ;;  %v5389_v61 = vmax.f32 %v5371_v21, %v5380_v18 }
 0x469   : > { %v5329_v48 = vadd.f32 %v5316_v16, %v5221_v38  ;;  %v5406_v31 = vld [vmem:[#allocation3 + $0x2b] sm:$0xff] }
 0x46a   : > { %v4918_v50 = vpop.f32.mrf.mxu3  ;;  %v5415_v62 = vmax.f32 %v5397_v39, %v5406_v31  ;;  %v5377_v16 = vld [vmem:[#allocation3 + $0x11] sm:$0xff] }
 0x46b   : > { %v5343_v6 = vadd.f32 %v16817_v8, %v5329_v48  ;;  %v4930_v51 = vadd.f32 %v4918_v50, %v4822_v15  ;;  %v5394_v38 = vld [vmem:[#allocation3 + $0x12] sm:$0xff]  ;;  %v5387_v50 = vmax.f32 %v5369_v54, %v5378_v27 }
 0x46c   : > { %v5403_v48 = vld [vmem:[#allocation3 + $0x13] sm:$0xff]  ;;  %v5424_v53 = vmax.f32 %v5388_v23, %v5415_v62 }
 0x46d   : > { %v5353_v43 = vmax.f32 %v5343_v6, 0.0  ;;  %v5072_v40 = vadd.f32 %v5060_v58, %v4930_v51  ;;  %v5368_v15 = vld [vmem:[#allocation3 + $0x10] sm:$0xff]  ;;  %v5413_v6 = vmax.f32 %v5395_v52, %v5404_v17 }
 0x46e   : > { %v5373_v9 = vld [vmem:[#allocation3 + $0x38] sm:$0xff]  ;;  %v5376_v51 = vld [vmem:[#allocation3 + $0x9] sm:$0xff] }
 0x46f   : > { %5364 = vst.msk [vmem:[#allocation3 + $0x40] sm:$0xff] %vm5355_vm12, %v5353_v43  ;;  %v5222_v35 = vadd.f32 %v5210_v32, %v5072_v40  ;;  %v5381_v42 = vld [vmem:[#allocation3 + $0x31] sm:$0xff]  ;;  %v5386_v32 = vmax.f32 %v5368_v15, %v5377_v16 }
 0x470   : > { %v5398_v11 = vld [vmem:[#allocation3 + $0x32] sm:$0xff]  ;;  %v5390_v20 = vmax.f32 %v5372_v47, %v5381_v42  ;;  %v5393_v58 = vld [vmem:[#allocation3 + $0xa] sm:$0xff] }
 0x471   : > { %v5330_v55 = vadd.f32 %v5318_v49, %v5222_v35  ;;  %v5407_v25 = vld [vmem:[#allocation3 + $0x33] sm:$0xff]  ;;  %v5402_v43 = vld [vmem:[#allocation3 + $0xb] sm:$0xff]  ;;  %v5423_v35 = vmax.f32 %v5387_v50, %v5414_v60  ;;  %v5412_v49 = vmax.f32 %v5394_v38, %v5403_v48 }
 0x472   : > { %v5416_v13 = vmax.f32 %v5398_v11, %v5407_v25  ;;  %v12705_v42 = vld [vmem:[%s18993_s5 + $0x8] sm:$0xff] }
 0x473   : > { %v5344_v34 = vadd.f32 %v16817_v8, %v5330_v55  ;;  %v5367_v55 = vld [vmem:[#allocation3 + $0x8] sm:$0xff]  ;;  %5561 = vmatpush.bf16.msrb.mxu2 %v12705_v42 }
 0x474   : > { %v5425_v26 = vmax.f32 %v5389_v61, %v5416_v13  ;;  %v12709_v47 = vld [vmem:[%s18993_s5 + $0x28] sm:$0xff] }
 0x475   : > { %v5354_v37 = vmax.f32 %v5344_v34, 0.0  ;;  %v5375_v34 = vld [vmem:[#allocation3 + $0x1] sm:$0xff] }
 0x476   : > { %v5374_v22 = vld [vmem:[#allocation3 + $0x40] sm:$0x1f]  ;;  %v5437_v40 = vpack.c.bf16 %v5425_v26, %v5424_v53 }
 0x477   : > { %5365 = vst.msk [vmem:[#allocation3 + $0x48] sm:$0xff] %vm5355_vm12, %v5354_v37  ;;  %v5383_v30 = vld [vmem:[#allocation3 + $0x41] sm:$0x1f]  ;;  %v5382_v45 = vld [vmem:[#allocation3 + $0x39] sm:$0xff]  ;;  %v5422_v37 = vmax.f32 %v5386_v32, %v5413_v6 }
 0x478   : > { %v5392_v36 = vmax.f32 %v5374_v22, %v5383_v30  ;;  %v5399_v46 = vld [vmem:[#allocation3 + $0x3a] sm:$0xff]  ;;  %v5391_v5 = vmax.f32 %v5373_v9, %v5382_v45  ;;  %v5385_v22 = vmax.f32 %v5367_v55, %v5376_v51  ;;  %v5411_v30 = vmax.f32 %v5393_v58, %v5402_v43  ;;  %v11652_v45 = vld [vmem:[%s19002_s14 + $0x10] sm:$0xf] }
 0x479   : > { %v5408_v0 = vld [vmem:[#allocation3 + $0x3b] sm:$0xff] }
 0x47a   : > { %v5417_v33 = vmax.f32 %v5399_v46, %v5408_v0  ;;  %v5421_v19 = vmax.f32 %v5385_v22, %v5412_v49  ;;  %v12703_v46 = vld [vmem:[%s19002_s14 + $0x10] sm:$0x10] }
 0x47b   : > { %v11653_v0 = vor.u32 %v12703_v46, %v11652_v45 }
 0x47c   : > { %v5426_v14 = vmax.f32 %v5390_v20, %v5417_v33  ;;  %v12704_v20 = vld [vmem:[%s18993_s5] sm:$0xff] }
 0x47d   : > { %5591 = vmatpush.bf16.msra.mxu2 %v12704_v20 }
 0x47e   : > { %v5401_v2 = vld [vmem:[#allocation3 + $0x4a] sm:$0x1f]  ;;  %v5400_v29 = vld [vmem:[#allocation3 + $0x42] sm:$0xff] }
 0x47f   : > { %v5410_v56 = vld [vmem:[#allocation3 + $0x4b] sm:$0x1f]  ;;  %v5409_v57 = vld [vmem:[#allocation3 + $0x43] sm:$0xff] }
 0x480   : > { %v5419_v4 = vmax.f32 %v5401_v2, %v5410_v56  ;;  %v5418_v8 = vmax.f32 %v5400_v29, %v5409_v57  ;;  %v5366_v2 = vld [vmem:[#allocation3] sm:$0xff]  ;;  %v5436_v56 = vpack.c.bf16 %v5423_v35, %v5422_v37  ;;  %v12702_v57 = vld [vmem:[%s19002_s14 + $0x8] sm:$0xff] }
 0x481   : > { %v5384_v29 = vmax.f32 %v5366_v2, %v5375_v34 }
 0x482   : > { %v5428_v1 = vmax.f32 %v5392_v36, %v5419_v4  ;;  %v5427_v10 = vmax.f32 %v5391_v5, %v5418_v8  ;;  %v12701_v4 = vld [vmem:[%s19002_s14] sm:$0xff]  ;;  %v12706_v8 = vld [vmem:[%s18993_s5 + $0x10] sm:$0xff] }
 0x483   : > { %v5420_v63 = vmax.f32 %v5384_v29, %v5411_v30  ;;  %13240 = vmatpush.bf16.msrb.mxu1 %v12706_v8  ;;  %5631 = vmatpush.bf16.msrb.mxu0 %v12706_v8 }
 0x484   : > { %v5439_v7 = vpack.c.bf16 %v5428_v1, %v5428_v1  ;;  %v5438_v12 = vpack.c.bf16 %v5427_v10, %v5426_v14 }
 0x485   : > { %v5435_v36 = vpack.c.bf16 %v5421_v19, %v5420_v63 }
 0x486   : > { %v5468_v28 = vand.u32 %v5466_v59, %v5439_v7  ;;  %v12707_v59 = vld [vmem:[%s18993_s5 + $0x18] sm:$0xff]  ;;  %v12710_v7 = vld [vmem:[%s18993_s5 + $0x30] sm:$0xff] }
 0x487   : > { %5827 = vmatpush.bf16.msra.mxu1 %v12710_v7  ;;  %5774 = vmatpush.bf16.msra.mxu0 %v12709_v47 }
 0x488   : > { %5473 = vmatpush.bf16.msrb.mxu3 %v5468_v28  ;;  %v12711_v28 = vld [vmem:[%s18993_s5 + $0x38] sm:$0xff] }
 0x48c   : > { %5474 = vmatpush.bf16.msrb.mxu3 %v5438_v12 }
 0x490   : > { %5475 = vmatpush.bf16.msrb.mxu3 %v5437_v40 }
 0x494   : > { %5476 = vmatpush.bf16.msrb.mxu3 %v5436_v56 }
 0x498   : > { %5477 = vmatpush.bf16.msrb.mxu3 %v5435_v36 }
 0x49b   : > { %11654 = vmatmul.msk.bf16.vlgmr.msrb.gmra.mxu3 %vm5455_vm13, %v12701_v4 }
 0x49c   : > { %5678 = vmatpush.bf16.msra.mxu3 %v12707_v59 }
 0x4a0   : > { %5884 = vmatpush.bf16.msrb.mxu3 %v12711_v28 }
 0x4ab   : > { %11655 = vmatmul.msk.bf16.gmra.mxu3 %vm5455_vm13, %v12702_v57 }
 0x4bb   : > { %11656 = vmatmul.msk.bf16.gmra.mxu3 %vm5455_vm13, %v11653_v0 }
 0x51e   : > { %v5479_v1 = vpop.f32.mrf.mxu3 }
 0x51f   : > { %v5494_v9 = vpack.c.bf16 %v5479_v1, %v5479_v1  ;;  %v12708_v1 = vld [vmem:[%s18993_s5 + $0x20] sm:$0xff] }
 0x521   : > { %5501 = vst.msk [vmem:[#allocation5] sm:$0xf] %vm5500_vm14, %v5494_v9 }
 0x526   : > { %v5481_v11 = vpop.f32.mrf.mxu3 }
 0x527   : > { %v5495_v25 = vpack.c.bf16 %v5481_v11, %v5481_v11 }
 0x528   : > { %v5602_v10 = vld [vmem:[#allocation5] sm:$0xe] }
 0x529   : > { %5502 = vst.msk [vmem:[#allocation5 + $0x4] sm:$0xf] %vm5500_vm14, %v5495_v25  ;;  %v5645_v13 = vld [vmem:[#allocation5] sm:$0x8]  ;;  %v5607_v24 = vunpack.c.l.b16 %v5602_v10 }
 0x52a   : > { %v5652_v3 = vunpack.c.l.b16 %v5645_v13 }
 0x52e   : > { %v5484_v5 = vpop.f32.mrf.mxu3 }
 0x52f   : > { %v5496_v33 = vpack.c.bf16 %v5484_v5, %v5484_v5 }
 0x530   : > { %v16910_v31 = vld [vmem:[#allocation5] sm:$0xff]  }
 0x531   : > { %5503 = vst.msk [vmem:[#allocation5 + $0x8] sm:$0xf] %vm5500_vm14, %v5496_v33  ;;  %v13147_v21 = vunpack.c.h.b16 %v16910_v31  ;;  %v5530_v61 = vshll.u32 %v16910_v31, 16  ;;  %v5528_v48 = vshrl.u32 %v16910_v31, 16  ;;  %v5788_v34 = vld [vmem:[#allocation5 + $0x4] sm:$0xc] }
 0x532   : > { %v5799_v30 = vunpack.c.l.b16 %v5788_v34 }
 0x533   : > { %v5608_v27 = vpack.c.b16 %v13147_v21, %v5607_v24  ;;  %v16923_v26 = vpack.c.b16 %v13147_v21, %v5652_v3  ;;  %v5532_v16 = vrot.slane %v5530_v61, 1 }
 0x535   : > { %v5609_v38 = vrot.slane %v5608_v27, 1  ;;  %v5656_v15 = vrot.slane %v16923_v26, 3  ;;  %v5533_v43 = vor.u32 %v5532_v16, %v5528_v48  ;;  %v5704_v27 = vshll.u32 %v16923_v26, 16 }
 0x536   : > { %v5486_v18 = vpop.f32.mrf.mxu3 }
 0x537   : > { %v5497_v39 = vpack.c.bf16 %v5486_v18, %v5486_v18 }
 0x538   : > { %v5510_v41 = vld [vmem:[#allocation5 + $0x8] sm:$0xf] }
 0x539   : > { %5504 = vst.msk [vmem:[#allocation5 + $0xc] sm:$0xf] %vm5500_vm14, %v5497_v39  ;;  %v16921_v17 = vunpack.c.l.b16 %v5510_v41  ;;  %v12712_v41 = vld [vmem:[%s18993_s5 + $0x40] sm:$0xff] }
 0x53b   : > { %v5753_v57 = vpack.c.b16 %v16921_v17, %v13147_v21  ;;  %v5572_v21 = vpack.c.b16 %v16921_v17, %v16921_v17 }
 0x53e   : > { %v5489_v44 = vpop.f32.mrf.mxu3 }
 0x53f   : > { %v5498_v14 = vpack.c.bf16 %v5489_v44, %v5489_v44  ;;  %v5898_v44 = vld [vmem:[#allocation5 + $0x4] sm:$0x8] }
 0x540   : > { %v5513_v62 = vld [vmem:[#allocation5 + $0xc] sm:$0x1]  ;;  %v5903_v24 = vunpack.c.l.b16 %v5898_v44 }
 0x541   : > { %v5646_v52 = vld [vmem:[#allocation5 + $0xc] sm:$0x7]  ;;  %5505 = vst.msk [vmem:[#allocation5 + $0x10] sm:$0xf] %vm5500_vm14, %v5498_v14  ;;  %v5524_v12 = vunpack.c.l.b16 %v5513_v62  ;;  %v5701_v62 = vshrl.u32 %v16923_v26, 16 }
 0x542   : > { %v5653_v23 = vunpack.c.l.b16 %v5646_v52  ;;  %v13235_v49 = vld [vmem:[#allocation5 + $0x8] sm:$0xff]  }
 0x543   : > { %v5526_v54 = vpack.c.b16 %v5524_v12, %v16921_v17  ;;  %v13150_v37 = vunpack.c.l.b16 %v13235_v49  ;;  %v13151_v22 = vunpack.c.h.b16 %v13235_v49  ;;  %v5692_v11 = vld [vmem:[#allocation5 + $0xc] sm:$0xf] }
 0x544   : > { %v5655_v60 = vpack.c.b16 %v5653_v23, %v16921_v17  ;;  %v5697_v33 = vunpack.c.l.b16 %v5692_v11 }
 0x545   : > { %v5610_v53 = vrot.slane %v5526_v54, 1  ;;  %v5535_v6 = vshll.u32 %v5526_v54, 16  ;;  %v5803_v56 = vpack.c.b16 %v13150_v37, %v5799_v30  ;;  %v5539_v45 = vshrl.u32 %v5526_v54, 16 }
 0x546   : > { %v5657_v50 = vrot.slane %v5655_v60, 3  ;;  %v5754_v28 = vpack.c.b16 %v5697_v33, %v5697_v33  ;;  %v5491_v10 = vpop.f32.mrf.mxu3  ;;  %v5698_v13 = vpack.c.b16 %v5697_v33, %v16921_v17  ;;  %v5703_v54 = vrot.slane %v5701_v62, 3 }
 0x547   : > { %11678 = vmatmul.msk.bf16.vlgmr.msrb.gmra.mxu1 %vm5355_vm12, %v5610_v53  ;;  %v5611_v51 = vsel %vm1247_vm0, %v5609_v38, %v5610_v53  ;;  %v5537_v40 = vrot.slane %v5535_v6, 1  ;;  %v5805_v36 = vrot.slane %v5803_v56, 2  ;;  %v5849_v59 = vshrl.u32 %v5803_v56, 16 }
 0x548   : > { %v5658_v58 = vsel %vm2182_vm2, %v5656_v15, %v5657_v50  ;;  %11677 = vmatmul.msk.bf16.vlgmr.msrb.gmra.mxu0 %vm5355_vm12, %v5611_v51  ;;  %v5791_v32 = vld [vmem:[#allocation5 + $0x10] sm:$0x3]  ;;  %v5852_v42 = vshll.u32 %v5803_v56, 16  ;;  %v5709_v14 = vshrl.u32 %v5698_v13, 16  ;;  %v5712_v3 = vshll.u32 %v5698_v13, 16 }
 0x549   : > { %11685 = vmatmul.msk.bf16.vlgmr.msra.gmra.mxu3 %vm5355_vm12, %v5658_v58  ;;  %v5538_v35 = vsel %vm4237_vm9, %v5533_v43, %v5537_v40  ;;  %v5802_v55 = vunpack.c.l.b16 %v5791_v32  ;;  %v5841_v29 = vld [vmem:[#allocation5 + $0x10] sm:$0x7]  ;;  %v5541_v0 = vor.u32 %v5539_v45, %v5537_v40  ;;  %v5851_v47 = vrot.slane %v5849_v59, 2 }
 0x54a   : > { %11663 = vmatmul.msk.bf16.vlgmr.msrb.gmra.mxu2 %vm5355_vm12, %v5538_v35  ;;  %v5846_v63 = vunpack.c.l.b16 %v5841_v29  ;;  %v5854_v5 = vrot.slane %v5852_v42, 3  ;;  %v5711_v12 = vrot.slane %v5709_v14, 3  ;;  %v5714_v17 = vrot.slane %v5712_v3, 4 }
 0x54b   : > { %v5804_v2 = vpack.c.b16 %v5802_v55, %v13151_v22  ;;  %5736 = vmatpush.bf16.msrb.mxu2 %v12708_v1  ;;  %v5706_v60 = vrot.slane %v5704_v27, 4 }
 0x54c   : > { %v5847_v46 = vpack.c.b16 %v5846_v63, %v13151_v22  ;;  %v5855_v39 = vor.u32 %v5854_v5, %v5851_v47  ;;  %v5715_v16 = vor.u32 %v5714_v17, %v5711_v12  ;;  %v13633_v17 = vld [vmem:[%s18994_s6] ss:$0 sm:$0xff] }
 0x54d   : > { %v5806_v19 = vrot.slane %v5804_v2, 2  ;;  %v5707_v38 = vor.u32 %v5706_v60, %v5703_v54 }
 0x54e   : > { %v5857_v9 = vshrl.u32 %v5847_v46, 16  ;;  %v5860_v8 = vshll.u32 %v5847_v46, 16  ;;  %v5906_v61 = vrot.slane %v5847_v46, 3 }
 0x54f   : > { %v5807_v4 = vsel %vm1475_vm1, %v5805_v36, %v5806_v19  ;;  %v5716_v48 = vsel %vm5699_vm15, %v5707_v38, %v5715_v16 }
 0x550   : > { %v5859_v25 = vrot.slane %v5857_v9, 2  ;;  %v5862_v7 = vrot.slane %v5860_v8, 3 }
 0x552   : > { %v5863_v18 = vor.u32 %v5862_v7, %v5859_v25 }
 0x554   : > { %v5864_v20 = vsel %vm5086_vm11, %v5855_v39, %v5863_v18 }
 0x557   : > { %11709 = vmatmul.msk.bf16.vlgmr.msra.gmra.mxu1 %vm5355_vm12, %v5807_v4 }
 0x558   : > { %11701 = vmatmul.msk.bf16.vlgmr.msra.gmra.mxu0 %vm5355_vm12, %v5753_v57 }
 0x559   : > { %11686 = vmatmul.msk.bf16.gmra.mxu3 %vm5355_vm12, %v5657_v50 }
 0x55a   : > { %11664 = vmatmul.msk.bf16.gmra.mxu2 %vm5355_vm12, %v5541_v0 }
 0x567   : > { %11710 = vmatmul.msk.bf16.gmra.mxu1 %vm5355_vm12, %v5806_v19 }
 0x568   : > { %11702 = vmatmul.msk.bf16.gmra.mxu0 %vm5355_vm12, %v5754_v28 }
 0x569   : > { %11717 = vmatmul.msk.bf16.vlgmr.msrb.gmra.mxu3 %vm5355_vm12, %v5864_v20 }
 0x56a   : > { %11669 = vmatmul.msk.bf16.vlgmr.msra.gmra.mxu2 %vm5355_vm12, %v16910_v31  ;;  %v5904_v31 = vpack.c.b16 %v13150_v37, %v5903_v24 }
 0x56b   : > { %5927 = vmatpush.bf16.msra.mxu2 %v12712_v41 }
 0x56c   : > { %v5905_v52 = vrot.slane %v5904_v31, 3 }
 0x56e   : > { %v5907_v23 = vsel %vm2182_vm2, %v5905_v52, %v5906_v61 }
 0x579   : > { %11718 = vmatmul.msk.bf16.gmra.mxu3 %vm5355_vm12, %v5863_v18 }
 0x57a   : > { %11670 = vmatmul.msk.bf16.gmra.mxu2 %vm5355_vm12, %v5572_v21 }
 0x58a   : > { %11693 = vmatmul.msk.bf16.vlgmr.msrb.gmra.mxu2 %vm5355_vm12, %v5716_v48 }
 0x59a   : > { %11694 = vmatmul.msk.bf16.gmra.mxu2 %vm5355_vm12, %v5715_v16 }
 0x5aa   : > { %11725 = vmatmul.msk.bf16.vlgmr.msra.gmra.mxu2 %vm5355_vm12, %v5907_v23 }
 0x5ba   : > { %11726 = vmatmul.msk.bf16.gmra.mxu2 %vm5355_vm12, %v5906_v61 }
 0x5c4   : > { %v5638_v26 = vpop.f32.mrf.mxu1 }
 0x5c5   : > { %v5633_v53 = vpop.f32.mrf.mxu0 }
 0x5cc   : > { %v5680_v15 = vpop.f32.mrf.mxu3  ;;  %v5640_v50 = vpop.f32.mrf.mxu1 }
 0x5cd   : > { %v5563_v6 = vpop.f32.mrf.mxu2  ;;  %v5635_v51 = vpop.f32.mrf.mxu0 }
 0x5d4   : > { %v5682_v58 = vpop.f32.mrf.mxu3  ;;  %v5829_v43 = vpop.f32.mrf.mxu1 }
 0x5d5   : > { %v5565_v40 = vpop.f32.mrf.mxu2  ;;  %v5776_v32 = vpop.f32.mrf.mxu0 }
 0x5dc   : > { %v5685_v35 = vpop.f32.mrf.mxu3  ;;  %v5831_v49 = vpop.f32.mrf.mxu1 }
 0x5dd   : > { %v5568_v55 = vpop.f32.mrf.mxu2  ;;  %v5778_v34 = vpop.f32.mrf.mxu0 }
 0x5e4   : > { %v5687_v37 = vpop.f32.mrf.mxu3  ;;  %v5834_v22 = vpop.f32.mrf.mxu1 }
 0x5e5   : > { %v5570_v30 = vpop.f32.mrf.mxu2  ;;  %v5781_v2 = vpop.f32.mrf.mxu0  ;;  %v12718_v37 = vld [vmem:[%s18995_s7 + $0x10] sm:$0xff] }
 0x5e6   : > { %6146 = vmatpush.bf16.msrb.mxu2 %v12718_v37 }
 0x5ec   : > { %v5886_v56 = vpop.f32.mrf.mxu3  ;;  %v5836_v29 = vpop.f32.mrf.mxu1 }
 0x5ed   : > { %v5593_v19 = vpop.f32.mrf.mxu2  ;;  %v5783_v63 = vpop.f32.mrf.mxu0  ;;  %v12720_v29 = vld [vmem:[%s18995_s7 + $0x20] sm:$0xff] }
 0x5ee   : > { %v5594_v36 = vadd.f32 %v5593_v19, %v5563_v6 }
 0x5f0   : > { %v5642_v4 = vadd.f32 %v5633_v53, %v5594_v36 }
 0x5f2   : > { %v5689_v57 = vadd.f32 %v5680_v15, %v5642_v4 }
 0x5f4   : > { %v5888_v45 = vpop.f32.mrf.mxu3 }
 0x5f5   : > { %v5595_v46 = vpop.f32.mrf.mxu2 }
 0x5f6   : > { %v5596_v13 = vadd.f32 %v5595_v46, %v5565_v40  ;;  %v11737_v40 = vld [vmem:[%s19003_s15 + $0x10] sm:$0xf] }
 0x5f8   : > { %v5643_v44 = vadd.f32 %v5635_v51, %v5596_v13 }
 0x5fa   : > { %v5690_v24 = vadd.f32 %v5682_v58, %v5643_v44  ;;  %v12713_v58 = vld [vmem:[%s19003_s15] sm:$0xff] }
 0x5fc   : > { %v5891_v0 = vpop.f32.mrf.mxu3 }
 0x5fd   : > { %v5598_v1 = vpop.f32.mrf.mxu2 }
 0x5fe   : > { %v5599_v9 = vadd.f32 %v5598_v1, %v5568_v55 }
 0x600   : > { %v5644_v8 = vadd.f32 %v5638_v26, %v5599_v9 }
 0x602   : > { %v5691_v59 = vadd.f32 %v5685_v35, %v5644_v8 }
 0x604   : > { %v5893_v42 = vpop.f32.mrf.mxu3 }
 0x605   : > { %v5600_v11 = vpop.f32.mrf.mxu2 }
 0x60d   : > { %v5738_v25 = vpop.f32.mrf.mxu2 }
 0x60e   : > { %v5747_v7 = vadd.f32 %v5738_v25, %v5689_v57 }
 0x610   : > { %v5785_v47 = vadd.f32 %v5776_v32, %v5747_v7  ;;  %v12715_v32 = vld [vmem:[%s19003_s15 + $0x10] sm:$0x10] }
 0x611   : > { %v11738_v35 = vor.u32 %v12715_v32, %v11737_v40 }
 0x612   : > { %v5838_v5 = vadd.f32 %v5829_v43, %v5785_v47  ;;  %v12714_v43 = vld [vmem:[%s19003_s15 + $0x8] sm:$0xff] }
 0x614   : > { %v5895_v33 = vadd.f32 %v5886_v56, %v5838_v5  ;;  %v12722_v56 = vld [vmem:[%s18995_s7 + $0x30] sm:$0xff] }
 0x615   : > { %v5740_v18 = vpop.f32.mrf.mxu2 }
 0x616   : > { %v5748_v3 = vadd.f32 %v5740_v18, %v5690_v24 }
 0x618   : > { %v5786_v31 = vadd.f32 %v5778_v34, %v5748_v3 }
 0x61a   : > { %v5839_v62 = vadd.f32 %v5831_v49, %v5786_v31  ;;  %v12716_v49 = vld [vmem:[%s18995_s7] sm:$0xff] }
 0x61b   : > { %6106 = vmatpush.bf16.msra.mxu3 %v12716_v49 }
 0x61c   : > { %v5896_v27 = vadd.f32 %v5888_v45, %v5839_v62 }
 0x61d   : > { %v5743_v39 = vpop.f32.mrf.mxu2 }
 0x61e   : > { %v5749_v28 = vadd.f32 %v5743_v39, %v5691_v59 }
 0x61f   : > { %6250 = vmatpush.bf16.msrb.mxu3 %v12720_v29 }
 0x620   : > { %v5787_v20 = vadd.f32 %v5781_v2, %v5749_v28  ;;  %v12721_v28 = vld [vmem:[%s18995_s7 + $0x28] sm:$0xff] }
 0x621   : > { %6288 = vmatpush.bf16.msra.mxu2 %v12721_v28 }
 0x622   : > { %v5840_v10 = vadd.f32 %v5834_v22, %v5787_v20  ;;  %v12717_v22 = vld [vmem:[%s18995_s7 + $0x8] sm:$0xff]  ;;  %v12719_v20 = vld [vmem:[%s18995_s7 + $0x18] sm:$0xff] }
 0x623   : > { %6076 = vmatpush.bf16.msrb.mxu1 %v12717_v22 }
 0x624   : > { %v5897_v21 = vadd.f32 %v5891_v0, %v5840_v10 }
 0x625   : > { %v5745_v41 = vpop.f32.mrf.mxu2 }
 0x627   : > { %6193 = vmatpush.bf16.msra.mxu1 %v12719_v20 }
 0x62d   : > { %v5929_v14 = vpop.f32.mrf.mxu2 }
 0x62e   : > { %v5938_v54 = vadd.f32 %v5929_v14, %v5895_v33 }
 0x630   : > { %v5945_v48 = vadd.f32 %v13633_v17, %v5938_v54 }
 0x632   : > { %v5948_v6 = vmax.f32 %v5945_v48, 0.0 }
 0x635   : > { %v5931_v61 = vpop.f32.mrf.mxu2 }
 0x636   : > { %v5939_v52 = vadd.f32 %v5931_v61, %v5896_v27 }
 0x638   : > { %v5946_v16 = vadd.f32 %v13633_v17, %v5939_v52 }
 0x63a   : > { %v5949_v53 = vmax.f32 %v5946_v16, 0.0 }
 0x63c   : > { %v5957_v51 = vpack.c.bf16 %v5949_v53, %v5948_v6 }
 0x63d   : > { %v5934_v12 = vpop.f32.mrf.mxu2 }
 0x63e   : > { %v5940_v23 = vadd.f32 %v5934_v12, %v5897_v21 }
 0x640   : > { %v5947_v60 = vadd.f32 %v13633_v17, %v5940_v23 }
 0x642   : > { %v5950_v38 = vmax.f32 %v5947_v60, 0.0 }
 0x644   : > { %v5958_v26 = vpack.c.bf16 %v5950_v38, %v5950_v38 }
 0x645   : > { %v5936_v15 = vpop.f32.mrf.mxu2 }
 0x646   : > { %v5985_v50 = vsel %vm2410_vm3, %v5958_v26, 0 }
 0x647   : > { %5993 = vmatpush.bf16.msrb.mxu0 %v5985_v50 }
 0x64b   : > { %5994 = vmatpush.bf16.msrb.mxu0 %v5957_v51 }
 0x64e   : > { %11739 = vmatmul.msk.bf16.vlgmr.msrb.gmra.mxu0 %vm5974_vm4, %v12713_v58 }
 0x64f   : > { %6341 = vmatpush.bf16.msra.mxu0 %v12722_v56 }
 0x65e   : > { %11740 = vmatmul.msk.bf16.gmra.mxu0 %vm5974_vm4, %v12714_v43  ;;  %v12724_v43 = vld [vmem:[%s18995_s7 + $0x40] sm:$0xff] }
 0x66e   : > { %11741 = vmatmul.msk.bf16.gmra.mxu0 %vm5974_vm4, %v11738_v35 }
 0x6cb   : > { %v5996_v55 = vpop.f32.mrf.mxu0 }
 0x6cc   : > { %v6011_v34 = vpack.c.bf16 %v5996_v55, %v5996_v55 }
 0x6ce   : > { %6017 = vst.msk [vmem:[#allocation6] sm:$0xf] %vm5500_vm14, %v6011_v34 }
 0x6d3   : > { %v5998_v30 = vpop.f32.mrf.mxu0 }
 0x6d4   : > { %v6012_v2 = vpack.c.bf16 %v5998_v30, %v5998_v30 }
 0x6d5   : > { %v6117_v0 = vld [vmem:[#allocation6] sm:$0xe] }
 0x6d6   : > { %6018 = vst.msk [vmem:[#allocation6 + $0x4] sm:$0xf] %vm5500_vm14, %v6012_v2  ;;  %v6160_v9 = vld [vmem:[#allocation6] sm:$0x8]  ;;  %v6122_v59 = vunpack.c.l.b16 %v6117_v0 }
 0x6d7   : > { %v6167_v7 = vunpack.c.l.b16 %v6160_v9 }
 0x6db   : > { %v6001_v19 = vpop.f32.mrf.mxu0 }
 0x6dc   : > { %v6013_v63 = vpack.c.bf16 %v6001_v19, %v6001_v19 }
 0x6dd   : > { %v13153_v36 = vld [vmem:[#allocation6] sm:$0xff]  }
 0x6de   : > { %6019 = vst.msk [vmem:[#allocation6 + $0x8] sm:$0xf] %vm5500_vm14, %v6013_v63  ;;  %11754 = vmatmul.msk.bf16.vlgmr.msra.gmra.mxu3 %vm5355_vm12, %v13153_v36  ;;  %v17008_v1 = vunpack.c.h.b16 %v13153_v36  ;;  %v6045_v42 = vshll.u32 %v13153_v36, 16  ;;  %v6043_v24 = vshrl.u32 %v13153_v36, 16  ;;  %v6302_v3 = vld [vmem:[#allocation6 + $0x4] sm:$0xc] }
 0x6df   : > { %v6313_v16 = vunpack.c.l.b16 %v6302_v3  ;;  %6441 = vmatpush.bf16.msra.mxu3 %v12724_v43  ;;  %v12723_v36 = vld [vmem:[%s18995_s7 + $0x38] sm:$0xff] }
 0x6e0   : > { %v6123_v5 = vpack.c.b16 %v17008_v1, %v6122_v59  ;;  %v17024_v10 = vpack.c.b16 %v17008_v1, %v6167_v7  ;;  %v6047_v13 = vrot.slane %v6045_v42, 1 }
 0x6e2   : > { %v6124_v14 = vrot.slane %v6123_v5, 1  ;;  %v6215_v52 = vshrl.u32 %v17024_v10, 16  ;;  %v6218_v12 = vshll.u32 %v17024_v10, 16  ;;  %v6048_v54 = vor.u32 %v6047_v13, %v6043_v24 }
 0x6e3   : > { %v6003_v4 = vpop.f32.mrf.mxu0  ;;  %v6171_v9 = vrot.slane %v17024_v10, 3 }
 0x6e4   : > { %v6014_v57 = vpack.c.bf16 %v6003_v4, %v6003_v4  ;;  %v6217_v51 = vrot.slane %v6215_v52, 3  ;;  %v6220_v58 = vrot.slane %v6218_v12, 4 }
 0x6e5   : > { %v6025_v45 = vld [vmem:[#allocation6 + $0x8] sm:$0xf] }
 0x6e6   : > { %6020 = vst.msk [vmem:[#allocation6 + $0xc] sm:$0xf] %vm5500_vm14, %v6014_v57  ;;  %v17006_v46 = vunpack.c.l.b16 %v6025_v45  ;;  %v6221_v55 = vor.u32 %v6220_v58, %v6217_v51  ;;  %v6412_v45 = vld [vmem:[#allocation6 + $0x4] sm:$0x8] }
 0x6e7   : > { %v6417_v59 = vunpack.c.l.b16 %v6412_v45 }
 0x6e8   : > { %v6087_v25 = vpack.c.b16 %v17006_v46, %v17006_v46  ;;  %v6267_v0 = vpack.c.b16 %v17006_v46, %v17008_v1 }
 0x6eb   : > { %v6006_v8 = vpop.f32.mrf.mxu0 }
 0x6ec   : > { %v6015_v11 = vpack.c.bf16 %v6006_v8, %v6006_v8 }
 0x6ed   : > { %v6028_v47 = vld [vmem:[#allocation6 + $0xc] sm:$0x1] }
 0x6ee   : > { %v6207_v33 = vld [vmem:[#allocation6 + $0xc] sm:$0xf]  ;;  %6021 = vst.msk [vmem:[#allocation6 + $0x10] sm:$0xf] %vm5500_vm14, %v6015_v11  ;;  %11755 = vmatmul.msk.bf16.gmra.mxu3 %vm5355_vm12, %v6087_v25  ;;  %v6039_v18 = vunpack.c.l.b16 %v6028_v47 }
 0x6ef   : > { %v17015_v39 = vunpack.c.l.b16 %v6207_v33  ;;  %v17026_v21 = vld [vmem:[#allocation6 + $0x8] sm:$0xff]  }
 0x6f0   : > { %v6041_v41 = vpack.c.b16 %v6039_v18, %v17006_v46  ;;  %v13158_v62 = vunpack.c.l.b16 %v17026_v21  ;;  %v13159_v15 = vunpack.c.h.b16 %v17026_v21  ;;  %v6161_v56 = vld [vmem:[#allocation6 + $0xc] sm:$0x7] }
 0x6f1   : > { %v6213_v44 = vpack.c.b16 %v17015_v39, %v17006_v46  ;;  %v6168_v29 = vunpack.c.l.b16 %v6161_v56 }
 0x6f2   : > { %v6125_v31 = vrot.slane %v6041_v41, 1  ;;  %v6050_v61 = vshll.u32 %v6041_v41, 16  ;;  %v6317_v6 = vpack.c.b16 %v13158_v62, %v6313_v16  ;;  %v6054_v30 = vshrl.u32 %v6041_v41, 16 }
 0x6f3   : > { %v6223_v27 = vshrl.u32 %v6213_v44, 16  ;;  %v6226_v17 = vshll.u32 %v6213_v44, 16  ;;  %v6008_v22 = vpop.f32.mrf.mxu0  ;;  %v6170_v19 = vpack.c.b16 %v6168_v29, %v17006_v46  ;;  %v6418_v11 = vpack.c.b16 %v13158_v62, %v6417_v59 }
 0x6f4   : > { %v6126_v23 = vsel %vm1247_vm0, %v6124_v14, %v6125_v31  ;;  %v6052_v60 = vrot.slane %v6050_v61, 1  ;;  %v6319_v35 = vrot.slane %v6317_v6, 2  ;;  %v6268_v46 = vpack.c.b16 %v17015_v39, %v17015_v39 }
 0x6f5   : > { %11762 = vmatmul.msk.bf16.vlgmr.msrb.gmra.mxu2 %vm5355_vm12, %v6126_v23  ;;  %v6305_v38 = vld [vmem:[#allocation6 + $0x10] sm:$0x3]  ;;  %v6225_v48 = vrot.slane %v6223_v27, 3  ;;  %v6228_v26 = vrot.slane %v6226_v17, 4  ;;  %v6172_v57 = vrot.slane %v6170_v19, 3  ;;  %v6419_v7 = vrot.slane %v6418_v11, 3 }
 0x6f6   : > { %v6053_v53 = vsel %vm4237_vm9, %v6048_v54, %v6052_v60  ;;  %v6316_v50 = vunpack.c.l.b16 %v6305_v38  ;;  %v6056_v2 = vor.u32 %v6054_v30, %v6052_v60  ;;  %v6355_v63 = vld [vmem:[#allocation6 + $0x10] sm:$0x7]  ;;  %v6363_v33 = vshrl.u32 %v6317_v6, 16 }
 0x6f7   : > { %11748 = vmatmul.msk.bf16.vlgmr.msrb.gmra.mxu1 %vm5355_vm12, %v6053_v53  ;;  %v6229_v32 = vor.u32 %v6228_v26, %v6225_v48  ;;  %v6360_v4 = vunpack.c.l.b16 %v6355_v63  ;;  %v6173_v42 = vsel %vm2182_vm2, %v6171_v9, %v6172_v57  ;;  %v6366_v18 = vshll.u32 %v6317_v6, 16 }
 0x6f8   : > { %v6318_v40 = vpack.c.b16 %v6316_v50, %v13159_v15  ;;  %6398 = vmatpush.bf16.msrb.mxu1 %v12723_v36  ;;  %v6365_v10 = vrot.slane %v6363_v33, 2 }
 0x6f9   : > { %v6230_v37 = vsel %vm5699_vm15, %v6221_v55, %v6229_v32  ;;  %v6361_v8 = vpack.c.b16 %v6360_v4, %v13159_v15  ;;  %v6368_v21 = vrot.slane %v6366_v18, 3 }
 0x6fa   : > { %v6320_v49 = vrot.slane %v6318_v40, 2 }
 0x6fb   : > { %v6420_v25 = vrot.slane %v6361_v8, 3  ;;  %v6371_v1 = vshrl.u32 %v6361_v8, 16  ;;  %v6374_v5 = vshll.u32 %v6361_v8, 16  ;;  %v6369_v41 = vor.u32 %v6368_v21, %v6365_v10 }
 0x6fc   : > { %v6321_v34 = vsel %vm1475_vm1, %v6319_v35, %v6320_v49 }
 0x6fd   : > { %11794 = vmatmul.msk.bf16.vlgmr.msra.gmra.mxu0 %vm5355_vm12, %v6321_v34  ;;  %v6421_v47 = vsel %vm2182_vm2, %v6419_v7, %v6420_v25  ;;  %v6373_v28 = vrot.slane %v6371_v1, 2  ;;  %v6376_v20 = vrot.slane %v6374_v5, 3 }
 0x6fe   : > { %11778 = vmatmul.msk.bf16.vlgmr.msrb.gmra.mxu3 %vm5355_vm12, %v6230_v37 }
 0x6ff   : > { %v6377_v13 = vor.u32 %v6376_v20, %v6373_v28  ;;  %v13634_v28 = vld [vmem:[%s18996_s8] ss:$0 sm:$0xff] }
 0x701   : > { %v6378_v44 = vsel %vm5086_vm11, %v6369_v41, %v6377_v13 }
 0x705   : > { %11763 = vmatmul.msk.bf16.gmra.mxu2 %vm5355_vm12, %v6125_v31 }
 0x707   : > { %11749 = vmatmul.msk.bf16.gmra.mxu1 %vm5355_vm12, %v6056_v2 }
 0x70d   : > { %11795 = vmatmul.msk.bf16.gmra.mxu0 %vm5355_vm12, %v6320_v49 }
 0x70e   : > { %11779 = vmatmul.msk.bf16.gmra.mxu3 %vm5355_vm12, %v6229_v32 }
 0x715   : > { %11786 = vmatmul.msk.bf16.vlgmr.msra.gmra.mxu2 %vm5355_vm12, %v6267_v0 }
 0x717   : > { %11770 = vmatmul.msk.bf16.vlgmr.msra.gmra.mxu1 %vm5355_vm12, %v6173_v42 }
 0x71e   : > { %11810 = vmatmul.msk.bf16.vlgmr.msra.gmra.mxu3 %vm5355_vm12, %v6421_v47 }
 0x725   : > { %11787 = vmatmul.msk.bf16.gmra.mxu2 %vm5355_vm12, %v6268_v46 }
 0x727   : > { %11771 = vmatmul.msk.bf16.gmra.mxu1 %vm5355_vm12, %v6172_v57 }
 0x72e   : > { %11811 = vmatmul.msk.bf16.gmra.mxu3 %vm5355_vm12, %v6420_v25 }
 0x737   : > { %11802 = vmatmul.msk.bf16.vlgmr.msrb.gmra.mxu1 %vm5355_vm12, %v6378_v44 }
 0x747   : > { %11803 = vmatmul.msk.bf16.gmra.mxu1 %vm5355_vm12, %v6377_v13 }
 0x761   : > { %v6108_v39 = vpop.f32.mrf.mxu3 }
 0x769   : > { %v6110_v24 = vpop.f32.mrf.mxu3 }
 0x771   : > { %v6113_v14 = vpop.f32.mrf.mxu3 }
 0x774   : > { %v6078_v3 = vpop.f32.mrf.mxu1 }
 0x775   : > { %v6109_v31 = vadd.f32 %v6108_v39, %v6078_v3 }
 0x778   : > { %v6148_v61 = vpop.f32.mrf.mxu2 }
 0x779   : > { %v6157_v62 = vadd.f32 %v6148_v61, %v6109_v31  ;;  %v6115_v27 = vpop.f32.mrf.mxu3 }
 0x77a   : > { %v6343_v52 = vpop.f32.mrf.mxu0  ;;  %v12726_v27 = vld [vmem:[%s19004_s16 + $0x8] sm:$0xff] }
 0x77c   : > { %v6080_v12 = vpop.f32.mrf.mxu1 }
 0x77d   : > { %v6111_v56 = vadd.f32 %v6110_v24, %v6080_v12  ;;  %v12728_v12 = vld [vmem:[%s19004_s16 + $0x18] sm:$0xff] }
 0x780   : > { %v6150_v17 = vpop.f32.mrf.mxu2 }
 0x781   : > { %v6252_v23 = vpop.f32.mrf.mxu3  ;;  %v6158_v63 = vadd.f32 %v6150_v17, %v6111_v56  ;;  %v12729_v17 = vld [vmem:[%s19004_s16 + $0x20] sm:$0xff] }
 0x782   : > { %v6345_v54 = vpop.f32.mrf.mxu0 }
 0x784   : > { %v6083_v60 = vpop.f32.mrf.mxu1 }
 0x785   : > { %v6114_v36 = vadd.f32 %v6113_v14, %v6083_v60  ;;  %v12731_v60 = vld [vmem:[%s19004_s16 + $0x30] sm:$0x70] }
 0x788   : > { %v6153_v16 = vpop.f32.mrf.mxu2 }
 0x789   : > { %v6254_v38 = vpop.f32.mrf.mxu3  ;;  %v6159_v45 = vadd.f32 %v6153_v16, %v6114_v36 }
 0x78a   : > { %v6348_v48 = vpop.f32.mrf.mxu0 }
 0x78c   : > { %v6085_v26 = vpop.f32.mrf.mxu1 }
 0x790   : > { %v6155_v53 = vpop.f32.mrf.mxu2 }
 0x791   : > { %v6257_v15 = vpop.f32.mrf.mxu3  ;;  %v12738_v53 = vld [vmem:[%s18997_s9 + $0x10] sm:$0xff] }
 0x792   : > { %v6350_v50 = vpop.f32.mrf.mxu0  ;;  %6852 = vmatpush.bf16.msrb.mxu3 %v12738_v53 }
 0x794   : > { %v6195_v6 = vpop.f32.mrf.mxu1 }
 0x795   : > { %v6204_v51 = vadd.f32 %v6195_v6, %v6157_v62  ;;  %v12725_v62 = vld [vmem:[%s19004_s16] sm:$0xff] }
 0x797   : > { %v6261_v58 = vadd.f32 %v6252_v23, %v6204_v51  ;;  %v12730_v23 = vld [vmem:[%s19004_s16 + $0x28] sm:$0xff] }
 0x798   : > { %v6290_v43 = vpop.f32.mrf.mxu2 }
 0x799   : > { %v6299_v40 = vadd.f32 %v6290_v43, %v6261_v58  ;;  %v6259_v32 = vpop.f32.mrf.mxu3 }
 0x79b   : > { %v6352_v35 = vadd.f32 %v6343_v52, %v6299_v40  ;;  %v12727_v52 = vld [vmem:[%s19004_s16 + $0x10] sm:$0xff] }
 0x79c   : > { %v6197_v49 = vpop.f32.mrf.mxu1  ;;  %v12750_v40 = vld [vmem:[%s18997_s9 + $0x30] sm:$0xff] }
 0x79d   : > { %v6205_v4 = vadd.f32 %v6197_v49, %v6158_v63 }
 0x79f   : > { %v6262_v9 = vadd.f32 %v6254_v38, %v6205_v4  ;;  %v12736_v38 = vld [vmem:[%s18997_s9] sm:$0xff] }
 0x7a0   : > { %v6292_v55 = vpop.f32.mrf.mxu2  ;;  %6779 = vmatpush.bf16.msra.mxu1 %v12736_v38 }
 0x7a1   : > { %v6443_v34 = vpop.f32.mrf.mxu3  ;;  %v6300_v42 = vadd.f32 %v6292_v55, %v6262_v9 }
 0x7a3   : > { %v6353_v7 = vadd.f32 %v6345_v54, %v6300_v42  ;;  %v11838_v54 = vld [vmem:[%s19004_s16 + $0x30] sm:$0xf] }
 0x7a4   : > { %v6200_v37 = vpop.f32.mrf.mxu1  ;;  %v11839_v16 = vor.u32 %v12731_v60, %v11838_v54 }
 0x7a5   : > { %v6206_v0 = vadd.f32 %v6200_v37, %v6159_v45 }
 0x7a7   : > { %v6263_v59 = vadd.f32 %v6257_v15, %v6206_v0  ;;  %v12737_v15 = vld [vmem:[%s18997_s9 + $0x8] sm:$0xff] }
 0x7a8   : > { %v6295_v22 = vpop.f32.mrf.mxu2  ;;  %6729 = vmatpush.bf16.msrb.mxu0 %v12737_v15 }
 0x7a9   : > { %v6445_v30 = vpop.f32.mrf.mxu3  ;;  %v6301_v25 = vadd.f32 %v6295_v22, %v6263_v59 }
 0x7ab   : > { %v6354_v46 = vadd.f32 %v6348_v48, %v6301_v25 }
 0x7ac   : > { %v6202_v2 = vpop.f32.mrf.mxu1 }
 0x7b0   : > { %v6297_v29 = vpop.f32.mrf.mxu2 }
 0x7b1   : > { %v6448_v19 = vpop.f32.mrf.mxu3 }
 0x7b4   : > { %v6400_v57 = vpop.f32.mrf.mxu1 }
 0x7b5   : > { %v6409_v1 = vadd.f32 %v6400_v57, %v6352_v35 }
 0x7b7   : > { %v6452_v10 = vadd.f32 %v6443_v34, %v6409_v1 }
 0x7b9   : > { %v6450_v8 = vpop.f32.mrf.mxu3  ;;  %v6459_v44 = vadd.f32 %v13634_v28, %v6452_v10 }
 0x7bb   : > { %v6462_v31 = vmax.f32 %v6459_v44, 0.0 }
 0x7bc   : > { %v6402_v11 = vpop.f32.mrf.mxu1 }
 0x7bd   : > { %v6410_v47 = vadd.f32 %v6402_v11, %v6353_v7 }
 0x7bf   : > { %v6453_v18 = vadd.f32 %v6445_v30, %v6410_v47 }
 0x7c1   : > { %v6460_v13 = vadd.f32 %v13634_v28, %v6453_v18 }
 0x7c3   : > { %v6463_v14 = vmax.f32 %v6460_v13, 0.0 }
 0x7c4   : > { %v6405_v5 = vpop.f32.mrf.mxu1 }
 0x7c5   : > { %v6411_v33 = vadd.f32 %v6405_v5, %v6354_v46  ;;  %v6479_v61 = vpack.c.bf16 %v6463_v14, %v6462_v31 }
 0x7c7   : > { %v6454_v20 = vadd.f32 %v6448_v19, %v6411_v33 }
 0x7c9   : > { %v6461_v21 = vadd.f32 %v13634_v28, %v6454_v20 }
 0x7cb   : > { %v6464_v41 = vmax.f32 %v6461_v21, 0.0 }
 0x7cc   : > { %v6407_v39 = vpop.f32.mrf.mxu1 }
 0x7cd   : > { %v6480_v24 = vpack.c.bf16 %v6464_v41, %v6464_v41 }
 0x7cf   : > { %v6538_v3 = vsel %vm2410_vm3, %v6480_v24, 0  ;;  %vm11186_vm3 = vcmask 0  }
 0x7d0   : > { %6546 = vmatpush.bf16.msrb.mxu2 %v6538_v3 }
 0x7d4   : > { %6547 = vmatpush.bf16.msrb.mxu2 %v6479_v61 }
 0x7d7   : > { %11840 = vmatmul.msk.bf16.vlgmr.msrb.gmra.mxu2 %vm5974_vm4, %v12725_v62 }
 0x7d8   : > { %7296 = vmatpush.bf16.msra.mxu2 %v12750_v40 }
 0x7e7   : > { %11841 = vmatmul.msk.bf16.gmra.mxu2 %vm5974_vm4, %v12726_v27  ;;  %v12744_v27 = vld [vmem:[%s18997_s9 + $0x20] sm:$0xff] }
 0x7e8   : > { %7095 = vmatpush.bf16.msrb.mxu1 %v12744_v27 }
 0x7f7   : > { %11842 = vmatmul.msk.bf16.gmra.mxu2 %vm5974_vm4, %v12727_v52 }
 0x807   : > { %11843 = vmatmul.msk.bf16.gmra.mxu2 %vm5974_vm4, %v12728_v12 }
 0x817   : > { %11844 = vmatmul.msk.bf16.gmra.mxu2 %vm5974_vm4, %v12729_v17 }
 0x827   : > { %11845 = vmatmul.msk.bf16.gmra.mxu2 %vm5974_vm4, %v12730_v23 }
 0x837   : > { %11846 = vmatmul.msk.bf16.gmra.mxu2 %vm5974_vm4, %v11839_v16 }
 0x85a   : > { %v6549_v48 = vpop.f32.mrf.mxu2 }
 0x85b   : > { %v6584_v26 = vpack.c.bf16 %v6549_v48, %v6549_v48 }
 0x85d   : > { %6598 = vst.msk [vmem:[#allocation7] sm:$0xf] %vm5500_vm14, %v6584_v26 }
 0x862   : > { %v6551_v50 = vpop.f32.mrf.mxu2 }
 0x863   : > { %v6585_v6 = vpack.c.bf16 %v6551_v50, %v6551_v50 }
 0x864   : > { %v13238_v34 = vld [vmem:[#allocation7] sm:$0xe] }
 0x865   : > { %6599 = vst.msk [vmem:[#allocation7 + $0x4] sm:$0xf] %vm5500_vm14, %v6585_v6 }
 0x86a   : > { %v6554_v51 = vpop.f32.mrf.mxu2 }
 0x86b   : > { %v6586_v58 = vpack.c.bf16 %v6554_v51, %v6554_v51 }
 0x86c   : > { %v13161_v43 = vld [vmem:[#allocation7] sm:$0xff]  }
 0x86d   : > { %6600 = vst.msk [vmem:[#allocation7 + $0x8] sm:$0xf] %vm5500_vm14, %v6586_v58  ;;  %11878 = vmatmul.msk.bf16.vlgmr.msra.gmra.mxu1 %vm5355_vm12, %v13161_v43  ;;  %v13237_v49 = vld [vmem:[#allocation7] sm:$0xf0]  ;;  %v6660_v55 = vshll.u32 %v13161_v43, 16  ;;  %v6658_v29 = vshrl.u32 %v13161_v43, 16 }
 0x86e   : > { %v13239_v22 = vor.u32 %v13238_v34, %v13237_v49  ;;  %v6889_v50 = vld [vmem:[#allocation7 + $0x4] sm:$0xe] }
 0x86f   : > { %v6662_v2 = vrot.slane %v6660_v55, 1 }
 0x870   : > { %v6813_v19 = vrot.slane %v13239_v22, 1  ;;  %v12743_v22 = vld [vmem:[%s18997_s9 + $0x18] sm:$0xff] }
 0x871   : > { %v6663_v4 = vor.u32 %v6662_v2, %v6658_v29  ;;  %6970 = vmatpush.bf16.msra.mxu0 %v12743_v22 }
 0x872   : > { %v6556_v32 = vpop.f32.mrf.mxu2 }
 0x873   : > { %v6587_v35 = vpack.c.bf16 %v6556_v32, %v6556_v32  ;;  %v6914_v32 = vunpack.c.l.b16 %v6889_v50 }
 0x874   : > { %v7215_v42 = vld [vmem:[#allocation7 + $0x8] sm:$0xc] }
 0x875   : > { %6601 = vst.msk [vmem:[#allocation7 + $0xc] sm:$0xf] %vm5500_vm14, %v6587_v35  ;;  %v7240_v25 = vunpack.c.l.b16 %v7215_v42 }
 0x87a   : > { %v6559_v37 = vpop.f32.mrf.mxu2 }
 0x87b   : > { %v6588_v30 = vpack.c.bf16 %v6559_v37, %v6559_v37  ;;  %v12745_v37 = vld [vmem:[%s18997_s9 + $0x28] sm:$0xff] }
 0x87c   : > { %v12732_v56 = vld [vmem:[#allocation7 + $0x8] sm:$0xff]  ;;  %7178 = vmatpush.bf16.msra.mxu3 %v12745_v37 }
 0x87d   : > { %6602 = vst.msk [vmem:[#allocation7 + $0x10] sm:$0xf] %vm5500_vm14, %v6588_v30  ;;  %11879 = vmatmul.msk.bf16.gmra.mxu1 %vm5355_vm12, %v12732_v56  ;;  %v6814_v63 = vrot.slane %v12732_v56, 1  ;;  %v6665_v36 = vshll.u32 %v12732_v56, 16  ;;  %v17128_v59 = vld [vmem:[#allocation7 + $0x8] sm:$0xff]   ;;  %v6669_v33 = vshrl.u32 %v12732_v56, 16 }
 0x87e   : > { %v7241_v11 = vunpack.c.h.b16 %v17128_v59  ;;  %v6915_v51 = vunpack.c.l.b16 %v17128_v59 }
 0x87f   : > { %v6815_v57 = vsel %vm1247_vm0, %v6813_v19, %v6814_v63  ;;  %v6667_v45 = vrot.slane %v6665_v36, 1 }
 0x880   : > { %11889 = vmatmul.msk.bf16.vlgmr.msrb.gmra.mxu3 %vm5355_vm12, %v6815_v57  ;;  %v17134_v47 = vpack.c.b16 %v7241_v11, %v7240_v25  ;;  %v17180_v30 = vpack.c.b16 %v6915_v51, %v6914_v32 }
 0x881   : > { %v6668_v9 = vsel %vm4237_vm9, %v6663_v4, %v6667_v45  ;;  %v6671_v41 = vor.u32 %v6669_v33, %v6667_v45 }
 0x882   : > { %v6561_v0 = vpop.f32.mrf.mxu2  ;;  %11869 = vmatmul.msk.bf16.vlgmr.msrb.gmra.mxu0 %vm5355_vm12, %v6668_v9  ;;  %v7257_v28 = vrot.slane %v17134_v47, 2  ;;  %v7018_v9 = vshll.u32 %v17180_v30, 16  ;;  %v6931_v37 = vrot.slane %v17180_v30, 1 }
 0x883   : > { %v6589_v8 = vpack.c.bf16 %v6561_v0, %v6561_v0  ;;  %v7015_v0 = vshrl.u32 %v17180_v30, 16 }
 0x884   : > { %v17168_v40 = vld [vmem:[#allocation7 + $0xc] sm:$0xff] }
 0x885   : > { %6603 = vst.msk [vmem:[#allocation7 + $0x14] sm:$0xf] %vm5500_vm14, %v6589_v8  ;;  %v7026_v36 = vshll.u32 %v17168_v40, 16  ;;  %v7140_v50 = vrot.slane %v17168_v40, 2 }
 0x887   : > { %v7028_v25 = vrot.slane %v7026_v36, 2 }
 0x88a   : > { %v6564_v7 = vpop.f32.mrf.mxu2 }
 0x88b   : > { %v6590_v46 = vpack.c.bf16 %v6564_v7, %v6564_v7 }
 0x88c   : > { %v12733_v1 = vld [vmem:[#allocation7 + $0x10] sm:$0xff] }
 0x88d   : > { %v17136_v5 = vld [vmem:[#allocation7 + $0x10] sm:$0xff]  ;;  %6604 = vst.msk [vmem:[#allocation7 + $0x18] sm:$0xf] %vm5500_vm14, %v6590_v46  ;;  %11880 = vmatmul.msk.bf16.gmra.mxu1 %vm5355_vm12, %v12733_v1  ;;  %v6816_v18 = vrot.slane %v12733_v1, 1  ;;  %v6673_v10 = vshll.u32 %v12733_v1, 16  ;;  %v6677_v17 = vshrl.u32 %v12733_v1, 16 }
 0x88e   : > { %v7258_v20 = vrot.slane %v17136_v5, 2  ;;  %v7017_v46 = vrot.slane %v7015_v0, 1  ;;  %v7020_v1 = vrot.slane %v7018_v9, 2 }
 0x88f   : > { %v6817_v21 = vsel %vm1247_vm0, %v6814_v63, %v6816_v18  ;;  %v6675_v44 = vrot.slane %v6673_v10, 1  ;;  %v7023_v63 = vshrl.u32 %v17168_v40, 16 }
 0x890   : > { %v7259_v13 = vsel %vm1475_vm1, %v7257_v28, %v7258_v20  ;;  %11890 = vmatmul.msk.bf16.gmra.mxu3 %vm5355_vm12, %v6817_v21  ;;  %v7021_v21 = vor.u32 %v7020_v1, %v7017_v46  ;;  %v12752_v1 = vld [vmem:[%s18997_s9 + $0x40] sm:$0xff] }
 0x891   : > { %11965 = vmatmul.msk.bf16.vlgmr.msra.gmra.mxu2 %vm5355_vm12, %v7259_v13  ;;  %v6676_v24 = vsel %vm4237_vm9, %v6671_v41, %v6675_v44  ;;  %v6679_v16 = vor.u32 %v6677_v17, %v6675_v44  ;;  %v7025_v42 = vrot.slane %v7023_v63, 1  ;;  %7504 = vmatpush.bf16.msra.mxu1 %v12752_v1 }
 0x892   : > { %v6566_v39 = vpop.f32.mrf.mxu2  ;;  %11870 = vmatmul.msk.bf16.gmra.mxu0 %vm5355_vm12, %v6676_v24 }
 0x893   : > { %v6591_v14 = vpack.c.bf16 %v6566_v39, %v6566_v39 }
 0x894   : > { %v17197_v39 = vld [vmem:[#allocation7 + $0x14] sm:$0xff] }
 0x895   : > { %6605 = vst.msk [vmem:[#allocation7 + $0x1c] sm:$0xf] %vm5500_vm14, %v6591_v14  ;;  %v6934_v36 = vrot.slane %v17197_v39, 1 }
 0x89a   : > { %v6569_v3 = vpop.f32.mrf.mxu2 }
 0x89b   : > { %v6592_v31 = vpack.c.bf16 %v6569_v3, %v6569_v3 }
 0x89c   : > { %v12734_v61 = vld [vmem:[#allocation7 + $0x18] sm:$0xff] }
 0x89d   : > { %v17149_v62 = vld [vmem:[#allocation7 + $0x18] sm:$0xff]  ;;  %6606 = vst.msk [vmem:[#allocation7 + $0x20] sm:$0xf] %vm5500_vm14, %v6592_v31  ;;  %11881 = vmatmul.msk.bf16.gmra.mxu1 %vm5355_vm12, %v12734_v61  ;;  %v6818_v52 = vrot.slane %v12734_v61, 1  ;;  %v6681_v23 = vshll.u32 %v12734_v61, 16  ;;  %v6685_v55 = vshrl.u32 %v12734_v61, 16 }
 0x89e   : > { %v7260_v12 = vrot.slane %v17149_v62, 2 }
 0x89f   : > { %v6819_v54 = vsel %vm1247_vm0, %v6816_v18, %v6818_v52  ;;  %v6683_v38 = vrot.slane %v6681_v23, 1  ;;  %v7029_v18 = vor.u32 %v7028_v25, %v7025_v42 }
 0x8a0   : > { %v7261_v60 = vsel %vm1475_vm1, %v7258_v20, %v7260_v12  ;;  %11891 = vmatmul.msk.bf16.gmra.mxu3 %vm5355_vm12, %v6819_v54 }
 0x8a1   : > { %11966 = vmatmul.msk.bf16.gmra.mxu2 %vm5355_vm12, %v7261_v60  ;;  %v6684_v26 = vsel %vm4237_vm9, %v6679_v16, %v6683_v38  ;;  %v6687_v29 = vor.u32 %v6685_v55, %v6683_v38  ;;  %v7030_v44 = vsel %vm4686_vm10, %v7021_v21, %v7029_v18  ;;  %v7132_v16 = vld [vmem:[#allocation7 + $0x4] sm:$0xc] }
 0x8a2   : > { %v6571_v48 = vpop.f32.mrf.mxu2  ;;  %11871 = vmatmul.msk.bf16.gmra.mxu0 %vm5355_vm12, %v6684_v26 }
 0x8a3   : > { %v6593_v53 = vpack.c.bf16 %v6571_v48, %v6571_v48  ;;  %v7137_v48 = vunpack.c.l.b16 %v7132_v16 }
 0x8a4   : > { %v17213_v32 = vld [vmem:[#allocation7 + $0x1c] sm:$0xff] }
 0x8a5   : > { %6607 = vst.msk [vmem:[#allocation7 + $0x24] sm:$0xf] %vm5500_vm14, %v6593_v53  ;;  %v7044_v22 = vshll.u32 %v17213_v32, 16 }
 0x8aa   : > { %v6574_v15 = vpop.f32.mrf.mxu2 }
 0x8ab   : > { %v6594_v6 = vpack.c.bf16 %v6574_v15, %v6574_v15  ;;  %v7138_v15 = vpack.c.b16 %v6915_v51, %v7137_v48  ;;  %v7041_v51 = vshrl.u32 %v17213_v32, 16 }
 0x8ac   : > { %v12735_v58 = vld [vmem:[#allocation7 + $0x20] sm:$0xff] }
 0x8ad   : > { %v17165_v43 = vld [vmem:[#allocation7 + $0x20] sm:$0xff]  ;;  %6608 = vst.msk [vmem:[#allocation7 + $0x28] sm:$0xf] %vm5500_vm14, %v6594_v6  ;;  %11882 = vmatmul.msk.bf16.gmra.mxu1 %vm5355_vm12, %v12735_v58  ;;  %v6820_v35 = vrot.slane %v12735_v58, 1  ;;  %v6689_v34 = vshll.u32 %v12735_v58, 16  ;;  %v6693_v14 = vshrl.u32 %v12735_v58, 16 }
 0x8ae   : > { %v7262_v49 = vrot.slane %v17165_v43, 2 }
 0x8af   : > { %v6821_v2 = vsel %vm1247_vm0, %v6818_v52, %v6820_v35  ;;  %v6691_v19 = vrot.slane %v6689_v34, 1  ;;  %v7032_v52 = vshrl.u32 %v17197_v39, 16 }
 0x8b0   : > { %v7263_v56 = vsel %vm1475_vm1, %v7260_v12, %v7262_v49  ;;  %11892 = vmatmul.msk.bf16.gmra.mxu3 %vm5355_vm12, %v6821_v2  ;;  %v7035_v12 = vshll.u32 %v17197_v39, 16 }
 0x8b1   : > { %11967 = vmatmul.msk.bf16.gmra.mxu2 %vm5355_vm12, %v7263_v56  ;;  %v6692_v57 = vsel %vm4237_vm9, %v6687_v29, %v6691_v19  ;;  %v6695_v27 = vor.u32 %v6693_v14, %v6691_v19  ;;  %v7034_v54 = vrot.slane %v7032_v52, 1  ;;  %v7043_v56 = vrot.slane %v7041_v51, 1 }
 0x8b2   : > { %v6576_v4 = vpop.f32.mrf.mxu2  ;;  %11872 = vmatmul.msk.bf16.gmra.mxu0 %vm5355_vm12, %v6692_v57  ;;  %v7037_v60 = vrot.slane %v7035_v12, 2  ;;  %v7142_v19 = vrot.slane %v17197_v39, 2 }
 0x8b3   : > { %v6595_v45 = vpack.c.bf16 %v6576_v4, %v6576_v4 }
 0x8b4   : > { %v6625_v8 = vld [vmem:[#allocation7 + $0x28] sm:$0x1]  ;;  %v7038_v53 = vor.u32 %v7037_v60, %v7034_v54  ;;  %v7143_v4 = vsel %vm1475_vm1, %v7140_v50, %v7142_v19  ;;  %v12751_v60 = vld [vmem:[%s18997_s9 + $0x38] sm:$0xff] }
 0x8b5   : > { %6609 = vst.msk [vmem:[#allocation7 + $0x2c] sm:$0xf] %vm5500_vm14, %v6595_v45  ;;  %v6650_v7 = vunpack.c.l.b16 %v6625_v8  ;;  %v17228_v30 = vld [vmem:[#allocation7 + $0x24] sm:$0xff]  ;;  %7421 = vmatpush.bf16.msrb.mxu0 %v12751_v60 }
 0x8b6   : > { %v7039_v58 = vsel %vm4686_vm10, %v7029_v18, %v7038_v53  ;;  %v7050_v57 = vshrl.u32 %v17228_v30, 16  ;;  %v7053_v45 = vshll.u32 %v17228_v30, 16  ;;  %v7144_v18 = vrot.slane %v17213_v32, 2 }
 0x8b7   : > { %v6656_v33 = vpack.c.b16 %v6650_v7, %v6650_v7  ;;  %v6938_v12 = vrot.slane %v17228_v30, 1 }
 0x8b8   : > { %v7052_v9 = vrot.slane %v7050_v57, 1  ;;  %v7055_v8 = vrot.slane %v7053_v45, 2  ;;  %v7145_v21 = vsel %vm1475_vm1, %v7142_v19, %v7144_v18  ;;  %v7341_v45 = vshrl.u32 %v17134_v47, 16 }
 0x8b9   : > { %v6697_v20 = vshll.u32 %v6656_v33, 16  ;;  %v6822_v13 = vrot.slane %v6656_v33, 1 }
 0x8ba   : > { %v6579_v28 = vpop.f32.mrf.mxu2  ;;  %v7056_v25 = vor.u32 %v7055_v8, %v7052_v9  ;;  %v7468_v8 = vrot.slane %v17149_v62, 3  ;;  %v7343_v1 = vrot.slane %v7341_v45, 2 }
 0x8bb   : > { %v6596_v10 = vpack.c.bf16 %v6579_v28, %v6579_v28  ;;  %v6699_v3 = vrot.slane %v6697_v20, 1  ;;  %v6823_v31 = vsel %vm1247_vm0, %v6820_v35, %v6822_v13  ;;  %v7139_v35 = vrot.slane %v7138_v15, 2 }
 0x8bc   : > { %v17193_v41 = vld [vmem:[#allocation7 + $0x28] sm:$0xff] }
 0x8bd   : > { %6610 = vst.msk [vmem:[#allocation7 + $0x30] sm:$0xf] %vm5500_vm14, %v6596_v10  ;;  %11927 = vmatmul.msk.bf16.vlgmr.msrb.gmra.mxu1 %vm5355_vm12, %v7030_v44  ;;  %v7264_v24 = vrot.slane %v17193_v41, 2  ;;  %v6700_v17 = vsel %vm4237_vm9, %v6695_v27, %v6699_v3  ;;  %v7141_v55 = vsel %vm1475_vm1, %v7139_v35, %v7140_v50  ;;  %v7007_v42 = vld [vmem:[#allocation7 + $0x2c] sm:$0x3]  ;;  %v6936_v10 = vrot.slane %v17213_v32, 1 }
 0x8be   : > { %v7012_v7 = vunpack.c.l.b16 %v7007_v42  ;;  %v7146_v27 = vrot.slane %v17228_v30, 2 }
 0x8bf   : > { %v7265_v61 = vsel %vm1475_vm1, %v7262_v49, %v7264_v24  ;;  %v6932_v49 = vrot.slane %v17168_v40, 1  ;;  %v7046_v40 = vrot.slane %v7044_v22, 2  ;;  %v6939_v16 = vsel %vm1247_vm0, %v6936_v10, %v6938_v12 }
 0x8c0   : > { %11893 = vmatmul.msk.bf16.gmra.mxu3 %vm5355_vm12, %v6823_v31  ;;  %v7013_v20 = vpack.c.b16 %v7012_v7, %v7012_v7 }
 0x8c1   : > { %11968 = vmatmul.msk.bf16.gmra.mxu2 %vm5355_vm12, %v7265_v61  ;;  %v6933_v2 = vsel %vm1247_vm0, %v6931_v37, %v6932_v49  ;;  %v7047_v29 = vor.u32 %v7046_v40, %v7043_v56  ;;  %v6935_v0 = vsel %vm1247_vm0, %v6932_v49, %v6934_v36  ;;  %v7466_v49 = vrot.slane %v17136_v5, 3 }
 0x8c2   : > { %11873 = vmatmul.msk.bf16.gmra.mxu0 %vm5355_vm12, %v6700_v17  ;;  %v6581_v33 = vpop.f32.mrf.mxu2  ;;  %v7059_v13 = vshrl.u32 %v7013_v20, 16  ;;  %v7062_v44 = vshll.u32 %v7013_v20, 16  ;;  %v7148_v22 = vrot.slane %v7013_v20, 2 }
 0x8c3   : > { %v7048_v63 = vsel %vm4686_vm10, %v7038_v53, %v7047_v29  ;;  %v7057_v28 = vsel %vm4686_vm10, %v7047_v29, %v7056_v25 }
 0x8c4   : > { %v7225_v23 = vld [vmem:[#allocation7 + $0x30] sm:$0x3]  ;;  %v7061_v14 = vrot.slane %v7059_v13, 1  ;;  %v7064_v3 = vrot.slane %v7062_v44, 2  ;;  %v7149_v59 = vsel %vm1475_vm1, %v7146_v27, %v7148_v22 }
 0x8c5   : > { %v7250_v38 = vunpack.c.l.b16 %v7225_v23  ;;  %v7147_v23 = vsel %vm1475_vm1, %v7144_v18, %v7146_v27  ;;  %v7469_v18 = vsel %vm2182_vm2, %v7466_v49, %v7468_v8  ;;  %v7333_v22 = vld [vmem:[#allocation7 + $0x30] sm:$0x7] }
 0x8c6   : > { %v7065_v31 = vor.u32 %v7064_v3, %v7061_v14 }
 0x8c7   : > { %v7256_v26 = vpack.c.b16 %v7250_v38, %v7250_v38  ;;  %v7458_v38 = vld [vmem:[#allocation7 + $0x8] sm:$0x8] }
 0x8c8   : > { %v7066_v52 = vsel %vm4686_vm10, %v7056_v25, %v7065_v31  ;;  %v7463_v50 = vunpack.c.l.b16 %v7458_v38  ;;  %v7470_v31 = vrot.slane %v17165_v43, 3 }
 0x8c9   : > { %v7266_v6 = vrot.slane %v7256_v26, 2  ;;  %v6899_v26 = vld [vmem:[#allocation7 + $0x2c] sm:$0x1] }
 0x8cb   : > { %v7267_v34 = vsel %vm1475_vm1, %v7264_v24, %v7266_v6  ;;  %v6937_v24 = vsel %vm1247_vm0, %v6934_v36, %v6936_v10  ;;  %v6924_v6 = vunpack.c.l.b16 %v6899_v26  ;;  %v7349_v36 = vshrl.u32 %v17136_v5, 16 }
 0x8cc   : > { %v7367_v26 = vshrl.u32 %v17165_v43, 16 }
 0x8cd   : > { %11928 = vmatmul.msk.bf16.gmra.mxu1 %vm5355_vm12, %v7039_v58  ;;  %v7464_v58 = vpack.c.b16 %v7241_v11, %v7463_v50  ;;  %v7351_v42 = vrot.slane %v7349_v36, 2  ;;  %v7379_v36 = vshll.u32 %v17193_v41, 16 }
 0x8cf   : > { %v7465_v37 = vrot.slane %v7464_v58, 3  ;;  %v7369_v58 = vrot.slane %v7367_v26, 2 }
 0x8d0   : > { %11938 = vmatmul.msk.bf16.vlgmr.msra.gmra.mxu3 %vm5355_vm12, %v7141_v55  ;;  %v6930_v55 = vpack.c.b16 %v6924_v6, %v6924_v6  ;;  %v7472_v6 = vrot.slane %v17193_v41, 3 }
 0x8d1   : > { %11969 = vmatmul.msk.bf16.gmra.mxu2 %vm5355_vm12, %v7267_v34 }
 0x8d2   : > { %11916 = vmatmul.msk.bf16.vlgmr.msra.gmra.mxu0 %vm5355_vm12, %v6933_v2  ;;  %v7467_v2 = vsel %vm2182_vm2, %v7465_v37, %v7466_v49  ;;  %v6940_v56 = vrot.slane %v6930_v55, 1 }
 0x8d4   : > { %v6941_v29 = vsel %vm1247_vm0, %v6938_v12, %v6940_v56 }
 0x8dd   : > { %11929 = vmatmul.msk.bf16.gmra.mxu1 %vm5355_vm12, %v7048_v63 }
 0x8e0   : > { %11939 = vmatmul.msk.bf16.gmra.mxu3 %vm5355_vm12, %v7143_v4  ;;  %v7352_v4 = vshll.u32 %v17136_v5, 16 }
 0x8e2   : > { %11917 = vmatmul.msk.bf16.gmra.mxu0 %vm5355_vm12, %v6935_v0  ;;  %v7344_v0 = vshll.u32 %v17134_v47, 16  ;;  %v7354_v25 = vrot.slane %v7352_v4, 3 }
 0x8e4   : > { %v7346_v33 = vrot.slane %v7344_v0, 3  ;;  %v7355_v5 = vor.u32 %v7354_v25, %v7351_v42  ;;  %v7381_v0 = vrot.slane %v7379_v36, 3 }
 0x8e6   : > { %v7347_v20 = vor.u32 %v7346_v33, %v7343_v1 }
 0x8e8   : > { %v7356_v47 = vsel %vm5086_vm11, %v7347_v20, %v7355_v5 }
 0x8ea   : > { %v6781_v46 = vpop.f32.mrf.mxu1 }
 0x8ed   : > { %11930 = vmatmul.msk.bf16.gmra.mxu1 %vm5355_vm12, %v7057_v28 }
 0x8f0   : > { %11940 = vmatmul.msk.bf16.gmra.mxu3 %vm5355_vm12, %v7145_v21 }
 0x8f2   : > { %v6783_v39 = vpop.f32.mrf.mxu1  ;;  %11918 = vmatmul.msk.bf16.gmra.mxu0 %vm5355_vm12, %v6937_v24  ;;  %v7361_v24 = vshll.u32 %v17149_v62, 16 }
 0x8f4   : > { %v7363_v27 = vrot.slane %v7361_v24, 3 }
 0x8fa   : > { %v6786_v61 = vpop.f32.mrf.mxu1 }
 0x8fd   : > { %11931 = vmatmul.msk.bf16.gmra.mxu1 %vm5355_vm12, %v7066_v52 }
 0x8ff   : > { %v6731_v17 = vpop.f32.mrf.mxu0 }
 0x900   : > { %v6782_v54 = vadd.f32 %v6781_v46, %v6731_v17  ;;  %11941 = vmatmul.msk.bf16.gmra.mxu3 %vm5355_vm12, %v7147_v23  ;;  %v7471_v17 = vsel %vm2182_vm2, %v7468_v8, %v7470_v31 }
 0x902   : > { %v6788_v48 = vpop.f32.mrf.mxu1  ;;  %11919 = vmatmul.msk.bf16.gmra.mxu0 %vm5355_vm12, %v6939_v16 }
 0x903   : > { %v6854_v53 = vpop.f32.mrf.mxu3 }
 0x904   : > { %v17260_v15 = vadd.f32 %v6854_v53, %v6782_v54  ;;  %v7370_v53 = vshll.u32 %v17165_v43, 16 }
 0x907   : > { %v6733_v32 = vpop.f32.mrf.mxu0 }
 0x908   : > { %v17264_v35 = vadd.f32 %v6783_v39, %v6733_v32  ;;  %v7358_v39 = vshrl.u32 %v17149_v62, 16  ;;  %v7372_v32 = vrot.slane %v7370_v53, 3 }
 0x90a   : > { %v6791_v34 = vpop.f32.mrf.mxu1  ;;  %v7373_v37 = vor.u32 %v7372_v32, %v7369_v58 }
 0x90b   : > { %v17267_v51 = vpop.f32.mrf.mxu3 }
 0x90d   : > { %11987 = vmatmul.msk.bf16.vlgmr.msra.gmra.mxu1 %vm5355_vm12, %v7467_v2 }
 0x90f   : > { %v6736_v40 = vpop.f32.mrf.mxu0 }
 0x910   : > { %v6787_v11 = vadd.f32 %v6786_v61, %v6736_v40  ;;  %11942 = vmatmul.msk.bf16.gmra.mxu3 %vm5355_vm12, %v7149_v59  ;;  %v7360_v61 = vrot.slane %v7358_v39, 2  ;;  %v7338_v40 = vunpack.c.l.b16 %v7333_v22 }
 0x912   : > { %v6793_v19 = vpop.f32.mrf.mxu1  ;;  %11920 = vmatmul.msk.bf16.gmra.mxu0 %vm5355_vm12, %v6941_v29  ;;  %v7364_v23 = vor.u32 %v7363_v27, %v7360_v61 }
 0x913   : > { %v6859_v63 = vpop.f32.mrf.mxu3 }
 0x914   : > { %v17275_v30 = vadd.f32 %v6859_v63, %v6787_v11  ;;  %v7365_v16 = vsel %vm5086_vm11, %v7355_v5, %v7364_v23  ;;  %v7374_v43 = vsel %vm5086_vm11, %v7364_v23, %v7373_v37  ;;  %v7376_v63 = vshrl.u32 %v17193_v41, 16  ;;  %v7298_v32 = vpop.f32.mrf.mxu2 }
 0x916   : > { %v7378_v45 = vrot.slane %v7376_v63, 2 }
 0x917   : > { %v6738_v57 = vpop.f32.mrf.mxu0 }
 0x918   : > { %v17281_v9 = vadd.f32 %v6788_v48, %v6738_v57 }
 0x91a   : > { %v6796_v7 = vpop.f32.mrf.mxu1 }
 0x91b   : > { %v17284_v46 = vpop.f32.mrf.mxu3 }
 0x91c   : > { %v7300_v22 = vpop.f32.mrf.mxu2 }
 0x91d   : > { %11988 = vmatmul.msk.bf16.gmra.mxu1 %vm5355_vm12, %v7469_v18 }
 0x91f   : > { %v6741_v28 = vpop.f32.mrf.mxu0 }
 0x920   : > { %v6792_v10 = vadd.f32 %v6791_v34, %v6741_v28  ;;  %v7473_v34 = vsel %vm2182_vm2, %v7470_v31, %v7472_v6 }
 0x922   : > { %v17289_v21 = vpop.f32.mrf.mxu1  ;;  %11976 = vmatmul.msk.bf16.vlgmr.msrb.gmra.mxu0 %vm5355_vm12, %v7356_v47 }
 0x923   : > { %v6864_v13 = vpop.f32.mrf.mxu3 }
 0x924   : > { %v17292_v44 = vadd.f32 %v6864_v13, %v6792_v10 }
 0x927   : > { %v6743_v14 = vpop.f32.mrf.mxu0 }
 0x928   : > { %v17296_v3 = vadd.f32 %v6793_v19, %v6743_v14  ;;  %v7339_v19 = vpack.c.b16 %v7338_v40, %v7338_v40 }
 0x92a   : > { %v6801_v52 = vpop.f32.mrf.mxu1  ;;  %v7474_v57 = vrot.slane %v7339_v19, 3  ;;  %v7385_v10 = vshrl.u32 %v7339_v19, 16  ;;  %v7388_v47 = vshll.u32 %v7339_v19, 16 }
 0x92b   : > { %v17299_v12 = vpop.f32.mrf.mxu3 }
 0x92c   : > { %v7475_v25 = vsel %vm2182_vm2, %v7472_v6, %v7474_v57  ;;  %v7387_v39 = vrot.slane %v7385_v10, 2  ;;  %v7390_v24 = vrot.slane %v7388_v47, 3  ;;  %vm7697_vm2 = vcmask 654336  }
 0x92d   : > { %11989 = vmatmul.msk.bf16.gmra.mxu1 %vm5355_vm12, %v7471_v17 }
 0x92e   : > { %v7391_v61 = vor.u32 %v7390_v24, %v7387_v39 }
 0x92f   : > { %v6746_v54 = vpop.f32.mrf.mxu0 }
 0x930   : > { %v6797_v60 = vadd.f32 %v6796_v7, %v6746_v54  ;;  %v7382_v7 = vor.u32 %v7381_v0, %v7378_v45 }
 0x932   : > { %v17304_v62 = vpop.f32.mrf.mxu1  ;;  %11977 = vmatmul.msk.bf16.gmra.mxu0 %vm5355_vm12, %v7365_v16  ;;  %v7383_v18 = vsel %vm5086_vm11, %v7373_v37, %v7382_v7 }
 0x933   : > { %v6869_v38 = vpop.f32.mrf.mxu3 }
 0x934   : > { %v17307_v48 = vadd.f32 %v6869_v38, %v6797_v60 }
 0x937   : > { %v17311_v50 = vpop.f32.mrf.mxu0 }
 0x93a   : > { %v7097_v49 = vpop.f32.mrf.mxu1 }
 0x93b   : > { %v17314_v55 = vpop.f32.mrf.mxu3 }
 0x93d   : > { %11990 = vmatmul.msk.bf16.gmra.mxu1 %vm5355_vm12, %v7473_v34 }
 0x93f   : > { %v6751_v2 = vpop.f32.mrf.mxu0 }
 0x940   : > { %v6802_v56 = vadd.f32 %v6801_v52, %v6751_v2  ;;  %v7392_v52 = vsel %vm5086_vm11, %v7382_v7, %v7391_v61 }
 0x942   : > { %v17319_v59 = vpop.f32.mrf.mxu1  ;;  %11978 = vmatmul.msk.bf16.gmra.mxu0 %vm5355_vm12, %v7374_v43  ;;  %v7303_v43 = vpop.f32.mrf.mxu2 }
 0x943   : > { %v6874_v11 = vpop.f32.mrf.mxu3 }
 0x944   : > { %v6887_v29 = vadd.f32 %v6874_v11, %v6802_v56 }
 0x947   : > { %v17324_v4 = vpop.f32.mrf.mxu0 }
 0x94a   : > { %v7102_v8 = vpop.f32.mrf.mxu1 }
 0x94b   : > { %v17326_v42 = vpop.f32.mrf.mxu3 }
 0x94d   : > { %11991 = vmatmul.msk.bf16.gmra.mxu1 %vm5355_vm12, %v7475_v25 }
 0x94f   : > { %v6972_v1 = vpop.f32.mrf.mxu0 }
 0x950   : > { %v6997_v33 = vadd.f32 %v6972_v1, %v17260_v15 }
 0x952   : > { %v17332_v5 = vpop.f32.mrf.mxu1  ;;  %11979 = vmatmul.msk.bf16.gmra.mxu0 %vm5355_vm12, %v7383_v18  ;;  %v7122_v41 = vadd.f32 %v7097_v49, %v6997_v33  ;;  %v7305_v18 = vpop.f32.mrf.mxu2 }
 0x953   : > { %v7180_v28 = vpop.f32.mrf.mxu3 }
 0x954   : > { %v7205_v20 = vadd.f32 %v7180_v28, %v7122_v41 }
 0x956   : > { %v7323_v0 = vadd.f32 %v7298_v32, %v7205_v20  ;;  %v6884_v20 = vadd.f32 %v17299_v12, %v17296_v3 }
 0x957   : > { %v17335_v13 = vpop.f32.mrf.mxu0 }
 0x95a   : > { %v7107_v14 = vpop.f32.mrf.mxu1 }
 0x95b   : > { %v17337_v31 = vpop.f32.mrf.mxu3 }
 0x95f   : > { %v6977_v15 = vpop.f32.mrf.mxu0 }
 0x960   : > { %v6999_v27 = vadd.f32 %v6977_v15, %v17275_v30 }
 0x962   : > { %v7109_v17 = vpop.f32.mrf.mxu1  ;;  %11980 = vmatmul.msk.bf16.gmra.mxu0 %vm5355_vm12, %v7392_v52  ;;  %v7124_v23 = vadd.f32 %v7102_v8, %v6999_v27  ;;  %v6882_v27 = vadd.f32 %v17284_v46, %v17281_v9 }
 0x963   : > { %v7185_v54 = vpop.f32.mrf.mxu3 }
 0x964   : > { %v7207_v60 = vadd.f32 %v7185_v54, %v7124_v23 }
 0x966   : > { %v7325_v11 = vadd.f32 %v7303_v43, %v7207_v60 }
 0x967   : > { %v6979_v16 = vpop.f32.mrf.mxu0 }
 0x968   : > { %v7000_v23 = vadd.f32 %v6979_v16, %v6882_v27 }
 0x96a   : > { %v7112_v38 = vpop.f32.mrf.mxu1 }
 0x96b   : > { %v7187_v25 = vpop.f32.mrf.mxu3 }
 0x96f   : > { %v6982_v26 = vpop.f32.mrf.mxu0 }
 0x970   : > { %v7001_v53 = vadd.f32 %v6982_v26, %v17292_v44 }
 0x972   : > { %v17343_v6 = vpop.f32.mrf.mxu1  ;;  %v7126_v58 = vadd.f32 %v7107_v14, %v7001_v53 }
 0x973   : > { %v7190_v41 = vpop.f32.mrf.mxu3 }
 0x977   : > { %v6984_v49 = vpop.f32.mrf.mxu0 }
 0x978   : > { %v7002_v15 = vadd.f32 %v6984_v49, %v6884_v20 }
 0x97a   : > { %v7117_v34 = vpop.f32.mrf.mxu1  ;;  %v7127_v54 = vadd.f32 %v7109_v17, %v7002_v15 }
 0x97b   : > { %v7192_v24 = vpop.f32.mrf.mxu3 }
 0x97f   : > { %v6987_v30 = vpop.f32.mrf.mxu0 }
 0x980   : > { %v7003_v37 = vadd.f32 %v6987_v30, %v17307_v48  ;;  %v7210_v30 = vadd.f32 %v7192_v24, %v7127_v54 }
 0x982   : > { %v17346_v2 = vadd.f32 %v7112_v38, %v7003_v37  ;;  %v17348_v56 = vpop.f32.mrf.mxu1  ;;  %v6880_v38 = vadd.f32 %v17267_v51, %v17264_v35  ;;  %v7209_v37 = vadd.f32 %v7190_v41, %v7126_v58 }
 0x983   : > { %v7195_v26 = vpop.f32.mrf.mxu3 }
 0x984   : > { %v6998_v32 = vadd.f32 %v17335_v13, %v6880_v38 }
 0x986   : > { %v7123_v3 = vadd.f32 %v17319_v59, %v6998_v32 }
 0x987   : > { %v17350_v40 = vpop.f32.mrf.mxu0 }
 0x988   : > { %v7206_v43 = vadd.f32 %v17337_v31, %v7123_v3  ;;  %v6799_v31 = vadd.f32 %v17289_v21, %v17311_v50 }
 0x98a   : > { %v7506_v19 = vpop.f32.mrf.mxu1  ;;  %v7324_v58 = vadd.f32 %v7300_v22, %v7206_v43  ;;  %v6886_v24 = vadd.f32 %v17314_v55, %v6799_v31  ;;  %v6804_v22 = vadd.f32 %v17304_v62, %v17324_v4  ;;  %v12762_v31 = vld [vmem:[%s19005_s17 + $0x48] sm:$0xff] }
 0x98f   : > { %v6992_v44 = vpop.f32.mrf.mxu0 }
 0x990   : > { %v7005_v63 = vadd.f32 %v6992_v44, %v6887_v29  ;;  %v7308_v29 = vpop.f32.mrf.mxu2 }
 0x991   : > { %v7327_v16 = vadd.f32 %v7308_v29, %v7209_v37 }
 0x992   : > { %v17352_v36 = vadd.f32 %v7117_v34, %v7005_v63  ;;  %v7508_v45 = vpop.f32.mrf.mxu1  ;;  %v7125_v34 = vadd.f32 %v17332_v5, %v7000_v23  ;;  %v13635_v5 = vld [vmem:[%s18998_s10] ss:$0 sm:$0xff] }
 0x994   : > { %v7208_v12 = vadd.f32 %v7187_v25, %v7125_v34 }
 0x996   : > { %v7326_v35 = vadd.f32 %v7305_v18, %v7208_v12 }
 0x997   : > { %v17354_v57 = vpop.f32.mrf.mxu0 }
 0x998   : > { %v7310_v52 = vpop.f32.mrf.mxu2 }
 0x999   : > { %v7328_v49 = vadd.f32 %v7310_v52, %v7210_v30 }
 0x99a   : > { %v7511_v1 = vpop.f32.mrf.mxu1 }
 0x99f   : > { %v7423_v8 = vpop.f32.mrf.mxu0 }
 0x9a0   : > { %v7448_v48 = vadd.f32 %v7423_v8, %v7323_v0  ;;  %v7313_v9 = vpop.f32.mrf.mxu2 }
 0x9a2   : > { %v17356_v7 = vadd.f32 %v7506_v19, %v7448_v48  ;;  %v7513_v28 = vpop.f32.mrf.mxu1 }
 0x9a4   : > { %v7545_v50 = vadd.f32 %v13635_v5, %v17356_v7 }
 0x9a7   : > { %v7425_v33 = vpop.f32.mrf.mxu0 }
 0x9a8   : > { %v7449_v0 = vadd.f32 %v7425_v33, %v7324_v58  ;;  %v7315_v25 = vpop.f32.mrf.mxu2  ;;  %v6888_v33 = vadd.f32 %v17326_v42, %v6804_v22  ;;  %v12788_v58 = vld [vmem:[%s18999_s11] sm:$0xff] }
 0x9a9   : > { %8376 = vmatpush.bf16.msra.mxu0 %v12788_v58 }
 0x9aa   : > { %v7516_v14 = vpop.f32.mrf.mxu1  ;;  %v7532_v41 = vadd.f32 %v7508_v45, %v7449_v0  ;;  %v7006_v21 = vadd.f32 %v17354_v57, %v6888_v33 }
 0x9ac   : > { %v7546_v20 = vadd.f32 %v13635_v5, %v7532_v41  ;;  %v7131_v62 = vadd.f32 %v17348_v56, %v7006_v21 }
 0x9ae   : > { %v7594_v52 = vpack.c.bf16 %v7546_v20, %v7545_v50 }
 0x9af   : > { %v7428_v10 = vpop.f32.mrf.mxu0 }
 0x9b0   : > { %v7450_v47 = vadd.f32 %v7428_v10, %v7325_v11  ;;  %v7197_v11 = vpop.f32.mrf.mxu3  ;;  %v7318_v45 = vpop.f32.mrf.mxu2 }
 0x9b2   : > { %v7533_v39 = vadd.f32 %v7511_v1, %v7450_v47  ;;  %v7518_v53 = vpop.f32.mrf.mxu1 }
 0x9b7   : > { %v7430_v61 = vpop.f32.mrf.mxu0 }
 0x9b8   : > { %v7451_v44 = vadd.f32 %v7430_v61, %v7326_v35  ;;  %v7200_v18 = vpop.f32.mrf.mxu3  ;;  %v12755_v35 = vld [vmem:[%s19005_s17 + $0x10] sm:$0xff] }
 0x9b9   : > { %v7213_v55 = vadd.f32 %v7200_v18, %v17352_v36 }
 0x9ba   : > { %v7521_v19 = vpop.f32.mrf.mxu1  ;;  %v7534_v8 = vadd.f32 %v7513_v28, %v7451_v44  ;;  %v7004_v28 = vadd.f32 %v17350_v40, %v6886_v24  ;;  %v7211_v40 = vadd.f32 %v7195_v26, %v17346_v2  ;;  %v12758_v44 = vld [vmem:[%s19005_s17 + $0x28] sm:$0xff]  ;;  %v12763_v24 = vld [vmem:[%s19005_s17 + $0x50] sm:$0xff] }
 0x9bc   : > { %v7548_v10 = vadd.f32 %v13635_v5, %v7534_v8  ;;  %v7129_v27 = vadd.f32 %v17343_v6, %v7004_v28  ;;  %v7329_v7 = vadd.f32 %v7313_v9, %v7211_v40  ;;  %v12753_v9 = vld [vmem:[%s19005_s17] sm:$0xff]  ;;  %v12806_v8 = vld [vmem:[%s18999_s11 + $0x10] sm:$0xff] }
 0x9bd   : > { %8671 = vmatpush.bf16.msrb.mxu1 %v12806_v8 }
 0x9be   : > { %v7212_v42 = vadd.f32 %v7197_v11, %v7129_v27  ;;  %v12754_v11 = vld [vmem:[%s19005_s17 + $0x8] sm:$0xff] }
 0x9bf   : > { %v7433_v60 = vpop.f32.mrf.mxu0 }
 0x9c0   : > { %v7452_v51 = vadd.f32 %v7433_v60, %v7327_v16  ;;  %v7202_v4 = vpop.f32.mrf.mxu3  ;;  %v7331_v60 = vadd.f32 %v7318_v45, %v7213_v55  ;;  %v7330_v38 = vadd.f32 %v7315_v25, %v7212_v42 }
 0x9c1   : > { %v7214_v54 = vadd.f32 %v7202_v4, %v7131_v62 }
 0x9c2   : > { %v7535_v59 = vadd.f32 %v7516_v14, %v7452_v51  ;;  %v7523_v29 = vpop.f32.mrf.mxu1  ;;  %v7547_v14 = vadd.f32 %v13635_v5, %v7533_v39  ;;  %v12756_v51 = vld [vmem:[%s19005_s17 + $0x18] sm:$0xff] }
 0x9c4   : > { %v7549_v1 = vadd.f32 %v13635_v5, %v7535_v59  ;;  %v7595_v15 = vpack.c.bf16 %v7548_v10, %v7547_v14  ;;  %v12761_v59 = vld [vmem:[%s19005_s17 + $0x40] sm:$0xff] }
 0x9c7   : > { %v7435_v46 = vpop.f32.mrf.mxu0 }
 0x9c8   : > { %v7453_v17 = vadd.f32 %v7435_v46, %v7328_v49 }
 0x9ca   : > { %v7536_v13 = vadd.f32 %v7518_v53, %v7453_v17  ;;  %v7526_v39 = vpop.f32.mrf.mxu1  ;;  %v7320_v53 = vpop.f32.mrf.mxu2 }
 0x9cb   : > { %v7332_v34 = vadd.f32 %v7320_v53, %v7214_v54  ;;  %v12764_v54 = vld [vmem:[%s19005_s17 + $0x58] sm:$0xff] }
 0x9cc   : > { %v7550_v48 = vadd.f32 %v13635_v5, %v7536_v13  ;;  %v12759_v13 = vld [vmem:[%s19005_s17 + $0x30] sm:$0xff] }
 0x9ce   : > { %v7596_v47 = vpack.c.bf16 %v7550_v48, %v7549_v1  ;;  %v12789_v48 = vld [vmem:[%s18999_s11 + $0x8] sm:$0xff] }
 0x9cf   : > { %v7438_v63 = vpop.f32.mrf.mxu0  ;;  %8249 = vmatpush.bf16.msrb.mxu2 %v12789_v48 }
 0x9d0   : > { %v7454_v30 = vadd.f32 %v7438_v63, %v7329_v7 }
 0x9d2   : > { %v7528_v3 = vpop.f32.mrf.mxu1  ;;  %v7537_v49 = vadd.f32 %v7521_v19, %v7454_v30  ;;  %v12757_v19 = vld [vmem:[%s19005_s17 + $0x20] sm:$0xff] }
 0x9d4   : > { %v7551_v26 = vadd.f32 %v13635_v5, %v7537_v49 }
 0x9d7   : > { %v7440_v61 = vpop.f32.mrf.mxu0 }
 0x9d8   : > { %v7455_v32 = vadd.f32 %v7440_v61, %v7330_v38 }
 0x9da   : > { %v7538_v56 = vadd.f32 %v7523_v29, %v7455_v32 }
 0x9dc   : > { %v7552_v17 = vadd.f32 %v13635_v5, %v7538_v56 }
 0x9de   : > { %v7597_v43 = vpack.c.bf16 %v7552_v17, %v7551_v26 }
 0x9df   : > { %v7443_v23 = vpop.f32.mrf.mxu0 }
 0x9e0   : > { %v7456_v57 = vadd.f32 %v7443_v23, %v7331_v60 }
 0x9e2   : > { %v7539_v37 = vadd.f32 %v7526_v39, %v7456_v57 }
 0x9e4   : > { %v7553_v46 = vadd.f32 %v13635_v5, %v7539_v37 }
 0x9e7   : > { %v7445_v6 = vpop.f32.mrf.mxu0 }
 0x9e8   : > { %v7457_v36 = vadd.f32 %v7445_v6, %v7332_v34 }
 0x9ea   : > { %v7540_v12 = vadd.f32 %v7528_v3, %v7457_v36 }
 0x9ec   : > { %v7554_v16 = vadd.f32 %v13635_v5, %v7540_v12  ;;  %v12760_v5 = vld [vmem:[%s19005_s17 + $0x38] sm:$0xff]  ;;  %v12765_v12 = vld [vmem:[%s19005_s17 + $0x60] sm:$0xff] }
 0x9ee   : > { %v7598_v2 = vpack.c.bf16 %v7554_v16, %v7553_v46 }
 0x9f0   : > { %7761 = vmatpush.bf16.msrb.mxu3 %v7598_v2 }
 0x9f4   : > { %7762 = vmatpush.bf16.msrb.mxu3 %v7597_v43 }
 0x9f8   : > { %7763 = vmatpush.bf16.msrb.mxu3 %v7596_v47 }
 0x9fc   : > { %7764 = vmatpush.bf16.msrb.mxu3 %v7595_v15 }
 0xa00   : > { %7765 = vmatpush.bf16.msrb.mxu3 %v7594_v52 }
 0xa03   : > { %12068 = vmatmul.msk.bf16.vlgmr.msrb.gmra.mxu3 %vm7697_vm2, %v12753_v9 }
 0xa13   : > { %12069 = vmatmul.msk.bf16.gmra.mxu3 %vm7697_vm2, %v12754_v11 }
 0xa23   : > { %12070 = vmatmul.msk.bf16.gmra.mxu3 %vm7697_vm2, %v12755_v35 }
 0xa33   : > { %12071 = vmatmul.msk.bf16.gmra.mxu3 %vm7697_vm2, %v12756_v51 }
 0xa43   : > { %12072 = vmatmul.msk.bf16.gmra.mxu3 %vm7697_vm2, %v12757_v19 }
 0xa53   : > { %12073 = vmatmul.msk.bf16.gmra.mxu3 %vm7697_vm2, %v12758_v44 }
 0xa63   : > { %12074 = vmatmul.msk.bf16.gmra.mxu3 %vm7697_vm2, %v12759_v13  ;;  %v12766_v13 = vld [vmem:[%s19005_s17 + $0x68] sm:$0xff] }
 0xa73   : > { %12075 = vmatmul.msk.bf16.gmra.mxu3 %vm7697_vm2, %v12760_v5 }
 0xa83   : > { %12076 = vmatmul.msk.bf16.gmra.mxu3 %vm7697_vm2, %v12761_v59 }
 0xa86   : > { %v7767_v63 = vpop.f32.mrf.mxu3 }
 0xa87   : > { %v7866_v0 = vpack.c.bf16 %v7767_v63, %v7767_v63 }
 0xa89   : > { %7905 = vst.msk [vmem:[#allocation8] sm:$0xf] %vm5500_vm14, %v7866_v0 }
 0xa8e   : > { %v7769_v25 = vpop.f32.mrf.mxu3 }
 0xa8f   : > { %v7867_v1 = vpack.c.bf16 %v7769_v25, %v7769_v25 }
 0xa90   : > { %v12198_v61 = vld [vmem:[#allocation8] sm:$0xe] }
 0xa91   : > { %7906 = vst.msk [vmem:[#allocation8 + $0x4] sm:$0xf] %vm5500_vm14, %v7867_v1 }
 0xa93   : > { %12077 = vmatmul.msk.bf16.gmra.mxu3 %vm7697_vm2, %v12762_v31 }
 0xa96   : > { %v7772_v18 = vpop.f32.mrf.mxu3 }
 0xa97   : > { %v7868_v41 = vpack.c.bf16 %v7772_v18, %v7772_v18 }
 0xa98   : > { %v12772_v10 = vld [vmem:[#allocation8] sm:$0xff] }
 0xa99   : > { %7907 = vst.msk [vmem:[#allocation8 + $0x8] sm:$0xf] %vm5500_vm14, %v7868_v41  ;;  %12178 = vmatmul.msk.bf16.vlgmr.msra.gmra.mxu0 %vm5355_vm12, %v12772_v10  ;;  %v12790_v22 = vld [vmem:[#allocation8] sm:$0xf0]  ;;  %v8064_v14 = vshll.u32 %v12772_v10, 16  ;;  %v8062_v55 = vshrl.u32 %v12772_v10, 16 }
 0xa9a   : > { %v12199_v28 = vor.u32 %v12790_v22, %v12198_v61 }
 0xa9b   : > { %v8066_v50 = vrot.slane %v8064_v14, 1 }
 0xa9c   : > { %v8577_v27 = vrot.slane %v12199_v28, 1 }
 0xa9d   : > { %v8067_v39 = vor.u32 %v8066_v50, %v8062_v55 }
 0xa9e   : > { %v7774_v47 = vpop.f32.mrf.mxu3 }
 0xa9f   : > { %v7869_v29 = vpack.c.bf16 %v7774_v47, %v7774_v47  ;;  %v12767_v47 = vld [vmem:[%s19005_s17 + $0x70] sm:$0xff] }
 0xaa1   : > { %7908 = vst.msk [vmem:[#allocation8 + $0xc] sm:$0xf] %vm5500_vm14, %v7869_v29 }
 0xaa3   : > { %12078 = vmatmul.msk.bf16.gmra.mxu3 %vm7697_vm2, %v12763_v24 }
 0xaa6   : > { %v7777_v33 = vpop.f32.mrf.mxu3 }
 0xaa7   : > { %v7870_v20 = vpack.c.bf16 %v7777_v33, %v7777_v33 }
 0xaa8   : > { %v12773_v15 = vld [vmem:[#allocation8 + $0x8] sm:$0xff] }
 0xaa9   : > { %v12791_v21 = vld [vmem:[#allocation8 + $0x8] sm:$0xff]  ;;  %7909 = vst.msk [vmem:[#allocation8 + $0x10] sm:$0xf] %vm5500_vm14, %v7870_v20  ;;  %v8069_v45 = vshll.u32 %v12773_v15, 16  ;;  %12179 = vmatmul.msk.bf16.gmra.mxu0 %vm5355_vm12, %v12773_v15  ;;  %v8073_v32 = vshrl.u32 %v12773_v15, 16 }
 0xaaa   : > { %v8578_v52 = vrot.slane %v12791_v21, 1 }
 0xaab   : > { %v8071_v62 = vrot.slane %v8069_v45, 1 }
 0xaac   : > { %v8579_v4 = vsel %vm1247_vm0, %v8577_v27, %v8578_v52 }
 0xaad   : > { %12264 = vmatmul.msk.bf16.vlgmr.msrb.gmra.mxu1 %vm5355_vm12, %v8579_v4  ;;  %v8072_v42 = vsel %vm4237_vm9, %v8067_v39, %v8071_v62  ;;  %v8075_v30 = vor.u32 %v8073_v32, %v8071_v62  ;;  %v12769_v32 = vld [vmem:[%s19005_s17 + $0x80] sm:$0xff] }
 0xaae   : > { %v7779_v23 = vpop.f32.mrf.mxu3  ;;  %12158 = vmatmul.msk.bf16.vlgmr.msrb.gmra.mxu2 %vm5355_vm12, %v8072_v42 }
 0xaaf   : > { %v7871_v40 = vpack.c.bf16 %v7779_v23, %v7779_v23 }
 0xab1   : > { %7910 = vst.msk [vmem:[#allocation8 + $0x14] sm:$0xf] %vm5500_vm14, %v7871_v40 }
 0xab3   : > { %12079 = vmatmul.msk.bf16.gmra.mxu3 %vm7697_vm2, %v12764_v54 }
 0xab6   : > { %v7782_v60 = vpop.f32.mrf.mxu3 }
 0xab7   : > { %v7872_v38 = vpack.c.bf16 %v7782_v60, %v7782_v60 }
 0xab8   : > { %v12774_v57 = vld [vmem:[#allocation8 + $0x10] sm:$0xff] }
 0xab9   : > { %v12792_v53 = vld [vmem:[#allocation8 + $0x10] sm:$0xff]  ;;  %7911 = vst.msk [vmem:[#allocation8 + $0x18] sm:$0xf] %vm5500_vm14, %v7872_v38  ;;  %12180 = vmatmul.msk.bf16.gmra.mxu0 %vm5355_vm12, %v12774_v57  ;;  %v8077_v34 = vshll.u32 %v12774_v57, 16  ;;  %v8081_v26 = vshrl.u32 %v12774_v57, 16 }
 0xaba   : > { %v8580_v7 = vrot.slane %v12792_v53, 1 }
 0xabb   : > { %v8079_v37 = vrot.slane %v8077_v34, 1  ;;  %v12824_v34 = vld [vmem:[#allocation8 + $0x8] sm:$0xf0] }
 0xabc   : > { %v8581_v6 = vsel %vm1247_vm0, %v8578_v52, %v8580_v7  ;;  %v12768_v52 = vld [vmem:[%s19005_s17 + $0x78] sm:$0xff] }
 0xabd   : > { %12265 = vmatmul.msk.bf16.gmra.mxu1 %vm5355_vm12, %v8581_v6  ;;  %v8080_v3 = vsel %vm4237_vm9, %v8075_v30, %v8079_v37  ;;  %v8083_v11 = vor.u32 %v8081_v26, %v8079_v37  ;;  %v12370_v30 = vld [vmem:[#allocation8 + $0x8] sm:$0xe] }
 0xabe   : > { %v7784_v36 = vpop.f32.mrf.mxu3  ;;  %12159 = vmatmul.msk.bf16.gmra.mxu2 %vm5355_vm12, %v8080_v3 }
 0xabf   : > { %v7873_v56 = vpack.c.bf16 %v7784_v36, %v7784_v36  ;;  %v17508_v36 = vor.u32 %v12824_v34, %v12370_v30 }
 0xac1   : > { %7912 = vst.msk [vmem:[#allocation8 + $0x1c] sm:$0xf] %vm5500_vm14, %v7873_v56 }
 0xac3   : > { %12080 = vmatmul.msk.bf16.gmra.mxu3 %vm7697_vm2, %v12765_v12  ;;  %v17511_v12 = vld [vmem:[#allocation8 + $0x10] sm:$0xff] }
 0xac6   : > { %v7787_v49 = vpop.f32.mrf.mxu3 }
 0xac7   : > { %v7874_v46 = vpack.c.bf16 %v7787_v49, %v7787_v49 }
 0xac8   : > { %v12775_v16 = vld [vmem:[#allocation8 + $0x18] sm:$0xff] }
 0xac9   : > { %v12793_v17 = vld [vmem:[#allocation8 + $0x18] sm:$0xff]  ;;  %7913 = vst.msk [vmem:[#allocation8 + $0x20] sm:$0xf] %vm5500_vm14, %v7874_v46  ;;  %12181 = vmatmul.msk.bf16.gmra.mxu0 %vm5355_vm12, %v12775_v16  ;;  %v8085_v43 = vshll.u32 %v12775_v16, 16  ;;  %v8089_v8 = vshrl.u32 %v12775_v16, 16 }
 0xaca   : > { %v8582_v2 = vrot.slane %v12793_v17, 1  ;;  %v9321_v17 = vrot.slane %v17508_v36, 1 }
 0xacb   : > { %v8087_v35 = vrot.slane %v8085_v43, 1 }
 0xacc   : > { %v8583_v9 = vsel %vm1247_vm0, %v8580_v7, %v8582_v2 }
 0xacd   : > { %12266 = vmatmul.msk.bf16.gmra.mxu1 %vm5355_vm12, %v8583_v9  ;;  %v8088_v19 = vsel %vm4237_vm9, %v8083_v11, %v8087_v35  ;;  %v8091_v1 = vor.u32 %v8089_v8, %v8087_v35 }
 0xace   : > { %v7789_v51 = vpop.f32.mrf.mxu3  ;;  %12160 = vmatmul.msk.bf16.gmra.mxu2 %vm5355_vm12, %v8088_v19 }
 0xacf   : > { %v7875_v44 = vpack.c.bf16 %v7789_v51, %v7789_v51 }
 0xad1   : > { %7914 = vst.msk [vmem:[#allocation8 + $0x24] sm:$0xf] %vm5500_vm14, %v7875_v44  ;;  %v12770_v44 = vld [vmem:[%s19005_s17 + $0x88] sm:$0xff] }
 0xad3   : > { %12081 = vmatmul.msk.bf16.gmra.mxu3 %vm7697_vm2, %v12766_v13  ;;  %v9860_v13 = vld [vmem:[#allocation8 + $0x14] sm:$0xf] }
 0xad6   : > { %v7792_v5 = vpop.f32.mrf.mxu3 }
 0xad7   : > { %v7876_v58 = vpack.c.bf16 %v7792_v5, %v7792_v5  ;;  %v9859_v5 = vld [vmem:[#allocation8 + $0x10] sm:$0xe] }
 0xad8   : > { %v12776_v59 = vld [vmem:[#allocation8 + $0x20] sm:$0xff] }
 0xad9   : > { %v12794_v63 = vld [vmem:[#allocation8 + $0x20] sm:$0xff]  ;;  %7915 = vst.msk [vmem:[#allocation8 + $0x28] sm:$0xf] %vm5500_vm14, %v7876_v58  ;;  %12182 = vmatmul.msk.bf16.gmra.mxu0 %vm5355_vm12, %v12776_v59  ;;  %v8093_v48 = vshll.u32 %v12776_v59, 16  ;;  %v8097_v33 = vshrl.u32 %v12776_v59, 16  ;;  %v9929_v58 = vunpack.c.l.b16 %v9860_v13  ;;  %v9928_v59 = vunpack.c.l.b16 %v9859_v5 }
 0xada   : > { %v8584_v0 = vrot.slane %v12794_v63, 1  ;;  %v10516_v63 = vld [vmem:[#allocation8 + $0x10] sm:$0xc] }
 0xadb   : > { %v8095_v31 = vrot.slane %v8093_v48, 1  ;;  %v17528_v8 = vpack.c.b16 %v9929_v58, %v9928_v59 }
 0xadc   : > { %v8585_v25 = vsel %vm1247_vm0, %v8582_v2, %v8584_v0  ;;  %v9322_v2 = vrot.slane %v17511_v12, 1 }
 0xadd   : > { %12267 = vmatmul.msk.bf16.gmra.mxu1 %vm5355_vm12, %v8585_v25  ;;  %v8096_v41 = vsel %vm4237_vm9, %v8091_v1, %v8095_v31  ;;  %v8099_v15 = vor.u32 %v8097_v33, %v8095_v31  ;;  %v10193_v33 = vshll.u32 %v17528_v8, 16 }
 0xade   : > { %v7794_v18 = vpop.f32.mrf.mxu3  ;;  %12161 = vmatmul.msk.bf16.gmra.mxu2 %vm5355_vm12, %v8096_v41  ;;  %v17519_v11 = vsel %vm1247_vm0, %v9321_v17, %v9322_v2 }
 0xadf   : > { %v7877_v10 = vpack.c.bf16 %v7794_v18, %v7794_v18  ;;  %v10523_v18 = vunpack.c.l.b16 %v10516_v63 }
 0xae1   : > { %7916 = vst.msk [vmem:[#allocation8 + $0x2c] sm:$0xf] %vm5500_vm14, %v7877_v10  ;;  %v17533_v10 = vld [vmem:[#allocation8 + $0x18] sm:$0xff] }
 0xae3   : > { %12082 = vmatmul.msk.bf16.gmra.mxu3 %vm7697_vm2, %v12767_v47 }
 0xae6   : > { %v7797_v29 = vpop.f32.mrf.mxu3 }
 0xae7   : > { %v7878_v24 = vpack.c.bf16 %v7797_v29, %v7797_v29 }
 0xae8   : > { %v12777_v22 = vld [vmem:[#allocation8 + $0x28] sm:$0xff] }
 0xae9   : > { %v12795_v14 = vld [vmem:[#allocation8 + $0x28] sm:$0xff]  ;;  %7917 = vst.msk [vmem:[#allocation8 + $0x30] sm:$0xf] %vm5500_vm14, %v7878_v24  ;;  %12183 = vmatmul.msk.bf16.gmra.mxu0 %vm5355_vm12, %v12777_v22  ;;  %v8101_v28 = vshll.u32 %v12777_v22, 16  ;;  %v8105_v42 = vshrl.u32 %v12777_v22, 16  ;;  %v17536_v24 = vld [vmem:[#allocation8 + $0x18] sm:$0xff]  ;;  %v10525_v22 = vpack.c.b16 %v9929_v58, %v10523_v18 }
 0xaea   : > { %v8586_v61 = vrot.slane %v12795_v14, 1  ;;  %v10190_v14 = vshrl.u32 %v17528_v8, 16 }
 0xaeb   : > { %v8103_v21 = vrot.slane %v8101_v28, 1 }
 0xaec   : > { %v8587_v20 = vsel %vm1247_vm0, %v8584_v0, %v8586_v61 }
 0xaed   : > { %12268 = vmatmul.msk.bf16.gmra.mxu1 %vm5355_vm12, %v8587_v20  ;;  %v8104_v45 = vsel %vm4237_vm9, %v8099_v15, %v8103_v21  ;;  %v8107_v60 = vor.u32 %v8105_v42, %v8103_v21  ;;  %v10198_v42 = vshrl.u32 %v17536_v24, 16 }
 0xaee   : > { %v7799_v50 = vpop.f32.mrf.mxu3  ;;  %12162 = vmatmul.msk.bf16.gmra.mxu2 %vm5355_vm12, %v8104_v45 }
 0xaef   : > { %v7879_v27 = vpack.c.bf16 %v7799_v50, %v7799_v50 }
 0xaf1   : > { %7918 = vst.msk [vmem:[#allocation8 + $0x34] sm:$0xf] %vm5500_vm14, %v7879_v27  ;;  %v10527_v27 = vrot.slane %v10525_v22, 2 }
 0xaf3   : > { %12083 = vmatmul.msk.bf16.gmra.mxu3 %vm7697_vm2, %v12768_v52  ;;  %v10528_v52 = vrot.slane %v17536_v24, 2 }
 0xaf6   : > { %v7802_v55 = vpop.f32.mrf.mxu3 }
 0xaf7   : > { %v7880_v62 = vpack.c.bf16 %v7802_v55, %v7802_v55  ;;  %v10192_v55 = vrot.slane %v10190_v14, 1 }
 0xaf8   : > { %v12778_v4 = vld [vmem:[#allocation8 + $0x30] sm:$0xff] }
 0xaf9   : > { %v12796_v39 = vld [vmem:[#allocation8 + $0x30] sm:$0xff]  ;;  %7919 = vst.msk [vmem:[#allocation8 + $0x38] sm:$0xf] %vm5500_vm14, %v7880_v62  ;;  %12184 = vmatmul.msk.bf16.gmra.mxu0 %vm5355_vm12, %v12778_v4  ;;  %v8109_v40 = vshll.u32 %v12778_v4, 16  ;;  %v8113_v46 = vshrl.u32 %v12778_v4, 16 }
 0xafa   : > { %v8588_v23 = vrot.slane %v12796_v39, 1  ;;  %v12771_v39 = vld [vmem:[%s19005_s17 + $0x90] sm:$0xff] }
 0xafb   : > { %v8111_v38 = vrot.slane %v8109_v40, 1  ;;  %v10201_v40 = vshll.u32 %v17536_v24, 16 }
 0xafc   : > { %v8589_v54 = vsel %vm1247_vm0, %v8586_v61, %v8588_v23  ;;  %v9324_v61 = vrot.slane %v17533_v10, 1 }
 0xafd   : > { %12269 = vmatmul.msk.bf16.gmra.mxu1 %vm5355_vm12, %v8589_v54  ;;  %v8112_v53 = vsel %vm4237_vm9, %v8107_v60, %v8111_v38  ;;  %v8115_v43 = vor.u32 %v8113_v46, %v8111_v38  ;;  %v17557_v54 = vsel %vm1475_vm1, %v10527_v27, %v10528_v52  ;;  %v12841_v60 = vld [vmem:[%s18999_s11 + $0x28] sm:$0xff]  ;;  %v10200_v38 = vrot.slane %v10198_v42, 1 }
 0xafe   : > { %v7804_v57 = vpop.f32.mrf.mxu3  ;;  %12163 = vmatmul.msk.bf16.gmra.mxu2 %vm5355_vm12, %v8112_v53  ;;  %v17544_v21 = vsel %vm1247_vm0, %v9322_v2, %v9324_v61  ;;  %19662 = vst [vmem:[#allocation43_spill] sm:$0xff] %v17557_v54  ;;  %9745 = vmatpush.bf16.msra.mxu3 %v12841_v60 }
 0xaff   : > { %v7881_v7 = vpack.c.bf16 %v7804_v57, %v7804_v57  ;;  %v10203_v57 = vrot.slane %v10201_v40, 2 }
 0xb01   : > { %7920 = vst.msk [vmem:[#allocation8 + $0x3c] sm:$0xf] %vm5500_vm14, %v7881_v7  ;;  %v10204_v7 = vor.u32 %v10203_v57, %v10200_v38 }
 0xb03   : > { %12084 = vmatmul.msk.bf16.gmra.mxu3 %vm7697_vm2, %v12769_v32 }
 0xb06   : > { %v7807_v6 = vpop.f32.mrf.mxu3 }
 0xb07   : > { %v7882_v37 = vpack.c.bf16 %v7807_v6, %v7807_v6 }
 0xb08   : > { %v12779_v3 = vld [vmem:[#allocation8 + $0x38] sm:$0xff] }
 0xb09   : > { %v12797_v56 = vld [vmem:[#allocation8 + $0x38] sm:$0xff]  ;;  %7921 = vst.msk [vmem:[#allocation8 + $0x40] sm:$0xf] %vm5500_vm14, %v7882_v37  ;;  %12185 = vmatmul.msk.bf16.gmra.mxu0 %vm5355_vm12, %v12779_v3  ;;  %v8117_v16 = vshll.u32 %v12779_v3, 16  ;;  %v8121_v41 = vshrl.u32 %v12779_v3, 16 }
 0xb0a   : > { %v8590_v49 = vrot.slane %v12797_v56, 1  ;;  %v7593_v56 = vld [vmem:[%s19005_s17 + $0x98] sm:$0x1] }
 0xb0b   : > { %v8119_v9 = vrot.slane %v8117_v16, 1 }
 0xb0c   : > { %v8591_v26 = vsel %vm1247_vm0, %v8588_v23, %v8590_v49  ;;  %v10195_v23 = vrot.slane %v10193_v33, 2 }
 0xb0d   : > { %12270 = vmatmul.msk.bf16.gmra.mxu1 %vm5355_vm12, %v8591_v26  ;;  %v8120_v51 = vsel %vm4237_vm9, %v8115_v43, %v8119_v9  ;;  %v8123_v20 = vor.u32 %v8121_v41, %v8119_v9  ;;  %v17578_v26 = vld [vmem:[#allocation8 + $0x20] sm:$0xff]  ;;  %v7676_v43 = vunpack.c.l.b16 %v7593_v56 }
 0xb0e   : > { %v7809_v35 = vpop.f32.mrf.mxu3  ;;  %12164 = vmatmul.msk.bf16.gmra.mxu2 %vm5355_vm12, %v8120_v51  ;;  %v10196_v53 = vor.u32 %v10195_v23, %v10192_v55  ;;  %v10530_v58 = vrot.slane %v17578_v26, 2 }
 0xb0f   : > { %v7883_v19 = vpack.c.bf16 %v7809_v35, %v7809_v35 }
 0xb10   : > { %v17565_v32 = vsel %vm4686_vm10, %v10196_v53, %v10204_v7  ;;  %v17629_v53 = vld [vmem:[#allocation8 + $0x28] sm:$0xff] }
 0xb11   : > { %7922 = vst.msk [vmem:[#allocation8 + $0x44] sm:$0xf] %vm5500_vm14, %v7883_v19 }
 0xb12   : > { %19663 = vst [vmem:[#allocation12_spill] sm:$0xff] %v17565_v32 }
 0xb13   : > { %12085 = vmatmul.msk.bf16.gmra.mxu3 %vm7697_vm2, %v12770_v44 }
 0xb16   : > { %v7812_v0 = vpop.f32.mrf.mxu3  ;;  %v17530_v25 = vpop.f32.mrf.mxu0 }
 0xb17   : > { %v7884_v48 = vpack.c.bf16 %v7812_v0, %v7812_v0  ;;  %v7696_v0 = vpack.c.b16 %v7676_v43, %v7676_v43 }
 0xb18   : > { %v12780_v1 = vld [vmem:[#allocation8 + $0x40] sm:$0xff] }
 0xb19   : > { %v12798_v31 = vld [vmem:[#allocation8 + $0x40] sm:$0xff]  ;;  %7923 = vst.msk [vmem:[#allocation8 + $0x48] sm:$0xf] %vm5500_vm14, %v7884_v48  ;;  %12186 = vmatmul.msk.bf16.gmra.mxu0 %vm5355_vm12, %v12780_v1  ;;  %v8125_v29 = vshll.u32 %v12780_v1, 16  ;;  %v8129_v17 = vshrl.u32 %v12780_v1, 16  ;;  %v10207_v48 = vshrl.u32 %v17578_v26, 16 }
 0xb1a   : > { %v8592_v47 = vrot.slane %v12798_v31, 1  ;;  %v10210_v1 = vshll.u32 %v17578_v26, 16  ;;  %v17594_v31 = vsel %vm1475_vm1, %v10528_v52, %v10530_v58 }
 0xb1b   : > { %v8127_v15 = vrot.slane %v8125_v29, 1  ;;  %19664 = vst [vmem:[#allocation17_spill] sm:$0xff] %v17594_v31  ;;  %v10209_v18 = vrot.slane %v10207_v48, 1 }
 0xb1c   : > { %v8593_v28 = vsel %vm1247_vm0, %v8590_v49, %v8592_v47  ;;  %v17573_v49 = vld [vmem:[#allocation8 + $0x20] sm:$0xff]  ;;  %v10212_v41 = vrot.slane %v10210_v1, 2 }
 0xb1d   : > { %12271 = vmatmul.msk.bf16.gmra.mxu1 %vm5355_vm12, %v8593_v28  ;;  %v8128_v45 = vsel %vm4237_vm9, %v8123_v20, %v8127_v15  ;;  %v9326_v9 = vrot.slane %v17573_v49, 1  ;;  %v8131_v51 = vor.u32 %v8129_v17, %v8127_v15  ;;  %v9544_v20 = vshll.u32 %v17511_v12, 16 }
 0xb1e   : > { %v7814_v50 = vpop.f32.mrf.mxu3  ;;  %12165 = vmatmul.msk.bf16.gmra.mxu2 %vm5355_vm12, %v8128_v45  ;;  %v17549_v4 = vpop.f32.mrf.mxu0  ;;  %v10213_v14 = vor.u32 %v10212_v41, %v10209_v18  ;;  %v9533_v45 = vshrl.u32 %v17508_v36, 16  ;;  %v9550_v41 = vshrl.u32 %v17533_v10, 16 }
 0xb1f   : > { %v7885_v62 = vpack.c.bf16 %v7814_v50, %v7814_v50  ;;  %v17584_v44 = vsel %vm1247_vm0, %v9324_v61, %v9326_v9  ;;  %v9541_v61 = vshrl.u32 %v17511_v12, 16  ;;  %v9546_v60 = vrot.slane %v9544_v20, 2 }
 0xb20   : > { %v17605_v33 = vsel %vm4686_vm10, %v10204_v7, %v10213_v14 }
 0xb21   : > { %7924 = vst.msk [vmem:[#allocation8 + $0x4c] sm:$0xf] %vm5500_vm14, %v7885_v62  ;;  %v9543_v55 = vrot.slane %v9541_v61, 1  ;;  %v17617_v62 = vld [vmem:[#allocation8 + $0x28] sm:$0xff]  ;;  %v9553_v61 = vshll.u32 %v17533_v10, 16 }
 0xb22   : > { %19665 = vst [vmem:[#allocation19_spill] sm:$0xff] %v17605_v33  ;;  %v9328_v57 = vrot.slane %v17617_v62, 1 }
 0xb23   : > { %12086 = vmatmul.msk.bf16.gmra.mxu3 %vm7697_vm2, %v12771_v39 }
 0xb26   : > { %v7817_v34 = vpop.f32.mrf.mxu3  ;;  %v17567_v30 = vpop.f32.mrf.mxu0 }
 0xb27   : > { %v7886_v6 = vpack.c.bf16 %v7817_v34, %v7817_v34 }
 0xb28   : > { %v12781_v37 = vld [vmem:[#allocation8 + $0x48] sm:$0xff] }
 0xb29   : > { %v12799_v3 = vld [vmem:[#allocation8 + $0x48] sm:$0xff]  ;;  %7925 = vst.msk [vmem:[#allocation8 + $0x50] sm:$0xf] %vm5500_vm14, %v7886_v6  ;;  %12187 = vmatmul.msk.bf16.gmra.mxu0 %vm5355_vm12, %v12781_v37  ;;  %v8133_v2 = vshll.u32 %v12781_v37, 16  ;;  %v8137_v42 = vshrl.u32 %v12781_v37, 16  ;;  %v17634_v37 = vsel %vm1247_vm0, %v9326_v9, %v9328_v57 }
 0xb2a   : > { %v17576_v46 = vpop.f32.mrf.mxu1  ;;  %v8594_v16 = vrot.slane %v12799_v3, 1 }
 0xb2b   : > { %v8135_v19 = vrot.slane %v8133_v2, 1 }
 0xb2c   : > { %v8595_v35 = vsel %vm1247_vm0, %v8592_v47, %v8594_v16 }
 0xb2d   : > { %12272 = vmatmul.msk.bf16.gmra.mxu1 %vm5355_vm12, %v8595_v35  ;;  %v8136_v5 = vsel %vm4237_vm9, %v8131_v51, %v8135_v19  ;;  %v8139_v34 = vor.u32 %v8137_v42, %v8135_v19  ;;  %v10532_v35 = vrot.slane %v17629_v53, 2  ;;  %v10219_v19 = vshll.u32 %v17629_v53, 16 }
 0xb2e   : > { %v7819_v13 = vpop.f32.mrf.mxu3  ;;  %12166 = vmatmul.msk.bf16.gmra.mxu2 %vm5355_vm12, %v8136_v5  ;;  %v17589_v63 = vpop.f32.mrf.mxu0  ;;  %v9555_v42 = vrot.slane %v9553_v61, 2  ;;  %v9559_v61 = vshrl.u32 %v17573_v49, 16 }
 0xb2f   : > { %v7887_v59 = vpack.c.bf16 %v7819_v13, %v7819_v13  ;;  %v17645_v9 = vsel %vm1475_vm1, %v10530_v58, %v10532_v35  ;;  %v10221_v48 = vrot.slane %v10219_v19, 2 }
 0xb30   : > { %19666 = vst [vmem:[#allocation28_spill] sm:$0xff] %v17645_v9 }
 0xb31   : > { %7926 = vst.msk [vmem:[#allocation8 + $0x54] sm:$0xf] %vm5500_vm14, %v7887_v59  ;;  %v8251_v47 = vpop.f32.mrf.mxu2 }
 0xb32   : > { %v17597_v29 = vpop.f32.mrf.mxu1  ;;  %v17601_v22 = vadd.f32 %v17530_v25, %v8251_v47  ;;  %v9536_v25 = vshll.u32 %v17508_v36, 16  ;;  %v9535_v36 = vrot.slane %v9533_v45, 1 }
 0xb33   : > { %12087 = vmatmul.msk.bf16.gmra.mxu3 %vm7697_vm2, %v7696_v0 }
 0xb34   : > { %v9538_v3 = vrot.slane %v9536_v25, 2 }
 0xb36   : > { %v7822_v28 = vpop.f32.mrf.mxu3  ;;  %v17608_v50 = vpop.f32.mrf.mxu0  ;;  %v9539_v51 = vor.u32 %v9538_v3, %v9535_v36  ;;  %v17672_v36 = vld [vmem:[#allocation8 + $0x30] sm:$0xff] }
 0xb37   : > { %v7888_v15 = vpack.c.bf16 %v7822_v28, %v7822_v28 }
 0xb38   : > { %v17611_v27 = vld [vmem:[#allocation8 + $0x50] sm:$0xff] }
 0xb39   : > { %v17613_v52 = vld [vmem:[#allocation8 + $0x50] sm:$0xff]  ;;  %7927 = vst.msk [vmem:[#allocation8 + $0x58] sm:$0xf] %vm5500_vm14, %v7888_v15  ;;  %v8253_v39 = vpop.f32.mrf.mxu2  ;;  %12188 = vmatmul.msk.bf16.gmra.mxu0 %vm5355_vm12, %v17611_v27  ;;  %v8141_v40 = vshll.u32 %v17611_v27, 16  ;;  %v8145_v10 = vshrl.u32 %v17611_v27, 16 }
 0xb3a   : > { %v17621_v12 = vpop.f32.mrf.mxu1  ;;  %v8596_v23 = vrot.slane %v17613_v52, 1  ;;  %v17626_v38 = vadd.f32 %v17549_v4, %v8253_v39  ;;  %v9547_v4 = vor.u32 %v9546_v60, %v9543_v55  ;;  %v17662_v52 = vld [vmem:[#allocation8 + $0x30] sm:$0xff] }
 0xb3b   : > { %v8143_v6 = vrot.slane %v8141_v40, 1  ;;  %v9330_v60 = vrot.slane %v17662_v52, 1 }
 0xb3c   : > { %v8597_v7 = vsel %vm1247_vm0, %v8594_v16, %v8596_v23  ;;  %v10216_v16 = vshrl.u32 %v17629_v53, 16  ;;  %v9548_v0 = vsel %vm4686_vm10, %v9539_v51, %v9547_v4  ;;  %v10534_v51 = vrot.slane %v17672_v36, 2 }
 0xb3d   : > { %12273 = vmatmul.msk.bf16.gmra.mxu1 %vm5355_vm12, %v8597_v7  ;;  %v8144_v17 = vsel %vm4237_vm9, %v8139_v34, %v8143_v6  ;;  %v8147_v34 = vor.u32 %v8145_v10, %v8143_v6  ;;  %v10228_v6 = vshll.u32 %v17672_v36, 16 }
 0xb3e   : > { %v7824_v56 = vpop.f32.mrf.mxu3  ;;  %12167 = vmatmul.msk.bf16.gmra.mxu2 %vm5355_vm12, %v8144_v17  ;;  %v17638_v43 = vpop.f32.mrf.mxu0  ;;  %v10218_v13 = vrot.slane %v10216_v16, 1 }
 0xb3f   : > { %v7889_v2 = vpack.c.bf16 %v7824_v56, %v7824_v56  ;;  %v17677_v56 = vsel %vm1247_vm0, %v9328_v57, %v9330_v60  ;;  %v17688_v57 = vsel %vm1475_vm1, %v10532_v35, %v10534_v51 }
 0xb40   : > { %v10222_v18 = vor.u32 %v10221_v48, %v10218_v13  ;;  %19668 = vst [vmem:[#allocation14_spill] sm:$0xff] %v17688_v57  ;;  %v10230_v48 = vrot.slane %v10228_v6, 2 }
 0xb41   : > { %7928 = vst.msk [vmem:[#allocation8 + $0x5c] sm:$0xf] %vm5500_vm14, %v7889_v2  ;;  %v8256_v5 = vpop.f32.mrf.mxu2 }
 0xb42   : > { %v17647_v59 = vpop.f32.mrf.mxu1  ;;  %v17651_v1 = vadd.f32 %v17567_v30, %v8256_v5  ;;  %v17657_v58 = vsel %vm4686_vm10, %v10213_v14, %v10222_v18  ;;  %v9552_v30 = vrot.slane %v9550_v41, 1 }
 0xb43   : > { %12458 = vmatmul.msk.bf16.vlgmr.msra.gmra.mxu3 %vm5355_vm12, %v9548_v0  ;;  %19667 = vst [vmem:[#allocation24_spill] sm:$0xff] %v17657_v58 }
 0xb44   : > { %v9556_v2 = vor.u32 %v9555_v42, %v9552_v30 }
 0xb46   : > { %v7827_v47 = vpop.f32.mrf.mxu3  ;;  %v17659_v20 = vpop.f32.mrf.mxu0  ;;  %v9557_v0 = vsel %vm4686_vm10, %v9547_v4, %v9556_v2 }
 0xb47   : > { %v7890_v28 = vpack.c.bf16 %v7827_v47, %v7827_v47 }
 0xb48   : > { %v12783_v15 = vld [vmem:[#allocation8 + $0x58] sm:$0xff] }
 0xb49   : > { %v12801_v45 = vld [vmem:[#allocation8 + $0x58] sm:$0xff]  ;;  %7929 = vst.msk [vmem:[#allocation8 + $0x60] sm:$0xf] %vm5500_vm14, %v7890_v28  ;;  %v8258_v25 = vpop.f32.mrf.mxu2  ;;  %12189 = vmatmul.msk.bf16.gmra.mxu0 %vm5355_vm12, %v12783_v15  ;;  %v8149_v14 = vshll.u32 %v12783_v15, 16 }
 0xb4a   : > { %v17665_v55 = vpop.f32.mrf.mxu1  ;;  %v8598_v39 = vrot.slane %v12801_v45, 1  ;;  %v17669_v40 = vadd.f32 %v17589_v63, %v8258_v25  ;;  %v9562_v45 = vshll.u32 %v17573_v49, 16  ;;  %v8153_v49 = vshrl.u32 %v12783_v15, 16 }
 0xb4b   : > { %v8151_v3 = vrot.slane %v8149_v14, 1  ;;  %v17705_v14 = vld [vmem:[#allocation8 + $0x38] sm:$0xff] }
 0xb4c   : > { %v8599_v7 = vsel %vm1247_vm0, %v8596_v23, %v8598_v39  ;;  %v10225_v23 = vshrl.u32 %v17672_v36, 16 }
 0xb4d   : > { %12274 = vmatmul.msk.bf16.gmra.mxu1 %vm5355_vm12, %v8599_v7  ;;  %v8152_v27 = vsel %vm4237_vm9, %v8147_v34, %v8151_v3 }
 0xb4e   : > { %v7829_v17 = vpop.f32.mrf.mxu3  ;;  %12168 = vmatmul.msk.bf16.gmra.mxu2 %vm5355_vm12, %v8152_v27  ;;  %v17681_v63 = vpop.f32.mrf.mxu0  ;;  %v10227_v19 = vrot.slane %v10225_v23, 1  ;;  %v17714_v23 = vld [vmem:[#allocation8 + $0x38] sm:$0xff] }
 0xb4f   : > { %v7891_v16 = vpack.c.bf16 %v7829_v17, %v7829_v17 }
 0xb50   : > { %v10231_v47 = vor.u32 %v10230_v48, %v10227_v19  ;;  %v8155_v19 = vor.u32 %v8153_v49, %v8151_v3  ;;  %v10237_v3 = vshll.u32 %v17714_v23, 16 }
 0xb51   : > { %7930 = vst.msk [vmem:[#allocation8 + $0x64] sm:$0xf] %vm5500_vm14, %v7891_v16  ;;  %v8261_v13 = vpop.f32.mrf.mxu2  ;;  %v9332_v16 = vrot.slane %v17705_v14, 1 }
 0xb52   : > { %v17690_v5 = vpop.f32.mrf.mxu1  ;;  %v17694_v41 = vadd.f32 %v17608_v50, %v8261_v13  ;;  %v17700_v35 = vsel %vm4686_vm10, %v10222_v18, %v10231_v47  ;;  %v9561_v50 = vrot.slane %v9559_v61, 1  ;;  %v9564_v18 = vrot.slane %v9562_v45, 2 }
 0xb53   : > { %12459 = vmatmul.msk.bf16.gmra.mxu3 %vm5355_vm12, %v9557_v0  ;;  %19669 = vst [vmem:[#allocation39_spill] sm:$0xff] %v17700_v35  ;;  %v17719_v0 = vsel %vm1247_vm0, %v9330_v60, %v9332_v16  ;;  %v10536_v45 = vrot.slane %v17714_v23, 2  ;;  %v10239_v49 = vrot.slane %v10237_v3, 2  ;;  %v17751_v3 = vld [vmem:[#allocation8 + $0x40] sm:$0xff] }
 0xb54   : > { %v9565_v61 = vor.u32 %v9564_v18, %v9561_v50 }
 0xb55   : > { %v17730_v60 = vsel %vm1475_vm1, %v10534_v51, %v10536_v45 }
 0xb56   : > { %v7832_v28 = vpop.f32.mrf.mxu3  ;;  %v17702_v25 = vpop.f32.mrf.mxu0  ;;  %19670 = vst [vmem:[#allocation25_spill] sm:$0xff] %v17730_v60  ;;  %v9566_v50 = vsel %vm4686_vm10, %v9556_v2, %v9565_v61 }
 0xb57   : > { %v7892_v30 = vpack.c.bf16 %v7832_v28, %v7832_v28 }
 0xb58   : > { %v12784_v10 = vld [vmem:[#allocation8 + $0x60] sm:$0xff] }
 0xb59   : > { %v12802_v4 = vld [vmem:[#allocation8 + $0x60] sm:$0xff]  ;;  %7931 = vst.msk [vmem:[#allocation8 + $0x68] sm:$0xf] %vm5500_vm14, %v7892_v30  ;;  %v8263_v42 = vpop.f32.mrf.mxu2  ;;  %12190 = vmatmul.msk.bf16.gmra.mxu0 %vm5355_vm12, %v12784_v10  ;;  %v8157_v17 = vshll.u32 %v12784_v10, 16 }
 0xb5a   : > { %v17708_v7 = vpop.f32.mrf.mxu1  ;;  %v8600_v34 = vrot.slane %v12802_v4, 1  ;;  %v17711_v27 = vadd.f32 %v17638_v43, %v8263_v42 }
 0xb5b   : > { %v8159_v13 = vrot.slane %v8157_v17, 1 }
 0xb5c   : > { %v8601_v6 = vsel %vm1247_vm0, %v8598_v39, %v8600_v34  ;;  %v10234_v39 = vshrl.u32 %v17714_v23, 16 }
 0xb5d   : > { %12275 = vmatmul.msk.bf16.gmra.mxu1 %vm5355_vm12, %v8601_v6  ;;  %v8160_v15 = vsel %vm4237_vm9, %v8155_v19, %v8159_v13  ;;  %v9568_v6 = vshrl.u32 %v17617_v62, 16 }
 0xb5e   : > { %v7834_v48 = vpop.f32.mrf.mxu3  ;;  %12169 = vmatmul.msk.bf16.gmra.mxu2 %vm5355_vm12, %v8160_v15  ;;  %v17723_v43 = vpop.f32.mrf.mxu0  ;;  %v10236_v30 = vrot.slane %v10234_v39, 1 }
 0xb5f   : > { %v7893_v28 = vpack.c.bf16 %v7834_v48, %v7834_v48  ;;  %v9571_v48 = vshll.u32 %v17617_v62, 16 }
 0xb60   : > { %v10240_v18 = vor.u32 %v10239_v49, %v10236_v30 }
 0xb61   : > { %7932 = vst.msk [vmem:[#allocation8 + $0x6c] sm:$0xf] %vm5500_vm14, %v7893_v28  ;;  %v8266_v4 = vpop.f32.mrf.mxu2  ;;  %v9573_v49 = vrot.slane %v9571_v48, 2 }
 0xb62   : > { %v17732_v42 = vpop.f32.mrf.mxu1  ;;  %v17736_v17 = vadd.f32 %v17659_v20, %v8266_v4  ;;  %v17742_v51 = vsel %vm4686_vm10, %v10231_v47, %v10240_v18  ;;  %v9570_v20 = vrot.slane %v9568_v6, 1  ;;  %v8161_v4 = vshrl.u32 %v12784_v10, 16  ;;  %v17763_v6 = vld [vmem:[#allocation8 + $0x40] sm:$0xff] }
 0xb63   : > { %19671 = vst [vmem:[#allocation15_spill] sm:$0xff] %v17732_v42  ;;  %12460 = vmatmul.msk.bf16.gmra.mxu3 %vm5355_vm12, %v9566_v50  ;;  %v9595_v42 = vshrl.u32 %v17751_v3, 16 }
 0xb64   : > { %19672 = vst [vmem:[#allocation29_spill] sm:$0xff] %v17742_v51  ;;  %v8163_v35 = vor.u32 %v8161_v4, %v8159_v13  ;;  %v9574_v48 = vor.u32 %v9573_v49, %v9570_v20  ;;  %v10246_v13 = vshll.u32 %v17763_v6, 16 }
 0xb66   : > { %v7837_v19 = vpop.f32.mrf.mxu3  ;;  %v17744_v28 = vpop.f32.mrf.mxu0  ;;  %v10248_v49 = vrot.slane %v10246_v13, 2 }
 0xb67   : > { %v7894_v15 = vpack.c.bf16 %v7837_v19, %v7837_v19 }
 0xb68   : > { %v17746_v39 = vld [vmem:[#allocation8 + $0x68] sm:$0xff] }
 0xb69   : > { %v17748_v2 = vld [vmem:[#allocation8 + $0x68] sm:$0xff]  ;;  %7933 = vst.msk [vmem:[#allocation8 + $0x70] sm:$0xf] %vm5500_vm14, %v7894_v15  ;;  %v8268_v30 = vpop.f32.mrf.mxu2  ;;  %12191 = vmatmul.msk.bf16.gmra.mxu0 %vm5355_vm12, %v17746_v39  ;;  %v8165_v50 = vshll.u32 %v17746_v39, 16  ;;  %v9334_v15 = vrot.slane %v17751_v3, 1 }
 0xb6a   : > { %v17755_v62 = vpop.f32.mrf.mxu1  ;;  %v8602_v47 = vrot.slane %v17748_v2, 1  ;;  %v17760_v19 = vadd.f32 %v17681_v63, %v8268_v30  ;;  %v10538_v30 = vrot.slane %v17763_v6, 2 }
 0xb6b   : > { %19673 = vst [vmem:[#allocation20_spill] sm:$0xff] %v17755_v62  ;;  %v8167_v60 = vrot.slane %v8165_v50, 1  ;;  %v17768_v58 = vsel %vm1247_vm0, %v9332_v16, %v9334_v15  ;;  %v12823_v16 = vld [vmem:[%s18999_s11 + $0x18] sm:$0xff]  ;;  %v9575_v50 = vsel %vm4686_vm10, %v9565_v61, %v9574_v48 }
 0xb6c   : > { %v8603_v51 = vsel %vm1247_vm0, %v8600_v34, %v8602_v47  ;;  %v10243_v34 = vshrl.u32 %v17763_v6, 16  ;;  %9088 = vmatpush.bf16.msra.mxu2 %v12823_v16  ;;  %v12840_v16 = vld [vmem:[%s18999_s11 + $0x20] sm:$0xff] }
 0xb6d   : > { %12276 = vmatmul.msk.bf16.gmra.mxu1 %vm5355_vm12, %v8603_v51  ;;  %v8168_v2 = vsel %vm4237_vm9, %v8163_v35, %v8167_v60  ;;  %v17782_v35 = vsel %vm1475_vm1, %v10536_v45, %v10538_v30  ;;  %v9580_v45 = vshll.u32 %v17662_v52, 16  ;;  %9415 = vmatpush.bf16.msrb.mxu0 %v12840_v16 }
 0xb6e   : > { %v7839_v10 = vpop.f32.mrf.mxu3  ;;  %12170 = vmatmul.msk.bf16.gmra.mxu2 %vm5355_vm12, %v8168_v2  ;;  %v17772_v63 = vpop.f32.mrf.mxu0  ;;  %19674 = vst [vmem:[#allocation31_spill] sm:$0xff] %v17782_v35  ;;  %v10245_v51 = vrot.slane %v10243_v34, 1  ;;  %v9577_v2 = vshrl.u32 %v17662_v52, 16 }
 0xb6f   : > { %v7895_v57 = vpack.c.bf16 %v7839_v10, %v7839_v10 }
 0xb71   : > { %7934 = vst.msk [vmem:[#allocation8 + $0x74] sm:$0xf] %vm5500_vm14, %v7895_v57  ;;  %v8271_v20 = vpop.f32.mrf.mxu2  ;;  %v10249_v57 = vor.u32 %v10248_v49, %v10245_v51  ;;  %v17806_v51 = vld [vmem:[#allocation8 + $0x48] sm:$0xff] }
 0xb72   : > { %v17784_v4 = vpop.f32.mrf.mxu1  ;;  %v17788_v10 = vadd.f32 %v17702_v25, %v8271_v20  ;;  %v9579_v25 = vrot.slane %v9577_v2, 1  ;;  %v9336_v2 = vrot.slane %v17806_v51, 1 }
 0xb73   : > { %19675 = vst [vmem:[#allocation35_spill] sm:$0xff] %v17784_v4  ;;  %12461 = vmatmul.msk.bf16.gmra.mxu3 %vm5355_vm12, %v9575_v50  ;;  %v17794_v34 = vsel %vm4686_vm10, %v10240_v18, %v10249_v57  ;;  %v8169_v18 = vshrl.u32 %v17746_v39, 16  ;;  %v9582_v50 = vrot.slane %v9580_v45, 2 }
 0xb74   : > { %19676 = vst [vmem:[#allocation34_spill] sm:$0xff] %v17788_v10  ;;  %v17824_v39 = vsel %vm1247_vm0, %v9334_v15, %v9336_v2 }
 0xb75   : > { %19677 = vst [vmem:[#allocation32_spill] sm:$0xff] %v17794_v34  ;;  %v17819_v34 = vld [vmem:[#allocation8 + $0x48] sm:$0xff]  ;;  %v8171_v31 = vor.u32 %v8169_v18, %v8167_v60 }
 0xb76   : > { %v7842_v33 = vpop.f32.mrf.mxu3  ;;  %v17796_v9 = vpop.f32.mrf.mxu0  ;;  %v10255_v60 = vshll.u32 %v17819_v34, 16 }
 0xb77   : > { %v7896_v35 = vpack.c.bf16 %v7842_v33, %v7842_v33 }
 0xb78   : > { %v17798_v61 = vld [vmem:[#allocation8 + $0x70] sm:$0xff] }
 0xb79   : > { %v17800_v13 = vld [vmem:[#allocation8 + $0x70] sm:$0xff]  ;;  %7935 = vst.msk [vmem:[#allocation8 + $0x78] sm:$0xf] %vm5500_vm14, %v7896_v35  ;;  %v8273_v52 = vpop.f32.mrf.mxu2  ;;  %12192 = vmatmul.msk.bf16.gmra.mxu0 %vm5355_vm12, %v17798_v61  ;;  %v8173_v20 = vshll.u32 %v17798_v61, 16 }
 0xb7a   : > { %v8604_v33 = vrot.slane %v17800_v13, 1  ;;  %v17814_v35 = vadd.f32 %v17723_v43, %v8273_v52  ;;  %v17816_v49 = vpop.f32.mrf.mxu1  ;;  %v9583_v13 = vor.u32 %v9582_v50, %v9579_v25  ;;  %v10257_v25 = vrot.slane %v10255_v60, 2 }
 0xb7b   : > { %19679 = vst [vmem:[#allocation30_spill] sm:$0xff] %v17816_v49  ;;  %v8175_v54 = vrot.slane %v8173_v20, 1  ;;  %v10540_v49 = vrot.slane %v17819_v34, 2 }
 0xb7c   : > { %19678 = vst [vmem:[#allocation13_spill] sm:$0xff] %v17814_v35  ;;  %v8605_v32 = vsel %vm1247_vm0, %v8602_v47, %v8604_v33  ;;  %v10252_v47 = vshrl.u32 %v17819_v34, 16 }
 0xb7d   : > { %12277 = vmatmul.msk.bf16.gmra.mxu1 %vm5355_vm12, %v8605_v32  ;;  %v8176_v43 = vsel %vm4237_vm9, %v8171_v31, %v8175_v54  ;;  %v17835_v32 = vsel %vm1475_vm1, %v10538_v30, %v10540_v49  ;;  %v9584_v31 = vsel %vm4686_vm10, %v9574_v48, %v9583_v13 }
 0xb7e   : > { %v7844_v45 = vpop.f32.mrf.mxu3  ;;  %12171 = vmatmul.msk.bf16.gmra.mxu2 %vm5355_vm12, %v8176_v43  ;;  %v17828_v16 = vpop.f32.mrf.mxu0  ;;  %19680 = vst [vmem:[#allocation40_spill] sm:$0xff] %v17835_v32  ;;  %v10254_v15 = vrot.slane %v10252_v47, 1  ;;  %v9586_v43 = vshrl.u32 %v17705_v14, 16 }
 0xb7f   : > { %v7897_v52 = vpack.c.bf16 %v7844_v45, %v7844_v45 }
 0xb80   : > { %v10258_v50 = vor.u32 %v10257_v25, %v10254_v15  ;;  %v9588_v60 = vrot.slane %v9586_v43, 1  ;;  %v17854_v15 = vld [vmem:[#allocation8 + $0x50] sm:$0xff] }
 0xb81   : > { %7936 = vst.msk [vmem:[#allocation8 + $0x7c] sm:$0xf] %vm5500_vm14, %v7897_v52  ;;  %v8276_v18 = vpop.f32.mrf.mxu2  ;;  %v9589_v52 = vshll.u32 %v17705_v14, 16  ;;  %v8177_v14 = vshrl.u32 %v17798_v61, 16  ;;  %v9338_v43 = vrot.slane %v17854_v15, 1 }
 0xb82   : > { %v17839_v20 = vadd.f32 %v17744_v28, %v8276_v18  ;;  %v17842_v45 = vpop.f32.mrf.mxu1  ;;  %v17847_v30 = vsel %vm4686_vm10, %v10249_v57, %v10258_v50 }
 0xb83   : > { %12462 = vmatmul.msk.bf16.gmra.mxu3 %vm5355_vm12, %v9584_v31  ;;  %19682 = vst [vmem:[#allocation36_spill] sm:$0xff] %v17842_v45  ;;  %v17872_v61 = vsel %vm1247_vm0, %v9336_v2, %v9338_v43 }
 0xb84   : > { %19681 = vst [vmem:[#allocation41_spill] sm:$0xff] %v17839_v20  ;;  %v8179_v20 = vor.u32 %v8177_v14, %v8175_v54 }
 0xb85   : > { %19683 = vst [vmem:[#allocation27_spill] sm:$0xff] %v17847_v30  ;;  %v17867_v30 = vld [vmem:[#allocation8 + $0x50] sm:$0xff] }
 0xb86   : > { %v7847_v4 = vpop.f32.mrf.mxu3  ;;  %v17849_v32 = vpop.f32.mrf.mxu0  ;;  %v10542_v54 = vrot.slane %v17867_v30, 2  ;;  %v10264_v2 = vshll.u32 %v17867_v30, 16 }
 0xb87   : > { %v7898_v47 = vpack.c.bf16 %v7847_v4, %v7847_v4  ;;  %v9591_v4 = vrot.slane %v9589_v52, 2 }
 0xb88   : > { %v17851_v48 = vld [vmem:[#allocation8 + $0x78] sm:$0xff] }
 0xb89   : > { %v12805_v28 = vld [vmem:[#allocation8 + $0x78] sm:$0xff]  ;;  %7937 = vst.msk [vmem:[#allocation8 + $0x80] sm:$0xf] %vm5500_vm14, %v7898_v47  ;;  %v8278_v18 = vpop.f32.mrf.mxu2  ;;  %12193 = vmatmul.msk.bf16.gmra.mxu0 %vm5355_vm12, %v17851_v48  ;;  %v8181_v57 = vshll.u32 %v17851_v48, 16  ;;  %v12857_v47 = vld [vmem:[%s18999_s11 + $0x30] sm:$0xff] }
 0xb8a   : > { %v8606_v31 = vrot.slane %v12805_v28, 1  ;;  %v17861_v25 = vadd.f32 %v17772_v63, %v8278_v18  ;;  %v9592_v18 = vor.u32 %v9591_v4, %v9588_v60  ;;  %10072 = vmatpush.bf16.msra.mxu1 %v12857_v47  ;;  %v10266_v47 = vrot.slane %v10264_v2, 2  ;;  %v17904_v2 = vld [vmem:[#allocation8 + $0x58] sm:$0xff] }
 0xb8b   : > { %v8183_v28 = vrot.slane %v8181_v57, 1 }
 0xb8c   : > { %19684 = vst [vmem:[#allocation23_spill] sm:$0xff] %v17861_v25  ;;  %v8607_v45 = vsel %vm1247_vm0, %v8604_v33, %v8606_v31  ;;  %v17875_v25 = vpop.f32.mrf.mxu1  ;;  %v9593_v57 = vsel %vm4686_vm10, %v9583_v13, %v9592_v18 }
 0xb8d   : > { %12278 = vmatmul.msk.bf16.gmra.mxu1 %vm5355_vm12, %v8607_v45  ;;  %v8184_v63 = vsel %vm4237_vm9, %v8179_v20, %v8183_v28  ;;  %19685 = vst [vmem:[#allocation37_spill] sm:$0xff] %v17875_v25  ;;  %v10261_v45 = vshrl.u32 %v17867_v30, 16  ;;  %v17885_v20 = vsel %vm1475_vm1, %v10540_v49, %v10542_v54 }
 0xb8e   : > { %v7849_v52 = vpop.f32.mrf.mxu3  ;;  %12172 = vmatmul.msk.bf16.gmra.mxu2 %vm5355_vm12, %v8184_v63  ;;  %v17878_v62 = vpop.f32.mrf.mxu0  ;;  %19686 = vst [vmem:[#allocation44_spill] sm:$0xff] %v17885_v20 }
 0xb8f   : > { %v7899_v35 = vpack.c.bf16 %v7849_v52, %v7849_v52  ;;  %v10263_v4 = vrot.slane %v10261_v45, 1 }
 0xb90   : > { %v8490_v33 = vld [vmem:[#allocation8 + $0x80] sm:$0x1] }
 0xb91   : > { %7938 = vst.msk [vmem:[#allocation8 + $0x84] sm:$0xf] %vm5500_vm14, %v7899_v35  ;;  %v8559_v14 = vunpack.c.l.b16 %v8490_v33  ;;  %v8281_v60 = vpop.f32.mrf.mxu2  ;;  %v10267_v25 = vor.u32 %v10266_v47, %v10263_v4  ;;  %v9598_v35 = vshll.u32 %v17751_v3, 16  ;;  %v9597_v3 = vrot.slane %v9595_v42, 1 }
 0xb92   : > { %v17889_v52 = vadd.f32 %v17796_v9, %v8281_v60  ;;  %v17902_v9 = vld [vmem:[#allocation8 + $0x58] sm:$0xff]  ;;  %v10544_v47 = vrot.slane %v17904_v2, 2 }
 0xb93   : > { %12463 = vmatmul.msk.bf16.gmra.mxu3 %vm5355_vm12, %v9593_v57  ;;  %v8576_v63 = vpack.c.b16 %v8559_v14, %v8559_v14  ;;  %v17895_v49 = vsel %vm4686_vm10, %v10258_v50, %v10267_v25  ;;  %v9600_v60 = vrot.slane %v9598_v35, 2  ;;  %v9340_v57 = vrot.slane %v17902_v9, 1 }
 0xb94   : > { %19687 = vst [vmem:[#allocation45_spill] sm:$0xff] %v17895_v49  ;;  %v17899_v45 = vpop.f32.mrf.mxu1  ;;  %v17929_v49 = vld [vmem:[#allocation8 + $0x10] sm:$0xff] }
 0xb95   : > { %v8608_v13 = vrot.slane %v8576_v63, 1  ;;  %19688 = vst [vmem:[#allocation33_spill] sm:$0xff] %v17899_v45  ;;  %v9601_v35 = vor.u32 %v9600_v60, %v9597_v3 }
 0xb96   : > { %v7852_v10 = vpop.f32.mrf.mxu3  ;;  %v17897_v20 = vpop.f32.mrf.mxu0 }
 0xb97   : > { %v7900_v33 = vpack.c.bf16 %v7852_v10, %v7852_v10  ;;  %v8185_v10 = vshrl.u32 %v17851_v48, 16  ;;  %v8609_v4 = vsel %vm1247_vm0, %v8606_v31, %v8608_v13  ;;  %v10273_v13 = vshll.u32 %v17904_v2, 16 }
 0xb99   : > { %7939 = vst.msk [vmem:[#allocation8 + $0x88] sm:$0xf] %vm5500_vm14, %v7900_v33  ;;  %v8283_v14 = vpop.f32.mrf.mxu2  ;;  %12436 = vmatmul.msk.bf16.vlgmr.msrb.gmra.mxu0 %vm5355_vm12, %v17519_v11  ;;  %v8187_v63 = vor.u32 %v8185_v10, %v8183_v28  ;;  %v17917_v33 = vsel %vm1247_vm0, %v9338_v43, %v9340_v57  ;;  %v10270_v11 = vshrl.u32 %v17904_v2, 16  ;;  %v10275_v43 = vrot.slane %v10273_v13, 2 }
 0xb9a   : > { %v17909_v50 = vadd.f32 %v17828_v16, %v8283_v14  ;;  %v17921_v16 = vsel %vm1475_vm1, %v10542_v54, %v10544_v47  ;;  %v9602_v10 = vsel %vm4686_vm10, %v9592_v18, %v9601_v35  ;;  %v9604_v13 = vshrl.u32 %v17806_v51, 16 }
 0xb9b   : > { %19690 = vst [vmem:[#allocation26_spill] sm:$0xff] %v17921_v16  ;;  %v10272_v31 = vrot.slane %v10270_v11, 1  ;;  %v9607_v18 = vshll.u32 %v17806_v51, 16 }
 0xb9c   : > { %19689 = vst [vmem:[#allocation22_spill] sm:$0xff] %v17909_v50  ;;  %v17931_v3 = vpop.f32.mrf.mxu1 }
 0xb9d   : > { %12279 = vmatmul.msk.bf16.gmra.mxu1 %vm5355_vm12, %v8609_v4  ;;  %v12807_v4 = vld [vmem:[#allocation8 + $0x8] sm:$0xff]  ;;  %19691 = vst [vmem:[#allocation38_spill] sm:$0xff] %v17931_v3  ;;  %v10276_v60 = vor.u32 %v10275_v43, %v10272_v31  ;;  %v17947_v43 = vld [vmem:[#allocation8 + $0x60] sm:$0xff]  ;;  %v9609_v3 = vrot.slane %v9607_v18, 2 }
 0xb9e   : > { %v7854_v42 = vpop.f32.mrf.mxu3  ;;  %12173 = vmatmul.msk.bf16.gmra.mxu2 %vm5355_vm12, %v8187_v63  ;;  %v17924_v14 = vpop.f32.mrf.mxu0  ;;  %v8903_v63 = vshll.u32 %v12807_v4, 16  ;;  %v8901_v31 = vshrl.u32 %v12807_v4, 16 }
 0xb9f   : > { %v7901_v48 = vpack.c.bf16 %v7854_v42, %v7854_v42  ;;  %v17938_v11 = vsel %vm4686_vm10, %v10267_v25, %v10276_v60  ;;  %v17949_v25 = vld [vmem:[#allocation8 + $0x60] sm:$0xff] }
 0xba0   : > { %19693 = vst [vmem:[#allocation42_spill] sm:$0xff] %v17938_v11  ;;  %v9978_v11 = vrot.slane %v17528_v8, 1  ;;  %v10279_v8 = vshrl.u32 %v17949_v25, 16 }
 0xba1   : > { %7940 = vst.msk [vmem:[#allocation8 + $0x8c] sm:$0xf] %vm5500_vm14, %v7901_v48  ;;  %v8286_v28 = vpop.f32.mrf.mxu2  ;;  %v8908_v48 = vshll.u32 %v17929_v49, 16 }
 0xba2   : > { %v17934_v54 = vadd.f32 %v17849_v32, %v8286_v28  ;;  %v9979_v32 = vrot.slane %v17536_v24, 1  ;;  %v8905_v28 = vrot.slane %v8903_v63, 1  ;;  %v9342_v24 = vrot.slane %v17947_v43, 1 }
 0xba3   : > { %12464 = vmatmul.msk.bf16.gmra.mxu3 %vm5355_vm12, %v9602_v10  ;;  %v8910_v51 = vrot.slane %v8908_v48, 1  ;;  %v10546_v63 = vrot.slane %v17949_v25, 2 }
 0xba4   : > { %19692 = vst [vmem:[#allocation21_spill] sm:$0xff] %v17934_v54  ;;  %v8906_v4 = vor.u32 %v8905_v28, %v8901_v31  ;;  %v17960_v50 = vpop.f32.mrf.mxu1  ;;  %v10281_v28 = vrot.slane %v10279_v8, 1  ;;  %v10282_v31 = vshll.u32 %v17949_v25, 16  ;;  %v9613_v8 = vshrl.u32 %v17854_v15, 16 }
 0xba5   : > { %19695 = vst [vmem:[#allocation10_spill] sm:$0xff] %v17960_v50  ;;  %v17969_v18 = vsel %vm1475_vm1, %v10544_v47, %v10546_v63  ;;  %v17976_v50 = vld [vmem:[#allocation8 + $0x18] sm:$0xff] }
 0xba6   : > { %v7857_v42 = vpop.f32.mrf.mxu3  ;;  %v17943_v45 = vpop.f32.mrf.mxu0  ;;  %19696 = vst [vmem:[#allocation18_spill] sm:$0xff] %v17969_v18 }
 0xba7   : > { %v7902_v16 = vpack.c.bf16 %v7857_v42, %v7857_v42  ;;  %v9606_v42 = vrot.slane %v9604_v13, 1 }
 0xba9   : > { %7941 = vst.msk [vmem:[#allocation8 + $0x90] sm:$0xf] %vm5500_vm14, %v7902_v16  ;;  %v8288_v10 = vpop.f32.mrf.mxu2  ;;  %12437 = vmatmul.msk.bf16.gmra.mxu0 %vm5355_vm12, %v17544_v21  ;;  %v9980_v16 = vsel %vm1247_vm0, %v9978_v11, %v9979_v32  ;;  %v17964_v21 = vsel %vm1247_vm0, %v9340_v57, %v9342_v24  ;;  %v9610_v13 = vor.u32 %v9609_v3, %v9606_v42 }
 0xbaa   : > { %v17955_v54 = vadd.f32 %v17878_v62, %v8288_v10  ;;  %v8911_v62 = vsel %vm4237_vm9, %v8906_v4, %v8910_v51  ;;  %v10284_v10 = vrot.slane %v10282_v31, 2  ;;  %v8916_v4 = vshll.u32 %v17976_v50, 16 }
 0xbab   : > { %v9611_v57 = vsel %vm4686_vm10, %v9601_v35, %v9610_v13 }
 0xbac   : > { %19694 = vst [vmem:[#allocation16_spill] sm:$0xff] %v17955_v54  ;;  %v10285_v47 = vor.u32 %v10284_v10, %v10281_v28  ;;  %v17988_v31 = vpop.f32.mrf.mxu1  ;;  %v8918_v10 = vrot.slane %v8916_v4, 1 }
 0xbad   : > { %12540 = vmatmul.msk.bf16.vlgmr.msra.gmra.mxu1 %vm5355_vm12, %v9980_v16  ;;  %19699 = vst [vmem:[#allocation47_spill] sm:$0xff] %v17988_v31 }
 0xbae   : > { %v7859_v48 = vpop.f32.mrf.mxu3  ;;  %v17971_v11 = vpop.f32.mrf.mxu0  ;;  %12350 = vmatmul.msk.bf16.vlgmr.msra.gmra.mxu2 %vm5355_vm12, %v8911_v62  ;;  %v17983_v3 = vsel %vm4686_vm10, %v10276_v60, %v10285_v47  ;;  %v9616_v62 = vshll.u32 %v17854_v15, 16  ;;  %v8912_v60 = vshrl.u32 %v17929_v49, 16 }
 0xbaf   : > { %19698 = vst [vmem:[#allocation46_spill] sm:$0xff] %v17983_v3 }
 0xbb0   : > { %v9618_v3 = vrot.slane %v9616_v62, 2  ;;  %v8914_v31 = vor.u32 %v8912_v60, %v8910_v51 }
 0xbb1   : > { %v8291_v16 = vpop.f32.mrf.mxu2 }
 0xbb2   : > { %v17979_v48 = vadd.f32 %v17897_v20, %v8291_v16  ;;  %v9981_v20 = vrot.slane %v17578_v26, 1  ;;  %v17993_v16 = vld [vmem:[#allocation8 + $0x68] sm:$0xff]  ;;  %v8919_v4 = vsel %vm4237_vm9, %v8914_v31, %v8918_v10 }
 0xbb3   : > { %12465 = vmatmul.msk.bf16.gmra.mxu3 %vm5355_vm12, %v9611_v57  ;;  %v17995_v57 = vld [vmem:[#allocation8 + $0x68] sm:$0xff]  ;;  %v9344_v18 = vrot.slane %v17993_v16, 1 }
 0xbb4   : > { %19697 = vst [vmem:[#allocation11_spill] sm:$0xff] %v17979_v48  ;;  %v9982_v26 = vsel %vm1247_vm0, %v9979_v32, %v9981_v20  ;;  %v10548_v48 = vrot.slane %v17995_v57, 2  ;;  %v10291_v51 = vshll.u32 %v17995_v57, 16 }
 0xbb5   : > { %v18008_v54 = vsel %vm1247_vm0, %v9342_v24, %v9344_v18 }
 0xbb6   : > { %v7862_v42 = vpop.f32.mrf.mxu3  ;;  %v17990_v35 = vpop.f32.mrf.mxu0  ;;  %v10293_v24 = vrot.slane %v10291_v51, 2  ;;  %v9983_v51 = vrot.slane %v17629_v53, 1 }
 0xbb7   : > { %v9615_v42 = vrot.slane %v9613_v8, 1 }
 0xbb9   : > { %v8293_v28 = vpop.f32.mrf.mxu2  ;;  %12438 = vmatmul.msk.bf16.gmra.mxu0 %vm5355_vm12, %v17584_v44  ;;  %v10288_v44 = vshrl.u32 %v17995_v57, 16  ;;  %v9619_v8 = vor.u32 %v9618_v3, %v9615_v42 }
 0xbba   : > { %v18001_v15 = vadd.f32 %v17924_v14, %v8293_v28  ;;  %v18013_v14 = vsel %vm1475_vm1, %v10546_v63, %v10548_v48  ;;  %v18019_v28 = vpop.f32.mrf.mxu1 }
 0xbbb   : > { %19701 = vst [vmem:[#allocation49_spill] sm:$0xff] %v18013_v14  ;;  %v10290_v32 = vrot.slane %v10288_v44, 1  ;;  %v9622_v44 = vshrl.u32 %v17902_v9, 16 }
 0xbbc   : > { %19700 = vst [vmem:[#allocation48_spill] sm:$0xff] %v18001_v15 }
 0xbbd   : > { %12541 = vmatmul.msk.bf16.gmra.mxu1 %vm5355_vm12, %v9982_v26  ;;  %19702 = vst [vmem:[#allocation50_spill] sm:$0xff] %v18019_v28  ;;  %v9620_v26 = vsel %vm4686_vm10, %v9610_v13, %v9619_v8  ;;  %v10294_v63 = vor.u32 %v10293_v24, %v10290_v32  ;;  %v18034_v13 = vld [vmem:[#allocation8 + $0x70] sm:$0xff]  ;;  %v9624_v24 = vrot.slane %v9622_v44, 1 }
 0xbbe   : > { %v7864_v49 = vpop.f32.mrf.mxu3  ;;  %v18015_v62 = vpop.f32.mrf.mxu0  ;;  %12351 = vmatmul.msk.bf16.gmra.mxu2 %vm5355_vm12, %v8919_v4  ;;  %v9625_v4 = vshll.u32 %v17902_v9, 16  ;;  %v18036_v28 = vld [vmem:[#allocation8 + $0x70] sm:$0xff]  ;;  %v9346_v53 = vrot.slane %v18034_v13, 1 }
 0xbbf   : > { %v12810_v49 = vld [vmem:[#allocation8 + $0x20] sm:$0xff]  ;;  %v18027_v3 = vsel %vm4686_vm10, %v10285_v47, %v10294_v63  ;;  %v8920_v47 = vshrl.u32 %v17976_v50, 16  ;;  %v10550_v15 = vrot.slane %v18036_v28, 2  ;;  %v10297_v50 = vshrl.u32 %v18036_v28, 16 }
 0xbc0   : > { %19704 = vst [vmem:[#allocation52_spill] sm:$0xff] %v18027_v3  ;;  %v8924_v42 = vshll.u32 %v12810_v49, 16  ;;  %v9984_v3 = vsel %vm1247_vm0, %v9981_v20, %v9983_v51 }
 0xbc1   : > { %v8296_v60 = vpop.f32.mrf.mxu2  ;;  %v10299_v20 = vrot.slane %v10297_v50, 1  ;;  %v9631_v50 = vshrl.u32 %v17947_v43, 16 }
 0xbc2   : > { %v18023_v31 = vadd.f32 %v17943_v45, %v8296_v60  ;;  %v8926_v32 = vrot.slane %v8924_v42, 1  ;;  %v9627_v60 = vrot.slane %v9625_v4, 2 }
 0xbc3   : > { %12466 = vmatmul.msk.bf16.gmra.mxu3 %vm5355_vm12, %v9620_v26  ;;  %v18041_v26 = vpop.f32.mrf.mxu1 }
 0xbc4   : > { %19703 = vst [vmem:[#allocation51_spill] sm:$0xff] %v18023_v31  ;;  %v8922_v31 = vor.u32 %v8920_v47, %v8918_v10  ;;  %v9628_v44 = vor.u32 %v9627_v60, %v9624_v24  ;;  %v10300_v10 = vshll.u32 %v18036_v28, 16  ;;  %v12811_v47 = vld [vmem:[#allocation8 + $0x28] sm:$0xff] }
 0xbc5   : > { %19705 = vst [vmem:[#allocation53_spill] sm:$0xff] %v18041_v26  ;;  %v8932_v60 = vshll.u32 %v12811_v47, 16 }
 0xbc6   : > { %v18031_v14 = vpop.f32.mrf.mxu0  ;;  %v8927_v42 = vsel %vm4237_vm9, %v8922_v31, %v8926_v32 }
 0xbc9   : > { %v8298_v45 = vpop.f32.mrf.mxu2  ;;  %12439 = vmatmul.msk.bf16.gmra.mxu0 %vm5355_vm12, %v17634_v37  ;;  %v18051_v37 = vsel %vm1247_vm0, %v9344_v18, %v9346_v53  ;;  %v9629_v18 = vsel %vm4686_vm10, %v9619_v8, %v9628_v44  ;;  %v9985_v8 = vrot.slane %v17672_v36, 1 }
 0xbca   : > { %v18044_v9 = vadd.f32 %v17971_v11, %v8298_v45  ;;  %v18056_v11 = vsel %vm1475_vm1, %v10548_v48, %v10550_v15  ;;  %v10302_v45 = vrot.slane %v10300_v10, 2 }
 0xbcb   : > { %19707 = vst [vmem:[#allocation55_spill] sm:$0xff] %v18056_v11  ;;  %v18067_v48 = vpop.f32.mrf.mxu1  ;;  %v18077_v11 = vld [vmem:[#allocation8 + $0x78] sm:$0xff] }
 0xbcc   : > { %19706 = vst [vmem:[#allocation54_spill] sm:$0xff] %v18044_v9  ;;  %v10303_v31 = vor.u32 %v10302_v45, %v10299_v20  ;;  %v8928_v20 = vshrl.u32 %v12810_v49, 16  ;;  %v9633_v45 = vrot.slane %v9631_v50, 1 }
 0xbcd   : > { %12542 = vmatmul.msk.bf16.gmra.mxu1 %vm5355_vm12, %v9984_v3  ;;  %19709 = vst [vmem:[#allocation57_spill] sm:$0xff] %v18067_v48 }
 0xbce   : > { %v18058_v4 = vpop.f32.mrf.mxu0  ;;  %12352 = vmatmul.msk.bf16.gmra.mxu2 %vm5355_vm12, %v8927_v42  ;;  %v18070_v24 = vsel %vm4686_vm10, %v10294_v63, %v10303_v31  ;;  %v9634_v42 = vshll.u32 %v17947_v43, 16  ;;  %v8934_v63 = vrot.slane %v8932_v60, 1  ;;  %v9348_v43 = vrot.slane %v18077_v11, 1 }
 0xbcf   : > { %19710 = vst [vmem:[#allocation58_spill] sm:$0xff] %v18070_v24  ;;  %v8930_v36 = vor.u32 %v8928_v20, %v8926_v32  ;;  %v12812_v20 = vld [vmem:[#allocation8 + $0x30] sm:$0xff] }
 0xbd0   : > { %v18091_v26 = vsel %vm1247_vm0, %v9346_v53, %v9348_v43 }
 0xbd1   : > { %v8301_v3 = vpop.f32.mrf.mxu2  ;;  %v8935_v49 = vsel %vm4237_vm9, %v8930_v36, %v8934_v63 }
 0xbd2   : > { %v18064_v9 = vadd.f32 %v17990_v35, %v8301_v3  ;;  %v18079_v35 = vld [vmem:[#allocation8 + $0x78] sm:$0xff] }
 0xbd3   : > { %12467 = vmatmul.msk.bf16.gmra.mxu3 %vm5355_vm12, %v9629_v18  ;;  %v9636_v18 = vrot.slane %v9634_v42, 2  ;;  %v10552_v48 = vrot.slane %v18079_v35, 2  ;;  %v18098_v50 = vpop.f32.mrf.mxu1  ;;  %v10309_v32 = vshll.u32 %v18079_v35, 16 }
 0xbd4   : > { %19708 = vst [vmem:[#allocation56_spill] sm:$0xff] %v18064_v9  ;;  %v9986_v9 = vsel %vm1247_vm0, %v9983_v51, %v9985_v8 }
 0xbd5   : > { %v9637_v60 = vor.u32 %v9636_v18, %v9633_v45  ;;  %19713 = vst [vmem:[#allocation61_spill] sm:$0xff] %v18098_v50  ;;  %v8940_v18 = vshll.u32 %v12812_v20, 16 }
 0xbd6   : > { %v18074_v10 = vpop.f32.mrf.mxu0 }
 0xbd9   : > { %v8303_v3 = vpop.f32.mrf.mxu2  ;;  %12440 = vmatmul.msk.bf16.gmra.mxu0 %vm5355_vm12, %v17677_v56  ;;  %v10306_v56 = vshrl.u32 %v18079_v35, 16 }
 0xbda   : > { %v18084_v24 = vadd.f32 %v18015_v62, %v8303_v3  ;;  %v18096_v62 = vsel %vm1475_vm1, %v10550_v15, %v10552_v48  ;;  %v9638_v3 = vsel %vm4686_vm10, %v9628_v44, %v9637_v60  ;;  %v18117_v44 = vld [vmem:[#allocation8 + $0x80] sm:$0xff] }
 0xbdb   : > { %19712 = vst [vmem:[#allocation60_spill] sm:$0xff] %v18096_v62  ;;  %v10308_v51 = vrot.slane %v10306_v56, 1  ;;  %v9643_v56 = vshll.u32 %v17993_v16, 16 }
 0xbdc   : > { %19711 = vst [vmem:[#allocation59_spill] sm:$0xff] %v18084_v24  ;;  %v18115_v24 = vpop.f32.mrf.mxu1 }
 0xbdd   : > { %12543 = vmatmul.msk.bf16.gmra.mxu1 %vm5355_vm12, %v9986_v9  ;;  %v10311_v9 = vrot.slane %v10309_v32, 2  ;;  %v9987_v32 = vrot.slane %v17714_v23, 1  ;;  %19716 = vst [vmem:[#allocation64_spill] sm:$0xff] %v18115_v24 }
 0xbde   : > { %v18100_v42 = vpop.f32.mrf.mxu0  ;;  %12353 = vmatmul.msk.bf16.gmra.mxu2 %vm5355_vm12, %v8935_v49  ;;  %v9640_v49 = vshrl.u32 %v17993_v16, 16  ;;  %v19195_v16 = vrot.slane %v18117_v44, 1 }
 0xbdf   : > { %v10312_v15 = vor.u32 %v10311_v9, %v10308_v51  ;;  %v8942_v51 = vrot.slane %v8940_v18, 1  ;;  %v9988_v23 = vsel %vm1247_vm0, %v9985_v8, %v9987_v32 }
 0xbe0   : > { %v9642_v9 = vrot.slane %v9640_v49, 1 }
 0xbe1   : > { %v8306_v53 = vpop.f32.mrf.mxu2  ;;  %v18110_v45 = vsel %vm4686_vm10, %v10303_v31, %v10312_v15  ;;  %v8936_v31 = vshrl.u32 %v12811_v47, 16 }
 0xbe2   : > { %v18106_v36 = vadd.f32 %v18031_v14, %v8306_v53  ;;  %19715 = vst [vmem:[#allocation63_spill] sm:$0xff] %v18110_v45  ;;  %v18119_v14 = vld [vmem:[#allocation8 + $0x80] sm:$0xff] }
 0xbe3   : > { %12468 = vmatmul.msk.bf16.gmra.mxu3 %vm5355_vm12, %v9638_v3  ;;  %19717 = vst [vmem:[#allocation65_spill] sm:$0xff] %v18119_v14  ;;  %v9645_v3 = vrot.slane %v9643_v56, 2  ;;  %v19196_v24 = vrot.slane %v18119_v14, 2  ;;  %v10315_v50 = vshrl.u32 %v18119_v14, 16  ;;  %v10318_v47 = vshll.u32 %v18119_v14, 16 }
 0xbe4   : > { %19714 = vst [vmem:[#allocation62_spill] sm:$0xff] %v18106_v36  ;;  %v8938_v36 = vor.u32 %v8936_v31, %v8934_v63 }
 0xbe5   : > { %v9646_v18 = vor.u32 %v9645_v3, %v9642_v9  ;;  %v18141_v8 = vsel %vm1475_vm1, %v10552_v48, %v19196_v24  ;;  %v10317_v49 = vrot.slane %v10315_v50, 1  ;;  %v10320_v56 = vrot.slane %v10318_v47, 2 }
 0xbe6   : > { %v8443_v62 = vpop.f32.mrf.mxu0  ;;  %19718 = vst [vmem:[#allocation66_spill] sm:$0xff] %v18141_v8  ;;  %v9649_v3 = vshrl.u32 %v18034_v13, 16  ;;  %v9652_v47 = vshll.u32 %v18034_v13, 16 }
 0xbe7   : > { %v18146_v31 = vor.u32 %v10320_v56, %v10317_v49 }
 0xbe9   : > { %v8308_v53 = vpop.f32.mrf.mxu2  ;;  %12441 = vmatmul.msk.bf16.gmra.mxu0 %vm5355_vm12, %v17719_v0  ;;  %v18134_v0 = vsel %vm1247_vm0, %v9348_v43, %v19195_v16  ;;  %19720 = vst [vmem:[#allocation68_spill] sm:$0xff] %v18146_v31  ;;  %v12813_v16 = vld [vmem:[#allocation8 + $0x38] sm:$0xff]  ;;  %v18157_v48 = vsel %vm4686_vm10, %v10312_v15, %v18146_v31 }
 0xbea   : > { %v18124_v45 = vadd.f32 %v18058_v4, %v8308_v53  ;;  %v8943_v4 = vsel %vm4237_vm9, %v8938_v36, %v8942_v51  ;;  %v18144_v53 = vpop.f32.mrf.mxu3  ;;  %v18149_v36 = vpop.f32.mrf.mxu1  ;;  %19721 = vst [vmem:[#allocation69_spill] sm:$0xff] %v18157_v48  ;;  %v8948_v50 = vshll.u32 %v12813_v16, 16 }
 0xbeb   : > { %19719 = vst [vmem:[#allocation67_spill] sm:$0xff] %v18144_v53 }
 0xbec   : > { %v8950_v56 = vrot.slane %v8948_v50, 1 }
 0xbed   : > { %12544 = vmatmul.msk.bf16.gmra.mxu1 %vm5355_vm12, %v9988_v23  ;;  %v9647_v23 = vsel %vm4686_vm10, %v9637_v60, %v9646_v18  ;;  %v9989_v60 = vrot.slane %v17763_v6, 1 }
 0xbee   : > { %v8445_v63 = vpop.f32.mrf.mxu0  ;;  %12354 = vmatmul.msk.bf16.gmra.mxu2 %vm5355_vm12, %v8943_v4 }
 0xbef   : > { %v9990_v31 = vsel %vm1247_vm0, %v9987_v32, %v9989_v60 }
 0xbf1   : > { %v8311_v43 = vpop.f32.mrf.mxu2 }
 0xbf2   : > { %v18152_v9 = vadd.f32 %v18074_v10, %v8311_v43  ;;  %v8944_v10 = vshrl.u32 %v12812_v20, 16  ;;  %v9651_v43 = vrot.slane %v9649_v3, 1  ;;  %v18164_v24 = vpop.f32.mrf.mxu3  ;;  %v18170_v13 = vpop.f32.mrf.mxu1  ;;  %v12814_v3 = vld [vmem:[#allocation8 + $0x40] sm:$0xff] }
 0xbf3   : > { %12469 = vmatmul.msk.bf16.gmra.mxu3 %vm5355_vm12, %v9647_v23  ;;  %v9654_v23 = vrot.slane %v9652_v47, 2  ;;  %19722 = vst [vmem:[#allocation70_spill] sm:$0xff] %v18164_v24  ;;  %v8956_v32 = vshll.u32 %v12814_v3, 16 }
 0xbf4   : > { %v8946_v48 = vor.u32 %v8944_v10, %v8942_v51  ;;  %v9658_v51 = vshrl.u32 %v18077_v11, 16  ;;  %v9991_v10 = vrot.slane %v17819_v34, 1 }
 0xbf5   : > { %v9655_v8 = vor.u32 %v9654_v23, %v9651_v43 }
 0xbf6   : > { %v8448_v4 = vpop.f32.mrf.mxu0  ;;  %v8951_v6 = vsel %vm4237_vm9, %v8946_v48, %v8950_v56  ;;  %v9660_v23 = vrot.slane %v9658_v51, 1 }
 0xbf7   : > { %v9656_v50 = vsel %vm4686_vm10, %v9646_v18, %v9655_v8  ;;  %v8958_v18 = vrot.slane %v8956_v32, 1 }
 0xbf9   : > { %v8313_v49 = vpop.f32.mrf.mxu2  ;;  %12442 = vmatmul.msk.bf16.gmra.mxu0 %vm5355_vm12, %v17768_v58 }
 0xbfa   : > { %v18167_v15 = vadd.f32 %v18100_v42, %v8313_v49  ;;  %v18179_v42 = vpop.f32.mrf.mxu3  ;;  %v18183_v48 = vpop.f32.mrf.mxu1 }
 0xbfb   : > { %19723 = vst [vmem:[#allocation71_spill] sm:$0xff] %v18179_v42 }
 0xbfd   : > { %12545 = vmatmul.msk.bf16.gmra.mxu1 %vm5355_vm12, %v9990_v31  ;;  %v9661_v31 = vshll.u32 %v18077_v11, 16 }
 0xbfe   : > { %v8450_v58 = vpop.f32.mrf.mxu0  ;;  %12355 = vmatmul.msk.bf16.gmra.mxu2 %vm5355_vm12, %v8951_v6 }
 0xbff   : > { %v9663_v6 = vrot.slane %v9661_v31, 2 }
 0xc01   : > { %v8316_v20 = vpop.f32.mrf.mxu2  ;;  %v9664_v24 = vor.u32 %v9663_v6, %v9660_v23 }
 0xc02   : > { %v18176_v47 = vadd.f32 %v8443_v62, %v8316_v20  ;;  %v8952_v62 = vshrl.u32 %v12813_v16, 16  ;;  %v18193_v53 = vpop.f32.mrf.mxu3 }
 0xc03   : > { %12470 = vmatmul.msk.bf16.gmra.mxu3 %vm5355_vm12, %v9656_v50  ;;  %v9992_v50 = vsel %vm1247_vm0, %v9989_v60, %v9991_v10  ;;  %19724 = vst [vmem:[#allocation72_spill] sm:$0xff] %v18193_v53  ;;  %v9665_v32 = vsel %vm4686_vm10, %v9655_v8, %v9664_v24  ;;  %v8960_v8 = vshrl.u32 %v12814_v3, 16 }
 0xc04   : > { %v8954_v42 = vor.u32 %v8952_v62, %v8950_v56  ;;  %v9667_v56 = vshrl.u32 %v18117_v44, 16 }
 0xc05   : > { %v8962_v53 = vor.u32 %v8960_v8, %v8958_v18 }
 0xc06   : > { %v8453_v49 = vpop.f32.mrf.mxu0  ;;  %v8959_v11 = vsel %vm4237_vm9, %v8954_v42, %v8958_v18  ;;  %v9670_v42 = vshll.u32 %v18117_v44, 16 }
 0xc09   : > { %v8318_v43 = vpop.f32.mrf.mxu2  ;;  %12443 = vmatmul.msk.bf16.gmra.mxu0 %vm5355_vm12, %v17824_v39  ;;  %v18196_v39 = vpop.f32.mrf.mxu1 }
 0xc0a   : > { %v18188_v20 = vadd.f32 %v8445_v63, %v8318_v43  ;;  %v12815_v63 = vld [vmem:[#allocation8 + $0x48] sm:$0xff]  ;;  %v9993_v43 = vrot.slane %v17867_v30, 1  ;;  %v18205_v62 = vpop.f32.mrf.mxu3 }
 0xc0b   : > { %v8964_v60 = vshll.u32 %v12815_v63, 16  ;;  %19725 = vst [vmem:[#allocation73_spill] sm:$0xff] %v18205_v62 }
 0xc0d   : > { %12546 = vmatmul.msk.bf16.gmra.mxu1 %vm5355_vm12, %v9992_v50  ;;  %v8966_v6 = vrot.slane %v8964_v60, 1  ;;  %v9672_v50 = vrot.slane %v9670_v42, 2 }
 0xc0e   : > { %v8455_v34 = vpop.f32.mrf.mxu0  ;;  %12356 = vmatmul.msk.bf16.gmra.mxu2 %vm5355_vm12, %v8959_v11 }
 0xc0f   : > { %v8967_v30 = vsel %vm4237_vm9, %v8962_v53, %v8966_v6 }
 0xc11   : > { %v8321_v16 = vpop.f32.mrf.mxu2  ;;  %v18209_v11 = vpop.f32.mrf.mxu1 }
 0xc12   : > { %v18199_v51 = vadd.f32 %v8448_v4, %v8321_v16  ;;  %v9669_v4 = vrot.slane %v9667_v56, 1  ;;  %v12816_v56 = vld [vmem:[#allocation8 + $0x50] sm:$0xff]  ;;  %v18221_v42 = vpop.f32.mrf.mxu3 }
 0xc13   : > { %12471 = vmatmul.msk.bf16.gmra.mxu3 %vm5355_vm12, %v9665_v32  ;;  %v9994_v32 = vsel %vm1247_vm0, %v9991_v10, %v9993_v43  ;;  %v8972_v18 = vshll.u32 %v12816_v56, 16 }
 0xc14   : > { %v18216_v62 = vor.u32 %v9672_v50, %v9669_v4  ;;  %v8968_v4 = vshrl.u32 %v12815_v63, 16  ;;  %v12817_v63 = vld [vmem:[#allocation8 + $0x58] sm:$0xff] }
 0xc15   : > { %v8974_v50 = vrot.slane %v8972_v18, 1 }
 0xc16   : > { %v9417_v31 = vpop.f32.mrf.mxu0  ;;  %v9674_v60 = vsel %vm4686_vm10, %v9664_v24, %v18216_v62 }
 0xc19   : > { %v8323_v23 = vpop.f32.mrf.mxu2  ;;  %12444 = vmatmul.msk.bf16.gmra.mxu0 %vm5355_vm12, %v17872_v61  ;;  %v18226_v10 = vpop.f32.mrf.mxu1 }
 0xc1a   : > { %v18211_v16 = vadd.f32 %v8450_v58, %v8323_v23  ;;  %v9995_v23 = vrot.slane %v17904_v2, 1 }
 0xc1d   : > { %12547 = vmatmul.msk.bf16.gmra.mxu1 %vm5355_vm12, %v9994_v32  ;;  %v9996_v32 = vsel %vm1247_vm0, %v9993_v43, %v9995_v23 }
 0xc1e   : > { %12357 = vmatmul.msk.bf16.gmra.mxu2 %vm5355_vm12, %v8967_v30  ;;  %v9419_v61 = vpop.f32.mrf.mxu0 }
 0xc21   : > { %v8326_v3 = vpop.f32.mrf.mxu2 }
 0xc22   : > { %v18223_v58 = vadd.f32 %v8453_v49, %v8326_v3  ;;  %v8970_v49 = vor.u32 %v8968_v4, %v8966_v6  ;;  %v18236_v3 = vpop.f32.mrf.mxu1  ;;  %v9997_v6 = vrot.slane %v17949_v25, 1 }
 0xc23   : > { %12472 = vmatmul.msk.bf16.gmra.mxu3 %vm5355_vm12, %v9674_v60  ;;  %v8753_v60 = vadd.f32 %v17576_v46, %v17601_v22 }
 0xc24   : > { %v8975_v30 = vsel %vm4237_vm9, %v8970_v49, %v8974_v50 }
 0xc26   : > { %v9422_v53 = vpop.f32.mrf.mxu0 }
 0xc29   : > { %v8328_v8 = vpop.f32.mrf.mxu2  ;;  %12445 = vmatmul.msk.bf16.gmra.mxu0 %vm5355_vm12, %v17917_v33 }
 0xc2a   : > { %v18231_v24 = vadd.f32 %v8455_v34, %v8328_v8  ;;  %v8980_v8 = vshll.u32 %v12817_v63, 16  ;;  %v18244_v4 = vpop.f32.mrf.mxu1 }
 0xc2c   : > { %v8982_v46 = vrot.slane %v8980_v8, 1 }
 0xc2d   : > { %12548 = vmatmul.msk.bf16.gmra.mxu1 %vm5355_vm12, %v9996_v32  ;;  %v8754_v32 = vadd.f32 %v17597_v29, %v17626_v38  ;;  %v8755_v29 = vadd.f32 %v17621_v12, %v17651_v1 }
 0xc2e   : > { %12358 = vmatmul.msk.bf16.gmra.mxu2 %vm5355_vm12, %v8975_v30  ;;  %v9424_v2 = vpop.f32.mrf.mxu0  ;;  %v8976_v30 = vshrl.u32 %v12816_v56, 16 }
 0xc31   : > { %v9090_v33 = vpop.f32.mrf.mxu2 }
 0xc32   : > { %v9170_v18 = vadd.f32 %v9090_v33, %v8753_v60  ;;  %v9998_v60 = vsel %vm1247_vm0, %v9995_v23, %v9997_v6  ;;  %v18258_v56 = vpop.f32.mrf.mxu1 }
 0xc34   : > { %v18241_v34 = vadd.f32 %v9417_v31, %v9170_v18  ;;  %v8978_v31 = vor.u32 %v8976_v30, %v8974_v50  ;;  %v9999_v50 = vrot.slane %v17995_v57, 1 }
 0xc36   : > { %v9427_v43 = vpop.f32.mrf.mxu0  ;;  %v8983_v25 = vsel %vm4237_vm9, %v8978_v31, %v8982_v46 }
 0xc39   : > { %v9092_v49 = vpop.f32.mrf.mxu2  ;;  %12446 = vmatmul.msk.bf16.gmra.mxu0 %vm5355_vm12, %v17964_v21  ;;  %v12818_v21 = vld [vmem:[#allocation8 + $0x60] sm:$0xff] }
 0xc3a   : > { %v9171_v22 = vadd.f32 %v9092_v49, %v8754_v32  ;;  %v8988_v23 = vshll.u32 %v12818_v21, 16  ;;  %v8756_v49 = vadd.f32 %v17647_v59, %v17669_v40  ;;  %v8757_v40 = vadd.f32 %v17665_v55, %v17694_v41 }
 0xc3c   : > { %v18251_v33 = vadd.f32 %v9419_v61, %v9171_v22  ;;  %v8984_v22 = vshrl.u32 %v12817_v63, 16  ;;  %v8990_v12 = vrot.slane %v8988_v23, 1  ;;  %v12819_v63 = vld [vmem:[#allocation8 + $0x68] sm:$0xff]  ;;  %v8758_v23 = vadd.f32 %v17690_v5, %v17711_v27 }
 0xc3d   : > { %12549 = vmatmul.msk.bf16.gmra.mxu1 %vm5355_vm12, %v9998_v60  ;;  %v10000_v60 = vsel %vm1247_vm0, %v9997_v6, %v9999_v50  ;;  %v8996_v6 = vshll.u32 %v12819_v63, 16  ;;  %v9234_v5 = vld [vmem:[#allocation8 + $0x88] sm:$0x1] }
 0xc3e   : > { %12359 = vmatmul.msk.bf16.gmra.mxu2 %vm5355_vm12, %v8983_v25  ;;  %v9429_v18 = vpop.f32.mrf.mxu0  ;;  %v8986_v31 = vor.u32 %v8984_v22, %v8982_v46  ;;  %v18268_v25 = vpop.f32.mrf.mxu1  ;;  %v9303_v27 = vunpack.c.l.b16 %v9234_v5 }
 0xc3f   : > { %v8998_v55 = vrot.slane %v8996_v6, 1 }
 0xc40   : > { %v8991_v57 = vsel %vm4237_vm9, %v8986_v31, %v8990_v12  ;;  %v18292_v31 = vpop.f32.mrf.mxu3 }
 0xc41   : > { %v9095_v38 = vpop.f32.mrf.mxu2 }
 0xc42   : > { %v9172_v8 = vadd.f32 %v9095_v38, %v8755_v29 }
 0xc44   : > { %v18260_v32 = vadd.f32 %v9422_v53, %v9172_v8  ;;  %v10001_v8 = vrot.slane %v18036_v28, 1 }
 0xc46   : > { %v9432_v61 = vpop.f32.mrf.mxu0  ;;  %v18279_v46 = vpop.f32.mrf.mxu1  ;;  %v10002_v22 = vsel %vm1247_vm0, %v9999_v50, %v10001_v8 }
 0xc49   : > { %v9097_v30 = vpop.f32.mrf.mxu2  ;;  %12447 = vmatmul.msk.bf16.gmra.mxu0 %vm5355_vm12, %v18008_v54 }
 0xc4a   : > { %v9173_v1 = vadd.f32 %v9097_v30, %v8756_v49  ;;  %v8992_v30 = vshrl.u32 %v12818_v21, 16  ;;  %v8759_v21 = vadd.f32 %v17708_v7, %v17736_v17  ;;  %v19726_v7 = vld [vmem:[#allocation15_spill] sm:$0xff] }
 0xc4b   : > { %v8760_v17 = vadd.f32 %v19726_v7, %v17760_v19 }
 0xc4c   : > { %v18270_v53 = vadd.f32 %v9424_v2, %v9173_v1 }
 0xc4d   : > { %12550 = vmatmul.msk.bf16.gmra.mxu1 %vm5355_vm12, %v10000_v60 }
 0xc4e   : > { %12360 = vmatmul.msk.bf16.gmra.mxu2 %vm5355_vm12, %v8991_v57  ;;  %v9434_v59 = vpop.f32.mrf.mxu0 }
 0xc51   : > { %v9100_v54 = vpop.f32.mrf.mxu2 }
 0xc52   : > { %v9174_v29 = vadd.f32 %v9100_v54, %v8757_v40 }
 0xc54   : > { %v18277_v38 = vadd.f32 %v9427_v43, %v9174_v29  ;;  %v8994_v43 = vor.u32 %v8992_v30, %v8990_v12  ;;  %v12820_v12 = vld [vmem:[#allocation8 + $0x70] sm:$0xff] }
 0xc55   : > { %v9004_v6 = vshll.u32 %v12820_v12, 16 }
 0xc56   : > { %v9437_v2 = vpop.f32.mrf.mxu0  ;;  %v8999_v60 = vsel %vm4237_vm9, %v8994_v43, %v8998_v55 }
 0xc57   : > { %v9006_v5 = vrot.slane %v9004_v6, 1 }
 0xc59   : > { %v9102_v49 = vpop.f32.mrf.mxu2  ;;  %12448 = vmatmul.msk.bf16.gmra.mxu0 %vm5355_vm12, %v18051_v37  ;;  %v18294_v37 = vpop.f32.mrf.mxu1 }
 0xc5a   : > { %v9175_v41 = vadd.f32 %v9102_v49, %v8758_v23 }
 0xc5c   : > { %v18287_v1 = vadd.f32 %v9429_v18, %v9175_v41  ;;  %v18298_v18 = vpack.c.b16 %v9303_v27, %v9303_v27  ;;  %v10003_v41 = vrot.slane %v18079_v35, 1  ;;  %v18311_v27 = vpop.f32.mrf.mxu3 }
 0xc5d   : > { %12551 = vmatmul.msk.bf16.gmra.mxu1 %vm5355_vm12, %v10002_v22 }
 0xc5e   : > { %12361 = vmatmul.msk.bf16.gmra.mxu2 %vm5355_vm12, %v8999_v60  ;;  %v9439_v28 = vpop.f32.mrf.mxu0  ;;  %v9676_v40 = vshrl.u32 %v18298_v18, 16  ;;  %v9679_v54 = vshll.u32 %v18298_v18, 16  ;;  %v9000_v60 = vshrl.u32 %v12819_v63, 16  ;;  %v10004_v35 = vsel %vm1247_vm0, %v10001_v8, %v10003_v41  ;;  %v12821_v8 = vld [vmem:[#allocation8 + $0x78] sm:$0xff] }
 0xc60   : > { %v9678_v23 = vrot.slane %v9676_v40, 1  ;;  %v9681_v49 = vrot.slane %v9679_v54, 2  ;;  %v19727_v40 = vld [vmem:[#allocation34_spill] sm:$0xff]  ;;  %v19728_v54 = vld [vmem:[#allocation20_spill] sm:$0xff] }
 0xc61   : > { %v9105_v50 = vpop.f32.mrf.mxu2  ;;  %v8761_v6 = vadd.f32 %v19728_v54, %v19727_v40 }
 0xc62   : > { %v9176_v57 = vadd.f32 %v9105_v50, %v8759_v21  ;;  %v9682_v22 = vor.u32 %v9681_v49, %v9678_v23  ;;  %v18313_v21 = vpop.f32.mrf.mxu1 }
 0xc64   : > { %v18302_v29 = vadd.f32 %v9432_v61, %v9176_v57  ;;  %v9683_v61 = vsel %vm4686_vm10, %v18216_v62, %v9682_v22  ;;  %v9002_v57 = vor.u32 %v9000_v60, %v8998_v55  ;;  %v12858_v62 = vld [vmem:[%s18999_s11 + $0x38] sm:$0xff]  ;;  %v9012_v22 = vshll.u32 %v12821_v8, 16  ;;  %v19729_v60 = vld [vmem:[#allocation13_spill] sm:$0xff] }
 0xc65   : > { %12473 = vmatmul.msk.bf16.gmra.mxu3 %vm5355_vm12, %v9683_v61  ;;  %10402 = vmatpush.bf16.msrb.mxu2 %v12858_v62  ;;  %v19730_v61 = vld [vmem:[#allocation35_spill] sm:$0xff] }
 0xc66   : > { %v9442_v30 = vpop.f32.mrf.mxu0 }
 0xc69   : > { %v9107_v43 = vpop.f32.mrf.mxu2  ;;  %12449 = vmatmul.msk.bf16.gmra.mxu0 %vm5355_vm12, %v18091_v26  ;;  %v9007_v26 = vsel %vm4237_vm9, %v9002_v57, %v9006_v5  ;;  %v9008_v57 = vshrl.u32 %v12820_v12, 16 }
 0xc6a   : > { %v9177_v50 = vadd.f32 %v9107_v43, %v8760_v17  ;;  %v12859_v17 = vld [vmem:[%s18999_s11 + $0x40] sm:$0xff]  ;;  %v10005_v43 = vrot.slane %v18119_v14, 1 }
 0xc6b   : > { %10621 = vmatpush.bf16.msra.mxu0 %v12859_v17  ;;  %v9010_v40 = vor.u32 %v9008_v57, %v9006_v5  ;;  %v19732_v17 = vld [vmem:[#allocation41_spill] sm:$0xff] }
 0xc6c   : > { %v18317_v19 = vadd.f32 %v9434_v59, %v9177_v50  ;;  %v18327_v59 = vpop.f32.mrf.mxu1  ;;  %v8762_v50 = vadd.f32 %v19730_v61, %v19729_v60  ;;  %v10006_v62 = vsel %vm1247_vm0, %v10003_v41, %v10005_v43  ;;  %v19733_v60 = vld [vmem:[#allocation30_spill] sm:$0xff] }
 0xc6d   : > { %12552 = vmatmul.msk.bf16.gmra.mxu1 %vm5355_vm12, %v10004_v35 }
 0xc6e   : > { %12362 = vmatmul.msk.bf16.gmra.mxu2 %vm5355_vm12, %v9007_v26  ;;  %v9444_v63 = vpop.f32.mrf.mxu0  ;;  %v9014_v26 = vrot.slane %v9012_v22, 1  ;;  %v12822_v22 = vld [vmem:[#allocation8 + $0x80] sm:$0xff] }
 0xc6f   : > { %v9020_v5 = vshll.u32 %v12822_v22, 16 }
 0xc71   : > { %v9110_v23 = vpop.f32.mrf.mxu2 }
 0xc72   : > { %v9178_v55 = vadd.f32 %v9110_v23, %v8761_v6  ;;  %v9015_v6 = vsel %vm4237_vm9, %v9010_v40, %v9014_v26  ;;  %v19736_v40 = vld [vmem:[#allocation36_spill] sm:$0xff] }
 0xc74   : > { %v18329_v49 = vadd.f32 %v9437_v2, %v9178_v55  ;;  %v18344_v23 = vpop.f32.mrf.mxu1 }
 0xc76   : > { %v9447_v7 = vpop.f32.mrf.mxu0 }
 0xc79   : > { %v9112_v35 = vpop.f32.mrf.mxu2  ;;  %12450 = vmatmul.msk.bf16.gmra.mxu0 %vm5355_vm12, %v18134_v0  ;;  %v8763_v0 = vadd.f32 %v19733_v60, %v19732_v17  ;;  %v19737_v17 = vrot.slane %v18117_v44, 1 }
 0xc7a   : > { %v9179_v2 = vadd.f32 %v9112_v35, %v8762_v50  ;;  %v18349_v50 = vld [vmem:[#allocation8 + $0x88] sm:$0xff] }
 0xc7b   : > { %v10007_v57 = vrot.slane %v18349_v50, 1 }
 0xc7c   : > { %v18340_v54 = vadd.f32 %v9439_v28, %v9179_v2  ;;  %v9352_v28 = vrot.slane %v18298_v18, 1  ;;  %v18355_v2 = vpop.f32.mrf.mxu1  ;;  %v9891_v18 = vld [vmem:[#allocation8 + $0x90] sm:$0x1] }
 0xc7d   : > { %12553 = vmatmul.msk.bf16.gmra.mxu1 %vm5355_vm12, %v10006_v62  ;;  %v19735_v62 = vld [vmem:[#allocation23_spill] sm:$0xff] }
 0xc7e   : > { %19731 = vst [vmem:[#allocation15_spill] sm:$0xff] %v18340_v54  ;;  %12363 = vmatmul.msk.bf16.gmra.mxu2 %vm5355_vm12, %v9015_v6  ;;  %v9449_v55 = vpop.f32.mrf.mxu0  ;;  %v8764_v6 = vadd.f32 %v19736_v40, %v19735_v62  ;;  %v9353_v60 = vsel %vm1247_vm0, %v19737_v17, %v9352_v28  ;;  %v10008_v54 = vsel %vm1247_vm0, %v10005_v43, %v10007_v57  ;;  %v9960_v40 = vunpack.c.l.b16 %v9891_v18  ;;  %v19739_v28 = vld [vmem:[#allocation37_spill] sm:$0xff]  ;;  %v19743_v18 = vld [vmem:[#allocation43_spill] sm:$0xff] }
 0xc7f   : > { %v8765_v17 = vadd.f32 %v19739_v28, %v17889_v52 }
 0xc81   : > { %v9115_v12 = vpop.f32.mrf.mxu2 }
 0xc82   : > { %v9180_v61 = vadd.f32 %v9115_v12, %v8763_v0  ;;  %v9022_v12 = vrot.slane %v9020_v5, 1  ;;  %v18371_v5 = vpack.c.b16 %v9960_v40, %v9960_v40 }
 0xc84   : > { %v18351_v41 = vadd.f32 %v9442_v30, %v9180_v61  ;;  %v9016_v30 = vshrl.u32 %v12821_v8, 16 }
 0xc86   : > { %19734 = vst [vmem:[#allocation34_spill] sm:$0xff] %v18351_v41  ;;  %v9452_v35 = vpop.f32.mrf.mxu0  ;;  %v9018_v41 = vor.u32 %v9016_v30, %v9014_v26  ;;  %v9024_v30 = vshrl.u32 %v12822_v22, 16 }
 0xc88   : > { %v9023_v62 = vsel %vm4237_vm9, %v9018_v41, %v9022_v12  ;;  %v19742_v41 = vld [vmem:[#allocation33_spill] sm:$0xff] }
 0xc89   : > { %v9117_v0 = vpop.f32.mrf.mxu2  ;;  %12451 = vmatmul.msk.bf16.gmra.mxu0 %vm5355_vm12, %v9353_v60  ;;  %v19741_v60 = vld [vmem:[#allocation22_spill] sm:$0xff] }
 0xc8a   : > { %v9181_v61 = vadd.f32 %v9117_v0, %v8764_v6  ;;  %v18373_v6 = vpop.f32.mrf.mxu1  ;;  %v8766_v0 = vadd.f32 %v19742_v41, %v19741_v60 }
 0xc8c   : > { %v18364_v14 = vadd.f32 %v9444_v63, %v9181_v61  ;;  %v10009_v63 = vrot.slane %v18371_v5, 1 }
 0xc8d   : > { %12554 = vmatmul.msk.bf16.gmra.mxu1 %vm5355_vm12, %v10008_v54 }
 0xc8e   : > { %19738 = vst [vmem:[#allocation20_spill] sm:$0xff] %v18364_v14  ;;  %12364 = vmatmul.msk.bf16.gmra.mxu2 %vm5355_vm12, %v9023_v62  ;;  %v9454_v44 = vpop.f32.mrf.mxu0  ;;  %v10010_v52 = vsel %vm1247_vm0, %v10007_v57, %v10009_v63  ;;  %v19747_v57 = vld [vmem:[#allocation16_spill] sm:$0xff]  ;;  %v19748_v63 = vld [vmem:[#allocation10_spill] sm:$0xff] }
 0xc91   : > { %v9120_v8 = vpop.f32.mrf.mxu2 }
 0xc92   : > { %v9182_v43 = vadd.f32 %v9120_v8, %v8765_v17  ;;  %v18383_v40 = vpop.f32.mrf.mxu1  ;;  %v19745_v8 = vld [vmem:[#allocation21_spill] sm:$0xff] }
 0xc94   : > { %v18375_v26 = vadd.f32 %v9447_v7, %v9182_v43  ;;  %v9026_v7 = vor.u32 %v9024_v30, %v9022_v12  ;;  %v19746_v43 = vld [vmem:[#allocation38_spill] sm:$0xff] }
 0xc95   : > { %v8767_v22 = vadd.f32 %v19746_v43, %v19745_v8  ;;  %v19753_v8 = vld [vmem:[#allocation47_spill] sm:$0xff] }
 0xc96   : > { %19740 = vst [vmem:[#allocation13_spill] sm:$0xff] %v18375_v26  ;;  %v9457_v54 = vpop.f32.mrf.mxu0 }
 0xc99   : > { %v9122_v61 = vpop.f32.mrf.mxu2  ;;  %12584 = vmatmul.msk.bf16.vlgmr.msra.gmra.mxu0 %vm5355_vm12, %v19743_v18 }
 0xc9a   : > { %v9183_v62 = vadd.f32 %v9122_v61, %v8766_v0  ;;  %v8768_v0 = vadd.f32 %v19748_v63, %v19747_v57  ;;  %v19755_v57 = vld [vmem:[#allocation48_spill] sm:$0xff]  ;;  %v19756_v63 = vld [vmem:[#allocation50_spill] sm:$0xff] }
 0xc9b   : > { %v8770_v26 = vadd.f32 %v19756_v63, %v19755_v57  ;;  %v19763_v57 = vld [vmem:[#allocation54_spill] sm:$0xff]  ;;  %v19764_v63 = vld [vmem:[#allocation57_spill] sm:$0xff] }
 0xc9c   : > { %v18385_v28 = vadd.f32 %v9449_v55, %v9183_v62  ;;  %v19749_v55 = vld [vmem:[#allocation17_spill] sm:$0xff]  ;;  %v19751_v62 = vld [vmem:[#allocation12_spill] sm:$0xff] }
 0xc9d   : > { %12555 = vmatmul.msk.bf16.gmra.mxu1 %vm5355_vm12, %v10010_v52 }
 0xc9e   : > { %19744 = vst [vmem:[#allocation35_spill] sm:$0xff] %v18385_v28  ;;  %12365 = vmatmul.msk.bf16.gmra.mxu2 %vm5355_vm12, %v9026_v7  ;;  %v9459_v17 = vpop.f32.mrf.mxu0  ;;  %v19752_v7 = vld [vmem:[#allocation11_spill] sm:$0xff] }
 0xc9f   : > { %v8769_v43 = vadd.f32 %v19753_v8, %v19752_v7  ;;  %v19761_v7 = vld [vmem:[#allocation53_spill] sm:$0xff] }
 0xca1   : > { %v9125_v60 = vpop.f32.mrf.mxu2 }
 0xca2   : > { %v9184_v41 = vadd.f32 %v9125_v60, %v8767_v22 }
 0xca4   : > { %v18391_v14 = vadd.f32 %v9452_v35, %v9184_v41 }
 0xca6   : > { %v9462_v18 = vpop.f32.mrf.mxu0 }
 0xca9   : > { %v9127_v61 = vpop.f32.mrf.mxu2  ;;  %12585 = vmatmul.msk.bf16.gmra.mxu0 %vm5355_vm12, %v19749_v55  ;;  %v19757_v55 = vld [vmem:[#allocation28_spill] sm:$0xff] }
 0xcaa   : > { %v9185_v52 = vadd.f32 %v9127_v61, %v8768_v0 }
 0xcac   : > { %v18397_v12 = vadd.f32 %v9454_v44, %v9185_v52  ;;  %v19759_v52 = vld [vmem:[#allocation19_spill] sm:$0xff] }
 0xcae   : > { %19750 = vst [vmem:[#allocation41_spill] sm:$0xff] %v18397_v12  ;;  %v9464_v30 = vpop.f32.mrf.mxu0  ;;  %12562 = vmatmul.msk.bf16.vlgmr.msrb.gmra.mxu2 %vm5355_vm12, %v19751_v62  ;;  %v19760_v62 = vld [vmem:[#allocation51_spill] sm:$0xff] }
 0xcaf   : > { %v8771_v8 = vadd.f32 %v19761_v7, %v19760_v62  ;;  %v19768_v62 = vld [vmem:[#allocation61_spill] sm:$0xff] }
 0xcb1   : > { %v9130_v35 = vpop.f32.mrf.mxu2 }
 0xcb2   : > { %v9186_v22 = vadd.f32 %v9130_v35, %v8769_v43 }
 0xcb4   : > { %v18403_v60 = vadd.f32 %v9457_v54, %v9186_v22 }
 0xcb6   : > { %19754 = vst [vmem:[#allocation30_spill] sm:$0xff] %v18403_v60  ;;  %v9467_v41 = vpop.f32.mrf.mxu0  ;;  %v8772_v60 = vadd.f32 %v19764_v63, %v19763_v57  ;;  %v19769_v57 = vld [vmem:[#allocation59_spill] sm:$0xff]  ;;  %v19770_v63 = vld [vmem:[#allocation64_spill] sm:$0xff] }
 0xcb9   : > { %v9132_v28 = vpop.f32.mrf.mxu2  ;;  %12586 = vmatmul.msk.bf16.gmra.mxu0 %vm5355_vm12, %v19757_v55  ;;  %v19765_v55 = vld [vmem:[#allocation14_spill] sm:$0xff] }
 0xcba   : > { %v9187_v44 = vadd.f32 %v9132_v28, %v8770_v26 }
 0xcbc   : > { %v18409_v0 = vadd.f32 %v9459_v17, %v9187_v44  ;;  %v19766_v44 = vld [vmem:[#allocation24_spill] sm:$0xff] }
 0xcbe   : > { %19758 = vst [vmem:[#allocation23_spill] sm:$0xff] %v18409_v0  ;;  %v9469_v61 = vpop.f32.mrf.mxu0  ;;  %12563 = vmatmul.msk.bf16.gmra.mxu2 %vm5355_vm12, %v19759_v52  ;;  %v19767_v52 = vld [vmem:[#allocation56_spill] sm:$0xff] }
 0xcbf   : > { %v8773_v7 = vadd.f32 %v19768_v62, %v19767_v52 }
 0xcc1   : > { %v9135_v54 = vpop.f32.mrf.mxu2 }
 0xcc2   : > { %v9188_v43 = vadd.f32 %v9135_v54, %v8771_v8 }
 0xcc4   : > { %v18415_v35 = vadd.f32 %v9462_v18, %v9188_v43 }
 0xcc6   : > { %19762 = vst [vmem:[#allocation36_spill] sm:$0xff] %v18415_v35  ;;  %v9472_v22 = vpop.f32.mrf.mxu0  ;;  %v8774_v35 = vadd.f32 %v19770_v63, %v19769_v57  ;;  %v19774_v63 = vld [vmem:[#allocation31_spill] sm:$0xff] }
 0xcc9   : > { %v9137_v12 = vpop.f32.mrf.mxu2  ;;  %12587 = vmatmul.msk.bf16.gmra.mxu0 %vm5355_vm12, %v19765_v55  ;;  %v19771_v55 = vld [vmem:[#allocation25_spill] sm:$0xff] }
 0xcca   : > { %v9189_v26 = vadd.f32 %v9137_v12, %v8772_v60 }
 0xccc   : > { %v18421_v28 = vadd.f32 %v9464_v30, %v9189_v26  ;;  %v19772_v26 = vld [vmem:[#allocation39_spill] sm:$0xff] }
 0xcce   : > { %v9474_v17 = vpop.f32.mrf.mxu0  ;;  %12564 = vmatmul.msk.bf16.gmra.mxu2 %vm5355_vm12, %v19766_v44  ;;  %v19773_v44 = vld [vmem:[#allocation62_spill] sm:$0xff] }
 0xccf   : > { %v8775_v52 = vadd.f32 %v18149_v36, %v19773_v44  ;;  %v8777_v36 = vadd.f32 %v18183_v48, %v18152_v9  ;;  %v8779_v9 = vadd.f32 %v18209_v11, %v18176_v47  ;;  %v8781_v47 = vadd.f32 %v18236_v3, %v18199_v51 }
 0xcd0   : > { %v8783_v51 = vadd.f32 %v18258_v56, %v18223_v58 }
 0xcd1   : > { %v9140_v18 = vpop.f32.mrf.mxu2 }
 0xcd2   : > { %v9190_v8 = vadd.f32 %v9140_v18, %v8773_v7 }
 0xcd4   : > { %v18427_v54 = vadd.f32 %v9467_v41, %v9190_v8  ;;  %v8776_v8 = vadd.f32 %v18170_v13, %v18124_v45  ;;  %v8778_v45 = vadd.f32 %v18196_v39, %v18167_v15  ;;  %v8780_v15 = vadd.f32 %v18226_v10, %v18188_v20 }
 0xcd5   : > { %v8782_v20 = vadd.f32 %v18244_v4, %v18211_v16  ;;  %v8784_v16 = vadd.f32 %v18268_v25, %v18231_v24  ;;  %v19794_v24 = vld [vmem:[#allocation70_spill] sm:$0xff] }
 0xcd6   : > { %v9477_v43 = vpop.f32.mrf.mxu0  ;;  %v9828_v25 = vadd.f32 %v19794_v24, %v18251_v33 }
 0xcd9   : > { %v9142_v0 = vpop.f32.mrf.mxu2  ;;  %12588 = vmatmul.msk.bf16.gmra.mxu0 %vm5355_vm12, %v19771_v55  ;;  %v19776_v55 = vld [vmem:[#allocation29_spill] sm:$0xff] }
 0xcda   : > { %v9191_v12 = vadd.f32 %v9142_v0, %v8774_v35 }
 0xcdc   : > { %v18433_v30 = vadd.f32 %v9469_v61, %v9191_v12 }
 0xcde   : > { %v9479_v60 = vpop.f32.mrf.mxu0  ;;  %12565 = vmatmul.msk.bf16.gmra.mxu2 %vm5355_vm12, %v19772_v26 }
 0xce1   : > { %v9145_v41 = vpop.f32.mrf.mxu2 }
 0xce2   : > { %v9192_v62 = vadd.f32 %v9145_v41, %v8775_v52  ;;  %v19778_v52 = vld [vmem:[#allocation40_spill] sm:$0xff] }
 0xce4   : > { %v18439_v7 = vadd.f32 %v9472_v22, %v9192_v62 }
 0xce6   : > { %v9482_v18 = vpop.f32.mrf.mxu0 }
 0xce9   : > { %v9147_v57 = vpop.f32.mrf.mxu2  ;;  %12589 = vmatmul.msk.bf16.gmra.mxu0 %vm5355_vm12, %v19774_v63 }
 0xcea   : > { %v9193_v0 = vadd.f32 %v9147_v57, %v8776_v8  ;;  %v19780_v8 = vld [vmem:[#allocation32_spill] sm:$0xff] }
 0xcec   : > { %v18445_v61 = vadd.f32 %v9474_v17, %v9193_v0  ;;  %v19782_v0 = vld [vmem:[#allocation44_spill] sm:$0xff] }
 0xcee   : > { %19775 = vst [vmem:[#allocation37_spill] sm:$0xff] %v18445_v61  ;;  %v9484_v35 = vpop.f32.mrf.mxu0  ;;  %12566 = vmatmul.msk.bf16.gmra.mxu2 %vm5355_vm12, %v19776_v55  ;;  %v19815_v61 = vld [vmem:[#allocation15_spill] sm:$0xff] }
 0xcf1   : > { %v9150_v22 = vpop.f32.mrf.mxu2 }
 0xcf2   : > { %v9194_v12 = vadd.f32 %v9150_v22, %v8777_v36  ;;  %v19784_v22 = vld [vmem:[#allocation27_spill] sm:$0xff] }
 0xcf4   : > { %v18451_v26 = vadd.f32 %v9477_v43, %v9194_v12 }
 0xcf6   : > { %19777 = vst [vmem:[#allocation22_spill] sm:$0xff] %v18451_v26  ;;  %v9487_v44 = vpop.f32.mrf.mxu0 }
 0xcf9   : > { %v9152_v13 = vpop.f32.mrf.mxu2  ;;  %12590 = vmatmul.msk.bf16.gmra.mxu0 %vm5355_vm12, %v19778_v52 }
 0xcfa   : > { %v9195_v17 = vadd.f32 %v9152_v13, %v8778_v45  ;;  %v19786_v13 = vld [vmem:[#allocation26_spill] sm:$0xff] }
 0xcfc   : > { %v18457_v41 = vadd.f32 %v9479_v60, %v9195_v17  ;;  %v19788_v17 = vld [vmem:[#allocation45_spill] sm:$0xff] }
 0xcfe   : > { %19779 = vst [vmem:[#allocation33_spill] sm:$0xff] %v18457_v41  ;;  %v9489_v62 = vpop.f32.mrf.mxu0  ;;  %12567 = vmatmul.msk.bf16.gmra.mxu2 %vm5355_vm12, %v19780_v8 }
 0xd01   : > { %v9155_v48 = vpop.f32.mrf.mxu2 }
 0xd02   : > { %v9196_v43 = vadd.f32 %v9155_v48, %v8779_v9 }
 0xd04   : > { %v18463_v57 = vadd.f32 %v9482_v18, %v9196_v43  ;;  %v19790_v43 = vld [vmem:[#allocation18_spill] sm:$0xff] }
 0xd06   : > { %19781 = vst [vmem:[#allocation43_spill] sm:$0xff] %v18463_v57  ;;  %v9492_v63 = vpop.f32.mrf.mxu0 }
 0xd09   : > { %v9157_v39 = vpop.f32.mrf.mxu2  ;;  %12591 = vmatmul.msk.bf16.gmra.mxu0 %vm5355_vm12, %v19782_v0 }
 0xd0a   : > { %v9197_v60 = vadd.f32 %v9157_v39, %v8780_v15  ;;  %v19792_v39 = vld [vmem:[#allocation67_spill] sm:$0xff] }
 0xd0b   : > { %v9827_v0 = vadd.f32 %v19792_v39, %v18241_v34  ;;  %v19799_v39 = vld [vmem:[#allocation55_spill] sm:$0xff] }
 0xd0c   : > { %v18469_v55 = vadd.f32 %v9484_v35, %v9197_v60  ;;  %v19793_v60 = vld [vmem:[#allocation42_spill] sm:$0xff] }
 0xd0d   : > { %v10154_v56 = vadd.f32 %v18279_v46, %v9827_v0 }
 0xd0e   : > { %19783 = vst [vmem:[#allocation21_spill] sm:$0xff] %v18469_v55  ;;  %v9494_v36 = vpop.f32.mrf.mxu0  ;;  %12568 = vmatmul.msk.bf16.gmra.mxu2 %vm5355_vm12, %v19784_v22  ;;  %v19810_v55 = vld [vmem:[#allocation35_spill] sm:$0xff] }
 0xd11   : > { %v9160_v11 = vpop.f32.mrf.mxu2 }
 0xd12   : > { %v9198_v18 = vadd.f32 %v9160_v11, %v8781_v47 }
 0xd14   : > { %v18475_v12 = vadd.f32 %v9487_v44, %v9198_v18 }
 0xd16   : > { %19785 = vst [vmem:[#allocation38_spill] sm:$0xff] %v18475_v12  ;;  %v10623_v45 = vpop.f32.mrf.mxu0 }
 0xd19   : > { %v9162_v10 = vpop.f32.mrf.mxu2  ;;  %12592 = vmatmul.msk.bf16.gmra.mxu0 %vm5355_vm12, %v19786_v13  ;;  %v19796_v13 = vld [vmem:[#allocation71_spill] sm:$0xff] }
 0xd1a   : > { %v9199_v35 = vadd.f32 %v9162_v10, %v8782_v20  ;;  %v19795_v20 = vld [vmem:[#allocation49_spill] sm:$0xff]  ;;  %v9829_v46 = vadd.f32 %v19796_v13, %v18260_v32  ;;  %v19802_v13 = vld [vmem:[#allocation60_spill] sm:$0xff] }
 0xd1c   : > { %v18481_v52 = vadd.f32 %v9489_v62, %v9199_v35  ;;  %v19797_v35 = vld [vmem:[#allocation46_spill] sm:$0xff]  ;;  %v10156_v33 = vadd.f32 %v18313_v21, %v9829_v46 }
 0xd1e   : > { %19787 = vst [vmem:[#allocation16_spill] sm:$0xff] %v18481_v52  ;;  %12569 = vmatmul.msk.bf16.gmra.mxu2 %vm5355_vm12, %v19788_v17  ;;  %v10625_v8 = vpop.f32.mrf.mxu0  ;;  %v9767_v17 = vpop.f32.mrf.mxu3 }
 0xd21   : > { %v9165_v3 = vpop.f32.mrf.mxu2 }
 0xd22   : > { %v9200_v44 = vadd.f32 %v9165_v3, %v8783_v51  ;;  %v10094_v51 = vpop.f32.mrf.mxu1 }
 0xd24   : > { %v18487_v9 = vadd.f32 %v9492_v63, %v9200_v44 }
 0xd26   : > { %19789 = vst [vmem:[#allocation10_spill] sm:$0xff] %v18487_v9  ;;  %v10628_v48 = vpop.f32.mrf.mxu0 }
 0xd29   : > { %v9167_v4 = vpop.f32.mrf.mxu2  ;;  %12593 = vmatmul.msk.bf16.gmra.mxu0 %vm5355_vm12, %v19790_v43 }
 0xd2a   : > { %v9201_v62 = vadd.f32 %v9167_v4, %v8784_v16  ;;  %v19798_v16 = vld [vmem:[#allocation72_spill] sm:$0xff] }
 0xd2b   : > { %v9830_v4 = vadd.f32 %v19798_v16, %v18270_v53 }
 0xd2c   : > { %v18493_v15 = vadd.f32 %v9494_v36, %v9201_v62  ;;  %v10155_v36 = vadd.f32 %v18294_v37, %v9828_v25  ;;  %v18519_v62 = vpop.f32.mrf.mxu3 }
 0xd2d   : > { %v10157_v43 = vadd.f32 %v18327_v59, %v9830_v4 }
 0xd2e   : > { %19791 = vst [vmem:[#allocation17_spill] sm:$0xff] %v18493_v15  ;;  %12570 = vmatmul.msk.bf16.gmra.mxu2 %vm5355_vm12, %v19793_v60  ;;  %v10630_v58 = vpop.f32.mrf.mxu0  ;;  %v18523_v60 = vpop.f32.mrf.mxu1  ;;  %v19811_v15 = vld [vmem:[#allocation41_spill] sm:$0xff] }
 0xd31   : > { %v10404_v63 = vpop.f32.mrf.mxu2 }
 0xd32   : > { %v10484_v22 = vadd.f32 %v10404_v63, %v10154_v56  ;;  %v19801_v63 = vld [vmem:[#allocation52_spill] sm:$0xff] }
 0xd34   : > { %v18500_v47 = vadd.f32 %v10623_v45, %v10484_v22  ;;  %v18532_v25 = vpop.f32.mrf.mxu3 }
 0xd36   : > { %v10633_v11 = vpop.f32.mrf.mxu0 }
 0xd39   : > { %v10406_v18 = vpop.f32.mrf.mxu2  ;;  %12594 = vmatmul.msk.bf16.gmra.mxu0 %vm5355_vm12, %v19795_v20 }
 0xd3a   : > { %v10485_v34 = vadd.f32 %v10406_v18, %v10155_v36  ;;  %v9832_v18 = vadd.f32 %v18221_v42, %v18287_v1 }
 0xd3c   : > { %v18507_v10 = vadd.f32 %v10625_v8, %v10485_v34 }
 0xd3e   : > { %12571 = vmatmul.msk.bf16.gmra.mxu2 %vm5355_vm12, %v19797_v35  ;;  %v10635_v45 = vpop.f32.mrf.mxu0  ;;  %v9833_v35 = vadd.f32 %v18292_v31, %v18302_v29 }
 0xd41   : > { %v10409_v3 = vpop.f32.mrf.mxu2 }
 0xd42   : > { %v10486_v37 = vadd.f32 %v10409_v3, %v10156_v33  ;;  %v19803_v33 = vld [vmem:[#allocation58_spill] sm:$0xff] }
 0xd44   : > { %v18514_v44 = vadd.f32 %v10628_v48, %v10486_v37  ;;  %v19800_v48 = vld [vmem:[#allocation73_spill] sm:$0xff] }
 0xd45   : > { %v9831_v56 = vadd.f32 %v19800_v48, %v18277_v38  ;;  %v10159_v38 = vadd.f32 %v18355_v2, %v9832_v18  ;;  %v10160_v2 = vadd.f32 %v18373_v6, %v9833_v35  ;;  %v19805_v48 = vld [vmem:[#allocation63_spill] sm:$0xff]  ;;  %v19808_v35 = vld [vmem:[#allocation69_spill] sm:$0xff] }
 0xd46   : > { %v10638_v8 = vpop.f32.mrf.mxu0 }
 0xd47   : > { %v10158_v59 = vadd.f32 %v18344_v23, %v9831_v56 }
 0xd49   : > { %v10411_v32 = vpop.f32.mrf.mxu2  ;;  %12595 = vmatmul.msk.bf16.gmra.mxu0 %vm5355_vm12, %v19799_v39  ;;  %v19804_v39 = vld [vmem:[#allocation66_spill] sm:$0xff] }
 0xd4a   : > { %v10487_v0 = vadd.f32 %v10411_v32, %v10157_v43 }
 0xd4c   : > { %v18525_v21 = vadd.f32 %v10630_v58, %v10487_v0  ;;  %v18538_v58 = vpop.f32.mrf.mxu1 }
 0xd4e   : > { %12572 = vmatmul.msk.bf16.gmra.mxu2 %vm5355_vm12, %v19801_v63  ;;  %v10640_v53 = vpop.f32.mrf.mxu0 }
 0xd51   : > { %v10414_v22 = vpop.f32.mrf.mxu2 }
 0xd52   : > { %v10488_v24 = vadd.f32 %v10414_v22, %v10158_v59 }
 0xd54   : > { %v18534_v36 = vadd.f32 %v10633_v11, %v10488_v24  ;;  %v18547_v11 = vpop.f32.mrf.mxu3  ;;  %v18553_v1 = vpop.f32.mrf.mxu1  ;;  %v10556_v24 = vrot.slane %v18349_v50, 2 }
 0xd56   : > { %v10643_v20 = vpop.f32.mrf.mxu0 }
 0xd59   : > { %v10416_v34 = vpop.f32.mrf.mxu2  ;;  %12596 = vmatmul.msk.bf16.gmra.mxu0 %vm5355_vm12, %v19802_v13 }
 0xd5a   : > { %v10489_v46 = vadd.f32 %v10416_v34, %v10159_v38  ;;  %v10517_v34 = vld [vmem:[#allocation8 + $0x90] sm:$0x3] }
 0xd5b   : > { %v10524_v13 = vunpack.c.l.b16 %v10517_v34 }
 0xd5c   : > { %v18543_v23 = vadd.f32 %v10635_v45, %v10489_v46  ;;  %v9834_v45 = vadd.f32 %v18311_v27, %v18317_v19  ;;  %v18562_v31 = vpop.f32.mrf.mxu3  ;;  %v18565_v43 = vpop.f32.mrf.mxu1 }
 0xd5e   : > { %12573 = vmatmul.msk.bf16.gmra.mxu2 %vm5355_vm12, %v19803_v33  ;;  %v18551_v42 = vpop.f32.mrf.mxu0  ;;  %v10161_v29 = vadd.f32 %v18383_v40, %v9834_v45  ;;  %v10526_v33 = vpack.c.b16 %v10524_v13, %v10524_v13  ;;  %v10333_v13 = vshrl.u32 %v18371_v5, 16 }
 0xd60   : > { %v10558_v45 = vrot.slane %v10526_v33, 2  ;;  %v10335_v33 = vrot.slane %v10333_v13, 1 }
 0xd61   : > { %v10419_v3 = vpop.f32.mrf.mxu2 }
 0xd62   : > { %v10490_v37 = vadd.f32 %v10419_v3, %v10160_v2  ;;  %v10324_v3 = vshrl.u32 %v18349_v50, 16 }
 0xd64   : > { %v18556_v16 = vadd.f32 %v10638_v8, %v10490_v37  ;;  %v9835_v8 = vadd.f32 %v9767_v17, %v18329_v49  ;;  %v9779_v56 = vpop.f32.mrf.mxu3  ;;  %v10106_v59 = vpop.f32.mrf.mxu1  ;;  %v10327_v37 = vshll.u32 %v18349_v50, 16 }
 0xd65   : > { %v9840_v12 = vadd.f32 %v9779_v56, %v19810_v55 }
 0xd66   : > { %v18560_v4 = vpop.f32.mrf.mxu0  ;;  %v10162_v19 = vadd.f32 %v10094_v51, %v9835_v8 }
 0xd69   : > { %v10421_v32 = vpop.f32.mrf.mxu2  ;;  %12597 = vmatmul.msk.bf16.gmra.mxu0 %vm5355_vm12, %v19804_v39  ;;  %v10329_v39 = vrot.slane %v10327_v37, 2 }
 0xd6a   : > { %v10491_v6 = vadd.f32 %v10421_v32, %v10161_v29  ;;  %v10326_v32 = vrot.slane %v10324_v3, 1 }
 0xd6c   : > { %v18569_v0 = vadd.f32 %v10640_v53, %v10491_v6  ;;  %v19806_v53 = vld [vmem:[#allocation65_spill] sm:$0xff]  ;;  %v9782_v51 = vpop.f32.mrf.mxu3  ;;  %v10109_v46 = vpop.f32.mrf.mxu1 }
 0xd6d   : > { %v19807_v38 = vrot.slane %v19806_v53, 2  ;;  %v9841_v41 = vadd.f32 %v9782_v51, %v18391_v14  ;;  %v19814_v51 = vld [vmem:[#allocation34_spill] sm:$0xff] }
 0xd6e   : > { %12574 = vmatmul.msk.bf16.gmra.mxu2 %vm5355_vm12, %v19805_v48  ;;  %v18574_v27 = vpop.f32.mrf.mxu0  ;;  %v10559_v48 = vsel %vm1475_vm1, %v10556_v24, %v10558_v45  ;;  %v9837_v55 = vadd.f32 %v18532_v25, %v19814_v51 }
 0xd6f   : > { %v10557_v49 = vsel %vm1475_vm1, %v19807_v38, %v10556_v24  ;;  %vm11157_vm1 = vcmask 7168  }
 0xd71   : > { %v10424_v63 = vpop.f32.mrf.mxu2 }
 0xd72   : > { %v10492_v40 = vadd.f32 %v10424_v63, %v10162_v19  ;;  %v10330_v63 = vor.u32 %v10329_v39, %v10326_v32 }
 0xd74   : > { %v18576_v22 = vadd.f32 %v10643_v20, %v10492_v40  ;;  %v9784_v29 = vpop.f32.mrf.mxu3  ;;  %v10111_v8 = vpop.f32.mrf.mxu1  ;;  %v19809_v40 = vld [vmem:[#allocation68_spill] sm:$0xff] }
 0xd75   : > { %v10331_v53 = vsel %vm4686_vm10, %v19809_v40, %v10330_v63 }
 0xd76   : > { %v18579_v18 = vpop.f32.mrf.mxu0 }
 0xd79   : > { %v18584_v17 = vpop.f32.mrf.mxu2  ;;  %12598 = vmatmul.msk.bf16.gmra.mxu0 %vm5355_vm12, %v10557_v49 }
 0xd7c   : > { %v9787_v49 = vpop.f32.mrf.mxu3  ;;  %v10114_v50 = vpop.f32.mrf.mxu1 }
 0xd7e   : > { %12575 = vmatmul.msk.bf16.gmra.mxu2 %vm5355_vm12, %v19808_v35  ;;  %v10655_v20 = vpop.f32.mrf.mxu0  ;;  %v10336_v35 = vshll.u32 %v18371_v5, 16  ;;  %v9842_v5 = vadd.f32 %v9784_v29, %v19811_v15 }
 0xd80   : > { %v10338_v3 = vrot.slane %v10336_v35, 2  ;;  %v19812_v35 = vld [vmem:[#allocation13_spill] sm:$0xff]  ;;  %v10169_v9 = vadd.f32 %v10111_v8, %v9842_v5  ;;  %v19816_v8 = vld [vmem:[#allocation30_spill] sm:$0xff] }
 0xd81   : > { %v18589_v2 = vpop.f32.mrf.mxu2  ;;  %v9839_v52 = vadd.f32 %v18562_v31, %v19812_v35  ;;  %v9836_v31 = vadd.f32 %v18519_v62, %v19815_v61  ;;  %v10164_v35 = vadd.f32 %v18538_v58, %v9837_v55 }
 0xd83   : > { %v10166_v15 = vadd.f32 %v18565_v43, %v9839_v52  ;;  %v10163_v43 = vadd.f32 %v18523_v60, %v9836_v31  ;;  %v10494_v61 = vadd.f32 %v18589_v2, %v10164_v35  ;;  %v19817_v2 = vld [vmem:[#allocation23_spill] sm:$0xff] }
 0xd84   : > { %v9789_v37 = vpop.f32.mrf.mxu3  ;;  %v10116_v32 = vpop.f32.mrf.mxu1 }
 0xd85   : > { %v10713_v60 = vadd.f32 %v18560_v4, %v10494_v61 }
 0xd86   : > { %v10658_v6 = vpop.f32.mrf.mxu0 }
 0xd89   : > { %v10431_v19 = vpop.f32.mrf.mxu2  ;;  %12599 = vmatmul.msk.bf16.gmra.mxu0 %vm5355_vm12, %v10559_v48  ;;  %v10339_v48 = vor.u32 %v10338_v3, %v10335_v33  ;;  %v10168_v33 = vadd.f32 %v10109_v46, %v9841_v41  ;;  %v19813_v3 = vld [vmem:[#allocation20_spill] sm:$0xff] }
 0xd8b   : > { %v10340_v39 = vsel %vm4686_vm10, %v10330_v63, %v10339_v48  ;;  %v9838_v63 = vadd.f32 %v18547_v11, %v19813_v3  ;;  %v10167_v48 = vadd.f32 %v10106_v59, %v9840_v12  ;;  %v18619_v59 = vld [vmem:[#allocation9] ss:$0 sm:$0xff] }
 0xd8c   : > { %v9792_v57 = vpop.f32.mrf.mxu3  ;;  %v18605_v13 = vpop.f32.mrf.mxu1 }
 0xd8d   : > { %v10165_v41 = vadd.f32 %v18553_v1, %v9838_v63 }
 0xd8e   : > { %12576 = vmatmul.msk.bf16.gmra.mxu2 %vm5355_vm12, %v10331_v53  ;;  %v10660_v38 = vpop.f32.mrf.mxu0 }
 0xd8f   : > { %v10495_v25 = vadd.f32 %v10431_v19, %v10165_v41 }
 0xd91   : > { %v10434_v34 = vpop.f32.mrf.mxu2  ;;  %v10714_v58 = vadd.f32 %v18574_v27, %v10495_v25 }
 0xd92   : > { %v10496_v46 = vadd.f32 %v10434_v34, %v10166_v15 }
 0xd94   : > { %v9794_v5 = vpop.f32.mrf.mxu3  ;;  %v10715_v62 = vadd.f32 %v18579_v18, %v10496_v46 }
 0xd96   : > { %v10663_v24 = vpop.f32.mrf.mxu0  ;;  %v10809_v18 = vadd.f32 %v18619_v59, %v10715_v62 }
 0xd99   : > { %v10436_v45 = vpop.f32.mrf.mxu2 }
 0xd9a   : > { %v10497_v56 = vadd.f32 %v10436_v45, %v10167_v48  ;;  %v10807_v48 = vadd.f32 %v18619_v59, %v10713_v60 }
 0xd9c   : > { %v9797_v27 = vpop.f32.mrf.mxu3 }
 0xd9e   : > { %12577 = vmatmul.msk.bf16.gmra.mxu2 %vm5355_vm12, %v10340_v39  ;;  %v10665_v40 = vpop.f32.mrf.mxu0 }
 0xda1   : > { %v10439_v53 = vpop.f32.mrf.mxu2 }
 0xda2   : > { %v10498_v39 = vadd.f32 %v10439_v53, %v10168_v33  ;;  %v9843_v53 = vadd.f32 %v9787_v49, %v19816_v8  ;;  %v10716_v33 = vadd.f32 %v10655_v20, %v10497_v56  ;;  %v10493_v49 = vadd.f32 %v18584_v17, %v10163_v43 }
 0xda3   : > { %v10808_v17 = vadd.f32 %v18619_v59, %v10714_v58 }
 0xda4   : > { %v10717_v11 = vadd.f32 %v10658_v6, %v10498_v39  ;;  %v10170_v1 = vadd.f32 %v10114_v50, %v9843_v53  ;;  %v10810_v20 = vadd.f32 %v18619_v59, %v10716_v33  ;;  %v9844_v50 = vadd.f32 %v9789_v37, %v19817_v2  ;;  %v19818_v37 = vld [vmem:[#allocation36_spill] sm:$0xff]  ;;  %v9799_v31 = vpop.f32.mrf.mxu3 }
 0xda5   : > { %v10712_v3 = vadd.f32 %v18551_v42, %v10493_v49  ;;  %v10805_v42 = vadd.f32 %v18619_v59, %v18576_v22  ;;  %v9845_v55 = vadd.f32 %v9792_v57, %v19818_v37  ;;  %v10802_v22 = vadd.f32 %v18619_v59, %v18543_v23 }
 0xda6   : > { %v18611_v26 = vpop.f32.mrf.mxu0  ;;  %v10811_v6 = vadd.f32 %v18619_v59, %v10717_v11  ;;  %v10171_v63 = vadd.f32 %v10116_v32, %v9844_v50  ;;  %v10804_v32 = vadd.f32 %v18619_v59, %v18569_v0  ;;  %v10801_v0 = vadd.f32 %v18619_v59, %v18534_v36 }
 0xda7   : > { %v10172_v56 = vadd.f32 %v18605_v13, %v9845_v55  ;;  %v9846_v13 = vadd.f32 %v9794_v5, %v18421_v28  ;;  %v10799_v23 = vadd.f32 %v18619_v59, %v18514_v44  ;;  %v10797_v28 = vadd.f32 %v18619_v59, %v18500_v47 }
 0xda8   : > { %v9848_v43 = vadd.f32 %v9799_v31, %v18433_v30 }
 0xda9   : > { %v10441_v14 = vpop.f32.mrf.mxu2 }
 0xdaa   : > { %v10499_v29 = vadd.f32 %v10441_v14, %v10169_v9  ;;  %v10121_v9 = vpop.f32.mrf.mxu1 }
 0xdac   : > { %v10718_v12 = vadd.f32 %v10660_v38, %v10499_v29  ;;  %v10803_v29 = vadd.f32 %v18619_v59, %v18556_v16  ;;  %v10800_v16 = vadd.f32 %v18619_v59, %v18525_v21  ;;  %v9802_v35 = vpop.f32.mrf.mxu3  ;;  %v9847_v21 = vadd.f32 %v9797_v27, %v18427_v54 }
 0xdad   : > { %v9849_v54 = vadd.f32 %v9802_v35, %v18439_v7 }
 0xdae   : > { %v10812_v52 = vadd.f32 %v18619_v59, %v10718_v12  ;;  %v10670_v34 = vpop.f32.mrf.mxu0  ;;  %v10173_v12 = vadd.f32 %v10121_v9, %v9846_v13 }
 0xdb0   : > { %10920 = vmatpush.msrb.mxu3 %v10812_v52 }
 0xdb1   : > { %v10444_v38 = vpop.f32.mrf.mxu2 }
 0xdb2   : > { %v10500_v19 = vadd.f32 %v10444_v38, %v10170_v1  ;;  %10921 = vmatpush.msrb.mxu3 %v10811_v6  ;;  %v10124_v39 = vpop.f32.mrf.mxu1 }
 0xdb3   : > { %v10174_v25 = vadd.f32 %v10124_v39, %v9847_v21  ;;  %v19820_v39 = vld [vmem:[#allocation22_spill] sm:$0xff] }
 0xdb4   : > { %v18632_v45 = vadd.f32 %v10663_v24, %v10500_v19  ;;  %10922 = vmatpush.msrb.mxu3 %v10810_v20  ;;  %v10806_v24 = vadd.f32 %v18619_v59, %v10712_v3  ;;  %v19821_v21 = vld [vmem:[#allocation10_spill] sm:$0xff] }
 0xdb6   : > { %10923 = vmatpush.msrb.mxu3 %v10809_v18  ;;  %v10673_v15 = vpop.f32.mrf.mxu0  ;;  %v19819_v18 = vld [vmem:[#allocation37_spill] sm:$0xff] }
 0xdb8   : > { %10924 = vmatpush.msrb.mxu3 %v10808_v17 }
 0xdb9   : > { %v10446_v14 = vpop.f32.mrf.mxu2 }
 0xdba   : > { %v10501_v4 = vadd.f32 %v10446_v14, %v10171_v63  ;;  %10925 = vmatpush.msrb.mxu3 %v10807_v48  ;;  %v10126_v46 = vpop.f32.mrf.mxu1 }
 0xdbb   : > { %v10175_v62 = vadd.f32 %v10126_v46, %v9848_v43 }
 0xdbc   : > { %v18640_v51 = vadd.f32 %v10665_v40, %v10501_v4  ;;  %10926 = vmatpush.msrb.mxu3 %v10806_v24 }
 0xdbe   : > { %10927 = vmatpush.msrb.mxu3 %v10805_v42  ;;  %v10675_v11 = vpop.f32.mrf.mxu0 }
 0xdc0   : > { %10928 = vmatpush.msrb.mxu3 %v10804_v32 }
 0xdc1   : > { %v10449_v40 = vpop.f32.mrf.mxu2 }
 0xdc2   : > { %v10502_v41 = vadd.f32 %v10449_v40, %v10172_v56  ;;  %10929 = vmatpush.msrb.mxu3 %v10803_v29  ;;  %v10129_v5 = vpop.f32.mrf.mxu1 }
 0xdc3   : > { %v10176_v58 = vadd.f32 %v10129_v5, %v9849_v54 }
 0xdc4   : > { %v18653_v57 = vadd.f32 %v18611_v26, %v10502_v41  ;;  %10930 = vmatpush.msrb.mxu3 %v10802_v22  ;;  %v10798_v26 = vadd.f32 %v18619_v59, %v18507_v10  ;;  %v9804_v10 = vpop.f32.mrf.mxu3 }
 0xdc5   : > { %v9850_v2 = vadd.f32 %v9804_v10, %v19819_v18  ;;  %v19824_v10 = vld [vmem:[#allocation38_spill] sm:$0xff] }
 0xdc6   : > { %10931 = vmatpush.msrb.mxu3 %v10801_v0  ;;  %v10678_v33 = vpop.f32.mrf.mxu0 }
 0xdc8   : > { %10932 = vmatpush.msrb.mxu3 %v10800_v16 }
 0xdc9   : > { %v10451_v8 = vpop.f32.mrf.mxu2 }
 0xdca   : > { %v10503_v53 = vadd.f32 %v10451_v8, %v10173_v12  ;;  %10933 = vmatpush.msrb.mxu3 %v10799_v23  ;;  %v10131_v61 = vpop.f32.mrf.mxu1 }
 0xdcb   : > { %v10177_v50 = vadd.f32 %v10131_v61, %v9850_v2 }
 0xdcc   : > { %v18664_v36 = vadd.f32 %v10670_v34, %v10503_v53  ;;  %10934 = vmatpush.msrb.mxu3 %v10798_v26  ;;  %v9807_v47 = vpop.f32.mrf.mxu3 }
 0xdcd   : > { %v9851_v14 = vadd.f32 %v9807_v47, %v19820_v39 }
 0xdce   : > { %10935 = vmatpush.msrb.mxu3 %v10797_v28  ;;  %v10680_v38 = vpop.f32.mrf.mxu0 }
 0xdd1   : > { %v10454_v44 = vpop.f32.mrf.mxu2 }
 0xdd2   : > { %v10504_v52 = vadd.f32 %v10454_v44, %v10174_v25  ;;  %v10134_v19 = vpop.f32.mrf.mxu1 }
 0xdd3   : > { %v10178_v4 = vadd.f32 %v10134_v19, %v9851_v14 }
 0xdd4   : > { %v18669_v9 = vadd.f32 %v10673_v15, %v10504_v52  ;;  %v9809_v3 = vpop.f32.mrf.mxu3  ;;  %v19823_v52 = vld [vmem:[#allocation17_spill] sm:$0xff] }
 0xdd6   : > { %v10683_v30 = vpop.f32.mrf.mxu0 }
 0xdd9   : > { %v10456_v1 = vpop.f32.mrf.mxu2 }
 0xdda   : > { %v10505_v6 = vadd.f32 %v10456_v1, %v10175_v62  ;;  %v10136_v63 = vpop.f32.mrf.mxu1 }
 0xddc   : > { %v18672_v49 = vadd.f32 %v10675_v11, %v10505_v6  ;;  %v9812_v37 = vpop.f32.mrf.mxu3  ;;  %v19825_v6 = vld [vmem:[#allocation21_spill] sm:$0xff] }
 0xdde   : > { %v18681_v7 = vpop.f32.mrf.mxu0 }
 0xde1   : > { %v10459_v20 = vpop.f32.mrf.mxu2 }
 0xde2   : > { %v10506_v34 = vadd.f32 %v10459_v20, %v10176_v58  ;;  %v10139_v15 = vpop.f32.mrf.mxu1  ;;  %v19826_v20 = vld [vmem:[#allocation43_spill] sm:$0xff] }
 0xde4   : > { %v18675_v60 = vadd.f32 %v10678_v33, %v10506_v34  ;;  %v9814_v29 = vpop.f32.mrf.mxu3  ;;  %v19822_v33 = vld [vmem:[#allocation16_spill] sm:$0xff]  ;;  %v9853_v34 = vadd.f32 %v9812_v37, %v19826_v20 }
 0xde5   : > { %v10758_v20 = vld [vmem:[%s19006_s18 + $0xb8] sm:$0xff] }
 0xde6   : > { %v10688_v32 = vpop.f32.mrf.mxu0 }
 0xde9   : > { %v10461_v17 = vpop.f32.mrf.mxu2 }
 0xdea   : > { %v10507_v27 = vadd.f32 %v10461_v17, %v10177_v50  ;;  %v10141_v31 = vpop.f32.mrf.mxu1  ;;  %v19827_v50 = vld [vmem:[#allocation33_spill] sm:$0xff] }
 0xdeb   : > { %v9852_v17 = vadd.f32 %v9809_v3, %v19827_v50  ;;  %v10762_v50 = vld [vmem:[%s19006_s18 + $0xd8] sm:$0xff] }
 0xdec   : > { %v18678_v48 = vadd.f32 %v10680_v38, %v10507_v27  ;;  %v9817_v22 = vpop.f32.mrf.mxu3  ;;  %v9854_v38 = vadd.f32 %v9814_v29, %v19825_v6  ;;  %v10752_v6 = vld [vmem:[%s19006_s18 + $0x88] sm:$0xff] }
 0xded   : > { %v9855_v61 = vadd.f32 %v9817_v22, %v19824_v10  ;;  %v10179_v37 = vadd.f32 %v10136_v63, %v9852_v17  ;;  %v10748_v10 = vld [vmem:[%s19006_s18 + $0x68] sm:$0xff]  ;;  %v10769_v17 = vld [vmem:[%s19006_s18 + $0x110] sm:$0xff] }
 0xdee   : > { %v10690_v41 = vpop.f32.mrf.mxu0  ;;  %v10181_v39 = vadd.f32 %v10141_v31, %v9854_v38  ;;  %v10759_v38 = vld [vmem:[%s19006_s18 + $0xc0] sm:$0xff] }
 0xdf1   : > { %v10464_v24 = vpop.f32.mrf.mxu2 }
 0xdf2   : > { %v10508_v42 = vadd.f32 %v10464_v24, %v10178_v4  ;;  %v10144_v46 = vpop.f32.mrf.mxu1 }
 0xdf3   : > { %v10182_v18 = vadd.f32 %v10144_v46, %v9855_v61  ;;  %v10755_v61 = vld [vmem:[%s19006_s18 + $0xa0] sm:$0xff] }
 0xdf4   : > { %v18683_v55 = vadd.f32 %v10683_v30, %v10508_v42  ;;  %v9819_v16 = vpop.f32.mrf.mxu3  ;;  %v10180_v42 = vadd.f32 %v10139_v15, %v9853_v34  ;;  %v10765_v34 = vld [vmem:[%s19006_s18 + $0xf0] sm:$0xff] }
 0xdf5   : > { %v9856_v44 = vadd.f32 %v9819_v16, %v19822_v33  ;;  %v10744_v33 = vld [vmem:[%s19006_s18 + $0x48] sm:$0xff] }
 0xdf6   : > { %v10693_v13 = vpop.f32.mrf.mxu0 }
 0xdf9   : > { %v10466_v56 = vpop.f32.mrf.mxu2 }
 0xdfa   : > { %v10146_v12 = vpop.f32.mrf.mxu1  ;;  %v10509_v31 = vadd.f32 %v10466_v56, %v10179_v37  ;;  %v10775_v37 = vld [vmem:[%s19006_s18 + $0x140] sm:$0xff] }
 0xdfb   : > { %v10183_v54 = vadd.f32 %v10146_v12, %v9856_v44  ;;  %v10735_v12 = vld [vmem:[%s19006_s18] sm:$0xff] }
 0xdfc   : > { %v9822_v8 = vpop.f32.mrf.mxu3  ;;  %10936 = vmatmul.f32.vlgmr.msrb.gmra.mxu3 %v10735_v12  ;;  %v10728_v63 = vadd.f32 %v18681_v7, %v10509_v31  ;;  %v10820_v7 = vadd.f32 %v18619_v59, %v18678_v48  ;;  %v10816_v48 = vadd.f32 %v18619_v59, %v18664_v36  ;;  %v10743_v36 = vld [vmem:[%s19006_s18 + $0x40] sm:$0xff] }
 0xdfd   : > { %v9857_v5 = vadd.f32 %v9822_v8, %v19821_v21  ;;  %v10736_v21 = vld [vmem:[%s19006_s18 + $0x8] sm:$0xff]  ;;  %v10751_v44 = vld [vmem:[%s19006_s18 + $0x80] sm:$0xff] }
 0xdfe   : > { %v10695_v23 = vpop.f32.mrf.mxu0 }
 0xe01   : > { %v10469_v40 = vpop.f32.mrf.mxu2 }
 0xe02   : > { %v10149_v26 = vpop.f32.mrf.mxu1  ;;  %v10510_v46 = vadd.f32 %v10469_v40, %v10180_v42  ;;  %v10773_v42 = vld [vmem:[%s19006_s18 + $0x130] sm:$0xff] }
 0xe03   : > { %v10184_v62 = vadd.f32 %v10149_v26, %v9857_v5  ;;  %v10819_v26 = vadd.f32 %v18619_v59, %v18675_v60  ;;  %v10815_v60 = vadd.f32 %v18619_v59, %v18653_v57  ;;  %v10747_v57 = vld [vmem:[%s19006_s18 + $0x60] sm:$0xff]  ;;  %v10742_v5 = vld [vmem:[%s19006_s18 + $0x38] sm:$0xff] }
 0xe04   : > { %v9824_v25 = vpop.f32.mrf.mxu3 }
 0xe05   : > { %v9858_v43 = vadd.f32 %v9824_v25, %v19823_v52  ;;  %v10749_v25 = vld [vmem:[%s19006_s18 + $0x70] sm:$0xff]  ;;  %v10746_v52 = vld [vmem:[%s19006_s18 + $0x58] sm:$0xff] }
 0xe06   : > { %v10698_v35 = vpop.f32.mrf.mxu0 }
 0xe09   : > { %v10471_v0 = vpop.f32.mrf.mxu2 }
 0xe0a   : > { %v10151_v1 = vpop.f32.mrf.mxu1  ;;  %v10511_v22 = vadd.f32 %v10471_v0, %v10181_v39  ;;  %v10729_v0 = vadd.f32 %v10688_v32, %v10510_v46  ;;  %v10821_v32 = vadd.f32 %v18619_v59, %v18683_v55  ;;  %v10817_v55 = vadd.f32 %v18619_v59, %v18669_v9  ;;  %v10764_v39 = vld [vmem:[%s19006_s18 + $0xe8] sm:$0xff] }
 0xe0b   : > { %v10185_v58 = vadd.f32 %v10151_v1, %v9858_v43  ;;  %v10813_v9 = vadd.f32 %v18619_v59, %v18632_v45  ;;  %v10740_v45 = vld [vmem:[%s19006_s18 + $0x28] sm:$0xff]  ;;  %v10753_v43 = vld [vmem:[%s19006_s18 + $0x90] sm:$0xff] }
 0xe0c   : > { %v10823_v56 = vadd.f32 %v18619_v59, %v10729_v0  ;;  %v10757_v1 = vld [vmem:[%s19006_s18 + $0xb0] sm:$0xff] }
 0xe0e   : > { %v10700_v27 = vpop.f32.mrf.mxu0 }
 0xe11   : > { %v10474_v11 = vpop.f32.mrf.mxu2 }
 0xe12   : > { %v10512_v14 = vadd.f32 %v10474_v11, %v10182_v18  ;;  %v10730_v11 = vadd.f32 %v10690_v41, %v10511_v22  ;;  %v10822_v41 = vadd.f32 %v18619_v59, %v10728_v63  ;;  %v10760_v18 = vld [vmem:[%s19006_s18 + $0xc8] sm:$0xff] }
 0xe14   : > { %v10731_v8 = vadd.f32 %v10693_v13, %v10512_v14  ;;  %v10824_v40 = vadd.f32 %v18619_v59, %v10730_v11  ;;  %v10739_v13 = vld [vmem:[%s19006_s18 + $0x20] sm:$0xff] }
 0xe15   : > { %v10771_v14 = vld [vmem:[%s19006_s18 + $0x120] sm:$0xff] }
 0xe19   : > { %v10476_v53 = vpop.f32.mrf.mxu2 }
 0xe1a   : > { %v10513_v2 = vadd.f32 %v10476_v53, %v10183_v54  ;;  %v10737_v53 = vld [vmem:[%s19006_s18 + $0x10] sm:$0xff]  ;;  %v10754_v54 = vld [vmem:[%s19006_s18 + $0x98] sm:$0xff] }
 0xe1b   : > { %10939 = vmatmul.f32.gmra.mxu3 %v10737_v53  ;;  %v10772_v53 = vld [vmem:[%s19006_s18 + $0x128] sm:$0xff] }
 0xe1c   : > { %v10732_v16 = vadd.f32 %v10695_v23, %v10513_v2  ;;  %v10825_v23 = vadd.f32 %v18619_v59, %v10731_v8  ;;  %v10767_v2 = vld [vmem:[%s19006_s18 + $0x100] sm:$0xff] }
 0xe1e   : > { %v10826_v15 = vadd.f32 %v18619_v59, %v10732_v16 }
 0xe21   : > { %v10479_v28 = vpop.f32.mrf.mxu2 }
 0xe22   : > { %v10514_v47 = vadd.f32 %v10479_v28, %v10184_v62  ;;  %v10741_v28 = vld [vmem:[%s19006_s18 + $0x30] sm:$0xff]  ;;  %v10750_v62 = vld [vmem:[%s19006_s18 + $0x78] sm:$0xff] }
 0xe23   : > { %10942 = vmatmul.f32.gmra.mxu3 %v10739_v13  ;;  %v10774_v13 = vld [vmem:[%s19006_s18 + $0x138] sm:$0xff] }
 0xe24   : > { %v10733_v4 = vadd.f32 %v10698_v35, %v10514_v47  ;;  %v10818_v35 = vadd.f32 %v18619_v59, %v18672_v49  ;;  %v10814_v49 = vadd.f32 %v18619_v59, %v18640_v51  ;;  %v10738_v51 = vld [vmem:[%s19006_s18 + $0x18] sm:$0xff]  ;;  %v10761_v47 = vld [vmem:[%s19006_s18 + $0xd0] sm:$0xff] }
 0xe26   : > { %v10827_v3 = vadd.f32 %v18619_v59, %v10733_v4 }
 0xe29   : > { %v10481_v19 = vpop.f32.mrf.mxu2 }
 0xe2a   : > { %v10515_v30 = vadd.f32 %v10481_v19, %v10185_v58  ;;  %v10756_v58 = vld [vmem:[%s19006_s18 + $0xa8] sm:$0xff]  ;;  %v10763_v19 = vld [vmem:[%s19006_s18 + $0xe0] sm:$0xff] }
 0xe2b   : > { %10945 = vmatmul.f32.gmra.mxu3 %v10741_v28 }
 0xe2c   : > { %v10734_v24 = vadd.f32 %v10700_v27, %v10515_v30 }
 0xe2e   : > { %v10828_v29 = vadd.f32 %v18619_v59, %v10734_v24  ;;  %v10745_v59 = vld [vmem:[%s19006_s18 + $0x50] sm:$0xff]  ;;  %v10766_v24 = vld [vmem:[%s19006_s18 + $0xf8] sm:$0xff] }
 0xe30   : > { %12600 = vmatpush.msk.msrb.mxu1 %vm1247_vm0, %v10828_v29  ;;  %vm10829_vm0 = vcmask 1039360   ;;  %v10768_v29 = vld [vmem:[%s19006_s18 + $0x108] sm:$0xff] }
 0xe32   : > { %11025 = vmatpush.msrb.mxu1 %v10827_v3  ;;  %v10770_v3 = vld [vmem:[%s19006_s18 + $0x118] sm:$0xff] }
 0xe33   : > { %10948 = vmatmul.f32.gmra.mxu3 %v10743_v36 }
 0xe34   : > { %11026 = vmatpush.msrb.mxu1 %v10826_v15  ;;  %v10777_v15 = vld [vmem:[%s19006_s18 + $0x150] sm:$0xff] }
 0xe36   : > { %11027 = vmatpush.msrb.mxu1 %v10825_v23 }
 0xe38   : > { %11028 = vmatpush.msrb.mxu1 %v10824_v40 }
 0xe3a   : > { %11029 = vmatpush.msrb.mxu1 %v10823_v56  ;;  %v10779_v56 = vld [vmem:[%s19006_s18 + $0x160] sm:$0xff] }
 0xe3b   : > { %10951 = vmatmul.f32.gmra.mxu3 %v10745_v59 }
 0xe3c   : > { %11030 = vmatpush.msrb.mxu1 %v10822_v41 }
 0xe3e   : > { %11031 = vmatpush.msrb.mxu1 %v10821_v32 }
 0xe40   : > { %11032 = vmatpush.msrb.mxu1 %v10820_v7 }
 0xe42   : > { %11033 = vmatpush.msrb.mxu1 %v10819_v26 }
 0xe43   : > { %10954 = vmatmul.f32.gmra.mxu3 %v10747_v57  ;;  %v10785_v57 = vld [vmem:[%s19006_s18 + $0x190] sm:$0xff] }
 0xe44   : > { %11034 = vmatpush.msrb.mxu1 %v10818_v35  ;;  %v10781_v35 = vld [vmem:[%s19006_s18 + $0x170] sm:$0xff] }
 0xe46   : > { %11035 = vmatpush.msrb.mxu1 %v10817_v55 }
 0xe48   : > { %11036 = vmatpush.msrb.mxu1 %v10816_v48  ;;  %v10776_v48 = vld [vmem:[%s19006_s18 + $0x148] sm:$0xff] }
 0xe4a   : > { %11037 = vmatpush.msrb.mxu1 %v10815_v60 }
 0xe4b   : > { %10957 = vmatmul.f32.gmra.mxu3 %v10749_v25 }
 0xe4c   : > { %11038 = vmatpush.msrb.mxu1 %v10814_v49 }
 0xe4e   : > { %11039 = vmatpush.msrb.mxu1 %v10813_v9  ;;  %v10783_v9 = vld [vmem:[%s19006_s18 + $0x180] sm:$0xff] }
 0xe4f   : > { %12601 = vmatmul.msk.f32.vlgmr.msrb.gmra.mxu1 %vm10829_vm0, %v10736_v21 }
 0xe53   : > { %10960 = vmatmul.f32.gmra.mxu3 %v10751_v44 }
 0xe57   : > { %12602 = vmatmul.msk.f32.gmra.mxu1 %vm10829_vm0, %v10738_v51  ;;  %v10778_v51 = vld [vmem:[%s19006_s18 + $0x158] sm:$0xff] }
 0xe5b   : > { %10963 = vmatmul.f32.gmra.mxu3 %v10753_v43  ;;  %v10787_v43 = vld [vmem:[%s19006_s18 + $0x1a0] sm:$0xff] }
 0xe5f   : > { %12603 = vmatmul.msk.f32.gmra.mxu1 %vm10829_vm0, %v10740_v45 }
 0xe63   : > { %10966 = vmatmul.f32.gmra.mxu3 %v10755_v61 }
 0xe67   : > { %12604 = vmatmul.msk.f32.gmra.mxu1 %vm10829_vm0, %v10742_v5 }
 0xe6b   : > { %10969 = vmatmul.f32.gmra.mxu3 %v10757_v1 }
 0xe6f   : > { %12605 = vmatmul.msk.f32.gmra.mxu1 %vm10829_vm0, %v10744_v33  ;;  %v10780_v33 = vld [vmem:[%s19006_s18 + $0x168] sm:$0xff] }
 0xe73   : > { %10972 = vmatmul.f32.gmra.mxu3 %v10759_v38  ;;  %v10789_v38 = vld [vmem:[%s19006_s18 + $0x1b0] sm:$0xff] }
 0xe77   : > { %12606 = vmatmul.msk.f32.gmra.mxu1 %vm10829_vm0, %v10746_v52 }
 0xe7b   : > { %10975 = vmatmul.f32.gmra.mxu3 %v10761_v47 }
 0xe7f   : > { %12607 = vmatmul.msk.f32.gmra.mxu1 %vm10829_vm0, %v10748_v10  ;;  %v10937_v30 = vpop.f32.mrf.mxu3 }
 0xe83   : > { %10978 = vmatmul.f32.gmra.mxu3 %v10763_v19 }
 0xe87   : > { %12608 = vmatmul.msk.f32.gmra.mxu1 %vm10829_vm0, %v10750_v62  ;;  %v10782_v62 = vld [vmem:[%s19006_s18 + $0x178] sm:$0xff] }
 0xe8b   : > { %10981 = vmatmul.f32.gmra.mxu3 %v10765_v34  ;;  %v10791_v34 = vld [vmem:[%s19006_s18 + $0x1c0] sm:$0x1] }
 0xe8f   : > { %12609 = vmatmul.msk.f32.gmra.mxu1 %vm10829_vm0, %v10752_v6 }
 0xe93   : > { %10984 = vmatmul.f32.gmra.mxu3 %v10767_v2 }
 0xe97   : > { %12610 = vmatmul.msk.f32.gmra.mxu1 %vm10829_vm0, %v10754_v54 }
 0xe9b   : > { %10987 = vmatmul.f32.gmra.mxu3 %v10769_v17 }
 0xe9e   : > { %v10940_v27 = vpop.f32.mrf.mxu3 }
 0xe9f   : > { %12611 = vmatmul.msk.f32.gmra.mxu1 %vm10829_vm0, %v10756_v58  ;;  %v10784_v58 = vld [vmem:[%s19006_s18 + $0x188] sm:$0xff] }
 0xea3   : > { %10990 = vmatmul.f32.gmra.mxu3 %v10771_v14  ;;  %v10788_v14 = vld [vmem:[%s19006_s18 + $0x1a8] sm:$0xff] }
 0xea6   : > { %v10943_v4 = vpop.f32.mrf.mxu3 }
 0xea7   : > { %12612 = vmatmul.msk.f32.gmra.mxu1 %vm10829_vm0, %v10758_v20 }
 0xeab   : > { %10993 = vmatmul.f32.gmra.mxu3 %v10773_v42 }
 0xeae   : > { %v10946_v22 = vpop.f32.mrf.mxu3 }
 0xeaf   : > { %12613 = vmatmul.msk.f32.gmra.mxu1 %vm10829_vm0, %v10760_v18 }
 0xeb3   : > { %10996 = vmatmul.f32.gmra.mxu3 %v10775_v37 }
 0xeb6   : > { %v10949_v46 = vpop.f32.mrf.mxu3 }
 0xeb7   : > { %12614 = vmatmul.msk.f32.gmra.mxu1 %vm10829_vm0, %v10762_v50 }
 0xebb   : > { %10999 = vmatmul.f32.gmra.mxu3 %v10777_v15 }
 0xebe   : > { %v10952_v0 = vpop.f32.mrf.mxu3 }
 0xebf   : > { %12615 = vmatmul.msk.f32.gmra.mxu1 %vm10829_vm0, %v10764_v39 }
 0xec3   : > { %11002 = vmatmul.f32.gmra.mxu3 %v10779_v56 }
 0xec6   : > { %v10955_v41 = vpop.f32.mrf.mxu3 }
 0xec7   : > { %12616 = vmatmul.msk.f32.gmra.mxu1 %vm10829_vm0, %v10766_v24 }
 0xecb   : > { %11005 = vmatmul.f32.gmra.mxu3 %v10781_v35 }
 0xecc   : > { %v11041_v16 = vpop.f32.mrf.mxu1 }
 0xecd   : > { %v11042_v12 = vadd.f32 %v11041_v16, %v10937_v30  ;;  %v10786_v30 = vld [vmem:[%s19006_s18 + $0x198] sm:$0xff] }
 0xece   : > { %v10958_v55 = vpop.f32.mrf.mxu3  ;;  %v10790_v16 = vld [vmem:[%s19006_s18 + $0x1b8] sm:$0xff] }
 0xecf   : > { %13637 = vtanh.f32 %v11042_v12  ;;  %12617 = vmatmul.msk.f32.gmra.mxu1 %vm10829_vm0, %v10768_v29 }
 0xed3   : > { %11008 = vmatmul.f32.gmra.mxu3 %v10783_v9 }
 0xed4   : > { %v11044_v8 = vpop.f32.mrf.mxu1 }
 0xed5   : > { %v13638_v31 = vpop.eup %13637  ;;  %v11045_v11 = vadd.f32 %v11044_v8, %v10940_v27  ;;  %v10792_v8 = vld [vmem:[%s19006_s18 + $0x1c8] sm:$0x1] }
 0xed6   : > { %11158 = vst.msk [vmem:[%s18854_s30] sm:$0xff] %vm11157_vm1, %v13638_v31  ;;  %v10961_v21 = vpop.f32.mrf.mxu3 }
 0xed7   : > { %13639 = vtanh.f32 %v11045_v11  ;;  %12618 = vmatmul.msk.f32.gmra.mxu1 %vm10829_vm0, %v10770_v3 }
 0xedb   : > { %11011 = vmatmul.f32.gmra.mxu3 %v10785_v57 }
 0xedc   : > { %v11047_v23 = vpop.f32.mrf.mxu1 }
 0xedd   : > { %v13640_v63 = vpop.eup %13639  ;;  %v11048_v40 = vadd.f32 %v11047_v23, %v10943_v4 }
 0xede   : > { %11159 = vst.msk [vmem:[%s18854_s30 + $0x8] sm:$0xff] %vm11157_vm1, %v13640_v63  ;;  %v10964_v5 = vpop.f32.mrf.mxu3 }
 0xedf   : > { %13641 = vtanh.f32 %v11048_v40  ;;  %12619 = vmatmul.msk.f32.gmra.mxu1 %vm10829_vm0, %v10772_v53 }
 0xee3   : > { %11014 = vmatmul.f32.gmra.mxu3 %v10787_v43 }
 0xee4   : > { %v11050_v32 = vpop.f32.mrf.mxu1 }
 0xee5   : > { %v13642_v7 = vpop.eup %13641  ;;  %v11051_v26 = vadd.f32 %v11050_v32, %v10946_v22 }
 0xee6   : > { %11160 = vst.msk [vmem:[%s18854_s30 + $0x10] sm:$0xff] %vm11157_vm1, %v13642_v7  ;;  %v10967_v10 = vpop.f32.mrf.mxu3 }
 0xee7   : > { %13643 = vtanh.f32 %v11051_v26  ;;  %12620 = vmatmul.msk.f32.gmra.mxu1 %vm10829_vm0, %v10774_v13 }
 0xeeb   : > { %11017 = vmatmul.f32.gmra.mxu3 %v10789_v38 }
 0xeec   : > { %v11053_v28 = vpop.f32.mrf.mxu1 }
 0xeed   : > { %v13644_v60 = vpop.eup %13643  ;;  %v11054_v49 = vadd.f32 %v11053_v28, %v10949_v46 }
 0xeee   : > { %11161 = vst.msk [vmem:[%s18854_s30 + $0x18] sm:$0xff] %vm11157_vm1, %v13644_v60  ;;  %v10970_v54 = vpop.f32.mrf.mxu3 }
 0xeef   : > { %13645 = vtanh.f32 %v11054_v49  ;;  %12621 = vmatmul.msk.f32.gmra.mxu1 %vm10829_vm0, %v10776_v48 }
 0xef3   : > { %11020 = vmatmul.f32.gmra.mxu3 %v10791_v34 }
 0xef4   : > { %v11056_v36 = vpop.f32.mrf.mxu1 }
 0xef5   : > { %v13646_v59 = vpop.eup %13645  ;;  %v11057_v45 = vadd.f32 %v11056_v36, %v10952_v0 }
 0xef6   : > { %11162 = vst.msk [vmem:[%s18854_s30 + $0x20] sm:$0xff] %vm11157_vm1, %v13646_v59  ;;  %v10973_v18 = vpop.f32.mrf.mxu3 }
 0xef7   : > { %13647 = vtanh.f32 %v11057_v45  ;;  %12622 = vmatmul.msk.f32.gmra.mxu1 %vm10829_vm0, %v10778_v51 }
 0xefc   : > { %v11059_v25 = vpop.f32.mrf.mxu1 }
 0xefd   : > { %v13648_v44 = vpop.eup %13647  ;;  %v11060_v52 = vadd.f32 %v11059_v25, %v10955_v41 }
 0xefe   : > { %11163 = vst.msk [vmem:[%s18854_s30 + $0x28] sm:$0xff] %vm11157_vm1, %v13648_v44  ;;  %v10976_v27 = vpop.f32.mrf.mxu3 }
 0xeff   : > { %13649 = vtanh.f32 %v11060_v52  ;;  %12623 = vmatmul.msk.f32.gmra.mxu1 %vm10829_vm0, %v10780_v33 }
 0xf04   : > { %v11062_v61 = vpop.f32.mrf.mxu1 }
 0xf05   : > { %v13650_v1 = vpop.eup %13649  ;;  %v11063_v6 = vadd.f32 %v11062_v61, %v10958_v55 }
 0xf06   : > { %11164 = vst.msk [vmem:[%s18854_s30 + $0x30] sm:$0xff] %vm11157_vm1, %v13650_v1  ;;  %v10979_v42 = vpop.f32.mrf.mxu3 }
 0xf07   : > { %13651 = vtanh.f32 %v11063_v6  ;;  %12624 = vmatmul.msk.f32.gmra.mxu1 %vm10829_vm0, %v10782_v62 }
 0xf0c   : > { %v11065_v47 = vpop.f32.mrf.mxu1 }
 0xf0d   : > { %v13652_v19 = vpop.eup %13651  ;;  %v11066_v20 = vadd.f32 %v11065_v47, %v10961_v21 }
 0xf0e   : > { %11165 = vst.msk [vmem:[%s18854_s30 + $0x38] sm:$0xff] %vm11157_vm1, %v13652_v19  ;;  %v10982_v37 = vpop.f32.mrf.mxu3 }
 0xf0f   : > { %13653 = vtanh.f32 %v11066_v20  ;;  %12625 = vmatmul.msk.f32.gmra.mxu1 %vm10829_vm0, %v10784_v58 }
 0xf14   : > { %v11068_v2 = vpop.f32.mrf.mxu1 }
 0xf15   : > { %v13654_v50 = vpop.eup %13653  ;;  %v11069_v17 = vadd.f32 %v11068_v2, %v10964_v5 }
 0xf16   : > { %11166 = vst.msk [vmem:[%s18854_s30 + $0x40] sm:$0xff] %vm11157_vm1, %v13654_v50  ;;  %v10985_v11 = vpop.f32.mrf.mxu3 }
 0xf17   : > { %13655 = vtanh.f32 %v11069_v17  ;;  %12626 = vmatmul.msk.f32.gmra.mxu1 %vm10829_vm0, %v10786_v30 }
 0xf1c   : > { %v11071_v39 = vpop.f32.mrf.mxu1 }
 0xf1d   : > { %v13656_v4 = vpop.eup %13655  ;;  %v11072_v24 = vadd.f32 %v11071_v39, %v10967_v10 }
 0xf1e   : > { %11167 = vst.msk [vmem:[%s18854_s30 + $0x48] sm:$0xff] %vm11157_vm1, %v13656_v4  ;;  %v10988_v63 = vpop.f32.mrf.mxu3 }
 0xf1f   : > { %13657 = vtanh.f32 %v11072_v24  ;;  %12627 = vmatmul.msk.f32.gmra.mxu1 %vm10829_vm0, %v10788_v14 }
 0xf24   : > { %v11074_v22 = vpop.f32.mrf.mxu1 }
 0xf25   : > { %v13658_v29 = vpop.eup %13657  ;;  %v11075_v12 = vadd.f32 %v11074_v22, %v10970_v54 }
 0xf26   : > { %11168 = vst.msk [vmem:[%s18854_s30 + $0x50] sm:$0xff] %vm11157_vm1, %v13658_v29  ;;  %v10991_v7 = vpop.f32.mrf.mxu3 }
 0xf27   : > { %13659 = vtanh.f32 %v11075_v12  ;;  %12628 = vmatmul.msk.f32.gmra.mxu1 %vm10829_vm0, %v10790_v16 }
 0xf2c   : > { %v11077_v46 = vpop.f32.mrf.mxu1 }
 0xf2d   : > { %v13660_v3 = vpop.eup %13659  ;;  %v11078_v31 = vadd.f32 %v11077_v46, %v10973_v18 }
 0xf2e   : > { %11169 = vst.msk [vmem:[%s18854_s30 + $0x58] sm:$0xff] %vm11157_vm1, %v13660_v3  ;;  %v10994_v28 = vpop.f32.mrf.mxu3 }
 0xf2f   : > { %13661 = vtanh.f32 %v11078_v31  ;;  %12629 = vmatmul.msk.f32.gmra.mxu1 %vm10829_vm0, %v10792_v8 }
 0xf34   : > { %v11080_v15 = vpop.f32.mrf.mxu1 }
 0xf35   : > { %v13662_v0 = vpop.eup %13661  ;;  %v11081_v23 = vadd.f32 %v11080_v15, %v10976_v27 }
 0xf36   : > { %11170 = vst.msk [vmem:[%s18854_s30 + $0x60] sm:$0xff] %vm11157_vm1, %v13662_v0  ;;  %v10997_v9 = vpop.f32.mrf.mxu3 }
 0xf37   : > { %13663 = vtanh.f32 %v11081_v23 }
 0xf3c   : > { %v11083_v53 = vpop.f32.mrf.mxu1 }
 0xf3d   : > { %v13664_v40 = vpop.eup %13663  ;;  %v11084_v56 = vadd.f32 %v11083_v53, %v10979_v42 }
 0xf3e   : > { %11171 = vst.msk [vmem:[%s18854_s30 + $0x68] sm:$0xff] %vm11157_vm1, %v13664_v40  ;;  %v11000_v45 = vpop.f32.mrf.mxu3 }
 0xf3f   : > { %13665 = vtanh.f32 %v11084_v56 }
 0xf44   : > { %v11086_v41 = vpop.f32.mrf.mxu1 }
 0xf45   : > { %v13666_v32 = vpop.eup %13665  ;;  %v11087_v13 = vadd.f32 %v11086_v41, %v10982_v37 }
 0xf46   : > { %11172 = vst.msk [vmem:[%s18854_s30 + $0x70] sm:$0xff] %vm11157_vm1, %v13666_v32  ;;  %v11003_v52 = vpop.f32.mrf.mxu3 }
 0xf47   : > { %13667 = vtanh.f32 %v11087_v13 }
 0xf4c   : > { %v11089_v26 = vpop.f32.mrf.mxu1 }
 0xf4d   : > { %v13668_v35 = vpop.eup %13667  ;;  %v11090_v55 = vadd.f32 %v11089_v26, %v10985_v11 }
 0xf4e   : > { %11173 = vst.msk [vmem:[%s18854_s30 + $0x78] sm:$0xff] %vm11157_vm1, %v13668_v35  ;;  %v11006_v62 = vpop.f32.mrf.mxu3 }
 0xf4f   : > { %13669 = vtanh.f32 %v11090_v55 }
 0xf54   : > { %v11092_v48 = vpop.f32.mrf.mxu1 }
 0xf55   : > { %v13670_v60 = vpop.eup %13669  ;;  %v11093_v49 = vadd.f32 %v11092_v48, %v10988_v63 }
 0xf56   : > { %11174 = vst.msk [vmem:[%s18854_s30 + $0x80] sm:$0xff] %vm11157_vm1, %v13670_v60  ;;  %v11009_v54 = vpop.f32.mrf.mxu3 }
 0xf57   : > { %13671 = vtanh.f32 %v11093_v49 }
 0xf5c   : > { %v11095_v21 = vpop.f32.mrf.mxu1 }
 0xf5d   : > { %v13672_v36 = vpop.eup %13671  ;;  %v11096_v51 = vadd.f32 %v11095_v21, %v10991_v7 }
 0xf5e   : > { %11175 = vst.msk [vmem:[%s18854_s30 + $0x88] sm:$0xff] %vm11157_vm1, %v13672_v36  ;;  %v11012_v34 = vpop.f32.mrf.mxu3 }
 0xf5f   : > { %13673 = vtanh.f32 %v11096_v51 }
 0xf64   : > { %v11098_v59 = vpop.f32.mrf.mxu1 }
 0xf65   : > { %v13674_v57 = vpop.eup %13673  ;;  %v11099_v5 = vadd.f32 %v11098_v59, %v10994_v28 }
 0xf66   : > { %11176 = vst.msk [vmem:[%s18854_s30 + $0x90] sm:$0xff] %vm11157_vm1, %v13674_v57  ;;  %v11015_v27 = vpop.f32.mrf.mxu3 }
 0xf67   : > { %13675 = vtanh.f32 %v11099_v5 }
 0xf6c   : > { %v11101_v25 = vpop.f32.mrf.mxu1 }
 0xf6d   : > { %v13676_v33 = vpop.eup %13675  ;;  %v11102_v44 = vadd.f32 %v11101_v25, %v10997_v9 }
 0xf6e   : > { %11177 = vst.msk [vmem:[%s18854_s30 + $0x98] sm:$0xff] %vm11157_vm1, %v13676_v33  ;;  %v11018_v24 = vpop.f32.mrf.mxu3 }
 0xf6f   : > { %13677 = vtanh.f32 %v11102_v44 }
 0xf74   : > { %v11104_v43 = vpop.f32.mrf.mxu1 }
 0xf75   : > { %v13678_v10 = vpop.eup %13677  ;;  %v11105_v61 = vadd.f32 %v11104_v43, %v11000_v45 }
 0xf76   : > { %11178 = vst.msk [vmem:[%s18854_s30 + $0xa0] sm:$0xff] %vm11157_vm1, %v13678_v10  ;;  %v11021_v29 = vpop.f32.mrf.mxu3 }
 0xf77   : > { %13679 = vtanh.f32 %v11105_v61 }
 0xf7c   : > { %v11107_v1 = vpop.f32.mrf.mxu1 }
 0xf7d   : > { %v13680_v6 = vpop.eup %13679  ;;  %v11108_v38 = vadd.f32 %v11107_v1, %v11003_v52 }
 0xf7e   : > { %11179 = vst.msk [vmem:[%s18854_s30 + $0xa8] sm:$0xff] %vm11157_vm1, %v13680_v6 }
 0xf7f   : > { %13681 = vtanh.f32 %v11108_v38 }
 0xf84   : > { %v11110_v47 = vpop.f32.mrf.mxu1 }
 0xf85   : > { %v13682_v58 = vpop.eup %13681  ;;  %v11111_v19 = vadd.f32 %v11110_v47, %v11006_v62 }
 0xf86   : > { %11180 = vst.msk [vmem:[%s18854_s30 + $0xb0] sm:$0xff] %vm11157_vm1, %v13682_v58 }
 0xf87   : > { %13683 = vtanh.f32 %v11111_v19 }
 0xf8c   : > { %v11113_v20 = vpop.f32.mrf.mxu1 }
 0xf8d   : > { %v13684_v18 = vpop.eup %13683  ;;  %v11114_v2 = vadd.f32 %v11113_v20, %v11009_v54 }
 0xf8e   : > { %11181 = vst.msk [vmem:[%s18854_s30 + $0xb8] sm:$0xff] %vm11157_vm1, %v13684_v18 }
 0xf8f   : > { %13685 = vtanh.f32 %v11114_v2 }
 0xf94   : > { %v11116_v30 = vpop.f32.mrf.mxu1 }
 0xf95   : > { %v13686_v50 = vpop.eup %13685  ;;  %v11117_v17 = vadd.f32 %v11116_v30, %v11012_v34 }
 0xf96   : > { %11182 = vst.msk [vmem:[%s18854_s30 + $0xc0] sm:$0xff] %vm11157_vm1, %v13686_v50 }
 0xf97   : > { %13687 = vtanh.f32 %v11117_v17 }
 0xf9c   : > { %v11119_v39 = vpop.f32.mrf.mxu1 }
 0xf9d   : > { %v13688_v14 = vpop.eup %13687  ;;  %v11120_v4 = vadd.f32 %v11119_v39, %v11015_v27 }
 0xf9e   : > { %11183 = vst.msk [vmem:[%s18854_s30 + $0xc8] sm:$0xff] %vm11157_vm1, %v13688_v14 }
 0xf9f   : > { %13689 = vtanh.f32 %v11120_v4 }
 0xfa4   : > { %v11122_v42 = vpop.f32.mrf.mxu1 }
 0xfa5   : > { %v13690_v22 = vpop.eup %13689  ;;  %v11123_v16 = vadd.f32 %v11122_v42, %v11018_v24 }
 0xfa6   : > { %11184 = vst.msk [vmem:[%s18854_s30 + $0xd0] sm:$0xff] %vm11157_vm1, %v13690_v22 }
 0xfa7   : > { %13691 = vtanh.f32 %v11123_v16 }
 0xfac   : > { %v11125_v12 = vpop.f32.mrf.mxu1 }
 0xfad   : > { %v13692_v37 = vpop.eup %13691  ;;  %v11126_v46 = vadd.f32 %v11125_v12, %v11021_v29 }
 0xfae   : > { %11185 = vst.msk [vmem:[%s18854_s30 + $0xd8] sm:$0xff] %vm11157_vm1, %v13692_v37 }
 0xfaf   : > { %13693 = vtanh.f32 %v11126_v46 }
 0xfb5   : > { %v13694_v8 = vpop.eup %13693 }
 0xfb6   : > { %11187 = vst.msk [vmem:[%s18854_s30 + $0xe0] sm:$0x1] %vm11186_vm3, %v13694_v8 }
 0xfb7 PF: > { %s31_s20 = sadd.s32 1, %s13704_s20  }
 0xfb8   : > { %p28_p4 = scmp.ge.s32.totalorder %s31_s20, 4  }
 0xfba   :  { %30 = sbr.rel (!%p28_p4) target bundleno = 5 (0x5), region = 166 }

</bundles_post_ra>
